<compile_context>
chip_gen: v5e
topology: v5e:2x2
jax: 0.10.0
libtpu: 0.0.40
codegen_flags: <defaults>
</compile_context>

<pallas_src>
import jax
import jax.numpy as jnp
from jax.experimental import pallas as pl
from jax.experimental.pallas import tpu as pltpu


# --------------------------------------------------------------------------
# 3x3 conv (padding=1) + ReLU: im2col GEMM, output laid out (Cout, H*W).
# --------------------------------------------------------------------------
def _conv_im2col_relu_kernel(p_ref, w_ref, b_ref, o_ref):
    # p_ref: (9*Cin, H*W) patches for one batch element
    # w_ref: (Cout, 9*Cin), b_ref: (Cout, 1), o_ref: (Cout, H*W)
    acc = jnp.dot(w_ref[...], p_ref[...], preferred_element_type=jnp.float32)
    acc = acc + b_ref[...]                      # broadcast bias over lanes
    o_ref[...] = jnp.maximum(acc, 0.0).astype(o_ref.dtype)


def conv2d_3x3_relu(x_nchw, w, b):
    """x_nchw: (B, Cin, H, W); w: (3, 3, Cin, Cout); b: (Cout,) -> (B, Cout, H, W)."""
    B, Cin, H, W = x_nchw.shape
    Cout = w.shape[-1]
    HW = H * W
    K9 = 9 * Cin

    # im2col in the wrapper (tiny data): tap-major, channel within tap.
    xp = jnp.pad(x_nchw, ((0, 0), (0, 0), (1, 1), (1, 1)))
    taps = [xp[:, :, dh:dh + H, dw:dw + W] for dh in range(3) for dw in range(3)]
    patches = jnp.stack(taps, axis=1).reshape(B, K9, HW)        # (B, 9*Cin, H*W)

    # Weight as (Cout, 9*Cin) with matching K ordering (tap-major, Cin within tap).
    w2d = jnp.transpose(w, (3, 0, 1, 2)).reshape(Cout, K9)
    b2 = b.reshape(Cout, 1)

    cost = pl.CostEstimate(
        flops=2 * B * Cout * K9 * HW,
        transcendentals=0,
        bytes_accessed=(B * K9 * HW + Cout * K9 + Cout + B * Cout * HW) * 4,
    )

    out = pl.pallas_call(
        _conv_im2col_relu_kernel,
        out_shape=jax.ShapeDtypeStruct((B, Cout, HW), jnp.float32),
        grid_spec=pltpu.PrefetchScalarGridSpec(
            num_scalar_prefetch=0,
            grid=(B,),
            in_specs=[
                pl.BlockSpec((None, K9, HW), lambda bi: (bi, 0, 0)),
                pl.BlockSpec((Cout, K9), lambda bi: (0, 0)),
                pl.BlockSpec((Cout, 1), lambda bi: (0, 0)),
            ],
            out_specs=pl.BlockSpec((None, Cout, HW), lambda bi: (bi, 0, 0)),
        ),
        compiler_params=pltpu.CompilerParams(dimension_semantics=("parallel",)),
        cost_estimate=cost,
    )(patches, w2d, b2)
    # (B, Cout, H*W) is exactly the NCHW layout / flatten order.
    return out.reshape(B, Cout, H, W)


# --------------------------------------------------------------------------
# Linear (+ optional ReLU): grid=(N//tn, K//tk); bf16 weights, f32 accumulation
# directly into the resident output block; bias/ReLU fused in the epilogue.
# --------------------------------------------------------------------------
def _make_linear_kernel(apply_relu):
    def kernel(x_ref, w_ref, b_ref, o_ref):
        k = pl.program_id(1)

        @pl.when(k == 0)
        def _():
            o_ref[...] = jnp.zeros_like(o_ref)

        o_ref[...] += jnp.dot(x_ref[...].astype(jnp.bfloat16), w_ref[...],
                              preferred_element_type=jnp.float32)

        @pl.when(k == pl.num_programs(1) - 1)
        def _():
            r = o_ref[...] + b_ref[0, :]
            if apply_relu:
                r = jnp.maximum(r, 0.0)
            o_ref[...] = r.astype(o_ref.dtype)
    return kernel


def linear(x, w, b, *, apply_relu, tk, tn=512):
    """x: (M, K) f32; w: (K, N) bf16; b: (N,) f32 -> (M, N) f32."""
    M, K = x.shape
    Kw, N = w.shape
    tk = min(tk, K)
    tn = min(tn, N)
    assert K == Kw and K % tk == 0 and N % tn == 0
    b2 = b.reshape(1, N)
    cost = pl.CostEstimate(
        flops=2 * M * K * N,
        transcendentals=0,
        bytes_accessed=K * N * w.dtype.itemsize + M * K * 4 + M * N * 4,
    )
    return pl.pallas_call(
        _make_linear_kernel(apply_relu),
        out_shape=jax.ShapeDtypeStruct((M, N), jnp.float32),
        grid_spec=pltpu.PrefetchScalarGridSpec(
            num_scalar_prefetch=0,
            grid=(N // tn, K // tk),
            in_specs=[
                pl.BlockSpec((M, tk), lambda n, k: (0, k)),
                pl.BlockSpec((tk, tn), lambda n, k: (k, n)),
                pl.BlockSpec((1, tn), lambda n, k: (0, n)),
            ],
            out_specs=pl.BlockSpec((M, tn), lambda n, k: (0, n)),
        ),
        compiler_params=pltpu.CompilerParams(
            dimension_semantics=("parallel", "arbitrary")),
        cost_estimate=cost,
    )(x, w, b2)


# --------------------------------------------------------------------------
# Parameter init (deterministic, PyTorch-like uniform bounds) and forward pass.
# --------------------------------------------------------------------------
def init_params(key):
    ks = jax.random.split(key, 8)

    def u(k, shape, fan_in):
        bound = 1.0 / (fan_in ** 0.5)
        return jax.random.uniform(k, shape, jnp.float32, -bound, bound)

    return {
        "w1": u(ks[0], (3, 3, 1, 16), 1 * 9),
        "b1": u(ks[1], (16,), 1 * 9),
        "w2": u(ks[2], (3, 3, 16, 32), 16 * 9),
        "b2": u(ks[3], (32,), 16 * 9),
        # fc weights stored bf16 to halve the dominant HBM weight stream;
        # matmul accumulation stays f32 inside the kernel.
        "fw1": u(ks[4], (32 * 32 * 32, 1024), 32 * 32 * 32).astype(jnp.bfloat16),
        "fb1": u(ks[5], (1024,), 32 * 32 * 32),
        "fw2": u(ks[6], (1024, 32 * 32), 1024).astype(jnp.bfloat16),
        "fb2": u(ks[7], (32 * 32,), 1024),
    }


@jax.jit
def arbitrary_nn_forward(x, params):
    # x: (B, 1, 32, 32) NCHW, float32
    h = conv2d_3x3_relu(x, params["w1"], params["b1"])      # (B, 16, 32, 32)
    h = conv2d_3x3_relu(h, params["w2"], params["b2"])      # (B, 32, 32, 32)
    B = h.shape[0]
    flat = h.reshape(B, -1)                                 # NCHW flatten == nn.Flatten
    h = linear(flat, params["fw1"], params["fb1"], apply_relu=True, tk=2048)
    h = linear(h, params["fw2"], params["fb2"], apply_relu=False, tk=1024)
    return h.reshape(-1, 1, 32, 32)


if __name__ == "__main__":
    key = jax.random.PRNGKey(0)
    pkey, xkey = jax.random.split(key)
    params = init_params(pkey)
    # Spatial size / channels are dictated by the module (Linear expects 32*32*32).
    x = jax.random.normal(xkey, (2, 1, 32, 32), jnp.float32)
    out = arbitrary_nn_forward(x, params)
    out = jax.block_until_ready(out)
    assert out.shape == (2, 1, 32, 32) and out.dtype == jnp.float32
    assert bool(jnp.all(jnp.isfinite(out)))
    print("KERNEL_OK")
</pallas_src>

<mosaic_0001>
module attributes {stable_mosaic.version = 11 : i64} {
  func.func @_conv_im2col_relu_kernel(%arg0: i32, %arg1: memref<1x9x1024xf32, #tpu.memory_space<vmem>>, %arg2: memref<16x9xf32, #tpu.memory_space<vmem>>, %arg3: memref<16x1xf32, #tpu.memory_space<vmem>>, %arg4: memref<1x16x1024xf32, #tpu.memory_space<vmem>>) attributes {dimension_semantics = [#tpu.dimension_semantics<parallel>], iteration_bounds = array<i64: 2>, scalar_prefetch = 0 : i64, scratch_operands = 0 : i64, tpu.core_type = #tpu.core_type<tc>, window_params = [{transform_indices = @transform_0, window_bounds = array<i64: 1, 9, 1024>}, {pipeline_mode = #tpu.pipeline_mode<synchronous>, transform_indices = @transform_1, window_bounds = array<i64: 16, 9>}, {pipeline_mode = #tpu.pipeline_mode<synchronous>, transform_indices = @transform_2, window_bounds = array<i64: 16, 1>}, {transform_indices = @transform_3, window_bounds = array<i64: 1, 16, 1024>}]} {
    %c0 = arith.constant 0 : index
    %c0_0 = arith.constant 0 : index
    %0 = vector.load %arg2[%c0, %c0_0] : memref<16x9xf32, #tpu.memory_space<vmem>>, vector<16x9xf32>
    %c0_1 = arith.constant 0 : index
    %c0_2 = arith.constant 0 : index
    %c0_3 = arith.constant 0 : index
    %1 = vector.load %arg1[%c0_1, %c0_2, %c0_3] : memref<1x9x1024xf32, #tpu.memory_space<vmem>>, vector<1x9x1024xf32>
    %2 = vector.shape_cast %1 : vector<1x9x1024xf32> to vector<9x1024xf32>
    %cst = arith.constant dense<0.000000e+00> : vector<16x1024xf32>
    %3 = tpu.matmul %0, %2, %cst {dimension_numbers = #tpu.dot_dimension_numbers<[1], [0], [0], [1], [0, 0, 1, 1], [], []>} : vector<16x9xf32>, vector<9x1024xf32>, vector<16x1024xf32> -> vector<16x1024xf32>
    %c0_4 = arith.constant 0 : index
    %c0_5 = arith.constant 0 : index
    %4 = vector.load %arg3[%c0_4, %c0_5] : memref<16x1xf32, #tpu.memory_space<vmem>>, vector<16x1xf32>
    %5 = vector.broadcast %4 : vector<16x1xf32> to vector<16x1024xf32>
    %6 = arith.addf %3, %5 : vector<16x1024xf32>
    %cst_6 = arith.constant 0.000000e+00 : f32
    %7 = vector.broadcast %cst_6 : f32 to vector<16x1024xf32>
    %8 = arith.maximumf %6, %7 : vector<16x1024xf32>
    %c0_7 = arith.constant 0 : index
    %c0_8 = arith.constant 0 : index
    %c0_9 = arith.constant 0 : index
    %9 = vector.load %arg4[%c0_7, %c0_8, %c0_9] : memref<1x16x1024xf32, #tpu.memory_space<vmem>>, vector<1x16x1024xf32>
    %10 = vector.shape_cast %9 : vector<1x16x1024xf32> to vector<16x1024xf32>
    %11 = vector.shape_cast %8 : vector<16x1024xf32> to vector<1x16x1024xf32>
    tpu.vector_store %arg4[%c0_7, %c0_8, %c0_9], %11 {strides = array<i32>} : memref<1x16x1024xf32, #tpu.memory_space<vmem>>, vector<1x16x1024xf32>,
    return
  }
  func.func @transform_0(%arg0: i32) -> (i32, i32, i32) {
    %c0_i32 = arith.constant 0 : i32
    %c0_i32_0 = arith.constant 0 : i32
    %c0_i32_1 = arith.constant 0 : i32
    return %arg0, %c0_i32, %c0_i32_0 : i32, i32, i32
  }
  func.func @transform_1(%arg0: i32) -> (i32, i32) {
    %c0_i32 = arith.constant 0 : i32
    %c0_i32_0 = arith.constant 0 : i32
    %c0_i32_1 = arith.constant 0 : i32
    return %c0_i32, %c0_i32_0 : i32, i32
  }
  func.func @transform_2(%arg0: i32) -> (i32, i32) {
    %c0_i32 = arith.constant 0 : i32
    %c0_i32_0 = arith.constant 0 : i32
    %c0_i32_1 = arith.constant 0 : i32
    return %c0_i32, %c0_i32_0 : i32, i32
  }
  func.func @transform_3(%arg0: i32) -> (i32, i32, i32) {
    %c0_i32 = arith.constant 0 : i32
    %c0_i32_0 = arith.constant 0 : i32
    %c0_i32_1 = arith.constant 0 : i32
    return %arg0, %c0_i32, %c0_i32_0 : i32, i32, i32
  }
}

module attributes {stable_mosaic.version = 11 : i64} {
  func.func @_conv_im2col_relu_kernel(%arg0: i32, %arg1: memref<1x144x1024xf32, #tpu.memory_space<vmem>>, %arg2: memref<32x144xf32, #tpu.memory_space<vmem>>, %arg3: memref<32x1xf32, #tpu.memory_space<vmem>>, %arg4: memref<1x32x1024xf32, #tpu.memory_space<vmem>>) attributes {dimension_semantics = [#tpu.dimension_semantics<parallel>], iteration_bounds = array<i64: 2>, scalar_prefetch = 0 : i64, scratch_operands = 0 : i64, tpu.core_type = #tpu.core_type<tc>, window_params = [{transform_indices = @transform_0, window_bounds = array<i64: 1, 144, 1024>}, {pipeline_mode = #tpu.pipeline_mode<synchronous>, transform_indices = @transform_1, window_bounds = array<i64: 32, 144>}, {pipeline_mode = #tpu.pipeline_mode<synchronous>, transform_indices = @transform_2, window_bounds = array<i64: 32, 1>}, {transform_indices = @transform_3, window_bounds = array<i64: 1, 32, 1024>}]} {
    %c0 = arith.constant 0 : index
    %c0_0 = arith.constant 0 : index
    %0 = vector.load %arg2[%c0, %c0_0] : memref<32x144xf32, #tpu.memory_space<vmem>>, vector<32x144xf32>
    %c0_1 = arith.constant 0 : index
    %c0_2 = arith.constant 0 : index
    %c0_3 = arith.constant 0 : index
    %1 = vector.load %arg1[%c0_1, %c0_2, %c0_3] : memref<1x144x1024xf32, #tpu.memory_space<vmem>>, vector<1x144x1024xf32>
    %2 = vector.shape_cast %1 : vector<1x144x1024xf32> to vector<144x1024xf32>
    %cst = arith.constant dense<0.000000e+00> : vector<32x1024xf32>
    %3 = tpu.matmul %0, %2, %cst {dimension_numbers = #tpu.dot_dimension_numbers<[1], [0], [0], [1], [0, 0, 1, 1], [], []>} : vector<32x144xf32>, vector<144x1024xf32>, vector<32x1024xf32> -> vector<32x1024xf32>
    %c0_4 = arith.constant 0 : index
    %c0_5 = arith.constant 0 : index
    %4 = vector.load %arg3[%c0_4, %c0_5] : memref<32x1xf32, #tpu.memory_space<vmem>>, vector<32x1xf32>
    %5 = vector.broadcast %4 : vector<32x1xf32> to vector<32x1024xf32>
    %6 = arith.addf %3, %5 : vector<32x1024xf32>
    %cst_6 = arith.constant 0.000000e+00 : f32
    %7 = vector.broadcast %cst_6 : f32 to vector<32x1024xf32>
    %8 = arith.maximumf %6, %7 : vector<32x1024xf32>
    %c0_7 = arith.constant 0 : index
    %c0_8 = arith.constant 0 : index
    %c0_9 = arith.constant 0 : index
    %9 = vector.load %arg4[%c0_7, %c0_8, %c0_9] : memref<1x32x1024xf32, #tpu.memory_space<vmem>>, vector<1x32x1024xf32>
    %10 = vector.shape_cast %9 : vector<1x32x1024xf32> to vector<32x1024xf32>
    %11 = vector.shape_cast %8 : vector<32x1024xf32> to vector<1x32x1024xf32>
    tpu.vector_store %arg4[%c0_7, %c0_8, %c0_9], %11 {strides = array<i32>} : memref<1x32x1024xf32, #tpu.memory_space<vmem>>, vector<1x32x1024xf32>,
    return
  }
  func.func @transform_0(%arg0: i32) -> (i32, i32, i32) {
    %c0_i32 = arith.constant 0 : i32
    %c0_i32_0 = arith.constant 0 : i32
    %c0_i32_1 = arith.constant 0 : i32
    return %arg0, %c0_i32, %c0_i32_0 : i32, i32, i32
  }
  func.func @transform_1(%arg0: i32) -> (i32, i32) {
    %c0_i32 = arith.constant 0 : i32
    %c0_i32_0 = arith.constant 0 : i32
    %c0_i32_1 = arith.constant 0 : i32
    return %c0_i32, %c0_i32_0 : i32, i32
  }
  func.func @transform_2(%arg0: i32) -> (i32, i32) {
    %c0_i32 = arith.constant 0 : i32
    %c0_i32_0 = arith.constant 0 : i32
    %c0_i32_1 = arith.constant 0 : i32
    return %c0_i32, %c0_i32_0 : i32, i32
  }
  func.func @transform_3(%arg0: i32) -> (i32, i32, i32) {
    %c0_i32 = arith.constant 0 : i32
    %c0_i32_0 = arith.constant 0 : i32
    %c0_i32_1 = arith.constant 0 : i32
    return %arg0, %c0_i32, %c0_i32_0 : i32, i32, i32
  }
}

module attributes {stable_mosaic.version = 11 : i64} {
  func.func @kernel(%arg0: i32, %arg1: i32, %arg2: memref<2x2048xf32, #tpu.memory_space<vmem>>, %arg3: memref<2048x512xbf16, #tpu.memory_space<vmem>>, %arg4: memref<1x512xf32, #tpu.memory_space<vmem>>, %arg5: memref<2x512xf32, #tpu.memory_space<vmem>>) attributes {dimension_semantics = [#tpu.dimension_semantics<parallel>, #tpu.dimension_semantics<arbitrary>], iteration_bounds = array<i64: 2, 16>, scalar_prefetch = 0 : i64, scratch_operands = 0 : i64, tpu.core_type = #tpu.core_type<tc>, window_params = [{transform_indices = @transform_0, window_bounds = array<i64: 2, 2048>}, {transform_indices = @transform_1, window_bounds = array<i64: 2048, 512>}, {transform_indices = @transform_2, window_bounds = array<i64: 1, 512>}, {transform_indices = @transform_3, window_bounds = array<i64: 2, 512>}]} {
    %c0_i32 = arith.constant 0 : i32
    %0 = arith.cmpi eq, %arg1, %c0_i32 : i32
    %1 = arith.extui %0 : i1 to i32
    %c0_i32_0 = arith.constant 0 : i32
    %2 = arith.cmpi ne, %1, %c0_i32_0 : i32
    scf.if %2 {
      %cst_9 = arith.constant 0.000000e+00 : f32
      %13 = vector.broadcast %cst_9 : f32 to vector<2x512xf32>
      %c0_10 = arith.constant 0 : index
      %c0_11 = arith.constant 0 : index
      %14 = vector.load %arg5[%c0_10, %c0_11] : memref<2x512xf32, #tpu.memory_space<vmem>>, vector<2x512xf32>
      tpu.vector_store %arg5[%c0_10, %c0_11], %13 {strides = array<i32>} : memref<2x512xf32, #tpu.memory_space<vmem>>, vector<2x512xf32>,
    } else {
    }
    %c0 = arith.constant 0 : index
    %c0_1 = arith.constant 0 : index
    %3 = vector.load %arg5[%c0, %c0_1] : memref<2x512xf32, #tpu.memory_space<vmem>>, vector<2x512xf32>
    %c0_2 = arith.constant 0 : index
    %c0_3 = arith.constant 0 : index
    %4 = vector.load %arg2[%c0_2, %c0_3] : memref<2x2048xf32, #tpu.memory_space<vmem>>, vector<2x2048xf32>
    %5 = arith.truncf %4 : vector<2x2048xf32> to vector<2x2048xbf16>
    %c0_4 = arith.constant 0 : index
    %c0_5 = arith.constant 0 : index
    %6 = vector.load %arg3[%c0_4, %c0_5] : memref<2048x512xbf16, #tpu.memory_space<vmem>>, vector<2048x512xbf16>
    %cst = arith.constant dense<0.000000e+00> : vector<2x512xf32>
    %7 = tpu.matmul %5, %6, %cst {dimension_numbers = #tpu.dot_dimension_numbers<[1], [0], [0], [1], [0, 0, 1, 1], [], []>} : vector<2x2048xbf16>, vector<2048x512xbf16>, vector<2x512xf32> -> vector<2x512xf32>
    %8 = arith.addf %3, %7 : vector<2x512xf32>
    %c0_6 = arith.constant 0 : index
    %c0_7 = arith.constant 0 : index
    %9 = vector.load %arg5[%c0_6, %c0_7] : memref<2x512xf32, #tpu.memory_space<vmem>>, vector<2x512xf32>
    tpu.vector_store %arg5[%c0_6, %c0_7], %8 {strides = array<i32>} : memref<2x512xf32, #tpu.memory_space<vmem>>, vector<2x512xf32>,
    %c15_i32 = arith.constant 15 : i32
    %10 = arith.cmpi eq, %arg1, %c15_i32 : i32
    %11 = arith.extui %10 : i1 to i32
    %c0_i32_8 = arith.constant 0 : i32
    %12 = arith.cmpi ne, %11, %c0_i32_8 : i32
    scf.if %12 {
      %c0_9 = arith.constant 0 : index
      %c0_10 = arith.constant 0 : index
      %13 = vector.load %arg5[%c0_9, %c0_10] : memref<2x512xf32, #tpu.memory_space<vmem>>, vector<2x512xf32>
      %c0_11 = arith.constant 0 : index
      %c0_12 = arith.constant 0 : index
      %14 = vector.load %arg4[%c0_11, %c0_12] : memref<1x512xf32, #tpu.memory_space<vmem>>, vector<1x512xf32>
      %15 = vector.shape_cast %14 : vector<1x512xf32> to vector<512xf32>
      %16 = vector.shape_cast %15 : vector<512xf32> to vector<1x512xf32>
      %17 = vector.broadcast %16 : vector<1x512xf32> to vector<2x512xf32>
      %18 = arith.addf %13, %17 : vector<2x512xf32>
      %cst_13 = arith.constant 0.000000e+00 : f32
      %19 = vector.broadcast %cst_13 : f32 to vector<2x512xf32>
      %20 = arith.maximumf %18, %19 : vector<2x512xf32>
      %c0_14 = arith.constant 0 : index
      %c0_15 = arith.constant 0 : index
      %21 = vector.load %arg5[%c0_14, %c0_15] : memref<2x512xf32, #tpu.memory_space<vmem>>, vector<2x512xf32>
      tpu.vector_store %arg5[%c0_14, %c0_15], %20 {strides = array<i32>} : memref<2x512xf32, #tpu.memory_space<vmem>>, vector<2x512xf32>,
    } else {
    }
    return
  }
  func.func @transform_0(%arg0: i32, %arg1: i32) -> (i32, i32) {
    %c0_i32 = arith.constant 0 : i32
    %c0_i32_0 = arith.constant 0 : i32
    return %c0_i32, %arg1 : i32, i32
  }
  func.func @transform_1(%arg0: i32, %arg1: i32) -> (i32, i32) {
    %c0_i32 = arith.constant 0 : i32
    return %arg1, %arg0 : i32, i32
  }
  func.func @transform_2(%arg0: i32, %arg1: i32) -> (i32, i32) {
    %c0_i32 = arith.constant 0 : i32
    %c0_i32_0 = arith.constant 0 : i32
    return %c0_i32, %arg0 : i32, i32
  }
  func.func @transform_3(%arg0: i32, %arg1: i32) -> (i32, i32) {
    %c0_i32 = arith.constant 0 : i32
    %c0_i32_0 = arith.constant 0 : i32
    return %c0_i32, %arg0 : i32, i32
  }
}

module attributes {stable_mosaic.version = 11 : i64} {
  func.func @kernel(%arg0: i32, %arg1: i32, %arg2: memref<2x1024xf32, #tpu.memory_space<vmem>>, %arg3: memref<1024x512xbf16, #tpu.memory_space<vmem>>, %arg4: memref<1x512xf32, #tpu.memory_space<vmem>>, %arg5: memref<2x512xf32, #tpu.memory_space<vmem>>) attributes {dimension_semantics = [#tpu.dimension_semantics<parallel>, #tpu.dimension_semantics<arbitrary>], iteration_bounds = array<i64: 2, 1>, scalar_prefetch = 0 : i64, scratch_operands = 0 : i64, tpu.core_type = #tpu.core_type<tc>, window_params = [{transform_indices = @transform_0, window_bounds = array<i64: 2, 1024>}, {transform_indices = @transform_1, window_bounds = array<i64: 1024, 512>}, {transform_indices = @transform_2, window_bounds = array<i64: 1, 512>}, {transform_indices = @transform_3, window_bounds = array<i64: 2, 512>}]} {
    %c0_i32 = arith.constant 0 : i32
    %0 = arith.cmpi eq, %arg1, %c0_i32 : i32
    %1 = arith.extui %0 : i1 to i32
    %c0_i32_0 = arith.constant 0 : i32
    %2 = arith.cmpi ne, %1, %c0_i32_0 : i32
    scf.if %2 {
      %cst_10 = arith.constant 0.000000e+00 : f32
      %13 = vector.broadcast %cst_10 : f32 to vector<2x512xf32>
      %c0_11 = arith.constant 0 : index
      %c0_12 = arith.constant 0 : index
      %14 = vector.load %arg5[%c0_11, %c0_12] : memref<2x512xf32, #tpu.memory_space<vmem>>, vector<2x512xf32>
      tpu.vector_store %arg5[%c0_11, %c0_12], %13 {strides = array<i32>} : memref<2x512xf32, #tpu.memory_space<vmem>>, vector<2x512xf32>,
    } else {
    }
    %c0 = arith.constant 0 : index
    %c0_1 = arith.constant 0 : index
    %3 = vector.load %arg5[%c0, %c0_1] : memref<2x512xf32, #tpu.memory_space<vmem>>, vector<2x512xf32>
    %c0_2 = arith.constant 0 : index
    %c0_3 = arith.constant 0 : index
    %4 = vector.load %arg2[%c0_2, %c0_3] : memref<2x1024xf32, #tpu.memory_space<vmem>>, vector<2x1024xf32>
    %5 = arith.truncf %4 : vector<2x1024xf32> to vector<2x1024xbf16>
    %c0_4 = arith.constant 0 : index
    %c0_5 = arith.constant 0 : index
    %6 = vector.load %arg3[%c0_4, %c0_5] : memref<1024x512xbf16, #tpu.memory_space<vmem>>, vector<1024x512xbf16>
    %cst = arith.constant dense<0.000000e+00> : vector<2x512xf32>
    %7 = tpu.matmul %5, %6, %cst {dimension_numbers = #tpu.dot_dimension_numbers<[1], [0], [0], [1], [0, 0, 1, 1], [], []>} : vector<2x1024xbf16>, vector<1024x512xbf16>, vector<2x512xf32> -> vector<2x512xf32>
    %8 = arith.addf %3, %7 : vector<2x512xf32>
    %c0_6 = arith.constant 0 : index
    %c0_7 = arith.constant 0 : index
    %9 = vector.load %arg5[%c0_6, %c0_7] : memref<2x512xf32, #tpu.memory_space<vmem>>, vector<2x512xf32>
    tpu.vector_store %arg5[%c0_6, %c0_7], %8 {strides = array<i32>} : memref<2x512xf32, #tpu.memory_space<vmem>>, vector<2x512xf32>,
    %c0_i32_8 = arith.constant 0 : i32
    %10 = arith.cmpi eq, %arg1, %c0_i32_8 : i32
    %11 = arith.extui %10 : i1 to i32
    %c0_i32_9 = arith.constant 0 : i32
    %12 = arith.cmpi ne, %11, %c0_i32_9 : i32
    scf.if %12 {
      %c0_10 = arith.constant 0 : index
      %c0_11 = arith.constant 0 : index
      %13 = vector.load %arg5[%c0_10, %c0_11] : memref<2x512xf32, #tpu.memory_space<vmem>>, vector<2x512xf32>
      %c0_12 = arith.constant 0 : index
      %c0_13 = arith.constant 0 : index
      %14 = vector.load %arg4[%c0_12, %c0_13] : memref<1x512xf32, #tpu.memory_space<vmem>>, vector<1x512xf32>
      %15 = vector.shape_cast %14 : vector<1x512xf32> to vector<512xf32>
      %16 = vector.shape_cast %15 : vector<512xf32> to vector<1x512xf32>
      %17 = vector.broadcast %16 : vector<1x512xf32> to vector<2x512xf32>
      %18 = arith.addf %13, %17 : vector<2x512xf32>
      %c0_14 = arith.constant 0 : index
      %c0_15 = arith.constant 0 : index
      %19 = vector.load %arg5[%c0_14, %c0_15] : memref<2x512xf32, #tpu.memory_space<vmem>>, vector<2x512xf32>
      tpu.vector_store %arg5[%c0_14, %c0_15], %18 {strides = array<i32>} : memref<2x512xf32, #tpu.memory_space<vmem>>, vector<2x512xf32>,
    } else {
    }
    return
  }
  func.func @transform_0(%arg0: i32, %arg1: i32) -> (i32, i32) {
    %c0_i32 = arith.constant 0 : i32
    %c0_i32_0 = arith.constant 0 : i32
    return %c0_i32, %arg1 : i32, i32
  }
  func.func @transform_1(%arg0: i32, %arg1: i32) -> (i32, i32) {
    %c0_i32 = arith.constant 0 : i32
    return %arg1, %arg0 : i32, i32
  }
  func.func @transform_2(%arg0: i32, %arg1: i32) -> (i32, i32) {
    %c0_i32 = arith.constant 0 : i32
    %c0_i32_0 = arith.constant 0 : i32
    return %c0_i32, %arg0 : i32, i32
  }
  func.func @transform_3(%arg0: i32, %arg1: i32) -> (i32, i32) {
    %c0_i32 = arith.constant 0 : i32
    %c0_i32_0 = arith.constant 0 : i32
    return %c0_i32, %arg0 : i32, i32
  }
}

</mosaic_0001>

<bundles_post_ra>
// kernel: arbitrary_nn_forward.4
= control target key start
LH: loop header
LB: loop body
LE: loop exit
PB: predicated region body
PF: predicated region fallthrough
CT: control target
= control target key end

     0   :  { %s580_s12 = smov 0   ;;  %s676_s0 = inlined_call_operand.vmem [shape: f32[2,9,1024], index: 0, kind: input, shape index: {}]   ;;  %s677_s1 = inlined_call_operand.vmem [shape: f32[16,9], index: 1, kind: input, shape index: {}]   ;;  %s678_s2 = inlined_call_operand.vmem [shape: f32[16,1], index: 2, kind: input, shape index: {}]   ;;  %s679_s3 = inlined_call_operand.vmem [shape: f32[2,16,1024], index: 3, kind: output, shape index: {}]  }
   0x1 LB: > { %s504_s13 = sadd.s32 4294967295, %s557_s12   ;;  %p508_p0 = scmp.ge.s32.totalorder %s557_s12, 1  ;;  %s557_s12 = sphi %s580_s12, %s13_s12  }
   0x2   : > { %p137_p1 = scmp.lt.s32.totalorder %s557_s12, 3 }
   0x4   : > { %p138_p2 = pnand %p508_p0, %p137_p1 }
   0x5   : > { %p161_p3 = scmp.lt.s32.totalorder (!%p138_p2), %s504_s13, 1 }
   0x6   : > { %141 = sbr.rel (%p138_p2) target bundleno = 182 (0xb6), region = 32 }
   0xb   : > { %v559_v0 = vmov 0   ;;  %v189_v1 = vld [vmem:[%s678_s2] sm:$0xff]  ;;  %s681_s13 = smov (!%p161_p3, %s504_s13), 1  ;;  %vm208_vm0 = vcmask 1040384   ;;  %vm201_vm1 = vcmask 72704   ;;  %v190_v19 = vld [vmem:[%s678_s2 + $0x8] sm:$0xff] }
   0xc   : > { %550 = vset.pattern.permute.xlu0 %v559_v0  ;;  %s539_s16 = sshll.u32 %s681_s13, 7  ;;  %v171_v10 = vld [vmem:[%s677_s1] sm:$0xff]  ;;  %v172_v20 = vld [vmem:[%s677_s1 + $0x8] sm:$0xff] }
   0xd   : > { %193 = vperm.xlu0 %550, %v189_v1   ;;  %s599_s19 = scalar_lea.vmem %s676_s0, %s539_s16  ;;  %s655_s28 = scalar_lea.vmem %s679_s3, %s539_s16 }
   0xe   : > { %v181_v2 = vld [vmem:[%s599_s19 + $0x40] sm:$0x1]  ;;  %v182_v3 = vld [vmem:[%s599_s19 + $0x48] sm:$0x1]  ;;  %v183_v4 = vld [vmem:[%s599_s19 + $0x50] sm:$0x1] }
   0xf   : > { %513 = vmatpush.msk.msra.mxu0 %vm208_vm0, %v181_v2  ;;  %516 = vmatpush.msk.msra.mxu1 %vm208_vm0, %v182_v3  ;;  %v184_v5 = vld [vmem:[%s599_s19 + $0x58] sm:$0x1]  ;;  %v173_v6 = vld [vmem:[%s599_s19] sm:$0xff]  ;;  %v174_v7 = vld [vmem:[%s599_s19 + $0x8] sm:$0xff] }
  0x10   : > { %519 = vmatpush.msk.msra.mxu2 %vm208_vm0, %v183_v4  ;;  %522 = vmatpush.msk.msra.mxu3 %vm208_vm0, %v184_v5  ;;  %v175_v8 = vld [vmem:[%s599_s19 + $0x10] sm:$0xff]  ;;  %v176_v9 = vld [vmem:[%s599_s19 + $0x18] sm:$0xff]  ;;  %v185_v13 = vld [vmem:[%s599_s19 + $0x60] sm:$0x1] }
  0x11   : > { %248 = vmatpush.msra.mxu0 %v173_v6  ;;  %271 = vmatpush.msra.mxu1 %v174_v7  ;;  %v187_v11 = vld [vmem:[%s599_s19 + $0x70] sm:$0x1]  ;;  %v188_v12 = vld [vmem:[%s599_s19 + $0x78] sm:$0x1]  ;;  %v186_v14 = vld [vmem:[%s599_s19 + $0x68] sm:$0x1] }
  0x12   : > { %294 = vmatpush.msra.mxu2 %v175_v8  ;;  %317 = vmatpush.msra.mxu3 %v176_v9  ;;  %v179_v15 = vld [vmem:[%s599_s19 + $0x30] sm:$0xff]  ;;  %v180_v16 = vld [vmem:[%s599_s19 + $0x38] sm:$0xff]  ;;  %v177_v17 = vld [vmem:[%s599_s19 + $0x20] sm:$0xff] }
  0x13   : > { %514 = vmatmul.msk.f32.vlgmr.msra.gmra.mxu0 %vm201_vm1, %v171_v10  ;;  %517 = vmatmul.msk.f32.vlgmr.msra.gmra.mxu1 %vm201_vm1, %v171_v10  ;;  %v178_v18 = vld [vmem:[%s599_s19 + $0x28] sm:$0xff] }
  0x14   : > { %520 = vmatmul.msk.f32.vlgmr.msra.gmra.mxu2 %vm201_vm1, %v171_v10  ;;  %523 = vmatmul.msk.f32.vlgmr.msra.gmra.mxu3 %vm201_vm1, %v171_v10 }
  0x15   : > { %531 = vmatpush.msk.msrb.mxu2 %vm208_vm0, %v187_v11  ;;  %534 = vmatpush.msk.msrb.mxu3 %vm208_vm0, %v188_v12 }
  0x16   : > { %525 = vmatpush.msk.msrb.mxu0 %vm208_vm0, %v185_v13  ;;  %528 = vmatpush.msk.msrb.mxu1 %vm208_vm0, %v186_v14 }
  0x17   : > { %386 = vmatpush.msrb.mxu2 %v179_v15  ;;  %409 = vmatpush.msrb.mxu3 %v180_v16 }
  0x18   : > { %340 = vmatpush.msrb.mxu0 %v177_v17  ;;  %363 = vmatpush.msrb.mxu1 %v178_v18 }
  0x19   : > { %198 = vperm.xlu0 %550, %v190_v19  }
  0x1b   : > { %515 = vmatmul.msk.f32.gmra.mxu0 %vm201_vm1, %v172_v20  ;;  %518 = vmatmul.msk.f32.gmra.mxu1 %vm201_vm1, %v172_v20 }
  0x1c   : > { %521 = vmatmul.msk.f32.gmra.mxu2 %vm201_vm1, %v172_v20  ;;  %524 = vmatmul.msk.f32.gmra.mxu3 %vm201_vm1, %v172_v20 }
  0x23   : > { %526 = vmatmul.msk.f32.vlgmr.msrb.gmra.mxu0 %vm201_vm1, %v171_v10  ;;  %529 = vmatmul.msk.f32.vlgmr.msrb.gmra.mxu1 %vm201_vm1, %v171_v10 }
  0x24   : > { %532 = vmatmul.msk.f32.vlgmr.msrb.gmra.mxu2 %vm201_vm1, %v171_v10  ;;  %535 = vmatmul.msk.f32.vlgmr.msrb.gmra.mxu3 %vm201_vm1, %v171_v10 }
  0x2b   : > { %527 = vmatmul.msk.f32.gmra.mxu0 %vm201_vm1, %v172_v20  ;;  %530 = vmatmul.msk.f32.gmra.mxu1 %vm201_vm1, %v172_v20 }
  0x2c   : > { %533 = vmatmul.msk.f32.gmra.mxu2 %vm201_vm1, %v172_v20  ;;  %536 = vmatmul.msk.f32.gmra.mxu3 %vm201_vm1, %v172_v20 }
  0x7f   : > { %v194_v21 = vpop.permute.xlu0 %193 }
  0x8b   : > { %v199_v28 = vpop.permute.xlu0 %198 }
  0x90   : > { %v250_v22 = vpop.f32.mrf.mxu0  ;;  %v273_v23 = vpop.f32.mrf.mxu1 }
  0x91   : > { %v251_v24 = vadd.f32 %v250_v22, %v194_v21  ;;  %v274_v25 = vadd.f32 %v273_v23, %v194_v21 }
  0x93   : > { %v417_v26 = vmax.f32 %v251_v24, 0.0  ;;  %v418_v27 = vmax.f32 %v274_v25, 0.0 }
  0x95   : > { %433 = vst [vmem:[%s655_s28] sm:$0xff] %v417_v26 }
  0x96   : > { %434 = vst [vmem:[%s655_s28 + $0x8] sm:$0xff] %v418_v27 }
  0x97   : > { %v296_v29 = vpop.f32.mrf.mxu2  ;;  %v319_v30 = vpop.f32.mrf.mxu3 }
  0x98   : > { %v297_v31 = vadd.f32 %v296_v29, %v194_v21  ;;  %v320_v32 = vadd.f32 %v319_v30, %v194_v21  ;;  %v253_v33 = vpop.f32.mrf.mxu0  ;;  %v276_v34 = vpop.f32.mrf.mxu1 }
  0x99   : > { %v254_v35 = vadd.f32 %v253_v33, %v199_v28  ;;  %v277_v36 = vadd.f32 %v276_v34, %v199_v28 }
  0x9a   : > { %v419_v37 = vmax.f32 %v297_v31, 0.0  ;;  %v420_v38 = vmax.f32 %v320_v32, 0.0 }
  0x9b   : > { %v425_v39 = vmax.f32 %v254_v35, 0.0  ;;  %v426_v40 = vmax.f32 %v277_v36, 0.0 }
  0x9c   : > { %435 = vst [vmem:[%s655_s28 + $0x10] sm:$0xff] %v419_v37 }
  0x9d   : > { %436 = vst [vmem:[%s655_s28 + $0x18] sm:$0xff] %v420_v38 }
  0x9e   : > { %441 = vst [vmem:[%s655_s28 + $0x40] sm:$0xff] %v425_v39 }
  0x9f   : > { %442 = vst [vmem:[%s655_s28 + $0x48] sm:$0xff] %v426_v40  ;;  %v299_v41 = vpop.f32.mrf.mxu2  ;;  %v322_v42 = vpop.f32.mrf.mxu3 }
  0xa0   : > { %v300_v43 = vadd.f32 %v299_v41, %v199_v28  ;;  %v323_v44 = vadd.f32 %v322_v42, %v199_v28  ;;  %v342_v45 = vpop.f32.mrf.mxu0  ;;  %v365_v46 = vpop.f32.mrf.mxu1 }
  0xa1   : > { %v343_v47 = vadd.f32 %v342_v45, %v194_v21  ;;  %v366_v48 = vadd.f32 %v365_v46, %v194_v21 }
  0xa2   : > { %v427_v49 = vmax.f32 %v300_v43, 0.0  ;;  %v428_v50 = vmax.f32 %v323_v44, 0.0 }
  0xa3   : > { %v421_v51 = vmax.f32 %v343_v47, 0.0  ;;  %v422_v52 = vmax.f32 %v366_v48, 0.0 }
  0xa4   : > { %443 = vst [vmem:[%s655_s28 + $0x50] sm:$0xff] %v427_v49 }
  0xa5   : > { %444 = vst [vmem:[%s655_s28 + $0x58] sm:$0xff] %v428_v50 }
  0xa6   : > { %437 = vst [vmem:[%s655_s28 + $0x20] sm:$0xff] %v421_v51 }
  0xa7   : > { %438 = vst [vmem:[%s655_s28 + $0x28] sm:$0xff] %v422_v52  ;;  %v388_v53 = vpop.f32.mrf.mxu2  ;;  %v411_v54 = vpop.f32.mrf.mxu3 }
  0xa8   : > { %v389_v55 = vadd.f32 %v388_v53, %v194_v21  ;;  %v412_v56 = vadd.f32 %v411_v54, %v194_v21  ;;  %v345_v57 = vpop.f32.mrf.mxu0  ;;  %v368_v58 = vpop.f32.mrf.mxu1 }
  0xa9   : > { %v346_v59 = vadd.f32 %v345_v57, %v199_v28  ;;  %v369_v60 = vadd.f32 %v368_v58, %v199_v28 }
  0xaa   : > { %v423_v61 = vmax.f32 %v389_v55, 0.0  ;;  %v424_v62 = vmax.f32 %v412_v56, 0.0 }
  0xab   : > { %v429_v63 = vmax.f32 %v346_v59, 0.0  ;;  %v430_v0 = vmax.f32 %v369_v60, 0.0 }
  0xac   : > { %439 = vst [vmem:[%s655_s28 + $0x30] sm:$0xff] %v423_v61 }
  0xad   : > { %440 = vst [vmem:[%s655_s28 + $0x38] sm:$0xff] %v424_v62 }
  0xae   : > { %445 = vst [vmem:[%s655_s28 + $0x60] sm:$0xff] %v429_v63 }
  0xaf   : > { %446 = vst [vmem:[%s655_s28 + $0x68] sm:$0xff] %v430_v0  ;;  %v391_v1 = vpop.f32.mrf.mxu2  ;;  %v414_v2 = vpop.f32.mrf.mxu3 }
  0xb0   : > { %v392_v3 = vadd.f32 %v391_v1, %v199_v28  ;;  %v415_v4 = vadd.f32 %v414_v2, %v199_v28 }
  0xb2   : > { %v431_v5 = vmax.f32 %v392_v3, 0.0  ;;  %v432_v6 = vmax.f32 %v415_v4, 0.0 }
  0xb4   : > { %447 = vst [vmem:[%s655_s28 + $0x70] sm:$0xff] %v431_v5 }
  0xb5   : > { %448 = vst [vmem:[%s655_s28 + $0x78] sm:$0xff] %v432_v6 }
  0xb6 PF: > { %s13_s12 = sadd.s32 1, %s557_s12  }
  0xb7   : > { %p10_p4 = scmp.ge.s32.totalorder %s13_s12, 4  }
  0xb9   :  { %12 = sbr.rel (!%p10_p4) target bundleno = 1 (0x1), region = 62 }

// kernel: arbitrary_nn_forward.5
= control target key start
LH: loop header
LB: loop body
LE: loop exit
PB: predicated region body
PF: predicated region fallthrough
CT: control target
= control target key end

     0   :  { %s1045_s12 = smov 0   ;;  %s1434_s0 = inlined_call_operand.vmem [shape: f32[2,144,1024], index: 0, kind: input, shape index: {}]   ;;  %s1435_s1 = inlined_call_operand.vmem [shape: f32[32,144], index: 1, kind: input, shape index: {}]   ;;  %s1436_s2 = inlined_call_operand.vmem [shape: f32[32,1], index: 2, kind: input, shape index: {}]   ;;  %s1437_s3 = inlined_call_operand.vmem [shape: f32[2,32,1024], index: 3, kind: output, shape index: {}]  }
   0x1 LB: > { %s943_s13 = sadd.s32 4294967295, %s1022_s12   ;;  %p947_p0 = scmp.ge.s32.totalorder %s1022_s12, 1  ;;  %s1022_s12 = sphi %s1045_s12, %s13_s12  }
   0x2   : > { %p137_p1 = scmp.lt.s32.totalorder %s1022_s12, 3 }
   0x4   : > { %p138_p2 = pnand %p947_p0, %p137_p1 }
   0x5   : > { %p161_p3 = scmp.lt.s32.totalorder (!%p138_p2), %s943_s13, 1 }
   0x6   : > { %141 = sbr.rel (%p138_p2) target bundleno = 302 (0x12e), region = 32 }
   0xb   : > { %s1439_s13 = smov (!%p161_p3, %s943_s13), 1  ;;  %v1076_v12 = vld [vmem:[%s1435_s1 + $0x8] sm:$0xff]  ;;  %vm347_vm0 = vcmask 130048   ;;  %v1024_v25 = vmov 0   ;;  %v1097_v26 = vld [vmem:[%s1435_s1 + $0x18] sm:$0xff]  ;;  %v323_v40 = vld [vmem:[%s1436_s2] sm:$0xff] }
   0xc   : > { %s1004_s14 = smul.u32 1152, %s1439_s13  ;;  %1014 = vset.pattern.permute.xlu0 %v1024_v25  ;;  %1015 = vset.pattern.permute.xlu1 %v1024_v25  ;;  %v1122_v41 = vld [vmem:[%s1435_s1 + $0x28] sm:$0xff]  ;;  %v325_v53 = vld [vmem:[%s1436_s2 + $0x10] sm:$0xff]  ;;  %v1150_v57 = vld [vmem:[%s1435_s1] sm:$0xff] }
   0xd   : > { %329 = vperm.xlu0 %1014, %v323_v40   ;;  %v324_v52 = vld [vmem:[%s1436_s2 + $0x8] sm:$0xff]  ;;  %339 = vperm.xlu1 %1015, %v325_v53   ;;  %v1155_v58 = vld [vmem:[%s1435_s1 + $0x38] sm:$0xff] }
   0xe   : > { %s1059_s17 = scalar_lea.vmem %s1434_s0, %s1004_s14 }
   0xf   : > { %v299_v0 = vld [vmem:[%s1059_s17 + $0x3c0] sm:$0xff]  ;;  %v300_v1 = vld [vmem:[%s1059_s17 + $0x3c8] sm:$0xff]  ;;  %v301_v15 = vld [vmem:[%s1059_s17 + $0x3d0] sm:$0xff] }
  0x10   : > { %v291_v2 = vld [vmem:[%s1059_s17 + $0x380] sm:$0xff]  ;;  %360 = vmatpush.msra.mxu0 %v299_v0  ;;  %418 = vmatpush.msra.mxu2 %v300_v1  ;;  %v292_v3 = vld [vmem:[%s1059_s17 + $0x388] sm:$0xff]  ;;  %v317_v16 = vld [vmem:[%s1059_s17 + $0x450] sm:$0xff] }
  0x11   : > { %v283_v4 = vld [vmem:[%s1059_s17 + $0x340] sm:$0xff]  ;;  %v284_v5 = vld [vmem:[%s1059_s17 + $0x348] sm:$0xff]  ;;  %v293_v19 = vld [vmem:[%s1059_s17 + $0x390] sm:$0xff] }
  0x12   : > { %v316_v6 = vld [vmem:[%s1059_s17 + $0x448] sm:$0xff]  ;;  %361 = vmatpush.msra.mxu0 %v291_v2  ;;  %419 = vmatpush.msra.mxu2 %v292_v3  ;;  %v315_v8 = vld [vmem:[%s1059_s17 + $0x440] sm:$0xff]  ;;  %v285_v22 = vld [vmem:[%s1059_s17 + $0x350] sm:$0xff] }
  0x13   : > { %v308_v7 = vld [vmem:[%s1059_s17 + $0x408] sm:$0xff]  ;;  %461 = vmatpush.msra.mxu3 %v316_v6  ;;  %v275_v9 = vld [vmem:[%s1059_s17 + $0x300] sm:$0xff]  ;;  %403 = vmatpush.msra.mxu1 %v315_v8  ;;  %v277_v27 = vld [vmem:[%s1059_s17 + $0x310] sm:$0xff] }
  0x14   : > { %v276_v10 = vld [vmem:[%s1059_s17 + $0x308] sm:$0xff]  ;;  %v307_v11 = vld [vmem:[%s1059_s17 + $0x400] sm:$0xff]  ;;  %362 = vmatpush.msra.mxu0 %v283_v4  ;;  %420 = vmatpush.msra.mxu2 %v284_v5  ;;  %v309_v32 = vld [vmem:[%s1059_s17 + $0x410] sm:$0xff] }
  0x15   : > { %462 = vmatpush.msra.mxu3 %v308_v7  ;;  %v267_v13 = vld [vmem:[%s1059_s17 + $0x2c0] sm:$0xff]  ;;  %v268_v14 = vld [vmem:[%s1059_s17 + $0x2c8] sm:$0xff]  ;;  %404 = vmatpush.msra.mxu1 %v307_v11  ;;  %v269_v33 = vld [vmem:[%s1059_s17 + $0x2d0] sm:$0xff] }
  0x16   : > { %363 = vmatpush.msra.mxu0 %v275_v9  ;;  %421 = vmatpush.msra.mxu2 %v276_v10  ;;  %v259_v17 = vld [vmem:[%s1059_s17 + $0x280] sm:$0xff]  ;;  %v260_v18 = vld [vmem:[%s1059_s17 + $0x288] sm:$0xff]  ;;  %v261_v36 = vld [vmem:[%s1059_s17 + $0x290] sm:$0xff] }
  0x17   : > { %955 = vmatmul.msk.f32.vlgmr.msra.gmra.mxu3 %vm347_vm0, %v1076_v12  ;;  %951 = vmatmul.msk.f32.vlgmr.msra.gmra.mxu1 %vm347_vm0, %v1076_v12  ;;  %v251_v20 = vld [vmem:[%s1059_s17 + $0x240] sm:$0xff]  ;;  %v252_v21 = vld [vmem:[%s1059_s17 + $0x248] sm:$0xff]  ;;  %v318_v37 = vld [vmem:[%s1059_s17 + $0x458] sm:$0xff] }
  0x18   : > { %364 = vmatpush.msra.mxu0 %v267_v13  ;;  %422 = vmatpush.msra.mxu2 %v268_v14  ;;  %v243_v23 = vld [vmem:[%s1059_s17 + $0x200] sm:$0xff]  ;;  %v244_v24 = vld [vmem:[%s1059_s17 + $0x208] sm:$0xff]  ;;  %v253_v42 = vld [vmem:[%s1059_s17 + $0x250] sm:$0xff] }
  0x19   : > { %476 = vmatpush.msrb.mxu1 %v301_v15  ;;  %519 = vmatpush.msrb.mxu3 %v317_v16  ;;  %v235_v28 = vld [vmem:[%s1059_s17 + $0x1c0] sm:$0xff]  ;;  %v236_v29 = vld [vmem:[%s1059_s17 + $0x1c8] sm:$0xff]  ;;  %v245_v45 = vld [vmem:[%s1059_s17 + $0x210] sm:$0xff] }
  0x1a   : > { %365 = vmatpush.msra.mxu0 %v259_v17  ;;  %423 = vmatpush.msra.mxu2 %v260_v18  ;;  %v227_v30 = vld [vmem:[%s1059_s17 + $0x180] sm:$0xff]  ;;  %v228_v31 = vld [vmem:[%s1059_s17 + $0x188] sm:$0xff]  ;;  %v310_v48 = vld [vmem:[%s1059_s17 + $0x418] sm:$0xff] }
  0x1b   : > { %477 = vmatpush.msrb.mxu1 %v293_v19  ;;  %v219_v34 = vld [vmem:[%s1059_s17 + $0x140] sm:$0xff]  ;;  %v220_v35 = vld [vmem:[%s1059_s17 + $0x148] sm:$0xff]  ;;  %520 = vmatpush.msrb.mxu3 %v309_v32  ;;  %v237_v51 = vld [vmem:[%s1059_s17 + $0x1d0] sm:$0xff] }
  0x1c   : > { %366 = vmatpush.msra.mxu0 %v251_v20  ;;  %424 = vmatpush.msra.mxu2 %v252_v21  ;;  %v211_v38 = vld [vmem:[%s1059_s17 + $0x100] sm:$0xff]  ;;  %v212_v39 = vld [vmem:[%s1059_s17 + $0x108] sm:$0xff]  ;;  %v229_v56 = vld [vmem:[%s1059_s17 + $0x190] sm:$0xff] }
  0x1d   : > { %478 = vmatpush.msrb.mxu1 %v285_v22  ;;  %986 = vmatpush.msra.mxu3 %v318_v37  ;;  %v203_v43 = vld [vmem:[%s1059_s17 + $0xc0] sm:$0xff]  ;;  %v204_v44 = vld [vmem:[%s1059_s17 + $0xc8] sm:$0xff]  ;;  %v221_v59 = vld [vmem:[%s1059_s17 + $0x150] sm:$0xff] }
  0x1e   : > { %367 = vmatpush.msra.mxu0 %v243_v23  ;;  %425 = vmatpush.msra.mxu2 %v244_v24  ;;  %v195_v46 = vld [vmem:[%s1059_s17 + $0x80] sm:$0xff]  ;;  %v196_v47 = vld [vmem:[%s1059_s17 + $0x88] sm:$0xff]  ;;  %v302_v60 = vld [vmem:[%s1059_s17 + $0x3d8] sm:$0xff] }
  0x1f   : > { %956 = vmatmul.msk.f32.gmra.mxu3 %vm347_vm0, %v1097_v26  ;;  %479 = vmatpush.msrb.mxu1 %v277_v27  ;;  %v187_v49 = vld [vmem:[%s1059_s17 + $0x40] sm:$0xff]  ;;  %v188_v50 = vld [vmem:[%s1059_s17 + $0x48] sm:$0xff]  ;;  %v213_v61 = vld [vmem:[%s1059_s17 + $0x110] sm:$0xff] }
  0x20   : > { %368 = vmatpush.msra.mxu0 %v235_v28  ;;  %426 = vmatpush.msra.mxu2 %v236_v29  ;;  %v179_v54 = vld [vmem:[%s1059_s17] sm:$0xff]  ;;  %v180_v55 = vld [vmem:[%s1059_s17 + $0x8] sm:$0xff]  ;;  %v294_v62 = vld [vmem:[%s1059_s17 + $0x398] sm:$0xff] }
  0x21   : > { %952 = vmatmul.msk.f32.gmra.mxu1 %vm347_vm0, %v1097_v26  ;;  %987 = vmatpush.msra.mxu3 %v310_v48  ;;  %v205_v63 = vld [vmem:[%s1059_s17 + $0xd0] sm:$0xff]  ;;  %v320_v0 = vld [vmem:[%s1059_s17 + $0x468] sm:$0xff]  ;;  %v286_v1 = vld [vmem:[%s1059_s17 + $0x358] sm:$0xff] }
  0x22   : > { %369 = vmatpush.msra.mxu0 %v227_v30  ;;  %427 = vmatpush.msra.mxu2 %v228_v31  ;;  %v326_v2 = vld [vmem:[%s1436_s2 + $0x18] sm:$0xff]  ;;  %v197_v3 = vld [vmem:[%s1059_s17 + $0x90] sm:$0xff]  ;;  %v303_v10 = vld [vmem:[%s1059_s17 + $0x3e0] sm:$0xff] }
  0x23   : > { %480 = vmatpush.msrb.mxu1 %v269_v33  ;;  %334 = vperm.xlu0 %1014, %v324_v52   ;;  %v1177_v4 = vld [vmem:[%s1435_s1 + $0x10] sm:$0xff]  ;;  %v278_v5 = vld [vmem:[%s1059_s17 + $0x318] sm:$0xff]  ;;  %v295_v13 = vld [vmem:[%s1059_s17 + $0x3a0] sm:$0xff] }
  0x24   : > { %370 = vmatpush.msra.mxu0 %v219_v34  ;;  %428 = vmatpush.msra.mxu2 %v220_v35  ;;  %v189_v6 = vld [vmem:[%s1059_s17 + $0x50] sm:$0xff]  ;;  %v270_v7 = vld [vmem:[%s1059_s17 + $0x2d8] sm:$0xff]  ;;  %v1195_v14 = vld [vmem:[%s1435_s1 + $0x20] sm:$0xff] }
  0x25   : > { %481 = vmatpush.msrb.mxu1 %v261_v36  ;;  %344 = vperm.xlu1 %1015, %v326_v2   ;;  %v181_v8 = vld [vmem:[%s1059_s17 + $0x10] sm:$0xff]  ;;  %v262_v9 = vld [vmem:[%s1059_s17 + $0x298] sm:$0xff]  ;;  %v312_v16 = vld [vmem:[%s1059_s17 + $0x428] sm:$0xff] }
  0x26   : > { %371 = vmatpush.msra.mxu0 %v211_v38  ;;  %429 = vmatpush.msra.mxu2 %v212_v39  ;;  %v254_v11 = vld [vmem:[%s1059_s17 + $0x258] sm:$0xff]  ;;  %v287_v17 = vld [vmem:[%s1059_s17 + $0x360] sm:$0xff]  ;;  %v1216_v27 = vld [vmem:[%s1435_s1 + $0x30] sm:$0xff] }
  0x27   : > { %957 = vmatmul.msk.f32.gmra.mxu3 %vm347_vm0, %v1122_v41  ;;  %482 = vmatpush.msrb.mxu1 %v253_v42  ;;  %v246_v15 = vld [vmem:[%s1059_s17 + $0x218] sm:$0xff]  ;;  %v319_v19 = vld [vmem:[%s1059_s17 + $0x460] sm:$0xff]  ;;  %v304_v38 = vld [vmem:[%s1059_s17 + $0x3e8] sm:$0xff] }
  0x28   : > { %372 = vmatpush.msra.mxu0 %v203_v43  ;;  %430 = vmatpush.msra.mxu2 %v204_v44  ;;  %v238_v18 = vld [vmem:[%s1059_s17 + $0x1d8] sm:$0xff]  ;;  %v279_v20 = vld [vmem:[%s1059_s17 + $0x320] sm:$0xff]  ;;  %v296_v42 = vld [vmem:[%s1059_s17 + $0x3a8] sm:$0xff] }
  0x29   : > { %483 = vmatpush.msrb.mxu1 %v245_v45  ;;  %v230_v21 = vld [vmem:[%s1059_s17 + $0x198] sm:$0xff]  ;;  %v271_v22 = vld [vmem:[%s1059_s17 + $0x2e0] sm:$0xff]  ;;  %v288_v44 = vld [vmem:[%s1059_s17 + $0x368] sm:$0xff] }
  0x2a   : > { %373 = vmatpush.msra.mxu0 %v195_v46  ;;  %431 = vmatpush.msra.mxu2 %v196_v47  ;;  %v311_v23 = vld [vmem:[%s1059_s17 + $0x420] sm:$0xff]  ;;  %v222_v24 = vld [vmem:[%s1059_s17 + $0x158] sm:$0xff]  ;;  %v280_v46 = vld [vmem:[%s1059_s17 + $0x328] sm:$0xff] }
  0x2b   : > { %953 = vmatmul.msk.f32.gmra.mxu1 %vm347_vm0, %v1122_v41  ;;  %v263_v25 = vld [vmem:[%s1059_s17 + $0x2a0] sm:$0xff]  ;;  %v214_v28 = vld [vmem:[%s1059_s17 + $0x118] sm:$0xff]  ;;  %v305_v52 = vld [vmem:[%s1059_s17 + $0x3f0] sm:$0xff] }
  0x2c   : > { %374 = vmatpush.msra.mxu0 %v187_v49  ;;  %432 = vmatpush.msra.mxu2 %v188_v50  ;;  %v255_v29 = vld [vmem:[%s1059_s17 + $0x260] sm:$0xff]  ;;  %v206_v30 = vld [vmem:[%s1059_s17 + $0xd8] sm:$0xff]  ;;  %v321_v49 = vld [vmem:[%s1059_s17 + $0x470] sm:$0xff] }
  0x2d   : > { %484 = vmatpush.msrb.mxu1 %v237_v51  ;;  %v247_v31 = vld [vmem:[%s1059_s17 + $0x220] sm:$0xff]  ;;  %v198_v32 = vld [vmem:[%s1059_s17 + $0x98] sm:$0xff]  ;;  %v264_v51 = vld [vmem:[%s1059_s17 + $0x2a8] sm:$0xff] }
  0x2e   : > { %375 = vmatpush.msra.mxu0 %v179_v54  ;;  %433 = vmatpush.msra.mxu2 %v180_v55  ;;  %v239_v33 = vld [vmem:[%s1059_s17 + $0x1e0] sm:$0xff]  ;;  %v190_v34 = vld [vmem:[%s1059_s17 + $0x58] sm:$0xff]  ;;  %v256_v53 = vld [vmem:[%s1059_s17 + $0x268] sm:$0xff] }
  0x2f   : > { %485 = vmatpush.msrb.mxu1 %v229_v56  ;;  %376 = vmatmul.f32.vlgmr.msra.gmra.mxu0 %v1150_v57  ;;  %v231_v35 = vld [vmem:[%s1059_s17 + $0x1a0] sm:$0xff]  ;;  %v182_v36 = vld [vmem:[%s1059_s17 + $0x18] sm:$0xff]  ;;  %v313_v54 = vld [vmem:[%s1059_s17 + $0x430] sm:$0xff] }
  0x30   : > { %434 = vmatmul.f32.vlgmr.msra.gmra.mxu2 %v1150_v57  ;;  %958 = vmatmul.msk.f32.gmra.mxu3 %vm347_vm0, %v1155_v58  ;;  %v322_v39 = vld [vmem:[%s1059_s17 + $0x478] sm:$0xff]  ;;  %v215_v40 = vld [vmem:[%s1059_s17 + $0x120] sm:$0xff]  ;;  %v297_v56 = vld [vmem:[%s1059_s17 + $0x3b0] sm:$0xff] }
  0x31   : > { %577 = vmatpush.msrb.mxu2 %v318_v37  ;;  %486 = vmatpush.msrb.mxu1 %v221_v59  ;;  %v223_v37 = vld [vmem:[%s1059_s17 + $0x160] sm:$0xff]  ;;  %v314_v55 = vld [vmem:[%s1059_s17 + $0x438] sm:$0xff]  ;;  %v248_v59 = vld [vmem:[%s1059_s17 + $0x228] sm:$0xff] }
  0x32   : > { %534 = vmatpush.msrb.mxu0 %v302_v60  ;;  %v207_v43 = vld [vmem:[%s1059_s17 + $0xe0] sm:$0xff]  ;;  %v240_v60 = vld [vmem:[%s1059_s17 + $0x1e8] sm:$0xff] }
  0x33   : > { %487 = vmatpush.msrb.mxu1 %v213_v61  ;;  %578 = vmatpush.msrb.mxu2 %v310_v48  ;;  %v199_v45 = vld [vmem:[%s1059_s17 + $0xa0] sm:$0xff]  ;;  %v272_v48 = vld [vmem:[%s1059_s17 + $0x2e8] sm:$0xff]  ;;  %v289_v61 = vld [vmem:[%s1059_s17 + $0x370] sm:$0xff] }
  0x34   : > { %535 = vmatpush.msrb.mxu0 %v294_v62  ;;  %954 = vmatmul.msk.f32.gmra.mxu1 %vm347_vm0, %v1155_v58  ;;  %v191_v47 = vld [vmem:[%s1059_s17 + $0x60] sm:$0xff]  ;;  %v232_v62 = vld [vmem:[%s1059_s17 + $0x1a8] sm:$0xff] }
  0x35   : > { %488 = vmatpush.msrb.mxu1 %v205_v63  ;;  %693 = vmatpush.msra.mxu2 %v320_v0  ;;  %v183_v50 = vld [vmem:[%s1059_s17 + $0x20] sm:$0xff]  ;;  %v281_v63 = vld [vmem:[%s1059_s17 + $0x330] sm:$0xff]  ;;  %v224_v0 = vld [vmem:[%s1059_s17 + $0x168] sm:$0xff] }
  0x36   : > { %536 = vmatpush.msrb.mxu0 %v286_v1  ;;  %v273_v1 = vld [vmem:[%s1059_s17 + $0x2f0] sm:$0xff]  ;;  %v216_v2 = vld [vmem:[%s1059_s17 + $0x128] sm:$0xff] }
  0x37   : > { %489 = vmatpush.msrb.mxu1 %v197_v3  ;;  %379 = vmatmul.f32.gmra.mxu0 %v1177_v4  ;;  %v265_v3 = vld [vmem:[%s1059_s17 + $0x2b0] sm:$0xff] }
  0x38   : > { %537 = vmatpush.msrb.mxu0 %v278_v5  ;;  %437 = vmatmul.f32.gmra.mxu2 %v1177_v4  ;;  %v208_v5 = vld [vmem:[%s1059_s17 + $0xe8] sm:$0xff] }
  0x39   : > { %959 = vmatmul.msk.f32.vlgmr.msrb.gmra.mxu3 %vm347_vm0, %v1076_v12  ;;  %490 = vmatpush.msrb.mxu1 %v189_v6  ;;  %v257_v6 = vld [vmem:[%s1059_s17 + $0x270] sm:$0xff] }
  0x3a   : > { %538 = vmatpush.msrb.mxu0 %v270_v7  ;;  %694 = vmatpush.msra.mxu2 %v312_v16  ;;  %v200_v7 = vld [vmem:[%s1059_s17 + $0xa8] sm:$0xff]  ;;  %v306_v16 = vld [vmem:[%s1059_s17 + $0x3f8] sm:$0xff] }
  0x3b   : > { %491 = vmatpush.msrb.mxu1 %v181_v8  ;;  %635 = vmatpush.msrb.mxu3 %v319_v19  ;;  %v249_v8 = vld [vmem:[%s1059_s17 + $0x230] sm:$0xff] }
  0x3c   : > { %539 = vmatpush.msrb.mxu0 %v262_v9  ;;  %492 = vmatmul.f32.vlgmr.msrb.gmra.mxu1 %v1150_v57  ;;  %v192_v9 = vld [vmem:[%s1059_s17 + $0x68] sm:$0xff]  ;;  %v209_v19 = vld [vmem:[%s1059_s17 + $0xf0] sm:$0xff] }
  0x3d   : > { %592 = vmatpush.msra.mxu1 %v303_v10  ;;  %636 = vmatpush.msrb.mxu3 %v311_v23  ;;  %v241_v10 = vld [vmem:[%s1059_s17 + $0x1f0] sm:$0xff] }
  0x3e   : > { %540 = vmatpush.msrb.mxu0 %v254_v11  ;;  %v184_v11 = vld [vmem:[%s1059_s17 + $0x28] sm:$0xff]  ;;  %v193_v23 = vld [vmem:[%s1059_s17 + $0x70] sm:$0xff] }
  0x3f   : > { %593 = vmatpush.msra.mxu1 %v295_v13  ;;  %382 = vmatmul.f32.gmra.mxu0 %v1195_v14  ;;  %v233_v13 = vld [vmem:[%s1059_s17 + $0x1b0] sm:$0xff] }
  0x40   : > { %541 = vmatpush.msrb.mxu0 %v246_v15  ;;  %440 = vmatmul.f32.gmra.mxu2 %v1195_v14  ;;  %v225_v15 = vld [vmem:[%s1059_s17 + $0x170] sm:$0xff] }
  0x41   : > { %960 = vmatmul.msk.f32.gmra.mxu3 %vm347_vm0, %v1097_v26  ;;  %594 = vmatpush.msra.mxu1 %v287_v17  ;;  %v217_v17 = vld [vmem:[%s1059_s17 + $0x130] sm:$0xff] }
  0x42   : > { %542 = vmatpush.msrb.mxu0 %v238_v18  ;;  %v298_v18 = vld [vmem:[%s1059_s17 + $0x3b8] sm:$0xff] }
  0x43   : > { %595 = vmatpush.msra.mxu1 %v279_v20  ;;  %v290_v20 = vld [vmem:[%s1059_s17 + $0x378] sm:$0xff] }
  0x44   : > { %543 = vmatpush.msrb.mxu0 %v230_v21  ;;  %495 = vmatmul.f32.gmra.mxu1 %v1177_v4  ;;  %v201_v21 = vld [vmem:[%s1059_s17 + $0xb0] sm:$0xff] }
  0x45   : > { %596 = vmatpush.msra.mxu1 %v271_v22  ;;  %v282_v22 = vld [vmem:[%s1059_s17 + $0x338] sm:$0xff] }
  0x46   : > { %544 = vmatpush.msrb.mxu0 %v222_v24  ;;  %v274_v24 = vld [vmem:[%s1059_s17 + $0x2f8] sm:$0xff] }
  0x47   : > { %597 = vmatpush.msra.mxu1 %v263_v25  ;;  %385 = vmatmul.f32.gmra.mxu0 %v1216_v27  ;;  %v185_v25 = vld [vmem:[%s1059_s17 + $0x30] sm:$0xff] }
  0x48   : > { %545 = vmatpush.msrb.mxu0 %v214_v28  ;;  %443 = vmatmul.f32.gmra.mxu2 %v1216_v27  ;;  %v266_v28 = vld [vmem:[%s1059_s17 + $0x2b8] sm:$0xff] }
  0x49   : > { %961 = vmatmul.msk.f32.gmra.mxu3 %vm347_vm0, %v1122_v41  ;;  %598 = vmatpush.msra.mxu1 %v255_v29  ;;  %v258_v29 = vld [vmem:[%s1059_s17 + $0x278] sm:$0xff] }
  0x4a   : > { %546 = vmatpush.msrb.mxu0 %v206_v30  ;;  %v250_v30 = vld [vmem:[%s1059_s17 + $0x238] sm:$0xff] }
  0x4b   : > { %599 = vmatpush.msra.mxu1 %v247_v31  ;;  %v242_v31 = vld [vmem:[%s1059_s17 + $0x1f8] sm:$0xff] }
  0x4c   : > { %547 = vmatpush.msrb.mxu0 %v198_v32  ;;  %498 = vmatmul.f32.gmra.mxu1 %v1195_v14  ;;  %v234_v32 = vld [vmem:[%s1059_s17 + $0x1b8] sm:$0xff] }
  0x4d   : > { %600 = vmatpush.msra.mxu1 %v239_v33  ;;  %v226_v33 = vld [vmem:[%s1059_s17 + $0x178] sm:$0xff] }
  0x4e   : > { %548 = vmatpush.msrb.mxu0 %v190_v34  ;;  %v218_v34 = vld [vmem:[%s1059_s17 + $0x138] sm:$0xff] }
  0x4f   : > { %601 = vmatpush.msra.mxu1 %v231_v35  ;;  %v210_v35 = vld [vmem:[%s1059_s17 + $0xf8] sm:$0xff] }
  0x50   : > { %549 = vmatpush.msrb.mxu0 %v182_v36  ;;  %963 = vmatmul.msk.f32.vlgmr.msrb.gmra.mxu2 %vm347_vm0, %v1076_v12  ;;  %v202_v36 = vld [vmem:[%s1059_s17 + $0xb8] sm:$0xff] }
  0x51   : > { %962 = vmatmul.msk.f32.gmra.mxu3 %vm347_vm0, %v1155_v58  ;;  %550 = vmatmul.f32.vlgmr.msrb.gmra.mxu0 %v1150_v57 }
  0x52   : > { %602 = vmatpush.msra.mxu1 %v223_v37  ;;  %650 = vmatpush.msra.mxu0 %v304_v38  ;;  %v194_v37 = vld [vmem:[%s1059_s17 + $0x78] sm:$0xff] }
  0x53   : > { %809 = vmatpush.msrb.mxu2 %v322_v39  ;;  %v186_v38 = vld [vmem:[%s1059_s17 + $0x38] sm:$0xff]  ;;  %s985_s17 = sshll.u32 %s1439_s13, 8 }
  0x54   : > { %603 = vmatpush.msra.mxu1 %v215_v40  ;;  %651 = vmatpush.msra.mxu0 %v296_v42  ;;  %s1360_s20 = scalar_lea.vmem %s1437_s3, %s985_s17 }
  0x55   : > { %501 = vmatmul.f32.gmra.mxu1 %v1216_v27  ;;  %810 = vmatpush.msrb.mxu2 %v314_v55 }
  0x56   : > { %604 = vmatpush.msra.mxu1 %v207_v43  ;;  %652 = vmatpush.msra.mxu0 %v288_v44 }
  0x58   : > { %605 = vmatpush.msra.mxu1 %v199_v45  ;;  %653 = vmatpush.msra.mxu0 %v280_v46 }
  0x59   : > { %553 = vmatmul.f32.gmra.mxu0 %v1177_v4  ;;  %964 = vmatmul.msk.f32.gmra.mxu2 %vm347_vm0, %v1097_v26 }
  0x5a   : > { %966 = vmatmul.msk.f32.vlgmr.msra.gmra.mxu3 %vm347_vm0, %v1155_v58  ;;  %606 = vmatpush.msra.mxu1 %v191_v47 }
  0x5b   : > { %654 = vmatpush.msra.mxu0 %v272_v48  ;;  %751 = vmatpush.msra.mxu3 %v321_v49 }
  0x5c   : > { %607 = vmatpush.msra.mxu1 %v183_v50 }
  0x5d   : > { %655 = vmatpush.msra.mxu0 %v264_v51  ;;  %608 = vmatmul.f32.vlgmr.msra.gmra.mxu1 %v1150_v57 }
  0x5e   : > { %708 = vmatpush.msrb.mxu1 %v305_v52  ;;  %752 = vmatpush.msra.mxu3 %v313_v54 }
  0x5f   : > { %656 = vmatpush.msra.mxu0 %v256_v53 }
  0x60   : > { %709 = vmatpush.msrb.mxu1 %v297_v56 }
  0x61   : > { %657 = vmatpush.msra.mxu0 %v248_v59  ;;  %965 = vmatmul.msk.f32.gmra.mxu2 %vm347_vm0, %v1122_v41 }
  0x62   : > { %556 = vmatmul.f32.gmra.mxu0 %v1195_v14  ;;  %967 = vmatmul.msk.f32.vlgmr.msrb.gmra.mxu3 %vm347_vm0, %v1076_v12 }
  0x63   : > { %658 = vmatpush.msra.mxu0 %v240_v60  ;;  %710 = vmatpush.msrb.mxu1 %v289_v61 }
  0x65   : > { %659 = vmatpush.msra.mxu0 %v232_v62  ;;  %711 = vmatpush.msrb.mxu1 %v281_v63 }
  0x66   : > { %611 = vmatmul.f32.gmra.mxu1 %v1177_v4 }
  0x67   : > { %660 = vmatpush.msra.mxu0 %v224_v0  ;;  %712 = vmatpush.msrb.mxu1 %v273_v1 }
  0x69   : > { %661 = vmatpush.msra.mxu0 %v216_v2  ;;  %713 = vmatpush.msrb.mxu1 %v265_v3 }
  0x6a   : > { %559 = vmatmul.f32.gmra.mxu0 %v1216_v27  ;;  %968 = vmatmul.msk.f32.gmra.mxu3 %vm347_vm0, %v1097_v26 }
  0x6b   : > { %971 = vmatmul.msk.f32.vlgmr.msra.gmra.mxu2 %vm347_vm0, %v1076_v12  ;;  %662 = vmatpush.msra.mxu0 %v208_v5 }
  0x6c   : > { %714 = vmatpush.msrb.mxu1 %v257_v6 }
  0x6d   : > { %663 = vmatpush.msra.mxu0 %v200_v7 }
  0x6e   : > { %715 = vmatpush.msrb.mxu1 %v249_v8 }
  0x6f   : > { %614 = vmatmul.f32.gmra.mxu1 %v1195_v14  ;;  %664 = vmatpush.msra.mxu0 %v192_v9 }
  0x70   : > { %716 = vmatpush.msrb.mxu1 %v241_v10 }
  0x71   : > { %665 = vmatpush.msra.mxu0 %v184_v11 }
  0x72   : > { %717 = vmatpush.msrb.mxu1 %v233_v13  ;;  %969 = vmatmul.msk.f32.gmra.mxu3 %vm347_vm0, %v1122_v41 }
  0x73   : > { %666 = vmatmul.f32.vlgmr.msra.gmra.mxu0 %v1150_v57  ;;  %972 = vmatmul.msk.f32.gmra.mxu2 %vm347_vm0, %v1097_v26 }
  0x74   : > { %718 = vmatpush.msrb.mxu1 %v225_v15  ;;  %766 = vmatpush.msrb.mxu0 %v306_v16 }
  0x76   : > { %719 = vmatpush.msrb.mxu1 %v217_v17  ;;  %767 = vmatpush.msrb.mxu0 %v298_v18 }
  0x77   : > { %617 = vmatmul.f32.gmra.mxu1 %v1216_v27 }
  0x78   : > { %720 = vmatpush.msrb.mxu1 %v209_v19  ;;  %768 = vmatpush.msrb.mxu0 %v290_v20 }
  0x7a   : > { %721 = vmatpush.msrb.mxu1 %v201_v21  ;;  %769 = vmatpush.msrb.mxu0 %v282_v22 }
  0x7b   : > { %970 = vmatmul.msk.f32.gmra.mxu3 %vm347_vm0, %v1155_v58  ;;  %669 = vmatmul.f32.gmra.mxu0 %v1177_v4 }
  0x7c   : > { %973 = vmatmul.msk.f32.gmra.mxu2 %vm347_vm0, %v1122_v41  ;;  %722 = vmatpush.msrb.mxu1 %v193_v23 }
  0x7d   : > { %770 = vmatpush.msrb.mxu0 %v274_v24 }
  0x7e   : > { %723 = vmatpush.msrb.mxu1 %v185_v25 }
  0x7f   : > { %771 = vmatpush.msrb.mxu0 %v266_v28  ;;  %724 = vmatmul.f32.vlgmr.msrb.gmra.mxu1 %v1150_v57  ;;  %v1353_v42 = vpop.permute.xlu0 %329  ;;  %v1367_v53 = vpop.permute.xlu1 %339 }
  0x80   : > { %988 = vmatpush.msra.mxu1 %v306_v16 }
  0x81   : > { %772 = vmatpush.msrb.mxu0 %v258_v29 }
  0x82   : > { %989 = vmatpush.msra.mxu1 %v298_v18 }
  0x83   : > { %773 = vmatpush.msrb.mxu0 %v250_v30  ;;  %975 = vmatmul.msk.f32.vlgmr.msra.gmra.mxu3 %vm347_vm0, %v1076_v12 }
  0x84   : > { %672 = vmatmul.f32.gmra.mxu0 %v1195_v14  ;;  %974 = vmatmul.msk.f32.gmra.mxu2 %vm347_vm0, %v1155_v58 }
  0x85   : > { %990 = vmatpush.msra.mxu1 %v290_v20  ;;  %774 = vmatpush.msrb.mxu0 %v242_v31 }
  0x87   : > { %991 = vmatpush.msra.mxu1 %v282_v22  ;;  %775 = vmatpush.msrb.mxu0 %v234_v32 }
  0x88   : > { %727 = vmatmul.f32.gmra.mxu1 %v1177_v4 }
  0x89   : > { %992 = vmatpush.msra.mxu1 %v274_v24  ;;  %776 = vmatpush.msrb.mxu0 %v226_v33 }
  0x8b   : > { %993 = vmatpush.msra.mxu1 %v266_v28  ;;  %777 = vmatpush.msrb.mxu0 %v218_v34 }
  0x8c   : > { %675 = vmatmul.f32.gmra.mxu0 %v1216_v27  ;;  %976 = vmatmul.msk.f32.gmra.mxu3 %vm347_vm0, %v1097_v26 }
  0x8d   : > { %979 = vmatmul.msk.f32.vlgmr.msrb.gmra.mxu2 %vm347_vm0, %v1076_v12  ;;  %994 = vmatpush.msra.mxu1 %v258_v29 }
  0x8e   : > { %778 = vmatpush.msrb.mxu0 %v210_v35 }
  0x8f   : > { %995 = vmatpush.msra.mxu1 %v250_v30 }
  0x90   : > { %779 = vmatpush.msrb.mxu0 %v202_v36  ;;  %730 = vmatmul.f32.gmra.mxu1 %v1195_v14 }
  0x91   : > { %996 = vmatpush.msra.mxu1 %v242_v31 }
  0x92   : > { %780 = vmatpush.msrb.mxu0 %v194_v37 }
  0x93   : > { %997 = vmatpush.msra.mxu1 %v234_v32 }
  0x94   : > { %781 = vmatpush.msrb.mxu0 %v186_v38  ;;  %977 = vmatmul.msk.f32.gmra.mxu3 %vm347_vm0, %v1122_v41  ;;  %v406_v39 = vpop.f32.mrf.mxu1 }
  0x95   : > { %782 = vmatmul.f32.vlgmr.msrb.gmra.mxu0 %v1150_v57  ;;  %980 = vmatmul.msk.f32.gmra.mxu2 %vm347_vm0, %v1097_v26 }
  0x96   : > { %998 = vmatpush.msra.mxu1 %v226_v33 }
  0x97   : > { %v1377_v9 = vpop.permute.xlu1 %344 }
  0x98   : > { %999 = vmatpush.msra.mxu1 %v218_v34 }
  0x99   : > { %733 = vmatmul.f32.gmra.mxu1 %v1216_v27 }
  0x9a   : > { %1000 = vmatpush.msra.mxu1 %v210_v35  ;;  %v464_v12 = vpop.f32.mrf.mxu3 }
  0x9c   : > { %1001 = vmatpush.msra.mxu1 %v202_v36  ;;  %978 = vmatmul.msk.f32.gmra.mxu3 %vm347_vm0, %v1155_v58 }
  0x9d   : > { %785 = vmatmul.f32.gmra.mxu0 %v1177_v4  ;;  %981 = vmatmul.msk.f32.gmra.mxu2 %vm347_vm0, %v1122_v41 }
  0x9e   : > { %1002 = vmatpush.msra.mxu1 %v194_v37  ;;  %v409_v57 = vpop.f32.mrf.mxu1 }
  0xa0   : > { %1003 = vmatpush.msra.mxu1 %v186_v38 }
  0xa1   : > { %791 = vmatmul.f32.vlgmr.msra.gmra.mxu1 %v1216_v27 }
  0xa2   : > { %v467_v26 = vpop.f32.mrf.mxu3 }
  0xa5   : > { %788 = vmatmul.f32.gmra.mxu0 %v1195_v14  ;;  %982 = vmatmul.msk.f32.gmra.mxu2 %vm347_vm0, %v1155_v58  ;;  %v1362_v58 = vpop.permute.xlu0 %334 }
  0xa8   : > { %v412_v40 = vpop.f32.mrf.mxu1 }
  0xaa   : > { %v470_v43 = vpop.f32.mrf.mxu3 }
  0xac   : > { %v377_v44 = vpop.f32.mrf.mxu0 }
  0xad   : > { %v378_v4 = vadd.f32 %v377_v44, %v1353_v42 }
  0xaf   : > { %v407_v41 = vadd.f32 %v406_v39, %v378_v4 }
  0xb1   : > { %v824_v14 = vmax.f32 %v407_v41, 0.0  ;;  %v415_v27 = vpop.f32.mrf.mxu1 }
  0xb3   : > { %856 = vst [vmem:[%s1360_s20] sm:$0xff] %v824_v14  ;;  %v435_v45 = vpop.f32.mrf.mxu2  ;;  %v473_v46 = vpop.f32.mrf.mxu3 }
  0xb4   : > { %v436_v47 = vadd.f32 %v435_v45, %v1353_v42  ;;  %v380_v48 = vpop.f32.mrf.mxu0 }
  0xb5   : > { %v381_v49 = vadd.f32 %v380_v48, %v1362_v58 }
  0xb6   : > { %v465_v50 = vadd.f32 %v464_v12, %v436_v47 }
  0xb7   : > { %v410_v51 = vadd.f32 %v409_v57, %v381_v49 }
  0xb8   : > { %v825_v52 = vmax.f32 %v465_v50, 0.0 }
  0xb9   : > { %v832_v54 = vmax.f32 %v410_v51, 0.0  ;;  %v493_v55 = vpop.f32.mrf.mxu1 }
  0xba   : > { %857 = vst [vmem:[%s1360_s20 + $0x8] sm:$0xff] %v825_v52  ;;  %v494_v56 = vadd.f32 %v493_v55, %v1353_v42 }
  0xbb   : > { %864 = vst [vmem:[%s1360_s20 + $0x40] sm:$0xff] %v832_v54  ;;  %v438_v59 = vpop.f32.mrf.mxu2 }
  0xbc   : > { %v439_v60 = vadd.f32 %v438_v59, %v1362_v58  ;;  %v522_v61 = vpop.f32.mrf.mxu3  ;;  %v383_v62 = vpop.f32.mrf.mxu0 }
  0xbd   : > { %v523_v63 = vadd.f32 %v522_v61, %v494_v56  ;;  %v384_v0 = vadd.f32 %v383_v62, %v1367_v53 }
  0xbe   : > { %v468_v1 = vadd.f32 %v467_v26, %v439_v60 }
  0xbf   : > { %v826_v2 = vmax.f32 %v523_v63, 0.0  ;;  %v413_v3 = vadd.f32 %v412_v40, %v384_v0 }
  0xc0   : > { %v833_v5 = vmax.f32 %v468_v1, 0.0 }
  0xc1   : > { %858 = vst [vmem:[%s1360_s20 + $0x10] sm:$0xff] %v826_v2  ;;  %v840_v6 = vmax.f32 %v413_v3, 0.0  ;;  %v496_v7 = vpop.f32.mrf.mxu1 }
  0xc2   : > { %865 = vst [vmem:[%s1360_s20 + $0x48] sm:$0xff] %v833_v5  ;;  %v497_v8 = vadd.f32 %v496_v7, %v1362_v58 }
  0xc3   : > { %872 = vst [vmem:[%s1360_s20 + $0x80] sm:$0xff] %v840_v6  ;;  %v441_v10 = vpop.f32.mrf.mxu2 }
  0xc4   : > { %v442_v11 = vadd.f32 %v441_v10, %v1367_v53  ;;  %v525_v13 = vpop.f32.mrf.mxu3  ;;  %v386_v15 = vpop.f32.mrf.mxu0 }
  0xc5   : > { %v526_v16 = vadd.f32 %v525_v13, %v497_v8  ;;  %v387_v17 = vadd.f32 %v386_v15, %v1377_v9 }
  0xc6   : > { %v471_v18 = vadd.f32 %v470_v43, %v442_v11 }
  0xc7   : > { %v834_v19 = vmax.f32 %v526_v16, 0.0  ;;  %v416_v20 = vadd.f32 %v415_v27, %v387_v17 }
  0xc8   : > { %v841_v21 = vmax.f32 %v471_v18, 0.0 }
  0xc9   : > { %866 = vst [vmem:[%s1360_s20 + $0x50] sm:$0xff] %v834_v19  ;;  %v848_v22 = vmax.f32 %v416_v20, 0.0  ;;  %v499_v23 = vpop.f32.mrf.mxu1 }
  0xca   : > { %873 = vst [vmem:[%s1360_s20 + $0x88] sm:$0xff] %v841_v21  ;;  %v500_v24 = vadd.f32 %v499_v23, %v1367_v53 }
  0xcb   : > { %880 = vst [vmem:[%s1360_s20 + $0xc0] sm:$0xff] %v848_v22  ;;  %v444_v25 = vpop.f32.mrf.mxu2 }
  0xcc   : > { %v445_v28 = vadd.f32 %v444_v25, %v1377_v9  ;;  %v528_v29 = vpop.f32.mrf.mxu3 }
  0xcd   : > { %v529_v30 = vadd.f32 %v528_v29, %v500_v24 }
  0xce   : > { %v474_v31 = vadd.f32 %v473_v46, %v445_v28  ;;  %v551_v32 = vpop.f32.mrf.mxu0 }
  0xcf   : > { %v842_v33 = vmax.f32 %v529_v30, 0.0  ;;  %v552_v35 = vadd.f32 %v551_v32, %v1353_v42 }
  0xd0   : > { %v849_v34 = vmax.f32 %v474_v31, 0.0 }
  0xd1   : > { %874 = vst [vmem:[%s1360_s20 + $0x90] sm:$0xff] %v842_v33 }
  0xd2   : > { %881 = vst [vmem:[%s1360_s20 + $0xc8] sm:$0xff] %v849_v34  ;;  %v502_v36 = vpop.f32.mrf.mxu1 }
  0xd3   : > { %v503_v37 = vadd.f32 %v502_v36, %v1377_v9  ;;  %v580_v38 = vpop.f32.mrf.mxu2 }
  0xd4   : > { %v531_v39 = vpop.f32.mrf.mxu3  ;;  %v581_v12 = vadd.f32 %v580_v38, %v552_v35 }
  0xd5   : > { %v532_v57 = vadd.f32 %v531_v39, %v503_v37 }
  0xd6   : > { %v827_v26 = vmax.f32 %v581_v12, 0.0  ;;  %v554_v40 = vpop.f32.mrf.mxu0 }
  0xd7   : > { %v850_v43 = vmax.f32 %v532_v57, 0.0  ;;  %v555_v44 = vadd.f32 %v554_v40, %v1362_v58 }
  0xd8   : > { %859 = vst [vmem:[%s1360_s20 + $0x18] sm:$0xff] %v827_v26 }
  0xd9   : > { %882 = vst [vmem:[%s1360_s20 + $0xd0] sm:$0xff] %v850_v43 }
  0xda   : > { %v609_v4 = vpop.f32.mrf.mxu1 }
  0xdb   : > { %v610_v48 = vadd.f32 %v609_v4, %v1353_v42 }
  0xdc   : > { %v583_v41 = vpop.f32.mrf.mxu2 }
  0xdd   : > { %v584_v14 = vadd.f32 %v583_v41, %v555_v44  ;;  %v589_v27 = vpop.f32.mrf.mxu3 }
  0xdf   : > { %v835_v45 = vmax.f32 %v584_v14, 0.0  ;;  %v557_v46 = vpop.f32.mrf.mxu0 }
  0xe0   : > { %v558_v47 = vadd.f32 %v557_v46, %v1367_v53 }
  0xe1   : > { %867 = vst [vmem:[%s1360_s20 + $0x58] sm:$0xff] %v835_v45 }
  0xe3   : > { %v612_v49 = vpop.f32.mrf.mxu1 }
  0xe4   : > { %v586_v50 = vpop.f32.mrf.mxu2  ;;  %v613_v61 = vadd.f32 %v612_v49, %v1362_v58 }
  0xe5   : > { %v587_v51 = vadd.f32 %v586_v50, %v558_v47  ;;  %v638_v52 = vpop.f32.mrf.mxu3 }
  0xe6   : > { %v639_v54 = vadd.f32 %v638_v52, %v610_v48 }
  0xe7   : > { %v843_v55 = vmax.f32 %v587_v51, 0.0  ;;  %v560_v56 = vpop.f32.mrf.mxu0 }
  0xe8   : > { %v828_v59 = vmax.f32 %v639_v54, 0.0  ;;  %v561_v60 = vadd.f32 %v560_v56, %v1377_v9 }
  0xe9   : > { %875 = vst [vmem:[%s1360_s20 + $0x98] sm:$0xff] %v843_v55 }
  0xea   : > { %860 = vst [vmem:[%s1360_s20 + $0x20] sm:$0xff] %v828_v59  ;;  %v590_v62 = vadd.f32 %v589_v27, %v561_v60 }
  0xec   : > { %v851_v63 = vmax.f32 %v590_v62, 0.0  ;;  %v615_v0 = vpop.f32.mrf.mxu1 }
  0xed   : > { %v641_v1 = vpop.f32.mrf.mxu3  ;;  %v616_v8 = vadd.f32 %v615_v0, %v1367_v53 }
  0xee   : > { %883 = vst [vmem:[%s1360_s20 + $0xd8] sm:$0xff] %v851_v63  ;;  %v642_v2 = vadd.f32 %v641_v1, %v613_v61  ;;  %v696_v3 = vpop.f32.mrf.mxu2 }
  0xf0   : > { %v836_v5 = vmax.f32 %v642_v2, 0.0  ;;  %v667_v6 = vpop.f32.mrf.mxu0 }
  0xf1   : > { %v668_v7 = vadd.f32 %v667_v6, %v1353_v42 }
  0xf2   : > { %868 = vst [vmem:[%s1360_s20 + $0x60] sm:$0xff] %v836_v5 }
  0xf3   : > { %v697_v10 = vadd.f32 %v696_v3, %v668_v7 }
  0xf4   : > { %v618_v11 = vpop.f32.mrf.mxu1 }
  0xf5   : > { %v829_v13 = vmax.f32 %v697_v10, 0.0  ;;  %v644_v15 = vpop.f32.mrf.mxu3  ;;  %v619_v21 = vadd.f32 %v618_v11, %v1377_v9 }
  0xf6   : > { %v645_v16 = vadd.f32 %v644_v15, %v616_v8  ;;  %v699_v17 = vpop.f32.mrf.mxu2 }
  0xf7   : > { %861 = vst [vmem:[%s1360_s20 + $0x28] sm:$0xff] %v829_v13 }
  0xf8   : > { %v844_v18 = vmax.f32 %v645_v16, 0.0  ;;  %v670_v19 = vpop.f32.mrf.mxu0 }
  0xf9   : > { %v671_v20 = vadd.f32 %v670_v19, %v1362_v58 }
  0xfa   : > { %876 = vst [vmem:[%s1360_s20 + $0xa0] sm:$0xff] %v844_v18 }
  0xfb   : > { %v700_v22 = vadd.f32 %v699_v17, %v671_v20 }
  0xfc   : > { %v725_v23 = vpop.f32.mrf.mxu1 }
  0xfd   : > { %v837_v24 = vmax.f32 %v700_v22, 0.0  ;;  %v726_v33 = vadd.f32 %v725_v23, %v1353_v42 }
  0xfe   : > { %v647_v25 = vpop.f32.mrf.mxu3 }
  0xff   : > { %869 = vst [vmem:[%s1360_s20 + $0x68] sm:$0xff] %v837_v24  ;;  %v648_v28 = vadd.f32 %v647_v25, %v619_v21  ;;  %v702_v29 = vpop.f32.mrf.mxu2 }
 0x101   : > { %v852_v30 = vmax.f32 %v648_v28, 0.0  ;;  %v673_v31 = vpop.f32.mrf.mxu0 }
 0x102   : > { %v674_v32 = vadd.f32 %v673_v31, %v1367_v53 }
 0x103   : > { %884 = vst [vmem:[%s1360_s20 + $0xe0] sm:$0xff] %v852_v30 }
 0x104   : > { %v703_v34 = vadd.f32 %v702_v29, %v674_v32 }
 0x105   : > { %v728_v36 = vpop.f32.mrf.mxu1 }
 0x106   : > { %v845_v35 = vmax.f32 %v703_v34, 0.0  ;;  %v754_v37 = vpop.f32.mrf.mxu3  ;;  %v729_v40 = vadd.f32 %v728_v36, %v1362_v58 }
 0x107   : > { %v705_v38 = vpop.f32.mrf.mxu2  ;;  %v755_v39 = vadd.f32 %v754_v37, %v726_v33 }
 0x108   : > { %877 = vst [vmem:[%s1360_s20 + $0xa8] sm:$0xff] %v845_v35 }
 0x109   : > { %v830_v12 = vmax.f32 %v755_v39, 0.0  ;;  %v676_v57 = vpop.f32.mrf.mxu0 }
 0x10a   : > { %v677_v26 = vadd.f32 %v676_v57, %v1377_v9 }
 0x10b   : > { %862 = vst [vmem:[%s1360_s20 + $0x30] sm:$0xff] %v830_v12 }
 0x10c   : > { %v706_v43 = vadd.f32 %v705_v38, %v677_v26 }
 0x10d   : > { %v731_v41 = vpop.f32.mrf.mxu1 }
 0x10e   : > { %v853_v44 = vmax.f32 %v706_v43, 0.0  ;;  %v732_v48 = vadd.f32 %v731_v41, %v1367_v53 }
 0x10f   : > { %v757_v4 = vpop.f32.mrf.mxu3 }
 0x110   : > { %885 = vst [vmem:[%s1360_s20 + $0xe8] sm:$0xff] %v853_v44  ;;  %v758_v14 = vadd.f32 %v757_v4, %v729_v40  ;;  %v812_v27 = vpop.f32.mrf.mxu2 }
 0x112   : > { %v838_v45 = vmax.f32 %v758_v14, 0.0  ;;  %v783_v46 = vpop.f32.mrf.mxu0 }
 0x113   : > { %v784_v47 = vadd.f32 %v783_v46, %v1353_v42 }
 0x114   : > { %870 = vst [vmem:[%s1360_s20 + $0x70] sm:$0xff] %v838_v45 }
 0x115   : > { %v813_v49 = vadd.f32 %v812_v27, %v784_v47 }
 0x116   : > { %v734_v55 = vpop.f32.mrf.mxu1 }
 0x117   : > { %v831_v50 = vmax.f32 %v813_v49, 0.0  ;;  %v760_v51 = vpop.f32.mrf.mxu3  ;;  %v735_v61 = vadd.f32 %v734_v55, %v1377_v9 }
 0x118   : > { %v761_v52 = vadd.f32 %v760_v51, %v732_v48  ;;  %v815_v54 = vpop.f32.mrf.mxu2 }
 0x119   : > { %863 = vst [vmem:[%s1360_s20 + $0x38] sm:$0xff] %v831_v50 }
 0x11a   : > { %v846_v56 = vmax.f32 %v761_v52, 0.0  ;;  %v786_v59 = vpop.f32.mrf.mxu0 }
 0x11b   : > { %v787_v60 = vadd.f32 %v786_v59, %v1362_v58 }
 0x11c   : > { %878 = vst [vmem:[%s1360_s20 + $0xb0] sm:$0xff] %v846_v56 }
 0x11d   : > { %v816_v42 = vadd.f32 %v815_v54, %v787_v60 }
 0x11e   : > { %v792_v6 = vpop.f32.mrf.mxu1 }
 0x11f   : > { %v839_v62 = vmax.f32 %v816_v42, 0.0  ;;  %v763_v63 = vpop.f32.mrf.mxu3  ;;  %v793_v58 = vadd.f32 %v792_v6, %v1377_v9 }
 0x120   : > { %v764_v0 = vadd.f32 %v763_v63, %v735_v61  ;;  %v818_v1 = vpop.f32.mrf.mxu2 }
 0x121   : > { %871 = vst [vmem:[%s1360_s20 + $0x78] sm:$0xff] %v839_v62 }
 0x122   : > { %v854_v2 = vmax.f32 %v764_v0, 0.0  ;;  %v789_v3 = vpop.f32.mrf.mxu0 }
 0x123   : > { %v790_v5 = vadd.f32 %v789_v3, %v1367_v53 }
 0x124   : > { %886 = vst [vmem:[%s1360_s20 + $0xf0] sm:$0xff] %v854_v2 }
 0x125   : > { %v819_v7 = vadd.f32 %v818_v1, %v790_v5 }
 0x127   : > { %v847_v8 = vmax.f32 %v819_v7, 0.0 }
 0x128   : > { %v821_v10 = vpop.f32.mrf.mxu2 }
 0x129   : > { %879 = vst [vmem:[%s1360_s20 + $0xb8] sm:$0xff] %v847_v8  ;;  %v822_v11 = vadd.f32 %v821_v10, %v793_v58 }
 0x12b   : > { %v855_v13 = vmax.f32 %v822_v11, 0.0 }
 0x12d   : > { %887 = vst [vmem:[%s1360_s20 + $0xf8] sm:$0xff] %v855_v13 }
 0x12e PF: > { %s13_s12 = sadd.s32 1, %s1022_s12  }
 0x12f   : > { %p10_p4 = scmp.ge.s32.totalorder %s13_s12, 4  }
 0x131   :  { %12 = sbr.rel (!%p10_p4) target bundleno = 1 (0x1), region = 62 }

// kernel: arbitrary_nn_forward.7
= control target key start
LH: loop header
LB: loop body
LE: loop exit
PB: predicated region body
PF: predicated region fallthrough
CT: control target
= control target key end

     0   :  { %s4281_s12 = smov 0   ;;  %s4283_s13 = smov 0   ;;  %s5445_s0 = inlined_call_operand.vmem [shape: f32[2,1024], index: 0, kind: input, shape index: {}]   ;;  %s5446_s1 = inlined_call_operand.vmem [shape: bf16[1024,1024], index: 1, kind: input, shape index: {}]   ;;  %s5447_s2 = inlined_call_operand.vmem [shape: f32[1,1024], index: 2, kind: input, shape index: {}]   ;;  %s5448_s3 = inlined_call_operand.vmem [shape: f32[2,1024], index: 3, kind: output, shape index: {}]  }
   0x1   :  { %s4285_s14 = smov 0   ;;  %s4287_s15 = smov 0  }
   0x2   :  { %s4289_s16 = smov 0  }
   0x3 LB: > { %s25_s17 = sadd.s32 1, %s4255_s15  ;;  %p67_p1 = scmp.ne.s32.totalorder %s4247_s13, %s4243_s12  ;;  %s4259_s16 = sphi %s4289_s16, %s13_s16   ;;  %s4255_s15 = sphi %s4287_s15, %s5452_s15   ;;  %s4251_s14 = sphi %s4285_s14, %s5451_s14   ;;  %s4247_s13 = sphi %s4283_s13, %s5450_s13   ;;  %s4243_s12 = sphi %s4281_s12, %s5449_s12  }
   0x4   : > { %p27_p0 = scmp.ge.s32.totalorder %s25_s17, 2  ;;  %p68_p2 = scmp.eq.s32.totalorder %s4259_s16, 0 }
   0x5   : > { %s60_s19 = sadd.s32 1, %s4247_s13  ;;  %p2888_p5 = scmp.ge.s32.totalorder %s4259_s16, 2 }
   0x6   : > { %s5454_s17 = smov (%p27_p0, %s25_s17), 0  ;;  %p69_p3 = por %p68_p2, %p67_p1 }
   0x7   : > { %s56_s18 = ssub.s32 %s4255_s15, %s5454_s17  ;;  %154 = sbr.rel (%p2888_p5) target bundleno = 272 (0x110), region = 20 }
   0x8   : > { %p58_p4 = scmp.eq.s32.totalorder %s56_s18, 0 }
   0xa   : > { %s4316_s20 = scalar_select %p58_p4, %s4247_s13, %s60_s19  }
   0xc   : > { %157 = sbr.rel (!%p69_p3) target bundleno = 272 (0x110), region = 24  ;;  %s159_s21 = sand.u32 (%p69_p3), 1, %s4247_s13  }
   0xd   : > { %s3923_s22 = sshll.u32 (%p69_p3), %s4255_s15, 4  ;;  %s2889_s23 = sshll.u32 (%p69_p3), %s159_s21, 11 }
   0xe   : > { %s4324_s26 = scalar_lea.vmem (%p69_p3), %s5446_s1, %s3923_s22  ;;  %s4329_s27 = scalar_lea.vmem (%p69_p3), [#allocation2], %s2889_s23 }
   0xf   : > { %v180_v0 = vld [vmem:[%s4324_s26] sm:$0xff] (%p69_p3)  ;;  %v182_v1 = vld [vmem:[%s4324_s26 + $0x8] sm:$0xff] (%p69_p3) }
  0x10   : > { %v184_v2 = vld [vmem:[%s4324_s26 + $0x20] sm:$0xff] (%p69_p3)  ;;  %181 = vst [vmem:[%s4329_s27] sm:$0xff] (%p69_p3), %v180_v0  ;;  %v186_v3 = vld [vmem:[%s4324_s26 + $0x28] sm:$0xff] (%p69_p3) }
  0x11   : > { %183 = vst [vmem:[%s4329_s27 + $0x8] sm:$0xff] %v182_v1  ;;  %v188_v4 = vld [vmem:[%s4324_s26 + $0x40] sm:$0xff]  ;;  %v190_v5 = vld [vmem:[%s4324_s26 + $0x48] sm:$0xff] }
  0x12   : > { %185 = vst [vmem:[%s4329_s27 + $0x10] sm:$0xff] %v184_v2  ;;  %v192_v6 = vld [vmem:[%s4324_s26 + $0x60] sm:$0xff]  ;;  %v194_v7 = vld [vmem:[%s4324_s26 + $0x68] sm:$0xff] }
  0x13   : > { %187 = vst [vmem:[%s4329_s27 + $0x18] sm:$0xff] %v186_v3  ;;  %v196_v8 = vld [vmem:[%s4324_s26 + $0x80] sm:$0xff]  ;;  %v198_v9 = vld [vmem:[%s4324_s26 + $0x88] sm:$0xff] }
  0x14   : > { %189 = vst [vmem:[%s4329_s27 + $0x20] sm:$0xff] %v188_v4  ;;  %v200_v10 = vld [vmem:[%s4324_s26 + $0xa0] sm:$0xff]  ;;  %v202_v11 = vld [vmem:[%s4324_s26 + $0xa8] sm:$0xff] }
  0x15   : > { %191 = vst [vmem:[%s4329_s27 + $0x28] sm:$0xff] %v190_v5  ;;  %v204_v12 = vld [vmem:[%s4324_s26 + $0xc0] sm:$0xff]  ;;  %v206_v13 = vld [vmem:[%s4324_s26 + $0xc8] sm:$0xff] }
  0x16   : > { %193 = vst [vmem:[%s4329_s27 + $0x30] sm:$0xff] %v192_v6  ;;  %v208_v14 = vld [vmem:[%s4324_s26 + $0xe0] sm:$0xff]  ;;  %v210_v15 = vld [vmem:[%s4324_s26 + $0xe8] sm:$0xff] }
  0x17   : > { %195 = vst [vmem:[%s4329_s27 + $0x38] sm:$0xff] %v194_v7  ;;  %v212_v16 = vld [vmem:[%s4324_s26 + $0x100] sm:$0xff]  ;;  %v214_v17 = vld [vmem:[%s4324_s26 + $0x108] sm:$0xff] }
  0x18   : > { %197 = vst [vmem:[%s4329_s27 + $0x40] sm:$0xff] %v196_v8  ;;  %v216_v18 = vld [vmem:[%s4324_s26 + $0x120] sm:$0xff]  ;;  %v218_v19 = vld [vmem:[%s4324_s26 + $0x128] sm:$0xff] }
  0x19   : > { %199 = vst [vmem:[%s4329_s27 + $0x48] sm:$0xff] %v198_v9  ;;  %v220_v20 = vld [vmem:[%s4324_s26 + $0x140] sm:$0xff]  ;;  %v222_v21 = vld [vmem:[%s4324_s26 + $0x148] sm:$0xff] }
  0x1a   : > { %201 = vst [vmem:[%s4329_s27 + $0x50] sm:$0xff] %v200_v10  ;;  %v224_v22 = vld [vmem:[%s4324_s26 + $0x160] sm:$0xff]  ;;  %v226_v23 = vld [vmem:[%s4324_s26 + $0x168] sm:$0xff] }
  0x1b   : > { %203 = vst [vmem:[%s4329_s27 + $0x58] sm:$0xff] %v202_v11  ;;  %v228_v24 = vld [vmem:[%s4324_s26 + $0x180] sm:$0xff]  ;;  %v230_v25 = vld [vmem:[%s4324_s26 + $0x188] sm:$0xff] }
  0x1c   : > { %205 = vst [vmem:[%s4329_s27 + $0x60] sm:$0xff] %v204_v12  ;;  %v232_v26 = vld [vmem:[%s4324_s26 + $0x1a0] sm:$0xff]  ;;  %v234_v27 = vld [vmem:[%s4324_s26 + $0x1a8] sm:$0xff] }
  0x1d   : > { %207 = vst [vmem:[%s4329_s27 + $0x68] sm:$0xff] %v206_v13  ;;  %v236_v28 = vld [vmem:[%s4324_s26 + $0x1c0] sm:$0xff]  ;;  %v238_v29 = vld [vmem:[%s4324_s26 + $0x1c8] sm:$0xff] }
  0x1e   : > { %209 = vst [vmem:[%s4329_s27 + $0x70] sm:$0xff] %v208_v14  ;;  %v240_v30 = vld [vmem:[%s4324_s26 + $0x1e0] sm:$0xff]  ;;  %v242_v31 = vld [vmem:[%s4324_s26 + $0x1e8] sm:$0xff] }
  0x1f   : > { %211 = vst [vmem:[%s4329_s27 + $0x78] sm:$0xff] %v210_v15  ;;  %v244_v32 = vld [vmem:[%s4324_s26 + $0x200] sm:$0xff]  ;;  %v246_v33 = vld [vmem:[%s4324_s26 + $0x208] sm:$0xff] }
  0x20   : > { %213 = vst [vmem:[%s4329_s27 + $0x80] sm:$0xff] %v212_v16  ;;  %v248_v34 = vld [vmem:[%s4324_s26 + $0x220] sm:$0xff]  ;;  %v250_v35 = vld [vmem:[%s4324_s26 + $0x228] sm:$0xff] }
  0x21   : > { %215 = vst [vmem:[%s4329_s27 + $0x88] sm:$0xff] %v214_v17  ;;  %v252_v36 = vld [vmem:[%s4324_s26 + $0x240] sm:$0xff]  ;;  %v254_v37 = vld [vmem:[%s4324_s26 + $0x248] sm:$0xff] }
  0x22   : > { %217 = vst [vmem:[%s4329_s27 + $0x90] sm:$0xff] %v216_v18  ;;  %v256_v38 = vld [vmem:[%s4324_s26 + $0x260] sm:$0xff]  ;;  %v258_v39 = vld [vmem:[%s4324_s26 + $0x268] sm:$0xff] }
  0x23   : > { %219 = vst [vmem:[%s4329_s27 + $0x98] sm:$0xff] %v218_v19  ;;  %v260_v40 = vld [vmem:[%s4324_s26 + $0x280] sm:$0xff]  ;;  %v262_v41 = vld [vmem:[%s4324_s26 + $0x288] sm:$0xff] }
  0x24   : > { %221 = vst [vmem:[%s4329_s27 + $0xa0] sm:$0xff] %v220_v20  ;;  %v264_v42 = vld [vmem:[%s4324_s26 + $0x2a0] sm:$0xff]  ;;  %v266_v43 = vld [vmem:[%s4324_s26 + $0x2a8] sm:$0xff] }
  0x25   : > { %223 = vst [vmem:[%s4329_s27 + $0xa8] sm:$0xff] %v222_v21  ;;  %v268_v44 = vld [vmem:[%s4324_s26 + $0x2c0] sm:$0xff]  ;;  %v270_v45 = vld [vmem:[%s4324_s26 + $0x2c8] sm:$0xff] }
  0x26   : > { %225 = vst [vmem:[%s4329_s27 + $0xb0] sm:$0xff] %v224_v22  ;;  %v272_v46 = vld [vmem:[%s4324_s26 + $0x2e0] sm:$0xff]  ;;  %v274_v47 = vld [vmem:[%s4324_s26 + $0x2e8] sm:$0xff] }
  0x27   : > { %227 = vst [vmem:[%s4329_s27 + $0xb8] sm:$0xff] %v226_v23  ;;  %v276_v48 = vld [vmem:[%s4324_s26 + $0x300] sm:$0xff]  ;;  %v278_v49 = vld [vmem:[%s4324_s26 + $0x308] sm:$0xff] }
  0x28   : > { %229 = vst [vmem:[%s4329_s27 + $0xc0] sm:$0xff] %v228_v24  ;;  %v280_v50 = vld [vmem:[%s4324_s26 + $0x320] sm:$0xff]  ;;  %v282_v51 = vld [vmem:[%s4324_s26 + $0x328] sm:$0xff] }
  0x29   : > { %231 = vst [vmem:[%s4329_s27 + $0xc8] sm:$0xff] %v230_v25  ;;  %v284_v52 = vld [vmem:[%s4324_s26 + $0x340] sm:$0xff]  ;;  %v286_v53 = vld [vmem:[%s4324_s26 + $0x348] sm:$0xff] }
  0x2a   : > { %233 = vst [vmem:[%s4329_s27 + $0xd0] sm:$0xff] %v232_v26  ;;  %v288_v54 = vld [vmem:[%s4324_s26 + $0x360] sm:$0xff]  ;;  %v290_v55 = vld [vmem:[%s4324_s26 + $0x368] sm:$0xff] }
  0x2b   : > { %235 = vst [vmem:[%s4329_s27 + $0xd8] sm:$0xff] %v234_v27  ;;  %v292_v56 = vld [vmem:[%s4324_s26 + $0x380] sm:$0xff]  ;;  %v294_v57 = vld [vmem:[%s4324_s26 + $0x388] sm:$0xff] }
  0x2c   : > { %237 = vst [vmem:[%s4329_s27 + $0xe0] sm:$0xff] %v236_v28  ;;  %v296_v58 = vld [vmem:[%s4324_s26 + $0x3a0] sm:$0xff]  ;;  %v298_v59 = vld [vmem:[%s4324_s26 + $0x3a8] sm:$0xff] }
  0x2d   : > { %239 = vst [vmem:[%s4329_s27 + $0xe8] sm:$0xff] %v238_v29  ;;  %v300_v60 = vld [vmem:[%s4324_s26 + $0x3c0] sm:$0xff]  ;;  %v302_v61 = vld [vmem:[%s4324_s26 + $0x3c8] sm:$0xff] }
  0x2e   : > { %241 = vst [vmem:[%s4329_s27 + $0xf0] sm:$0xff] %v240_v30  ;;  %v304_v62 = vld [vmem:[%s4324_s26 + $0x3e0] sm:$0xff]  ;;  %v306_v63 = vld [vmem:[%s4324_s26 + $0x3e8] sm:$0xff] }
  0x2f   : > { %243 = vst [vmem:[%s4329_s27 + $0xf8] sm:$0xff] %v242_v31  ;;  %v308_v0 = vld [vmem:[%s4324_s26 + $0x400] sm:$0xff]  ;;  %v310_v1 = vld [vmem:[%s4324_s26 + $0x408] sm:$0xff] }
  0x30   : > { %245 = vst [vmem:[%s4329_s27 + $0x100] sm:$0xff] %v244_v32  ;;  %v312_v2 = vld [vmem:[%s4324_s26 + $0x420] sm:$0xff]  ;;  %v314_v3 = vld [vmem:[%s4324_s26 + $0x428] sm:$0xff] }
  0x31   : > { %247 = vst [vmem:[%s4329_s27 + $0x108] sm:$0xff] %v246_v33  ;;  %v316_v4 = vld [vmem:[%s4324_s26 + $0x440] sm:$0xff]  ;;  %v318_v5 = vld [vmem:[%s4324_s26 + $0x448] sm:$0xff] }
  0x32   : > { %249 = vst [vmem:[%s4329_s27 + $0x110] sm:$0xff] %v248_v34  ;;  %v320_v6 = vld [vmem:[%s4324_s26 + $0x460] sm:$0xff]  ;;  %v322_v7 = vld [vmem:[%s4324_s26 + $0x468] sm:$0xff] }
  0x33   : > { %251 = vst [vmem:[%s4329_s27 + $0x118] sm:$0xff] %v250_v35  ;;  %v324_v8 = vld [vmem:[%s4324_s26 + $0x480] sm:$0xff]  ;;  %v326_v9 = vld [vmem:[%s4324_s26 + $0x488] sm:$0xff] }
  0x34   : > { %253 = vst [vmem:[%s4329_s27 + $0x120] sm:$0xff] %v252_v36  ;;  %v328_v10 = vld [vmem:[%s4324_s26 + $0x4a0] sm:$0xff]  ;;  %v330_v11 = vld [vmem:[%s4324_s26 + $0x4a8] sm:$0xff] }
  0x35   : > { %255 = vst [vmem:[%s4329_s27 + $0x128] sm:$0xff] %v254_v37  ;;  %v332_v12 = vld [vmem:[%s4324_s26 + $0x4c0] sm:$0xff]  ;;  %v334_v13 = vld [vmem:[%s4324_s26 + $0x4c8] sm:$0xff] }
  0x36   : > { %257 = vst [vmem:[%s4329_s27 + $0x130] sm:$0xff] %v256_v38  ;;  %v336_v14 = vld [vmem:[%s4324_s26 + $0x4e0] sm:$0xff]  ;;  %v338_v15 = vld [vmem:[%s4324_s26 + $0x4e8] sm:$0xff] }
  0x37   : > { %259 = vst [vmem:[%s4329_s27 + $0x138] sm:$0xff] %v258_v39  ;;  %v340_v16 = vld [vmem:[%s4324_s26 + $0x500] sm:$0xff]  ;;  %v342_v17 = vld [vmem:[%s4324_s26 + $0x508] sm:$0xff] }
  0x38   : > { %261 = vst [vmem:[%s4329_s27 + $0x140] sm:$0xff] %v260_v40  ;;  %v344_v18 = vld [vmem:[%s4324_s26 + $0x520] sm:$0xff]  ;;  %v346_v19 = vld [vmem:[%s4324_s26 + $0x528] sm:$0xff] }
  0x39   : > { %263 = vst [vmem:[%s4329_s27 + $0x148] sm:$0xff] %v262_v41  ;;  %v348_v20 = vld [vmem:[%s4324_s26 + $0x540] sm:$0xff]  ;;  %v350_v21 = vld [vmem:[%s4324_s26 + $0x548] sm:$0xff] }
  0x3a   : > { %265 = vst [vmem:[%s4329_s27 + $0x150] sm:$0xff] %v264_v42  ;;  %v352_v22 = vld [vmem:[%s4324_s26 + $0x560] sm:$0xff]  ;;  %v354_v23 = vld [vmem:[%s4324_s26 + $0x568] sm:$0xff] }
  0x3b   : > { %267 = vst [vmem:[%s4329_s27 + $0x158] sm:$0xff] %v266_v43  ;;  %v356_v24 = vld [vmem:[%s4324_s26 + $0x580] sm:$0xff]  ;;  %v358_v25 = vld [vmem:[%s4324_s26 + $0x588] sm:$0xff] }
  0x3c   : > { %269 = vst [vmem:[%s4329_s27 + $0x160] sm:$0xff] %v268_v44  ;;  %v360_v26 = vld [vmem:[%s4324_s26 + $0x5a0] sm:$0xff]  ;;  %v362_v27 = vld [vmem:[%s4324_s26 + $0x5a8] sm:$0xff] }
  0x3d   : > { %271 = vst [vmem:[%s4329_s27 + $0x168] sm:$0xff] %v270_v45  ;;  %v364_v28 = vld [vmem:[%s4324_s26 + $0x5c0] sm:$0xff]  ;;  %v366_v29 = vld [vmem:[%s4324_s26 + $0x5c8] sm:$0xff] }
  0x3e   : > { %273 = vst [vmem:[%s4329_s27 + $0x170] sm:$0xff] %v272_v46  ;;  %v368_v30 = vld [vmem:[%s4324_s26 + $0x5e0] sm:$0xff]  ;;  %v370_v31 = vld [vmem:[%s4324_s26 + $0x5e8] sm:$0xff] }
  0x3f   : > { %275 = vst [vmem:[%s4329_s27 + $0x178] sm:$0xff] %v274_v47  ;;  %v372_v32 = vld [vmem:[%s4324_s26 + $0x600] sm:$0xff]  ;;  %v374_v33 = vld [vmem:[%s4324_s26 + $0x608] sm:$0xff] }
  0x40   : > { %277 = vst [vmem:[%s4329_s27 + $0x180] sm:$0xff] %v276_v48  ;;  %v376_v34 = vld [vmem:[%s4324_s26 + $0x620] sm:$0xff]  ;;  %v378_v35 = vld [vmem:[%s4324_s26 + $0x628] sm:$0xff] }
  0x41   : > { %279 = vst [vmem:[%s4329_s27 + $0x188] sm:$0xff] %v278_v49  ;;  %v380_v36 = vld [vmem:[%s4324_s26 + $0x640] sm:$0xff]  ;;  %v382_v37 = vld [vmem:[%s4324_s26 + $0x648] sm:$0xff] }
  0x42   : > { %281 = vst [vmem:[%s4329_s27 + $0x190] sm:$0xff] %v280_v50  ;;  %v384_v38 = vld [vmem:[%s4324_s26 + $0x660] sm:$0xff]  ;;  %v386_v39 = vld [vmem:[%s4324_s26 + $0x668] sm:$0xff] }
  0x43   : > { %283 = vst [vmem:[%s4329_s27 + $0x198] sm:$0xff] %v282_v51  ;;  %v388_v40 = vld [vmem:[%s4324_s26 + $0x680] sm:$0xff]  ;;  %v390_v41 = vld [vmem:[%s4324_s26 + $0x688] sm:$0xff] }
  0x44   : > { %285 = vst [vmem:[%s4329_s27 + $0x1a0] sm:$0xff] %v284_v52  ;;  %v392_v42 = vld [vmem:[%s4324_s26 + $0x6a0] sm:$0xff]  ;;  %v394_v43 = vld [vmem:[%s4324_s26 + $0x6a8] sm:$0xff] }
  0x45   : > { %287 = vst [vmem:[%s4329_s27 + $0x1a8] sm:$0xff] %v286_v53  ;;  %v396_v44 = vld [vmem:[%s4324_s26 + $0x6c0] sm:$0xff]  ;;  %v398_v45 = vld [vmem:[%s4324_s26 + $0x6c8] sm:$0xff] }
  0x46   : > { %289 = vst [vmem:[%s4329_s27 + $0x1b0] sm:$0xff] %v288_v54  ;;  %v400_v46 = vld [vmem:[%s4324_s26 + $0x6e0] sm:$0xff]  ;;  %v402_v47 = vld [vmem:[%s4324_s26 + $0x6e8] sm:$0xff] }
  0x47   : > { %291 = vst [vmem:[%s4329_s27 + $0x1b8] sm:$0xff] %v290_v55  ;;  %v404_v48 = vld [vmem:[%s4324_s26 + $0x700] sm:$0xff]  ;;  %v406_v49 = vld [vmem:[%s4324_s26 + $0x708] sm:$0xff] }
  0x48   : > { %293 = vst [vmem:[%s4329_s27 + $0x1c0] sm:$0xff] %v292_v56  ;;  %v408_v50 = vld [vmem:[%s4324_s26 + $0x720] sm:$0xff]  ;;  %v410_v51 = vld [vmem:[%s4324_s26 + $0x728] sm:$0xff] }
  0x49   : > { %295 = vst [vmem:[%s4329_s27 + $0x1c8] sm:$0xff] %v294_v57  ;;  %v412_v52 = vld [vmem:[%s4324_s26 + $0x740] sm:$0xff]  ;;  %v414_v53 = vld [vmem:[%s4324_s26 + $0x748] sm:$0xff] }
  0x4a   : > { %297 = vst [vmem:[%s4329_s27 + $0x1d0] sm:$0xff] %v296_v58  ;;  %v416_v54 = vld [vmem:[%s4324_s26 + $0x760] sm:$0xff]  ;;  %v418_v55 = vld [vmem:[%s4324_s26 + $0x768] sm:$0xff] }
  0x4b   : > { %299 = vst [vmem:[%s4329_s27 + $0x1d8] sm:$0xff] %v298_v59  ;;  %v420_v56 = vld [vmem:[%s4324_s26 + $0x780] sm:$0xff]  ;;  %v422_v57 = vld [vmem:[%s4324_s26 + $0x788] sm:$0xff] }
  0x4c   : > { %301 = vst [vmem:[%s4329_s27 + $0x1e0] sm:$0xff] %v300_v60  ;;  %v424_v58 = vld [vmem:[%s4324_s26 + $0x7a0] sm:$0xff]  ;;  %v426_v59 = vld [vmem:[%s4324_s26 + $0x7a8] sm:$0xff] }
  0x4d   : > { %303 = vst [vmem:[%s4329_s27 + $0x1e8] sm:$0xff] %v302_v61  ;;  %v428_v60 = vld [vmem:[%s4324_s26 + $0x7c0] sm:$0xff]  ;;  %v430_v61 = vld [vmem:[%s4324_s26 + $0x7c8] sm:$0xff] }
  0x4e   : > { %305 = vst [vmem:[%s4329_s27 + $0x1f0] sm:$0xff] %v304_v62  ;;  %v432_v62 = vld [vmem:[%s4324_s26 + $0x7e0] sm:$0xff] }
  0x4f   : > { %307 = vst [vmem:[%s4329_s27 + $0x1f8] sm:$0xff] %v306_v63  ;;  %v434_v63 = vld [vmem:[%s4324_s26 + $0x7e8] sm:$0xff] }
  0x50   : > { %309 = vst [vmem:[%s4329_s27 + $0x200] sm:$0xff] %v308_v0  ;;  %v436_v0 = vld [vmem:[%s4324_s26 + $0x800] sm:$0xff] }
  0x51   : > { %311 = vst [vmem:[%s4329_s27 + $0x208] sm:$0xff] %v310_v1  ;;  %v438_v1 = vld [vmem:[%s4324_s26 + $0x808] sm:$0xff] }
  0x52   : > { %313 = vst [vmem:[%s4329_s27 + $0x210] sm:$0xff] %v312_v2  ;;  %v440_v2 = vld [vmem:[%s4324_s26 + $0x820] sm:$0xff] }
  0x53   : > { %315 = vst [vmem:[%s4329_s27 + $0x218] sm:$0xff] %v314_v3  ;;  %v442_v3 = vld [vmem:[%s4324_s26 + $0x828] sm:$0xff] }
  0x54   : > { %317 = vst [vmem:[%s4329_s27 + $0x220] sm:$0xff] %v316_v4  ;;  %v444_v4 = vld [vmem:[%s4324_s26 + $0x840] sm:$0xff] }
  0x55   : > { %319 = vst [vmem:[%s4329_s27 + $0x228] sm:$0xff] %v318_v5  ;;  %v446_v5 = vld [vmem:[%s4324_s26 + $0x848] sm:$0xff] }
  0x56   : > { %321 = vst [vmem:[%s4329_s27 + $0x230] sm:$0xff] %v320_v6  ;;  %v448_v6 = vld [vmem:[%s4324_s26 + $0x860] sm:$0xff] }
  0x57   : > { %323 = vst [vmem:[%s4329_s27 + $0x238] sm:$0xff] %v322_v7  ;;  %v450_v7 = vld [vmem:[%s4324_s26 + $0x868] sm:$0xff] }
  0x58   : > { %325 = vst [vmem:[%s4329_s27 + $0x240] sm:$0xff] %v324_v8  ;;  %v452_v8 = vld [vmem:[%s4324_s26 + $0x880] sm:$0xff] }
  0x59   : > { %327 = vst [vmem:[%s4329_s27 + $0x248] sm:$0xff] %v326_v9  ;;  %v454_v9 = vld [vmem:[%s4324_s26 + $0x888] sm:$0xff] }
  0x5a   : > { %329 = vst [vmem:[%s4329_s27 + $0x250] sm:$0xff] %v328_v10  ;;  %v456_v10 = vld [vmem:[%s4324_s26 + $0x8a0] sm:$0xff] }
  0x5b   : > { %331 = vst [vmem:[%s4329_s27 + $0x258] sm:$0xff] %v330_v11  ;;  %v458_v11 = vld [vmem:[%s4324_s26 + $0x8a8] sm:$0xff] }
  0x5c   : > { %333 = vst [vmem:[%s4329_s27 + $0x260] sm:$0xff] %v332_v12  ;;  %v460_v12 = vld [vmem:[%s4324_s26 + $0x8c0] sm:$0xff] }
  0x5d   : > { %335 = vst [vmem:[%s4329_s27 + $0x268] sm:$0xff] %v334_v13  ;;  %v462_v13 = vld [vmem:[%s4324_s26 + $0x8c8] sm:$0xff] }
  0x5e   : > { %337 = vst [vmem:[%s4329_s27 + $0x270] sm:$0xff] %v336_v14  ;;  %v464_v14 = vld [vmem:[%s4324_s26 + $0x8e0] sm:$0xff] }
  0x5f   : > { %339 = vst [vmem:[%s4329_s27 + $0x278] sm:$0xff] %v338_v15  ;;  %v466_v15 = vld [vmem:[%s4324_s26 + $0x8e8] sm:$0xff] }
  0x60   : > { %341 = vst [vmem:[%s4329_s27 + $0x280] sm:$0xff] %v340_v16  ;;  %v468_v16 = vld [vmem:[%s4324_s26 + $0x900] sm:$0xff] }
  0x61   : > { %343 = vst [vmem:[%s4329_s27 + $0x288] sm:$0xff] %v342_v17  ;;  %v470_v17 = vld [vmem:[%s4324_s26 + $0x908] sm:$0xff] }
  0x62   : > { %345 = vst [vmem:[%s4329_s27 + $0x290] sm:$0xff] %v344_v18  ;;  %v472_v18 = vld [vmem:[%s4324_s26 + $0x920] sm:$0xff] }
  0x63   : > { %347 = vst [vmem:[%s4329_s27 + $0x298] sm:$0xff] %v346_v19  ;;  %v474_v19 = vld [vmem:[%s4324_s26 + $0x928] sm:$0xff] }
  0x64   : > { %349 = vst [vmem:[%s4329_s27 + $0x2a0] sm:$0xff] %v348_v20  ;;  %v476_v20 = vld [vmem:[%s4324_s26 + $0x940] sm:$0xff] }
  0x65   : > { %351 = vst [vmem:[%s4329_s27 + $0x2a8] sm:$0xff] %v350_v21  ;;  %v478_v21 = vld [vmem:[%s4324_s26 + $0x948] sm:$0xff] }
  0x66   : > { %353 = vst [vmem:[%s4329_s27 + $0x2b0] sm:$0xff] %v352_v22  ;;  %v480_v22 = vld [vmem:[%s4324_s26 + $0x960] sm:$0xff] }
  0x67   : > { %355 = vst [vmem:[%s4329_s27 + $0x2b8] sm:$0xff] %v354_v23  ;;  %v482_v23 = vld [vmem:[%s4324_s26 + $0x968] sm:$0xff] }
  0x68   : > { %357 = vst [vmem:[%s4329_s27 + $0x2c0] sm:$0xff] %v356_v24  ;;  %v484_v24 = vld [vmem:[%s4324_s26 + $0x980] sm:$0xff] }
  0x69   : > { %359 = vst [vmem:[%s4329_s27 + $0x2c8] sm:$0xff] %v358_v25  ;;  %v486_v25 = vld [vmem:[%s4324_s26 + $0x988] sm:$0xff] }
  0x6a   : > { %361 = vst [vmem:[%s4329_s27 + $0x2d0] sm:$0xff] %v360_v26  ;;  %v488_v26 = vld [vmem:[%s4324_s26 + $0x9a0] sm:$0xff] }
  0x6b   : > { %363 = vst [vmem:[%s4329_s27 + $0x2d8] sm:$0xff] %v362_v27  ;;  %v490_v27 = vld [vmem:[%s4324_s26 + $0x9a8] sm:$0xff] }
  0x6c   : > { %365 = vst [vmem:[%s4329_s27 + $0x2e0] sm:$0xff] %v364_v28  ;;  %v492_v28 = vld [vmem:[%s4324_s26 + $0x9c0] sm:$0xff] }
  0x6d   : > { %367 = vst [vmem:[%s4329_s27 + $0x2e8] sm:$0xff] %v366_v29  ;;  %v494_v29 = vld [vmem:[%s4324_s26 + $0x9c8] sm:$0xff] }
  0x6e   : > { %369 = vst [vmem:[%s4329_s27 + $0x2f0] sm:$0xff] %v368_v30  ;;  %v496_v30 = vld [vmem:[%s4324_s26 + $0x9e0] sm:$0xff] }
  0x6f   : > { %371 = vst [vmem:[%s4329_s27 + $0x2f8] sm:$0xff] %v370_v31  ;;  %v498_v31 = vld [vmem:[%s4324_s26 + $0x9e8] sm:$0xff] }
  0x70   : > { %373 = vst [vmem:[%s4329_s27 + $0x300] sm:$0xff] %v372_v32  ;;  %v500_v32 = vld [vmem:[%s4324_s26 + $0xa00] sm:$0xff] }
  0x71   : > { %375 = vst [vmem:[%s4329_s27 + $0x308] sm:$0xff] %v374_v33  ;;  %v502_v33 = vld [vmem:[%s4324_s26 + $0xa08] sm:$0xff] }
  0x72   : > { %377 = vst [vmem:[%s4329_s27 + $0x310] sm:$0xff] %v376_v34  ;;  %v504_v34 = vld [vmem:[%s4324_s26 + $0xa20] sm:$0xff] }
  0x73   : > { %379 = vst [vmem:[%s4329_s27 + $0x318] sm:$0xff] %v378_v35  ;;  %v506_v35 = vld [vmem:[%s4324_s26 + $0xa28] sm:$0xff] }
  0x74   : > { %381 = vst [vmem:[%s4329_s27 + $0x320] sm:$0xff] %v380_v36  ;;  %v508_v36 = vld [vmem:[%s4324_s26 + $0xa40] sm:$0xff] }
  0x75   : > { %383 = vst [vmem:[%s4329_s27 + $0x328] sm:$0xff] %v382_v37  ;;  %v510_v37 = vld [vmem:[%s4324_s26 + $0xa48] sm:$0xff] }
  0x76   : > { %385 = vst [vmem:[%s4329_s27 + $0x330] sm:$0xff] %v384_v38  ;;  %v512_v38 = vld [vmem:[%s4324_s26 + $0xa60] sm:$0xff] }
  0x77   : > { %387 = vst [vmem:[%s4329_s27 + $0x338] sm:$0xff] %v386_v39  ;;  %v514_v39 = vld [vmem:[%s4324_s26 + $0xa68] sm:$0xff] }
  0x78   : > { %389 = vst [vmem:[%s4329_s27 + $0x340] sm:$0xff] %v388_v40  ;;  %v516_v40 = vld [vmem:[%s4324_s26 + $0xa80] sm:$0xff] }
  0x79   : > { %391 = vst [vmem:[%s4329_s27 + $0x348] sm:$0xff] %v390_v41  ;;  %v518_v41 = vld [vmem:[%s4324_s26 + $0xa88] sm:$0xff] }
  0x7a   : > { %393 = vst [vmem:[%s4329_s27 + $0x350] sm:$0xff] %v392_v42  ;;  %v520_v42 = vld [vmem:[%s4324_s26 + $0xaa0] sm:$0xff] }
  0x7b   : > { %395 = vst [vmem:[%s4329_s27 + $0x358] sm:$0xff] %v394_v43  ;;  %v522_v43 = vld [vmem:[%s4324_s26 + $0xaa8] sm:$0xff] }
  0x7c   : > { %397 = vst [vmem:[%s4329_s27 + $0x360] sm:$0xff] %v396_v44  ;;  %v524_v44 = vld [vmem:[%s4324_s26 + $0xac0] sm:$0xff] }
  0x7d   : > { %399 = vst [vmem:[%s4329_s27 + $0x368] sm:$0xff] %v398_v45  ;;  %v526_v45 = vld [vmem:[%s4324_s26 + $0xac8] sm:$0xff] }
  0x7e   : > { %401 = vst [vmem:[%s4329_s27 + $0x370] sm:$0xff] %v400_v46  ;;  %v528_v46 = vld [vmem:[%s4324_s26 + $0xae0] sm:$0xff] }
  0x7f   : > { %403 = vst [vmem:[%s4329_s27 + $0x378] sm:$0xff] %v402_v47  ;;  %v530_v47 = vld [vmem:[%s4324_s26 + $0xae8] sm:$0xff] }
  0x80   : > { %405 = vst [vmem:[%s4329_s27 + $0x380] sm:$0xff] %v404_v48  ;;  %v532_v48 = vld [vmem:[%s4324_s26 + $0xb00] sm:$0xff] }
  0x81   : > { %407 = vst [vmem:[%s4329_s27 + $0x388] sm:$0xff] %v406_v49  ;;  %v534_v49 = vld [vmem:[%s4324_s26 + $0xb08] sm:$0xff] }
  0x82   : > { %409 = vst [vmem:[%s4329_s27 + $0x390] sm:$0xff] %v408_v50  ;;  %v536_v50 = vld [vmem:[%s4324_s26 + $0xb20] sm:$0xff] }
  0x83   : > { %411 = vst [vmem:[%s4329_s27 + $0x398] sm:$0xff] %v410_v51  ;;  %v538_v51 = vld [vmem:[%s4324_s26 + $0xb28] sm:$0xff] }
  0x84   : > { %413 = vst [vmem:[%s4329_s27 + $0x3a0] sm:$0xff] %v412_v52  ;;  %v540_v52 = vld [vmem:[%s4324_s26 + $0xb40] sm:$0xff] }
  0x85   : > { %415 = vst [vmem:[%s4329_s27 + $0x3a8] sm:$0xff] %v414_v53  ;;  %v542_v53 = vld [vmem:[%s4324_s26 + $0xb48] sm:$0xff] }
  0x86   : > { %417 = vst [vmem:[%s4329_s27 + $0x3b0] sm:$0xff] %v416_v54  ;;  %v544_v54 = vld [vmem:[%s4324_s26 + $0xb60] sm:$0xff] }
  0x87   : > { %419 = vst [vmem:[%s4329_s27 + $0x3b8] sm:$0xff] %v418_v55  ;;  %v546_v55 = vld [vmem:[%s4324_s26 + $0xb68] sm:$0xff] }
  0x88   : > { %421 = vst [vmem:[%s4329_s27 + $0x3c0] sm:$0xff] %v420_v56  ;;  %v548_v56 = vld [vmem:[%s4324_s26 + $0xb80] sm:$0xff] }
  0x89   : > { %423 = vst [vmem:[%s4329_s27 + $0x3c8] sm:$0xff] %v422_v57  ;;  %v550_v57 = vld [vmem:[%s4324_s26 + $0xb88] sm:$0xff] }
  0x8a   : > { %425 = vst [vmem:[%s4329_s27 + $0x3d0] sm:$0xff] %v424_v58  ;;  %v552_v58 = vld [vmem:[%s4324_s26 + $0xba0] sm:$0xff] }
  0x8b   : > { %427 = vst [vmem:[%s4329_s27 + $0x3d8] sm:$0xff] %v426_v59  ;;  %v554_v59 = vld [vmem:[%s4324_s26 + $0xba8] sm:$0xff] }
  0x8c   : > { %429 = vst [vmem:[%s4329_s27 + $0x3e0] sm:$0xff] %v428_v60  ;;  %v556_v60 = vld [vmem:[%s4324_s26 + $0xbc0] sm:$0xff] }
  0x8d   : > { %431 = vst [vmem:[%s4329_s27 + $0x3e8] sm:$0xff] %v430_v61  ;;  %v558_v61 = vld [vmem:[%s4324_s26 + $0xbc8] sm:$0xff] }
  0x8e   : > { %433 = vst [vmem:[%s4329_s27 + $0x3f0] sm:$0xff] %v432_v62  ;;  %v560_v62 = vld [vmem:[%s4324_s26 + $0xbe0] sm:$0xff] }
  0x8f   : > { %435 = vst [vmem:[%s4329_s27 + $0x3f8] sm:$0xff] %v434_v63  ;;  %v562_v63 = vld [vmem:[%s4324_s26 + $0xbe8] sm:$0xff] }
  0x90   : > { %437 = vst [vmem:[%s4329_s27 + $0x400] sm:$0xff] %v436_v0  ;;  %v564_v0 = vld [vmem:[%s4324_s26 + $0xc00] sm:$0xff] }
  0x91   : > { %439 = vst [vmem:[%s4329_s27 + $0x408] sm:$0xff] %v438_v1  ;;  %v566_v1 = vld [vmem:[%s4324_s26 + $0xc08] sm:$0xff] }
  0x92   : > { %441 = vst [vmem:[%s4329_s27 + $0x410] sm:$0xff] %v440_v2  ;;  %v568_v2 = vld [vmem:[%s4324_s26 + $0xc20] sm:$0xff] }
  0x93   : > { %443 = vst [vmem:[%s4329_s27 + $0x418] sm:$0xff] %v442_v3  ;;  %v570_v3 = vld [vmem:[%s4324_s26 + $0xc28] sm:$0xff] }
  0x94   : > { %445 = vst [vmem:[%s4329_s27 + $0x420] sm:$0xff] %v444_v4  ;;  %v572_v4 = vld [vmem:[%s4324_s26 + $0xc40] sm:$0xff] }
  0x95   : > { %447 = vst [vmem:[%s4329_s27 + $0x428] sm:$0xff] %v446_v5  ;;  %v574_v5 = vld [vmem:[%s4324_s26 + $0xc48] sm:$0xff] }
  0x96   : > { %449 = vst [vmem:[%s4329_s27 + $0x430] sm:$0xff] %v448_v6  ;;  %v576_v6 = vld [vmem:[%s4324_s26 + $0xc60] sm:$0xff] }
  0x97   : > { %451 = vst [vmem:[%s4329_s27 + $0x438] sm:$0xff] %v450_v7  ;;  %v578_v7 = vld [vmem:[%s4324_s26 + $0xc68] sm:$0xff] }
  0x98   : > { %453 = vst [vmem:[%s4329_s27 + $0x440] sm:$0xff] %v452_v8  ;;  %v580_v8 = vld [vmem:[%s4324_s26 + $0xc80] sm:$0xff] }
  0x99   : > { %455 = vst [vmem:[%s4329_s27 + $0x448] sm:$0xff] %v454_v9  ;;  %v582_v9 = vld [vmem:[%s4324_s26 + $0xc88] sm:$0xff] }
  0x9a   : > { %457 = vst [vmem:[%s4329_s27 + $0x450] sm:$0xff] %v456_v10  ;;  %v584_v10 = vld [vmem:[%s4324_s26 + $0xca0] sm:$0xff] }
  0x9b   : > { %459 = vst [vmem:[%s4329_s27 + $0x458] sm:$0xff] %v458_v11  ;;  %v586_v11 = vld [vmem:[%s4324_s26 + $0xca8] sm:$0xff] }
  0x9c   : > { %461 = vst [vmem:[%s4329_s27 + $0x460] sm:$0xff] %v460_v12  ;;  %v588_v12 = vld [vmem:[%s4324_s26 + $0xcc0] sm:$0xff] }
  0x9d   : > { %463 = vst [vmem:[%s4329_s27 + $0x468] sm:$0xff] %v462_v13  ;;  %v590_v13 = vld [vmem:[%s4324_s26 + $0xcc8] sm:$0xff] }
  0x9e   : > { %465 = vst [vmem:[%s4329_s27 + $0x470] sm:$0xff] %v464_v14  ;;  %v592_v14 = vld [vmem:[%s4324_s26 + $0xce0] sm:$0xff] }
  0x9f   : > { %467 = vst [vmem:[%s4329_s27 + $0x478] sm:$0xff] %v466_v15  ;;  %v594_v15 = vld [vmem:[%s4324_s26 + $0xce8] sm:$0xff] }
  0xa0   : > { %469 = vst [vmem:[%s4329_s27 + $0x480] sm:$0xff] %v468_v16  ;;  %v596_v16 = vld [vmem:[%s4324_s26 + $0xd00] sm:$0xff] }
  0xa1   : > { %471 = vst [vmem:[%s4329_s27 + $0x488] sm:$0xff] %v470_v17  ;;  %v598_v17 = vld [vmem:[%s4324_s26 + $0xd08] sm:$0xff] }
  0xa2   : > { %473 = vst [vmem:[%s4329_s27 + $0x490] sm:$0xff] %v472_v18  ;;  %v600_v18 = vld [vmem:[%s4324_s26 + $0xd20] sm:$0xff] }
  0xa3   : > { %475 = vst [vmem:[%s4329_s27 + $0x498] sm:$0xff] %v474_v19  ;;  %v602_v19 = vld [vmem:[%s4324_s26 + $0xd28] sm:$0xff] }
  0xa4   : > { %477 = vst [vmem:[%s4329_s27 + $0x4a0] sm:$0xff] %v476_v20  ;;  %v604_v20 = vld [vmem:[%s4324_s26 + $0xd40] sm:$0xff] }
  0xa5   : > { %479 = vst [vmem:[%s4329_s27 + $0x4a8] sm:$0xff] %v478_v21  ;;  %v606_v21 = vld [vmem:[%s4324_s26 + $0xd48] sm:$0xff] }
  0xa6   : > { %481 = vst [vmem:[%s4329_s27 + $0x4b0] sm:$0xff] %v480_v22  ;;  %v608_v22 = vld [vmem:[%s4324_s26 + $0xd60] sm:$0xff] }
  0xa7   : > { %483 = vst [vmem:[%s4329_s27 + $0x4b8] sm:$0xff] %v482_v23  ;;  %v610_v23 = vld [vmem:[%s4324_s26 + $0xd68] sm:$0xff] }
  0xa8   : > { %485 = vst [vmem:[%s4329_s27 + $0x4c0] sm:$0xff] %v484_v24  ;;  %v612_v24 = vld [vmem:[%s4324_s26 + $0xd80] sm:$0xff] }
  0xa9   : > { %487 = vst [vmem:[%s4329_s27 + $0x4c8] sm:$0xff] %v486_v25  ;;  %v614_v25 = vld [vmem:[%s4324_s26 + $0xd88] sm:$0xff] }
  0xaa   : > { %489 = vst [vmem:[%s4329_s27 + $0x4d0] sm:$0xff] %v488_v26  ;;  %v616_v26 = vld [vmem:[%s4324_s26 + $0xda0] sm:$0xff] }
  0xab   : > { %491 = vst [vmem:[%s4329_s27 + $0x4d8] sm:$0xff] %v490_v27  ;;  %v618_v27 = vld [vmem:[%s4324_s26 + $0xda8] sm:$0xff] }
  0xac   : > { %493 = vst [vmem:[%s4329_s27 + $0x4e0] sm:$0xff] %v492_v28  ;;  %v620_v28 = vld [vmem:[%s4324_s26 + $0xdc0] sm:$0xff] }
  0xad   : > { %495 = vst [vmem:[%s4329_s27 + $0x4e8] sm:$0xff] %v494_v29  ;;  %v622_v29 = vld [vmem:[%s4324_s26 + $0xdc8] sm:$0xff] }
  0xae   : > { %497 = vst [vmem:[%s4329_s27 + $0x4f0] sm:$0xff] %v496_v30  ;;  %v624_v30 = vld [vmem:[%s4324_s26 + $0xde0] sm:$0xff] }
  0xaf   : > { %499 = vst [vmem:[%s4329_s27 + $0x4f8] sm:$0xff] %v498_v31  ;;  %v626_v31 = vld [vmem:[%s4324_s26 + $0xde8] sm:$0xff] }
  0xb0   : > { %501 = vst [vmem:[%s4329_s27 + $0x500] sm:$0xff] %v500_v32  ;;  %v628_v32 = vld [vmem:[%s4324_s26 + $0xe00] sm:$0xff] }
  0xb1   : > { %503 = vst [vmem:[%s4329_s27 + $0x508] sm:$0xff] %v502_v33  ;;  %v630_v33 = vld [vmem:[%s4324_s26 + $0xe08] sm:$0xff] }
  0xb2   : > { %505 = vst [vmem:[%s4329_s27 + $0x510] sm:$0xff] %v504_v34  ;;  %v632_v34 = vld [vmem:[%s4324_s26 + $0xe20] sm:$0xff] }
  0xb3   : > { %507 = vst [vmem:[%s4329_s27 + $0x518] sm:$0xff] %v506_v35  ;;  %v634_v35 = vld [vmem:[%s4324_s26 + $0xe28] sm:$0xff] }
  0xb4   : > { %509 = vst [vmem:[%s4329_s27 + $0x520] sm:$0xff] %v508_v36  ;;  %v636_v36 = vld [vmem:[%s4324_s26 + $0xe40] sm:$0xff] }
  0xb5   : > { %511 = vst [vmem:[%s4329_s27 + $0x528] sm:$0xff] %v510_v37  ;;  %v638_v37 = vld [vmem:[%s4324_s26 + $0xe48] sm:$0xff] }
  0xb6   : > { %513 = vst [vmem:[%s4329_s27 + $0x530] sm:$0xff] %v512_v38  ;;  %v640_v38 = vld [vmem:[%s4324_s26 + $0xe60] sm:$0xff] }
  0xb7   : > { %515 = vst [vmem:[%s4329_s27 + $0x538] sm:$0xff] %v514_v39  ;;  %v642_v39 = vld [vmem:[%s4324_s26 + $0xe68] sm:$0xff] }
  0xb8   : > { %517 = vst [vmem:[%s4329_s27 + $0x540] sm:$0xff] %v516_v40  ;;  %v644_v40 = vld [vmem:[%s4324_s26 + $0xe80] sm:$0xff] }
  0xb9   : > { %519 = vst [vmem:[%s4329_s27 + $0x548] sm:$0xff] %v518_v41  ;;  %v646_v41 = vld [vmem:[%s4324_s26 + $0xe88] sm:$0xff] }
  0xba   : > { %521 = vst [vmem:[%s4329_s27 + $0x550] sm:$0xff] %v520_v42  ;;  %v648_v42 = vld [vmem:[%s4324_s26 + $0xea0] sm:$0xff] }
  0xbb   : > { %523 = vst [vmem:[%s4329_s27 + $0x558] sm:$0xff] %v522_v43  ;;  %v650_v43 = vld [vmem:[%s4324_s26 + $0xea8] sm:$0xff] }
  0xbc   : > { %525 = vst [vmem:[%s4329_s27 + $0x560] sm:$0xff] %v524_v44  ;;  %v652_v44 = vld [vmem:[%s4324_s26 + $0xec0] sm:$0xff] }
  0xbd   : > { %527 = vst [vmem:[%s4329_s27 + $0x568] sm:$0xff] %v526_v45  ;;  %v654_v45 = vld [vmem:[%s4324_s26 + $0xec8] sm:$0xff] }
  0xbe   : > { %529 = vst [vmem:[%s4329_s27 + $0x570] sm:$0xff] %v528_v46  ;;  %v656_v46 = vld [vmem:[%s4324_s26 + $0xee0] sm:$0xff] }
  0xbf   : > { %531 = vst [vmem:[%s4329_s27 + $0x578] sm:$0xff] %v530_v47  ;;  %v658_v47 = vld [vmem:[%s4324_s26 + $0xee8] sm:$0xff] }
  0xc0   : > { %533 = vst [vmem:[%s4329_s27 + $0x580] sm:$0xff] %v532_v48  ;;  %v660_v48 = vld [vmem:[%s4324_s26 + $0xf00] sm:$0xff] }
  0xc1   : > { %535 = vst [vmem:[%s4329_s27 + $0x588] sm:$0xff] %v534_v49  ;;  %v662_v49 = vld [vmem:[%s4324_s26 + $0xf08] sm:$0xff] }
  0xc2   : > { %537 = vst [vmem:[%s4329_s27 + $0x590] sm:$0xff] %v536_v50  ;;  %v664_v50 = vld [vmem:[%s4324_s26 + $0xf20] sm:$0xff] }
  0xc3   : > { %539 = vst [vmem:[%s4329_s27 + $0x598] sm:$0xff] %v538_v51  ;;  %v666_v51 = vld [vmem:[%s4324_s26 + $0xf28] sm:$0xff] }
  0xc4   : > { %541 = vst [vmem:[%s4329_s27 + $0x5a0] sm:$0xff] %v540_v52  ;;  %v668_v52 = vld [vmem:[%s4324_s26 + $0xf40] sm:$0xff] }
  0xc5   : > { %543 = vst [vmem:[%s4329_s27 + $0x5a8] sm:$0xff] %v542_v53  ;;  %v670_v53 = vld [vmem:[%s4324_s26 + $0xf48] sm:$0xff] }
  0xc6   : > { %545 = vst [vmem:[%s4329_s27 + $0x5b0] sm:$0xff] %v544_v54  ;;  %v672_v54 = vld [vmem:[%s4324_s26 + $0xf60] sm:$0xff] }
  0xc7   : > { %547 = vst [vmem:[%s4329_s27 + $0x5b8] sm:$0xff] %v546_v55  ;;  %v674_v55 = vld [vmem:[%s4324_s26 + $0xf68] sm:$0xff] }
  0xc8   : > { %549 = vst [vmem:[%s4329_s27 + $0x5c0] sm:$0xff] %v548_v56  ;;  %v676_v56 = vld [vmem:[%s4324_s26 + $0xf80] sm:$0xff] }
  0xc9   : > { %551 = vst [vmem:[%s4329_s27 + $0x5c8] sm:$0xff] %v550_v57  ;;  %v678_v57 = vld [vmem:[%s4324_s26 + $0xf88] sm:$0xff] }
  0xca   : > { %553 = vst [vmem:[%s4329_s27 + $0x5d0] sm:$0xff] %v552_v58  ;;  %v680_v58 = vld [vmem:[%s4324_s26 + $0xfa0] sm:$0xff] }
  0xcb   : > { %555 = vst [vmem:[%s4329_s27 + $0x5d8] sm:$0xff] %v554_v59  ;;  %v682_v59 = vld [vmem:[%s4324_s26 + $0xfa8] sm:$0xff] }
  0xcc   : > { %557 = vst [vmem:[%s4329_s27 + $0x5e0] sm:$0xff] %v556_v60  ;;  %v684_v60 = vld [vmem:[%s4324_s26 + $0xfc0] sm:$0xff] }
  0xcd   : > { %559 = vst [vmem:[%s4329_s27 + $0x5e8] sm:$0xff] %v558_v61  ;;  %v686_v61 = vld [vmem:[%s4324_s26 + $0xfc8] sm:$0xff] }
  0xce   : > { %561 = vst [vmem:[%s4329_s27 + $0x5f0] sm:$0xff] %v560_v62  ;;  %v688_v62 = vld [vmem:[%s4324_s26 + $0xfe0] sm:$0xff] }
  0xcf   : > { %563 = vst [vmem:[%s4329_s27 + $0x5f8] sm:$0xff] %v562_v63  ;;  %v690_v63 = vld [vmem:[%s4324_s26 + $0xfe8] sm:$0xff] }
  0xd0   : > { %565 = vst [vmem:[%s4329_s27 + $0x600] sm:$0xff] %v564_v0 }
  0xd1   : > { %567 = vst [vmem:[%s4329_s27 + $0x608] sm:$0xff] %v566_v1 }
  0xd2   : > { %569 = vst [vmem:[%s4329_s27 + $0x610] sm:$0xff] %v568_v2 }
  0xd3   : > { %571 = vst [vmem:[%s4329_s27 + $0x618] sm:$0xff] %v570_v3 }
  0xd4   : > { %573 = vst [vmem:[%s4329_s27 + $0x620] sm:$0xff] %v572_v4 }
  0xd5   : > { %575 = vst [vmem:[%s4329_s27 + $0x628] sm:$0xff] %v574_v5 }
  0xd6   : > { %577 = vst [vmem:[%s4329_s27 + $0x630] sm:$0xff] %v576_v6 }
  0xd7   : > { %579 = vst [vmem:[%s4329_s27 + $0x638] sm:$0xff] %v578_v7 }
  0xd8   : > { %581 = vst [vmem:[%s4329_s27 + $0x640] sm:$0xff] %v580_v8 }
  0xd9   : > { %583 = vst [vmem:[%s4329_s27 + $0x648] sm:$0xff] %v582_v9 }
  0xda   : > { %585 = vst [vmem:[%s4329_s27 + $0x650] sm:$0xff] %v584_v10 }
  0xdb   : > { %587 = vst [vmem:[%s4329_s27 + $0x658] sm:$0xff] %v586_v11 }
  0xdc   : > { %589 = vst [vmem:[%s4329_s27 + $0x660] sm:$0xff] %v588_v12 }
  0xdd   : > { %591 = vst [vmem:[%s4329_s27 + $0x668] sm:$0xff] %v590_v13 }
  0xde   : > { %593 = vst [vmem:[%s4329_s27 + $0x670] sm:$0xff] %v592_v14 }
  0xdf   : > { %595 = vst [vmem:[%s4329_s27 + $0x678] sm:$0xff] %v594_v15 }
  0xe0   : > { %597 = vst [vmem:[%s4329_s27 + $0x680] sm:$0xff] %v596_v16 }
  0xe1   : > { %599 = vst [vmem:[%s4329_s27 + $0x688] sm:$0xff] %v598_v17 }
  0xe2   : > { %601 = vst [vmem:[%s4329_s27 + $0x690] sm:$0xff] %v600_v18 }
  0xe3   : > { %603 = vst [vmem:[%s4329_s27 + $0x698] sm:$0xff] %v602_v19 }
  0xe4   : > { %605 = vst [vmem:[%s4329_s27 + $0x6a0] sm:$0xff] %v604_v20 }
  0xe5   : > { %607 = vst [vmem:[%s4329_s27 + $0x6a8] sm:$0xff] %v606_v21 }
  0xe6   : > { %609 = vst [vmem:[%s4329_s27 + $0x6b0] sm:$0xff] %v608_v22 }
  0xe7   : > { %611 = vst [vmem:[%s4329_s27 + $0x6b8] sm:$0xff] %v610_v23 }
  0xe8   : > { %613 = vst [vmem:[%s4329_s27 + $0x6c0] sm:$0xff] %v612_v24 }
  0xe9   : > { %615 = vst [vmem:[%s4329_s27 + $0x6c8] sm:$0xff] %v614_v25 }
  0xea   : > { %617 = vst [vmem:[%s4329_s27 + $0x6d0] sm:$0xff] %v616_v26 }
  0xeb   : > { %619 = vst [vmem:[%s4329_s27 + $0x6d8] sm:$0xff] %v618_v27 }
  0xec   : > { %621 = vst [vmem:[%s4329_s27 + $0x6e0] sm:$0xff] %v620_v28 }
  0xed   : > { %623 = vst [vmem:[%s4329_s27 + $0x6e8] sm:$0xff] %v622_v29 }
  0xee   : > { %625 = vst [vmem:[%s4329_s27 + $0x6f0] sm:$0xff] %v624_v30 }
  0xef   : > { %627 = vst [vmem:[%s4329_s27 + $0x6f8] sm:$0xff] %v626_v31 }
  0xf0   : > { %629 = vst [vmem:[%s4329_s27 + $0x700] sm:$0xff] %v628_v32 }
  0xf1   : > { %631 = vst [vmem:[%s4329_s27 + $0x708] sm:$0xff] %v630_v33 }
  0xf2   : > { %633 = vst [vmem:[%s4329_s27 + $0x710] sm:$0xff] %v632_v34 }
  0xf3   : > { %635 = vst [vmem:[%s4329_s27 + $0x718] sm:$0xff] %v634_v35 }
  0xf4   : > { %637 = vst [vmem:[%s4329_s27 + $0x720] sm:$0xff] %v636_v36 }
  0xf5   : > { %639 = vst [vmem:[%s4329_s27 + $0x728] sm:$0xff] %v638_v37 }
  0xf6   : > { %641 = vst [vmem:[%s4329_s27 + $0x730] sm:$0xff] %v640_v38 }
  0xf7   : > { %643 = vst [vmem:[%s4329_s27 + $0x738] sm:$0xff] %v642_v39 }
  0xf8   : > { %645 = vst [vmem:[%s4329_s27 + $0x740] sm:$0xff] %v644_v40 }
  0xf9   : > { %647 = vst [vmem:[%s4329_s27 + $0x748] sm:$0xff] %v646_v41 }
  0xfa   : > { %649 = vst [vmem:[%s4329_s27 + $0x750] sm:$0xff] %v648_v42 }
  0xfb   : > { %651 = vst [vmem:[%s4329_s27 + $0x758] sm:$0xff] %v650_v43 }
  0xfc   : > { %653 = vst [vmem:[%s4329_s27 + $0x760] sm:$0xff] %v652_v44 }
  0xfd   : > { %655 = vst [vmem:[%s4329_s27 + $0x768] sm:$0xff] %v654_v45 }
  0xfe   : > { %657 = vst [vmem:[%s4329_s27 + $0x770] sm:$0xff] %v656_v46 }
  0xff   : > { %659 = vst [vmem:[%s4329_s27 + $0x778] sm:$0xff] %v658_v47 }
 0x100   : > { %661 = vst [vmem:[%s4329_s27 + $0x780] sm:$0xff] %v660_v48 }
 0x101   : > { %663 = vst [vmem:[%s4329_s27 + $0x788] sm:$0xff] %v662_v49 }
 0x102   : > { %665 = vst [vmem:[%s4329_s27 + $0x790] sm:$0xff] %v664_v50 }
 0x103   : > { %667 = vst [vmem:[%s4329_s27 + $0x798] sm:$0xff] %v666_v51 }
 0x104   : > { %669 = vst [vmem:[%s4329_s27 + $0x7a0] sm:$0xff] %v668_v52 }
 0x105   : > { %671 = vst [vmem:[%s4329_s27 + $0x7a8] sm:$0xff] %v670_v53 }
 0x106   : > { %673 = vst [vmem:[%s4329_s27 + $0x7b0] sm:$0xff] %v672_v54 }
 0x107   : > { %675 = vst [vmem:[%s4329_s27 + $0x7b8] sm:$0xff] %v674_v55 }
 0x108   : > { %677 = vst [vmem:[%s4329_s27 + $0x7c0] sm:$0xff] %v676_v56 }
 0x109   : > { %679 = vst [vmem:[%s4329_s27 + $0x7c8] sm:$0xff] %v678_v57 }
 0x10a   : > { %681 = vst [vmem:[%s4329_s27 + $0x7d0] sm:$0xff] %v680_v58 }
 0x10b   : > { %683 = vst [vmem:[%s4329_s27 + $0x7d8] sm:$0xff] %v682_v59 }
 0x10c   : > { %685 = vst [vmem:[%s4329_s27 + $0x7e0] sm:$0xff] %v684_v60 }
 0x10d   : > { %687 = vst [vmem:[%s4329_s27 + $0x7e8] sm:$0xff] %v686_v61 }
 0x10e   : > { %689 = vst [vmem:[%s4329_s27 + $0x7f0] sm:$0xff] %v688_v62 }
 0x10f   : > { %691 = vst [vmem:[%s4329_s27 + $0x7f8] sm:$0xff] %v690_v63 }
 0x110 PF: > { %p2892_p6 = scmp.ge.s32.totalorder %s4259_s16, 1  ;;  %p704_p7 = scmp.lt.s32.totalorder %s4259_s16, 3 }
 0x112   : > { %p705_p8 = pnand %p2892_p6, %p704_p7 }
 0x113   : > { %s711_s28 = sand.u32 (!%p705_p8), 1, %s4243_s12   ;;  %s2894_s8 = sshll.u32 (!%p705_p8), %s4251_s14, 2 }
 0x114   : > { %708 = sbr.rel (%p705_p8) target bundleno = 687 (0x2af), region = 51  ;;  %s2893_s29 = sshll.u32 (!%p705_p8), %s711_s28, 11 }
 0x115   : > { %s4843_s30 = scalar_lea.vmem (!%p705_p8), [#allocation2], %s2893_s29  ;;  %p752_p9 = scmp.lt.s32.totalorder (!%p705_p8), %s2894_s8, 7 }
 0x119   : > { %v3011_v0 = vld [vmem:[%s4843_s30 + $0xe0] sm:$0xf]  ;;  %v3954_v1 = vld [vmem:[%s4843_s30 + $0xec] sm:$0xf0]  ;;  %vm2758_vm0 = vcmask 1041408   ;;  %s5456_s8 = smov (!%p752_p9, %s2894_s8), 7 }
 0x11a   : > { %v3139_v2 = vld [vmem:[%s4843_s30 + $0x1e0] sm:$0xf]  ;;  %v3012_v3 = vor.u32 %v3954_v1, %v3011_v0  ;;  %v3986_v4 = vld [vmem:[%s4843_s30 + $0x1ec] sm:$0xf0]  ;;  %s754_s11 = scalar_lea.vmem %s5447_s2, %s5456_s8  ;;  %vm2760_vm1 = vcmask 1045508   ;;  %vm2762_vm2 = vcmask 1043456  }
 0x11b   : > { %v3267_v5 = vld [vmem:[%s4843_s30 + $0x2e0] sm:$0xf]  ;;  %v4018_v6 = vld [vmem:[%s4843_s30 + $0x2ec] sm:$0xf0]  ;;  %v3140_v7 = vor.u32 %v3986_v4, %v3139_v2  ;;  %s2896_s12 = sshll.u32 %s5456_s8, 1 }
 0x11c   : > { %v3268_v8 = vor.u32 %v4018_v6, %v3267_v5  ;;  %v3395_v9 = vld [vmem:[%s4843_s30 + $0x3e0] sm:$0xf]  ;;  %v4050_v10 = vld [vmem:[%s4843_s30 + $0x3ec] sm:$0xf0]  ;;  %2335 = vmatpush.bf16.msra.mxu0 %v3012_v3  ;;  %s760_s19 = scalar_lea.vmem %s5448_s3, %s2896_s12 }
 0x11d   : > { %v2995_v11 = vld [vmem:[%s4843_s30 + $0xc0] sm:$0xf]  ;;  %v3396_v12 = vor.u32 %v4050_v10, %v3395_v9  ;;  %v3950_v13 = vld [vmem:[%s4843_s30 + $0xcc] sm:$0xf0]  ;;  %2348 = vmatpush.bf16.msra.mxu1 %v3140_v7 }
 0x11e   : > { %v3123_v14 = vld [vmem:[%s4843_s30 + $0x1c0] sm:$0xf]  ;;  %v3982_v15 = vld [vmem:[%s4843_s30 + $0x1cc] sm:$0xf0]  ;;  %2361 = vmatpush.bf16.msra.mxu2 %v3268_v8  ;;  %v2996_v16 = vor.u32 %v3950_v13, %v2995_v11 }
 0x11f   : > { %v3124_v17 = vor.u32 %v3982_v15, %v3123_v14  ;;  %v3251_v18 = vld [vmem:[%s4843_s30 + $0x2c0] sm:$0xf]  ;;  %v4014_v19 = vld [vmem:[%s4843_s30 + $0x2cc] sm:$0xf0]  ;;  %2374 = vmatpush.bf16.msra.mxu3 %v3396_v12 }
 0x120   : > { %v3379_v20 = vld [vmem:[%s4843_s30 + $0x3c0] sm:$0xf]  ;;  %v3252_v21 = vor.u32 %v4014_v19, %v3251_v18  ;;  %v4046_v22 = vld [vmem:[%s4843_s30 + $0x3cc] sm:$0xf0]  ;;  %2336 = vmatpush.bf16.msra.mxu0 %v2996_v16 }
 0x121   : > { %v2979_v23 = vld [vmem:[%s4843_s30 + $0xa0] sm:$0xf]  ;;  %v3946_v24 = vld [vmem:[%s4843_s30 + $0xac] sm:$0xf0]  ;;  %v3380_v25 = vor.u32 %v4046_v22, %v3379_v20  ;;  %2349 = vmatpush.bf16.msra.mxu1 %v3124_v17 }
 0x122   : > { %v3107_v26 = vld [vmem:[%s4843_s30 + $0x1a0] sm:$0xf]  ;;  %v3978_v27 = vld [vmem:[%s4843_s30 + $0x1ac] sm:$0xf0]  ;;  %v2980_v29 = vor.u32 %v3946_v24, %v2979_v23  ;;  %2362 = vmatpush.bf16.msra.mxu2 %v3252_v21 }
 0x123   : > { %v3235_v28 = vld [vmem:[%s4843_s30 + $0x2a0] sm:$0xf]  ;;  %v4010_v30 = vld [vmem:[%s4843_s30 + $0x2ac] sm:$0xf0]  ;;  %v3108_v33 = vor.u32 %v3978_v27, %v3107_v26  ;;  %2375 = vmatpush.bf16.msra.mxu3 %v3380_v25 }
 0x124   : > { %v3363_v31 = vld [vmem:[%s4843_s30 + $0x3a0] sm:$0xf]  ;;  %v4042_v32 = vld [vmem:[%s4843_s30 + $0x3ac] sm:$0xf0]  ;;  %v3236_v34 = vor.u32 %v4010_v30, %v3235_v28  ;;  %2337 = vmatpush.bf16.msra.mxu0 %v2980_v29 }
 0x125   : > { %v2963_v35 = vld [vmem:[%s4843_s30 + $0x80] sm:$0xf]  ;;  %v3942_v36 = vld [vmem:[%s4843_s30 + $0x8c] sm:$0xf0]  ;;  %v3364_v38 = vor.u32 %v4042_v32, %v3363_v31  ;;  %2350 = vmatpush.bf16.msra.mxu1 %v3108_v33 }
 0x126   : > { %v3091_v37 = vld [vmem:[%s4843_s30 + $0x180] sm:$0xf]  ;;  %v3974_v39 = vld [vmem:[%s4843_s30 + $0x18c] sm:$0xf0]  ;;  %v2964_v44 = vor.u32 %v3942_v36, %v2963_v35  ;;  %2363 = vmatpush.bf16.msra.mxu2 %v3236_v34 }
 0x127   : > { %v3219_v40 = vld [vmem:[%s4843_s30 + $0x280] sm:$0xf]  ;;  %v4006_v41 = vld [vmem:[%s4843_s30 + $0x28c] sm:$0xf0]  ;;  %v3092_v45 = vor.u32 %v3974_v39, %v3091_v37  ;;  %2376 = vmatpush.bf16.msra.mxu3 %v3364_v38 }
 0x128   : > { %v3347_v42 = vld [vmem:[%s4843_s30 + $0x380] sm:$0xf]  ;;  %v4038_v43 = vld [vmem:[%s4843_s30 + $0x38c] sm:$0xf0]  ;;  %v3220_v46 = vor.u32 %v4006_v41, %v3219_v40  ;;  %2338 = vmatpush.bf16.msra.mxu0 %v2964_v44 }
 0x129   : > { %v2947_v47 = vld [vmem:[%s4843_s30 + $0x60] sm:$0xf]  ;;  %v3938_v48 = vld [vmem:[%s4843_s30 + $0x6c] sm:$0xf0]  ;;  %v3348_v50 = vor.u32 %v4038_v43, %v3347_v42  ;;  %2351 = vmatpush.bf16.msra.mxu1 %v3092_v45 }
 0x12a   : > { %v3075_v49 = vld [vmem:[%s4843_s30 + $0x160] sm:$0xf]  ;;  %v3970_v51 = vld [vmem:[%s4843_s30 + $0x16c] sm:$0xf0]  ;;  %v2948_v56 = vor.u32 %v3938_v48, %v2947_v47  ;;  %2364 = vmatpush.bf16.msra.mxu2 %v3220_v46 }
 0x12b   : > { %v3203_v52 = vld [vmem:[%s4843_s30 + $0x260] sm:$0xf]  ;;  %v4002_v53 = vld [vmem:[%s4843_s30 + $0x26c] sm:$0xf0]  ;;  %v3076_v57 = vor.u32 %v3970_v51, %v3075_v49  ;;  %2377 = vmatpush.bf16.msra.mxu3 %v3348_v50 }
 0x12c   : > { %v3331_v54 = vld [vmem:[%s4843_s30 + $0x360] sm:$0xf]  ;;  %v4034_v55 = vld [vmem:[%s4843_s30 + $0x36c] sm:$0xf0]  ;;  %v3204_v58 = vor.u32 %v4002_v53, %v3203_v52  ;;  %2339 = vmatpush.bf16.msra.mxu0 %v2948_v56 }
 0x12d   : > { %v2931_v59 = vld [vmem:[%s4843_s30 + $0x40] sm:$0xf]  ;;  %v3934_v60 = vld [vmem:[%s4843_s30 + $0x4c] sm:$0xf0]  ;;  %v3332_v62 = vor.u32 %v4034_v55, %v3331_v54  ;;  %2352 = vmatpush.bf16.msra.mxu1 %v3076_v57 }
 0x12e   : > { %v3059_v61 = vld [vmem:[%s4843_s30 + $0x140] sm:$0xf]  ;;  %v3966_v63 = vld [vmem:[%s4843_s30 + $0x14c] sm:$0xf0]  ;;  %v2932_v4 = vor.u32 %v3934_v60, %v2931_v59  ;;  %2365 = vmatpush.bf16.msra.mxu2 %v3204_v58  ;;  %v768_v59 = vld [vmem:[%s5445_s0] sm:$0xff] }
 0x12f   : > { %v3187_v0 = vld [vmem:[%s4843_s30 + $0x240] sm:$0xf]  ;;  %v3998_v1 = vld [vmem:[%s4843_s30 + $0x24c] sm:$0xf0]  ;;  %v3060_v5 = vor.u32 %v3966_v63, %v3059_v61  ;;  %2378 = vmatpush.bf16.msra.mxu3 %v3332_v62  ;;  %772 = vst [vmem:[#allocation1] ss:$4 sm:$0xff] %v768_v59 }
 0x130   : > { %v3315_v2 = vld [vmem:[%s4843_s30 + $0x340] sm:$0xf]  ;;  %v4030_v3 = vld [vmem:[%s4843_s30 + $0x34c] sm:$0xf0]  ;;  %v3188_v6 = vor.u32 %v3998_v1, %v3187_v0  ;;  %2340 = vmatpush.bf16.msra.mxu0 %v2932_v4 }
 0x131   : > { %v2915_v7 = vld [vmem:[%s4843_s30 + $0x20] sm:$0xf]  ;;  %v3930_v8 = vld [vmem:[%s4843_s30 + $0x2c] sm:$0xf0]  ;;  %v3316_v10 = vor.u32 %v4030_v3, %v3315_v2  ;;  %2353 = vmatpush.bf16.msra.mxu1 %v3060_v5 }
 0x132   : > { %v3043_v9 = vld [vmem:[%s4843_s30 + $0x120] sm:$0xf]  ;;  %v3962_v11 = vld [vmem:[%s4843_s30 + $0x12c] sm:$0xf0]  ;;  %v2916_v16 = vor.u32 %v3930_v8, %v2915_v7  ;;  %2366 = vmatpush.bf16.msra.mxu2 %v3188_v6 }
 0x133   : > { %v3171_v12 = vld [vmem:[%s4843_s30 + $0x220] sm:$0xf]  ;;  %v3994_v13 = vld [vmem:[%s4843_s30 + $0x22c] sm:$0xf0]  ;;  %v3044_v19 = vor.u32 %v3962_v11, %v3043_v9  ;;  %2379 = vmatpush.bf16.msra.mxu3 %v3316_v10 }
 0x134   : > { %v3299_v14 = vld [vmem:[%s4843_s30 + $0x320] sm:$0xf]  ;;  %v4026_v15 = vld [vmem:[%s4843_s30 + $0x32c] sm:$0xf0]  ;;  %v3172_v20 = vor.u32 %v3994_v13, %v3171_v12  ;;  %2341 = vmatpush.bf16.msra.mxu0 %v2916_v16 }
 0x135   : > { %v2899_v17 = vld [vmem:[%s4843_s30] sm:$0xf]  ;;  %v3926_v18 = vld [vmem:[%s4843_s30 + $0xc] sm:$0xf0]  ;;  %v3300_v24 = vor.u32 %v4026_v15, %v3299_v14  ;;  %2354 = vmatpush.bf16.msra.mxu1 %v3044_v19 }
 0x136   : > { %v3027_v21 = vld [vmem:[%s4843_s30 + $0x100] sm:$0xf]  ;;  %v3958_v22 = vld [vmem:[%s4843_s30 + $0x10c] sm:$0xf0]  ;;  %v2900_v31 = vor.u32 %v3926_v18, %v2899_v17  ;;  %2367 = vmatpush.bf16.msra.mxu2 %v3172_v20 }
 0x137   : > { %v3155_v23 = vld [vmem:[%s4843_s30 + $0x200] sm:$0xf]  ;;  %v3990_v25 = vld [vmem:[%s4843_s30 + $0x20c] sm:$0xf0]  ;;  %v3028_v35 = vor.u32 %v3958_v22, %v3027_v21  ;;  %2380 = vmatpush.bf16.msra.mxu3 %v3300_v24 }
 0x138   : > { %v3283_v26 = vld [vmem:[%s4843_s30 + $0x300] sm:$0xf]  ;;  %v4022_v27 = vld [vmem:[%s4843_s30 + $0x30c] sm:$0xf0]  ;;  %v3156_v36 = vor.u32 %v3990_v25, %v3155_v23  ;;  %2342 = vmatpush.bf16.msra.mxu0 %v2900_v31 }
 0x139   : > { %v3523_v28 = vld [vmem:[%s4843_s30 + $0x4e0] sm:$0xf]  ;;  %v4082_v29 = vld [vmem:[%s4843_s30 + $0x4ec] sm:$0xf0]  ;;  %v3284_v39 = vor.u32 %v4022_v27, %v3283_v26  ;;  %2355 = vmatpush.bf16.msra.mxu1 %v3028_v35 }
 0x13a   : > { %v3651_v30 = vld [vmem:[%s4843_s30 + $0x5e0] sm:$0xf]  ;;  %v4114_v32 = vld [vmem:[%s4843_s30 + $0x5ec] sm:$0xf0]  ;;  %v3524_v40 = vor.u32 %v4082_v29, %v3523_v28  ;;  %2368 = vmatpush.bf16.msra.mxu2 %v3156_v36 }
 0x13b   : > { %v3779_v33 = vld [vmem:[%s4843_s30 + $0x6e0] sm:$0xf]  ;;  %v4146_v34 = vld [vmem:[%s4843_s30 + $0x6ec] sm:$0xf0]  ;;  %v3652_v41 = vor.u32 %v4114_v32, %v3651_v30  ;;  %2381 = vmatpush.bf16.msra.mxu3 %v3284_v39 }
 0x13c   : > { %v3907_v37 = vld [vmem:[%s4843_s30 + $0x7e0] sm:$0xf]  ;;  %v4178_v38 = vld [vmem:[%s4843_s30 + $0x7ec] sm:$0xf0]  ;;  %v3780_v42 = vor.u32 %v4146_v34, %v3779_v33  ;;  %2387 = vmatpush.bf16.msrb.mxu0 %v3524_v40 }
 0x13d   : > { %v3507_v43 = vld [vmem:[%s4843_s30 + $0x4c0] sm:$0xf]  ;;  %v4078_v44 = vld [vmem:[%s4843_s30 + $0x4cc] sm:$0xf0]  ;;  %v3908_v46 = vor.u32 %v4178_v38, %v3907_v37  ;;  %2400 = vmatpush.bf16.msrb.mxu1 %v3652_v41 }
 0x13e   : > { %v3635_v45 = vld [vmem:[%s4843_s30 + $0x5c0] sm:$0xf]  ;;  %v4110_v47 = vld [vmem:[%s4843_s30 + $0x5cc] sm:$0xf0]  ;;  %v3508_v52 = vor.u32 %v4078_v44, %v3507_v43  ;;  %2413 = vmatpush.bf16.msrb.mxu2 %v3780_v42 }
 0x13f   : > { %v3763_v48 = vld [vmem:[%s4843_s30 + $0x6c0] sm:$0xf]  ;;  %v4142_v49 = vld [vmem:[%s4843_s30 + $0x6cc] sm:$0xf0]  ;;  %v3636_v55 = vor.u32 %v4110_v47, %v3635_v45  ;;  %2426 = vmatpush.bf16.msrb.mxu3 %v3908_v46 }
 0x140   : > { %v3891_v50 = vld [vmem:[%s4843_s30 + $0x7c0] sm:$0xf]  ;;  %v4174_v51 = vld [vmem:[%s4843_s30 + $0x7cc] sm:$0xf0]  ;;  %v3764_v56 = vor.u32 %v4142_v49, %v3763_v48  ;;  %2388 = vmatpush.bf16.msrb.mxu0 %v3508_v52 }
 0x141   : > { %v3491_v53 = vld [vmem:[%s4843_s30 + $0x4a0] sm:$0xf]  ;;  %v4074_v54 = vld [vmem:[%s4843_s30 + $0x4ac] sm:$0xf0]  ;;  %v3892_v60 = vor.u32 %v4174_v51, %v3891_v50  ;;  %2401 = vmatpush.bf16.msrb.mxu1 %v3636_v55 }
 0x142   : > { %v3619_v57 = vld [vmem:[%s4843_s30 + $0x5a0] sm:$0xf]  ;;  %v4106_v58 = vld [vmem:[%s4843_s30 + $0x5ac] sm:$0xf0]  ;;  %v3492_v1 = vor.u32 %v4074_v54, %v3491_v53  ;;  %2414 = vmatpush.bf16.msrb.mxu2 %v3764_v56 }
 0x143   : > { %v3747_v61 = vld [vmem:[%s4843_s30 + $0x6a0] sm:$0xf]  ;;  %v4138_v62 = vld [vmem:[%s4843_s30 + $0x6ac] sm:$0xf0]  ;;  %v3620_v3 = vor.u32 %v4106_v58, %v3619_v57  ;;  %2427 = vmatpush.bf16.msrb.mxu3 %v3892_v60 }
 0x144   : > { %v3875_v63 = vld [vmem:[%s4843_s30 + $0x7a0] sm:$0xf]  ;;  %v4170_v0 = vld [vmem:[%s4843_s30 + $0x7ac] sm:$0xf0]  ;;  %v3748_v4 = vor.u32 %v4138_v62, %v3747_v61  ;;  %2389 = vmatpush.bf16.msrb.mxu0 %v3492_v1 }
 0x145   : > { %v3475_v2 = vld [vmem:[%s4843_s30 + $0x480] sm:$0xf]  ;;  %v4070_v5 = vld [vmem:[%s4843_s30 + $0x48c] sm:$0xf0]  ;;  %v3876_v8 = vor.u32 %v4170_v0, %v3875_v63  ;;  %2402 = vmatpush.bf16.msrb.mxu1 %v3620_v3 }
 0x146   : > { %v3603_v6 = vld [vmem:[%s4843_s30 + $0x580] sm:$0xf]  ;;  %v4102_v7 = vld [vmem:[%s4843_s30 + $0x58c] sm:$0xf0]  ;;  %v3476_v15 = vor.u32 %v4070_v5, %v3475_v2  ;;  %2415 = vmatpush.bf16.msrb.mxu2 %v3748_v4 }
 0x147   : > { %v3731_v9 = vld [vmem:[%s4843_s30 + $0x680] sm:$0xf]  ;;  %v4134_v10 = vld [vmem:[%s4843_s30 + $0x68c] sm:$0xf0]  ;;  %v3604_v20 = vor.u32 %v4102_v7, %v3603_v6  ;;  %2428 = vmatpush.bf16.msrb.mxu3 %v3876_v8  ;;  %v3952_v6 = vld [vmem:[%s4843_s30 + $0xe4] sm:$0xf] }
 0x148   : > { %v3859_v11 = vld [vmem:[%s4843_s30 + $0x780] sm:$0xf]  ;;  %v4166_v12 = vld [vmem:[%s4843_s30 + $0x78c] sm:$0xf0]  ;;  %v3732_v21 = vor.u32 %v4134_v10, %v3731_v9  ;;  %2390 = vmatpush.bf16.msrb.mxu0 %v3476_v15  ;;  %v3013_v7 = vld [vmem:[%s4843_s30 + $0xf0] sm:$0xf0] }
 0x149   : > { %v3459_v13 = vld [vmem:[%s4843_s30 + $0x460] sm:$0xf]  ;;  %v4066_v14 = vld [vmem:[%s4843_s30 + $0x46c] sm:$0xf0]  ;;  %v3860_v24 = vor.u32 %v4166_v12, %v3859_v11  ;;  %2403 = vmatpush.bf16.msrb.mxu1 %v3604_v20  ;;  %v3984_v8 = vld [vmem:[%s4843_s30 + $0x1e4] sm:$0xf] }
 0x14a   : > { %v3587_v16 = vld [vmem:[%s4843_s30 + $0x560] sm:$0xf]  ;;  %v4098_v17 = vld [vmem:[%s4843_s30 + $0x56c] sm:$0xf0]  ;;  %v3460_v33 = vor.u32 %v4066_v14, %v3459_v13  ;;  %2416 = vmatpush.bf16.msrb.mxu2 %v3732_v21  ;;  %v3141_v9 = vld [vmem:[%s4843_s30 + $0x1f0] sm:$0xf0]  ;;  %v3016_v21 = vor.u32 %v3952_v6, %v3013_v7 }
 0x14b   : > { %v3715_v18 = vld [vmem:[%s4843_s30 + $0x660] sm:$0xf]  ;;  %v4130_v19 = vld [vmem:[%s4843_s30 + $0x66c] sm:$0xf0]  ;;  %v3588_v34 = vor.u32 %v4098_v17, %v3587_v16  ;;  %2429 = vmatpush.bf16.msrb.mxu3 %v3860_v24  ;;  %v4016_v10 = vld [vmem:[%s4843_s30 + $0x2e4] sm:$0xf]  ;;  %v3144_v24 = vor.u32 %v3984_v8, %v3141_v9 }
 0x14c   : > { %v777_v22 = vld.sshfl [vmem:[#allocation1 + $0x10] sm:$0xff pattern:$0x73625140]  ;;  %v775_v23 = vld.sshfl [vmem:[#allocation1] sm:$0xff pattern:$0x73625140]  ;;  %v3716_v35 = vor.u32 %v4130_v19, %v3715_v18  ;;  %2391 = vmatpush.bf16.msrb.mxu0 %v3460_v33 }
 0x14d   : > { %v4950_v25 = vpack.c.bf16 %v777_v22, %v777_v22  ;;  %v4952_v26 = vpack.c.bf16 %v775_v23, %v775_v23  ;;  %v778_v27 = vld.sshfl [vmem:[#allocation1 + $0x18] sm:$0xff pattern:$0x73625140]  ;;  %v776_v28 = vld.sshfl [vmem:[#allocation1 + $0x8] sm:$0xff pattern:$0x73625140]  ;;  %2404 = vmatpush.bf16.msrb.mxu1 %v3588_v34 }
 0x14e   : > { %v3843_v29 = vld [vmem:[%s4843_s30 + $0x760] sm:$0xf]  ;;  %v4162_v30 = vld [vmem:[%s4843_s30 + $0x76c] sm:$0xf0]  ;;  %v4956_v31 = vpack.c.bf16 %v778_v27, %v778_v27  ;;  %v4958_v32 = vpack.c.bf16 %v776_v28, %v776_v28  ;;  %2417 = vmatpush.bf16.msrb.mxu2 %v3716_v35  ;;  %v3269_v12 = vld [vmem:[%s4843_s30 + $0x2f0] sm:$0xf0] }
 0x14f   : > { %2369 = vmatmul.bf16.vlgmr.msra.gmra.mxu2 %v4950_v25  ;;  %v3443_v36 = vld [vmem:[%s4843_s30 + $0x440] sm:$0xf]  ;;  %v4062_v37 = vld [vmem:[%s4843_s30 + $0x44c] sm:$0xf0]  ;;  %v3844_v39 = vor.u32 %v4162_v30, %v3843_v29  ;;  %2343 = vmatmul.bf16.vlgmr.msra.gmra.mxu0 %v4952_v26  ;;  %v4048_v13 = vld [vmem:[%s4843_s30 + $0x3e4] sm:$0xf]  ;;  %v3272_v27 = vor.u32 %v4016_v10, %v3269_v12 }
 0x150   : > { %v3571_v38 = vld [vmem:[%s4843_s30 + $0x540] sm:$0xf]  ;;  %v4094_v40 = vld [vmem:[%s4843_s30 + $0x54c] sm:$0xf0]  ;;  %2382 = vmatmul.bf16.vlgmr.msra.gmra.mxu3 %v4956_v31  ;;  %2356 = vmatmul.bf16.vlgmr.msra.gmra.mxu1 %v4958_v32  ;;  %v3444_v45 = vor.u32 %v4062_v37, %v3443_v36  ;;  %v3397_v14 = vld [vmem:[%s4843_s30 + $0x3f0] sm:$0xf0] }
 0x151   : > { %v3699_v41 = vld [vmem:[%s4843_s30 + $0x640] sm:$0xf]  ;;  %v4126_v42 = vld [vmem:[%s4843_s30 + $0x64c] sm:$0xf0]  ;;  %v3572_v48 = vor.u32 %v4094_v40, %v3571_v38  ;;  %2430 = vmatpush.bf16.msrb.mxu3 %v3844_v39  ;;  %v3948_v17 = vld [vmem:[%s4843_s30 + $0xc4] sm:$0xf]  ;;  %v3400_v30 = vor.u32 %v4048_v13, %v3397_v14 }
 0x152   : > { %v3827_v43 = vld [vmem:[%s4843_s30 + $0x740] sm:$0xf]  ;;  %v4158_v44 = vld [vmem:[%s4843_s30 + $0x74c] sm:$0xf0]  ;;  %v3700_v49 = vor.u32 %v4126_v42, %v3699_v41  ;;  %2392 = vmatpush.bf16.msrb.mxu0 %v3444_v45  ;;  %v2997_v18 = vld [vmem:[%s4843_s30 + $0xd0] sm:$0xf0] }
 0x153   : > { %v3427_v46 = vld [vmem:[%s4843_s30 + $0x420] sm:$0xf]  ;;  %v4058_v47 = vld [vmem:[%s4843_s30 + $0x42c] sm:$0xf0]  ;;  %v3828_v53 = vor.u32 %v4158_v44, %v3827_v43  ;;  %2405 = vmatpush.bf16.msrb.mxu1 %v3572_v48  ;;  %v3980_v28 = vld [vmem:[%s4843_s30 + $0x1c4] sm:$0xf]  ;;  %v3000_v41 = vor.u32 %v3948_v17, %v2997_v18 }
 0x154   : > { %v3555_v50 = vld [vmem:[%s4843_s30 + $0x520] sm:$0xf]  ;;  %v4090_v51 = vld [vmem:[%s4843_s30 + $0x52c] sm:$0xf0]  ;;  %v3428_v59 = vor.u32 %v4058_v47, %v3427_v46  ;;  %2418 = vmatpush.bf16.msrb.mxu2 %v3700_v49  ;;  %v3125_v33 = vld [vmem:[%s4843_s30 + $0x1d0] sm:$0xf0] }
 0x155   : > { %v769_v52 = vld [vmem:[%s5445_s0 + $0x8] sm:$0xff]  ;;  %v4122_v55 = vld [vmem:[%s4843_s30 + $0x62c] sm:$0xf0]  ;;  %v3556_v63 = vor.u32 %v4090_v51, %v3555_v50  ;;  %2431 = vmatpush.bf16.msrb.mxu3 %v3828_v53  ;;  %v3253_v35 = vld [vmem:[%s4843_s30 + $0x2d0] sm:$0xf0]  ;;  %v3128_v43 = vor.u32 %v3980_v28, %v3125_v33 }
 0x156   : > { %v3683_v54 = vld [vmem:[%s4843_s30 + $0x620] sm:$0xf]  ;;  %774 = vst [vmem:[#allocation1 + $0x20] ss:$4 sm:$0xff] %v769_v52  ;;  %v4154_v57 = vld [vmem:[%s4843_s30 + $0x72c] sm:$0xf0]  ;;  %2393 = vmatpush.bf16.msrb.mxu0 %v3428_v59 }
 0x157   : > { %v3811_v56 = vld [vmem:[%s4843_s30 + $0x720] sm:$0xf]  ;;  %v4054_v60 = vld [vmem:[%s4843_s30 + $0x40c] sm:$0xf0]  ;;  %v3684_v0 = vor.u32 %v4122_v55, %v3683_v54  ;;  %2406 = vmatpush.bf16.msrb.mxu1 %v3556_v63  ;;  %v4012_v34 = vld [vmem:[%s4843_s30 + $0x2c4] sm:$0xf] }
 0x158   : > { %v3411_v58 = vld [vmem:[%s4843_s30 + $0x400] sm:$0xf]  ;;  %v4086_v62 = vld [vmem:[%s4843_s30 + $0x50c] sm:$0xf0]  ;;  %v3812_v4 = vor.u32 %v4154_v57, %v3811_v56  ;;  %v4044_v37 = vld [vmem:[%s4843_s30 + $0x3c4] sm:$0xf]  ;;  %v3256_v44 = vor.u32 %v4012_v34, %v3253_v35 }
 0x159   : > { %v3539_v61 = vld [vmem:[%s4843_s30 + $0x500] sm:$0xf]  ;;  %v4118_v2 = vld [vmem:[%s4843_s30 + $0x60c] sm:$0xf0]  ;;  %v3412_v11 = vor.u32 %v4054_v60, %v3411_v58  ;;  %2419 = vmatpush.bf16.msrb.mxu2 %v3684_v0  ;;  %v3381_v38 = vld [vmem:[%s4843_s30 + $0x3d0] sm:$0xf0] }
 0x15a   : > { %v3667_v1 = vld [vmem:[%s4843_s30 + $0x600] sm:$0xf]  ;;  %v4150_v5 = vld [vmem:[%s4843_s30 + $0x70c] sm:$0xf0]  ;;  %v3540_v15 = vor.u32 %v4086_v62, %v3539_v61  ;;  %2432 = vmatpush.bf16.msrb.mxu3 %v3812_v4  ;;  %v3944_v45 = vld [vmem:[%s4843_s30 + $0xa4] sm:$0xf]  ;;  %v3384_v48 = vor.u32 %v4044_v37, %v3381_v38 }
 0x15b   : > { %v3795_v3 = vld [vmem:[%s4843_s30 + $0x700] sm:$0xf]  ;;  %v3668_v16 = vor.u32 %v4118_v2, %v3667_v1  ;;  %2394 = vmatpush.bf16.msrb.mxu0 %v3412_v11  ;;  %v2981_v46 = vld [vmem:[%s4843_s30 + $0xb0] sm:$0xf0]  ;;  %v3976_v47 = vld [vmem:[%s4843_s30 + $0x1a4] sm:$0xf] }
 0x15c   : > { %v3796_v20 = vor.u32 %v4150_v5, %v3795_v3  ;;  %2407 = vmatpush.bf16.msrb.mxu1 %v3540_v15  ;;  %v3109_v49 = vld [vmem:[%s4843_s30 + $0x1b0] sm:$0xf0]  ;;  %v4008_v50 = vld [vmem:[%s4843_s30 + $0x2a4] sm:$0xf]  ;;  %v2984_v54 = vor.u32 %v3944_v45, %v2981_v46 }
 0x15d   : > { %v781_v19 = vld.sshfl [vmem:[#allocation1 + $0x30] sm:$0xff pattern:$0x73625140]  ;;  %v779_v22 = vld.sshfl [vmem:[#allocation1 + $0x20] sm:$0xff pattern:$0x73625140]  ;;  %2420 = vmatpush.bf16.msrb.mxu2 %v3668_v16  ;;  %v3112_v55 = vor.u32 %v3976_v47, %v3109_v49 }
 0x15e   : > { %v782_v23 = vld.sshfl [vmem:[#allocation1 + $0x38] sm:$0xff pattern:$0x73625140]  ;;  %v780_v29 = vld.sshfl [vmem:[#allocation1 + $0x28] sm:$0xff pattern:$0x73625140]  ;;  %v5005_v36 = vpack.c.bf16 %v781_v19, %v781_v19  ;;  %v5009_v39 = vpack.c.bf16 %v779_v22, %v779_v22  ;;  %2433 = vmatpush.bf16.msrb.mxu3 %v3796_v20 }
 0x15f   : > { %v5011_v40 = vpack.c.bf16 %v782_v23, %v782_v23  ;;  %2439 = vmatpush.bf16.msra.mxu0 %v3016_v21  ;;  %v5013_v42 = vpack.c.bf16 %v780_v29, %v780_v29  ;;  %v3237_v51 = vld [vmem:[%s4843_s30 + $0x2b0] sm:$0xf0]  ;;  %v4040_v52 = vld [vmem:[%s4843_s30 + $0x3a4] sm:$0xf] }
 0x160   : > { %2452 = vmatpush.bf16.msra.mxu1 %v3144_v24  ;;  %2421 = vmatmul.bf16.vlgmr.msrb.gmra.mxu2 %v5005_v36  ;;  %v3365_v53 = vld [vmem:[%s4843_s30 + $0x3b0] sm:$0xf0]  ;;  %v3240_v56 = vor.u32 %v4008_v50, %v3237_v51  ;;  %v3940_v57 = vld [vmem:[%s4843_s30 + $0x84] sm:$0xf] }
 0x161   : > { %2465 = vmatpush.bf16.msra.mxu2 %v3272_v27  ;;  %2395 = vmatmul.bf16.vlgmr.msrb.gmra.mxu0 %v5009_v39  ;;  %v2965_v58 = vld [vmem:[%s4843_s30 + $0x90] sm:$0xf0]  ;;  %v3972_v59 = vld [vmem:[%s4843_s30 + $0x184] sm:$0xf]  ;;  %v3368_v60 = vor.u32 %v4040_v52, %v3365_v53 }
 0x162   : > { %2478 = vmatpush.bf16.msra.mxu3 %v3400_v30  ;;  %2408 = vmatmul.bf16.vlgmr.msrb.gmra.mxu1 %v5013_v42  ;;  %v3093_v61 = vld [vmem:[%s4843_s30 + $0x190] sm:$0xf0]  ;;  %v4004_v62 = vld [vmem:[%s4843_s30 + $0x284] sm:$0xf]  ;;  %v2968_v2 = vor.u32 %v3940_v57, %v2965_v58 }
 0x163   : > { %2434 = vmatmul.bf16.vlgmr.msrb.gmra.mxu3 %v5011_v40  ;;  %2440 = vmatpush.bf16.msra.mxu0 %v3000_v41  ;;  %v3221_v63 = vld [vmem:[%s4843_s30 + $0x290] sm:$0xf0]  ;;  %v4036_v0 = vld [vmem:[%s4843_s30 + $0x384] sm:$0xf]  ;;  %v3096_v3 = vor.u32 %v3972_v59, %v3093_v61 }
 0x164   : > { %2453 = vmatpush.bf16.msra.mxu1 %v3128_v43  ;;  %v3349_v1 = vld [vmem:[%s4843_s30 + $0x390] sm:$0xf0]  ;;  %v3224_v4 = vor.u32 %v4004_v62, %v3221_v63  ;;  %v3936_v5 = vld [vmem:[%s4843_s30 + $0x64] sm:$0xf] }
 0x165   : > { %2466 = vmatpush.bf16.msra.mxu2 %v3256_v44  ;;  %v2949_v6 = vld [vmem:[%s4843_s30 + $0x70] sm:$0xf0]  ;;  %v3968_v7 = vld [vmem:[%s4843_s30 + $0x164] sm:$0xf]  ;;  %v3352_v8 = vor.u32 %v4036_v0, %v3349_v1 }
 0x166   : > { %2479 = vmatpush.bf16.msra.mxu3 %v3384_v48  ;;  %v3077_v9 = vld [vmem:[%s4843_s30 + $0x170] sm:$0xf0]  ;;  %v4000_v10 = vld [vmem:[%s4843_s30 + $0x264] sm:$0xf]  ;;  %v2952_v14 = vor.u32 %v3936_v5, %v2949_v6 }
 0x167   : > { %2441 = vmatpush.bf16.msra.mxu0 %v2984_v54  ;;  %v3205_v11 = vld [vmem:[%s4843_s30 + $0x270] sm:$0xf0]  ;;  %v4032_v12 = vld [vmem:[%s4843_s30 + $0x364] sm:$0xf]  ;;  %v3080_v15 = vor.u32 %v3968_v7, %v3077_v9 }
 0x168   : > { %2454 = vmatpush.bf16.msra.mxu1 %v3112_v55  ;;  %v3333_v13 = vld [vmem:[%s4843_s30 + $0x370] sm:$0xf0]  ;;  %v3208_v16 = vor.u32 %v4000_v10, %v3205_v11  ;;  %v3932_v17 = vld [vmem:[%s4843_s30 + $0x44] sm:$0xf] }
 0x169   : > { %2467 = vmatpush.bf16.msra.mxu2 %v3240_v56  ;;  %v2933_v18 = vld [vmem:[%s4843_s30 + $0x50] sm:$0xf0]  ;;  %v3964_v19 = vld [vmem:[%s4843_s30 + $0x144] sm:$0xf]  ;;  %v3336_v20 = vor.u32 %v4032_v12, %v3333_v13 }
 0x16a   : > { %2480 = vmatpush.bf16.msra.mxu3 %v3368_v60  ;;  %v3061_v21 = vld [vmem:[%s4843_s30 + $0x150] sm:$0xf0]  ;;  %v3996_v22 = vld [vmem:[%s4843_s30 + $0x244] sm:$0xf]  ;;  %v2936_v28 = vor.u32 %v3932_v17, %v2933_v18 }
 0x16b   : > { %2442 = vmatpush.bf16.msra.mxu0 %v2968_v2  ;;  %v3189_v23 = vld [vmem:[%s4843_s30 + $0x250] sm:$0xf0]  ;;  %v4028_v24 = vld [vmem:[%s4843_s30 + $0x344] sm:$0xf]  ;;  %v3064_v29 = vor.u32 %v3964_v19, %v3061_v21 }
 0x16c   : > { %2455 = vmatpush.bf16.msra.mxu1 %v3096_v3  ;;  %v3317_v27 = vld [vmem:[%s4843_s30 + $0x350] sm:$0xf0]  ;;  %v3192_v30 = vor.u32 %v3996_v22, %v3189_v23  ;;  %v3928_v33 = vld [vmem:[%s4843_s30 + $0x24] sm:$0xf] }
 0x16d   : > { %2468 = vmatpush.bf16.msra.mxu2 %v3224_v4  ;;  %v2917_v34 = vld [vmem:[%s4843_s30 + $0x30] sm:$0xf0]  ;;  %v3960_v35 = vld [vmem:[%s4843_s30 + $0x124] sm:$0xf]  ;;  %v3320_v37 = vor.u32 %v4028_v24, %v3317_v27 }
 0x16e   : > { %2481 = vmatpush.bf16.msra.mxu3 %v3352_v8  ;;  %v3045_v38 = vld [vmem:[%s4843_s30 + $0x130] sm:$0xf0]  ;;  %v3992_v41 = vld [vmem:[%s4843_s30 + $0x224] sm:$0xf]  ;;  %v2920_v46 = vor.u32 %v3928_v33, %v2917_v34 }
 0x16f   : > { %2443 = vmatpush.bf16.msra.mxu0 %v2952_v14  ;;  %v3173_v43 = vld [vmem:[%s4843_s30 + $0x230] sm:$0xf0]  ;;  %v4024_v44 = vld [vmem:[%s4843_s30 + $0x324] sm:$0xf]  ;;  %v3048_v49 = vor.u32 %v3960_v35, %v3045_v38 }
 0x170   : > { %2456 = vmatpush.bf16.msra.mxu1 %v3080_v15  ;;  %v3301_v45 = vld [vmem:[%s4843_s30 + $0x330] sm:$0xf0]  ;;  %v3924_v47 = vld [vmem:[%s4843_s30 + $0x4] sm:$0xf]  ;;  %v3176_v50 = vor.u32 %v3992_v41, %v3173_v43 }
 0x171   : > { %2469 = vmatpush.bf16.msra.mxu2 %v3208_v16  ;;  %v2901_v48 = vld [vmem:[%s4843_s30 + $0x10] sm:$0xf0]  ;;  %v3956_v51 = vld [vmem:[%s4843_s30 + $0x104] sm:$0xf]  ;;  %v3304_v54 = vor.u32 %v4024_v44, %v3301_v45 }
 0x172   : > { %2482 = vmatpush.bf16.msra.mxu3 %v3336_v20  ;;  %v3029_v52 = vld [vmem:[%s4843_s30 + $0x110] sm:$0xf0]  ;;  %v3988_v53 = vld [vmem:[%s4843_s30 + $0x204] sm:$0xf]  ;;  %v2904_v61 = vor.u32 %v3924_v47, %v2901_v48 }
 0x173   : > { %2444 = vmatpush.bf16.msra.mxu0 %v2936_v28  ;;  %v3157_v55 = vld [vmem:[%s4843_s30 + $0x210] sm:$0xf0]  ;;  %v4020_v56 = vld [vmem:[%s4843_s30 + $0x304] sm:$0xf]  ;;  %v3032_v1 = vor.u32 %v3956_v51, %v3029_v52 }
 0x174   : > { %2457 = vmatpush.bf16.msra.mxu1 %v3064_v29  ;;  %v3285_v57 = vld [vmem:[%s4843_s30 + $0x310] sm:$0xf0]  ;;  %v4080_v58 = vld [vmem:[%s4843_s30 + $0x4e4] sm:$0xf]  ;;  %v3160_v2 = vor.u32 %v3988_v53, %v3157_v55 }
 0x175   : > { %2470 = vmatpush.bf16.msra.mxu2 %v3192_v30  ;;  %v3525_v59 = vld [vmem:[%s4843_s30 + $0x4f0] sm:$0xf0]  ;;  %v4112_v60 = vld [vmem:[%s4843_s30 + $0x5e4] sm:$0xf]  ;;  %v3288_v5 = vor.u32 %v4020_v56, %v3285_v57 }
 0x176   : > { %2483 = vmatpush.bf16.msra.mxu3 %v3320_v37  ;;  %v3653_v62 = vld [vmem:[%s4843_s30 + $0x5f0] sm:$0xf0]  ;;  %v4144_v63 = vld [vmem:[%s4843_s30 + $0x6e4] sm:$0xf]  ;;  %v3528_v6 = vor.u32 %v4080_v58, %v3525_v59 }
 0x177   : > { %2445 = vmatpush.bf16.msra.mxu0 %v2920_v46  ;;  %v3781_v0 = vld [vmem:[%s4843_s30 + $0x6f0] sm:$0xf0]  ;;  %v4176_v3 = vld [vmem:[%s4843_s30 + $0x7e4] sm:$0xf]  ;;  %v3656_v7 = vor.u32 %v4112_v60, %v3653_v62 }
 0x178   : > { %2458 = vmatpush.bf16.msra.mxu1 %v3048_v49  ;;  %v3909_v4 = vld [vmem:[%s4843_s30 + $0x7f0] sm:$0xf0]  ;;  %v3784_v8 = vor.u32 %v4144_v63, %v3781_v0  ;;  %v4076_v9 = vld [vmem:[%s4843_s30 + $0x4c4] sm:$0xf] }
 0x179   : > { %2471 = vmatpush.bf16.msra.mxu2 %v3176_v50  ;;  %v3509_v10 = vld [vmem:[%s4843_s30 + $0x4d0] sm:$0xf0]  ;;  %v4108_v11 = vld [vmem:[%s4843_s30 + $0x5c4] sm:$0xf]  ;;  %v3912_v12 = vor.u32 %v4176_v3, %v3909_v4 }
 0x17a   : > { %2484 = vmatpush.bf16.msra.mxu3 %v3304_v54  ;;  %v3637_v13 = vld [vmem:[%s4843_s30 + $0x5d0] sm:$0xf0]  ;;  %v4140_v14 = vld [vmem:[%s4843_s30 + $0x6c4] sm:$0xf]  ;;  %v3512_v18 = vor.u32 %v4076_v9, %v3509_v10 }
 0x17b   : > { %2446 = vmatpush.bf16.msra.mxu0 %v2904_v61  ;;  %v3765_v15 = vld [vmem:[%s4843_s30 + $0x6d0] sm:$0xf0]  ;;  %v4172_v16 = vld [vmem:[%s4843_s30 + $0x7c4] sm:$0xf]  ;;  %v3640_v19 = vor.u32 %v4108_v11, %v3637_v13 }
 0x17c   : > { %2459 = vmatpush.bf16.msra.mxu1 %v3032_v1  ;;  %v3893_v17 = vld [vmem:[%s4843_s30 + $0x7d0] sm:$0xf0]  ;;  %v3768_v20 = vor.u32 %v4140_v14, %v3765_v15  ;;  %v4072_v21 = vld [vmem:[%s4843_s30 + $0x4a4] sm:$0xf] }
 0x17d   : > { %2472 = vmatpush.bf16.msra.mxu2 %v3160_v2  ;;  %v3493_v22 = vld [vmem:[%s4843_s30 + $0x4b0] sm:$0xf0]  ;;  %v4104_v23 = vld [vmem:[%s4843_s30 + $0x5a4] sm:$0xf]  ;;  %v3896_v24 = vor.u32 %v4172_v16, %v3893_v17 }
 0x17e   : > { %2485 = vmatpush.bf16.msra.mxu3 %v3288_v5  ;;  %v3621_v27 = vld [vmem:[%s4843_s30 + $0x5b0] sm:$0xf0]  ;;  %v4136_v28 = vld [vmem:[%s4843_s30 + $0x6a4] sm:$0xf]  ;;  %2447 = vmatmul.bf16.vlgmr.msra.gmra.mxu0 %v4952_v26  ;;  %v3496_v34 = vor.u32 %v4072_v21, %v3493_v22 }
 0x17f   : > { %2491 = vmatpush.bf16.msrb.mxu0 %v3528_v6  ;;  %v3749_v29 = vld [vmem:[%s4843_s30 + $0x6b0] sm:$0xf0]  ;;  %v4168_v30 = vld [vmem:[%s4843_s30 + $0x7a4] sm:$0xf]  ;;  %2460 = vmatmul.bf16.vlgmr.msra.gmra.mxu1 %v4958_v32  ;;  %v3624_v35 = vor.u32 %v4104_v23, %v3621_v27 }
 0x180   : > { %2504 = vmatpush.bf16.msrb.mxu1 %v3656_v7  ;;  %2473 = vmatmul.bf16.vlgmr.msra.gmra.mxu2 %v4950_v25  ;;  %v3877_v33 = vld [vmem:[%s4843_s30 + $0x7b0] sm:$0xf0]  ;;  %v3752_v37 = vor.u32 %v4136_v28, %v3749_v29  ;;  %v4068_v38 = vld [vmem:[%s4843_s30 + $0x484] sm:$0xf] }
 0x181   : > { %2517 = vmatpush.bf16.msrb.mxu2 %v3784_v8  ;;  %2486 = vmatmul.bf16.vlgmr.msra.gmra.mxu3 %v4956_v31  ;;  %v3477_v41 = vld [vmem:[%s4843_s30 + $0x490] sm:$0xf0]  ;;  %v4100_v43 = vld [vmem:[%s4843_s30 + $0x584] sm:$0xf]  ;;  %v3880_v44 = vor.u32 %v4168_v30, %v3877_v33 }
 0x182   : > { %2530 = vmatpush.bf16.msrb.mxu3 %v3912_v12  ;;  %v3605_v45 = vld [vmem:[%s4843_s30 + $0x590] sm:$0xf0]  ;;  %v4132_v46 = vld [vmem:[%s4843_s30 + $0x684] sm:$0xf]  ;;  %v3480_v50 = vor.u32 %v4068_v38, %v3477_v41  ;;  %v3019_v41 = vld [vmem:[%s4843_s30 + $0xe8] sm:$0xf] }
 0x183   : > { %2492 = vmatpush.bf16.msrb.mxu0 %v3512_v18  ;;  %v3733_v47 = vld [vmem:[%s4843_s30 + $0x690] sm:$0xf0]  ;;  %v4164_v48 = vld [vmem:[%s4843_s30 + $0x784] sm:$0xf]  ;;  %v3608_v51 = vor.u32 %v4100_v43, %v3605_v45  ;;  %v3955_v43 = vld [vmem:[%s4843_s30 + $0xf4] sm:$0xf0] }
 0x184   : > { %2505 = vmatpush.bf16.msrb.mxu1 %v3640_v19  ;;  %v3861_v49 = vld [vmem:[%s4843_s30 + $0x790] sm:$0xf0]  ;;  %v3736_v52 = vor.u32 %v4132_v46, %v3733_v47  ;;  %v4064_v53 = vld [vmem:[%s4843_s30 + $0x464] sm:$0xf]  ;;  %v3987_v46 = vld [vmem:[%s4843_s30 + $0x1f4] sm:$0xf0] }
 0x185   : > { %2518 = vmatpush.bf16.msrb.mxu2 %v3768_v20  ;;  %v3461_v54 = vld [vmem:[%s4843_s30 + $0x470] sm:$0xf0]  ;;  %v4096_v55 = vld [vmem:[%s4843_s30 + $0x564] sm:$0xf]  ;;  %v3864_v56 = vor.u32 %v4164_v48, %v3861_v49  ;;  %v3275_v47 = vld [vmem:[%s4843_s30 + $0x2e8] sm:$0xf] }
 0x186   : > { %2531 = vmatpush.bf16.msrb.mxu3 %v3896_v24  ;;  %v3589_v57 = vld [vmem:[%s4843_s30 + $0x570] sm:$0xf0]  ;;  %v4128_v58 = vld [vmem:[%s4843_s30 + $0x664] sm:$0xf]  ;;  %v3464_v62 = vor.u32 %v4064_v53, %v3461_v54  ;;  %v4019_v48 = vld [vmem:[%s4843_s30 + $0x2f4] sm:$0xf0]  ;;  %v3020_v54 = vor.u32 %v3955_v43, %v3019_v41 }
 0x187   : > { %2493 = vmatpush.bf16.msrb.mxu0 %v3496_v34  ;;  %v3717_v59 = vld [vmem:[%s4843_s30 + $0x670] sm:$0xf0]  ;;  %v4160_v60 = vld [vmem:[%s4843_s30 + $0x764] sm:$0xf]  ;;  %v3592_v63 = vor.u32 %v4096_v55, %v3589_v57  ;;  %v3003_v57 = vld [vmem:[%s4843_s30 + $0xc8] sm:$0xf] }
 0x188   : > { %2506 = vmatpush.bf16.msrb.mxu1 %v3624_v35  ;;  %v3845_v61 = vld [vmem:[%s4843_s30 + $0x770] sm:$0xf0]  ;;  %v3720_v0 = vor.u32 %v4128_v58, %v3717_v59  ;;  %v4060_v1 = vld [vmem:[%s4843_s30 + $0x444] sm:$0xf]  ;;  %v3951_v58 = vld [vmem:[%s4843_s30 + $0xd4] sm:$0xf0] }
 0x189   : > { %2519 = vmatpush.bf16.msrb.mxu2 %v3752_v37  ;;  %v3445_v2 = vld [vmem:[%s4843_s30 + $0x450] sm:$0xf0]  ;;  %v4092_v3 = vld [vmem:[%s4843_s30 + $0x544] sm:$0xf]  ;;  %v3848_v4 = vor.u32 %v4160_v60, %v3845_v61  ;;  %v3131_v59 = vld [vmem:[%s4843_s30 + $0x1c8] sm:$0xf] }
 0x18a   : > { %2532 = vmatpush.bf16.msrb.mxu3 %v3880_v44  ;;  %v3573_v5 = vld [vmem:[%s4843_s30 + $0x550] sm:$0xf0]  ;;  %v4124_v6 = vld [vmem:[%s4843_s30 + $0x644] sm:$0xf]  ;;  %v3448_v10 = vor.u32 %v4060_v1, %v3445_v2  ;;  %v3147_v44 = vld [vmem:[%s4843_s30 + $0x1e8] sm:$0xf]  ;;  %v3004_v2 = vor.u32 %v3951_v58, %v3003_v57 }
 0x18b   : > { %2494 = vmatpush.bf16.msrb.mxu0 %v3480_v50  ;;  %v3701_v7 = vld [vmem:[%s4843_s30 + $0x650] sm:$0xf0]  ;;  %v4156_v8 = vld [vmem:[%s4843_s30 + $0x744] sm:$0xf]  ;;  %v3576_v11 = vor.u32 %v4092_v3, %v3573_v5  ;;  %v3148_v55 = vor.u32 %v3987_v46, %v3147_v44  ;;  %v3983_v61 = vld [vmem:[%s4843_s30 + $0x1d4] sm:$0xf0] }
 0x18c   : > { %2507 = vmatpush.bf16.msrb.mxu1 %v3608_v51  ;;  %v3829_v9 = vld [vmem:[%s4843_s30 + $0x750] sm:$0xf0]  ;;  %v3704_v12 = vor.u32 %v4124_v6, %v3701_v7  ;;  %v4056_v13 = vld [vmem:[%s4843_s30 + $0x424] sm:$0xf]  ;;  %v3403_v51 = vld [vmem:[%s4843_s30 + $0x3e8] sm:$0xf]  ;;  %v3132_v3 = vor.u32 %v3983_v61, %v3131_v59 }
 0x18d   : > { %2520 = vmatpush.bf16.msrb.mxu2 %v3736_v52  ;;  %v3429_v14 = vld [vmem:[%s4843_s30 + $0x430] sm:$0xf0]  ;;  %v4088_v15 = vld [vmem:[%s4843_s30 + $0x524] sm:$0xf]  ;;  %v3832_v16 = vor.u32 %v4156_v8, %v3829_v9  ;;  %v4051_v52 = vld [vmem:[%s4843_s30 + $0x3f4] sm:$0xf0] }
 0x18e   : > { %2533 = vmatpush.bf16.msrb.mxu3 %v3864_v56  ;;  %v3557_v17 = vld [vmem:[%s4843_s30 + $0x530] sm:$0xf0]  ;;  %v4120_v18 = vld [vmem:[%s4843_s30 + $0x624] sm:$0xf]  ;;  %v3432_v22 = vor.u32 %v4056_v13, %v3429_v14  ;;  %v3276_v56 = vor.u32 %v4019_v48, %v3275_v47  ;;  %v3404_v60 = vor.u32 %v4051_v52, %v3403_v51  ;;  %v4047_v1 = vld [vmem:[%s4843_s30 + $0x3d4] sm:$0xf0] }
 0x18f   : > { %2495 = vmatpush.bf16.msrb.mxu0 %v3464_v62  ;;  %v3685_v19 = vld [vmem:[%s4843_s30 + $0x630] sm:$0xf0]  ;;  %v4152_v20 = vld [vmem:[%s4843_s30 + $0x724] sm:$0xf]  ;;  %v3560_v27 = vor.u32 %v4088_v15, %v3557_v17  ;;  %v3259_v62 = vld [vmem:[%s4843_s30 + $0x2c8] sm:$0xf] }
 0x190   : > { %2508 = vmatpush.bf16.msrb.mxu1 %v3592_v63  ;;  %v3813_v21 = vld [vmem:[%s4843_s30 + $0x730] sm:$0xf0]  ;;  %v4052_v23 = vld [vmem:[%s4843_s30 + $0x404] sm:$0xf]  ;;  %v3688_v28 = vor.u32 %v4120_v18, %v3685_v19  ;;  %v4015_v63 = vld [vmem:[%s4843_s30 + $0x2d4] sm:$0xf0] }
 0x191   : > { %2521 = vmatpush.bf16.msrb.mxu2 %v3720_v0  ;;  %v3413_v24 = vld [vmem:[%s4843_s30 + $0x410] sm:$0xf0]  ;;  %v4084_v29 = vld [vmem:[%s4843_s30 + $0x504] sm:$0xf]  ;;  %v3816_v34 = vor.u32 %v4152_v20, %v3813_v21  ;;  %v3387_v0 = vld [vmem:[%s4843_s30 + $0x3c8] sm:$0xf] }
 0x192   : > { %2534 = vmatpush.bf16.msrb.mxu3 %v3848_v4  ;;  %v3541_v30 = vld [vmem:[%s4843_s30 + $0x510] sm:$0xf0]  ;;  %v4116_v33 = vld [vmem:[%s4843_s30 + $0x604] sm:$0xf]  ;;  %v3416_v45 = vor.u32 %v4052_v23, %v3413_v24  ;;  %v3260_v4 = vor.u32 %v4015_v63, %v3259_v62  ;;  %v2987_v5 = vld [vmem:[%s4843_s30 + $0xa8] sm:$0xf]  ;;  %v3388_v8 = vor.u32 %v4047_v1, %v3387_v0 }
 0x193   : > { %2496 = vmatpush.bf16.msrb.mxu0 %v3448_v10  ;;  %v3669_v35 = vld [vmem:[%s4843_s30 + $0x610] sm:$0xf0]  ;;  %v4148_v37 = vld [vmem:[%s4843_s30 + $0x704] sm:$0xf]  ;;  %v3544_v49 = vor.u32 %v4084_v29, %v3541_v30  ;;  %v3947_v6 = vld [vmem:[%s4843_s30 + $0xb4] sm:$0xf0] }
 0x194   : > { %2509 = vmatpush.bf16.msrb.mxu1 %v3576_v11  ;;  %v3797_v38 = vld [vmem:[%s4843_s30 + $0x710] sm:$0xf0]  ;;  %v3672_v50 = vor.u32 %v4116_v33, %v3669_v35  ;;  %v3115_v7 = vld [vmem:[%s4843_s30 + $0x1a8] sm:$0xf]  ;;  %v3979_v9 = vld [vmem:[%s4843_s30 + $0x1b4] sm:$0xf0]  ;;  %v2988_v14 = vor.u32 %v3947_v6, %v2987_v5 }
 0x195   : > { %2522 = vmatpush.bf16.msrb.mxu2 %v3704_v12  ;;  %v3800_v53 = vor.u32 %v4148_v37, %v3797_v38  ;;  %v3243_v10 = vld [vmem:[%s4843_s30 + $0x2a8] sm:$0xf]  ;;  %v4011_v11 = vld [vmem:[%s4843_s30 + $0x2b4] sm:$0xf0]  ;;  %v3116_v15 = vor.u32 %v3979_v9, %v3115_v7 }
 0x196   : > { %2535 = vmatpush.bf16.msrb.mxu3 %v3832_v16  ;;  %v3371_v12 = vld [vmem:[%s4843_s30 + $0x3a8] sm:$0xf]  ;;  %v4043_v13 = vld [vmem:[%s4843_s30 + $0x3b4] sm:$0xf0]  ;;  %v3244_v16 = vor.u32 %v4011_v11, %v3243_v10 }
 0x197   : > { %2497 = vmatpush.bf16.msrb.mxu0 %v3432_v22  ;;  %v2971_v17 = vld [vmem:[%s4843_s30 + $0x88] sm:$0xf]  ;;  %v3943_v18 = vld [vmem:[%s4843_s30 + $0x94] sm:$0xf0]  ;;  %v3372_v20 = vor.u32 %v4043_v13, %v3371_v12 }
 0x198   : > { %2510 = vmatpush.bf16.msrb.mxu1 %v3560_v27  ;;  %v3099_v19 = vld [vmem:[%s4843_s30 + $0x188] sm:$0xf]  ;;  %v3975_v21 = vld [vmem:[%s4843_s30 + $0x194] sm:$0xf0] }
 0x199   : > { %2523 = vmatpush.bf16.msrb.mxu2 %v3688_v28  ;;  %v3227_v22 = vld [vmem:[%s4843_s30 + $0x288] sm:$0xf]  ;;  %v4007_v23 = vld [vmem:[%s4843_s30 + $0x294] sm:$0xf0]  ;;  %v2972_v28 = vor.u32 %v3943_v18, %v2971_v17  ;;  %v3100_v29 = vor.u32 %v3975_v21, %v3099_v19 }
 0x19a   : > { %2536 = vmatpush.bf16.msrb.mxu3 %v3816_v34  ;;  %v3355_v24 = vld [vmem:[%s4843_s30 + $0x388] sm:$0xf]  ;;  %v4039_v27 = vld [vmem:[%s4843_s30 + $0x394] sm:$0xf0]  ;;  %v3228_v30 = vor.u32 %v4007_v23, %v3227_v22 }
 0x19b   : > { %2498 = vmatpush.bf16.msrb.mxu0 %v3416_v45  ;;  %v2955_v33 = vld [vmem:[%s4843_s30 + $0x68] sm:$0xf]  ;;  %v3939_v34 = vld [vmem:[%s4843_s30 + $0x74] sm:$0xf0]  ;;  %v3356_v37 = vor.u32 %v4039_v27, %v3355_v24 }
 0x19c   : > { %2511 = vmatpush.bf16.msrb.mxu1 %v3544_v49  ;;  %v3083_v35 = vld [vmem:[%s4843_s30 + $0x168] sm:$0xf]  ;;  %v3971_v38 = vld [vmem:[%s4843_s30 + $0x174] sm:$0xf0]  ;;  %v2956_v46 = vor.u32 %v3939_v34, %v2955_v33 }
 0x19d   : > { %2524 = vmatpush.bf16.msrb.mxu2 %v3672_v50  ;;  %v3211_v41 = vld [vmem:[%s4843_s30 + $0x268] sm:$0xf]  ;;  %v4003_v43 = vld [vmem:[%s4843_s30 + $0x274] sm:$0xf0]  ;;  %v3084_v47 = vor.u32 %v3971_v38, %v3083_v35 }
 0x19e   : > { %2537 = vmatpush.bf16.msrb.mxu3 %v3800_v53  ;;  %2499 = vmatmul.bf16.vlgmr.msrb.gmra.mxu0 %v5009_v39  ;;  %v3339_v44 = vld [vmem:[%s4843_s30 + $0x368] sm:$0xf]  ;;  %v4035_v45 = vld [vmem:[%s4843_s30 + $0x374] sm:$0xf0]  ;;  %v3212_v48 = vor.u32 %v4003_v43, %v3211_v41 }
 0x19f   : > { %2543 = vmatpush.bf16.msra.mxu0 %v3020_v54  ;;  %2512 = vmatmul.bf16.vlgmr.msrb.gmra.mxu1 %v5013_v42  ;;  %v2939_v49 = vld [vmem:[%s4843_s30 + $0x48] sm:$0xf]  ;;  %v3935_v50 = vld [vmem:[%s4843_s30 + $0x54] sm:$0xf0]  ;;  %v3340_v52 = vor.u32 %v4035_v45, %v3339_v44 }
 0x1a0   : > { %2556 = vmatpush.bf16.msra.mxu1 %v3148_v55  ;;  %2525 = vmatmul.bf16.vlgmr.msrb.gmra.mxu2 %v5005_v36  ;;  %v3067_v51 = vld [vmem:[%s4843_s30 + $0x148] sm:$0xf]  ;;  %v3967_v53 = vld [vmem:[%s4843_s30 + $0x154] sm:$0xf0]  ;;  %v2940_v58 = vor.u32 %v3935_v50, %v2939_v49 }
 0x1a1   : > { %2569 = vmatpush.bf16.msra.mxu2 %v3276_v56  ;;  %2538 = vmatmul.bf16.vlgmr.msrb.gmra.mxu3 %v5011_v40  ;;  %v3195_v54 = vld [vmem:[%s4843_s30 + $0x248] sm:$0xf]  ;;  %v3999_v55 = vld [vmem:[%s4843_s30 + $0x254] sm:$0xf0]  ;;  %v3068_v59 = vor.u32 %v3967_v53, %v3067_v51 }
 0x1a2   : > { %2582 = vmatpush.bf16.msra.mxu3 %v3404_v60  ;;  %v3323_v56 = vld [vmem:[%s4843_s30 + $0x348] sm:$0xf]  ;;  %v4031_v57 = vld [vmem:[%s4843_s30 + $0x354] sm:$0xf0]  ;;  %v3196_v60 = vor.u32 %v3999_v55, %v3195_v54 }
 0x1a3   : > { %2544 = vmatpush.bf16.msra.mxu0 %v3004_v2  ;;  %v2923_v61 = vld [vmem:[%s4843_s30 + $0x28] sm:$0xf]  ;;  %v3931_v62 = vld [vmem:[%s4843_s30 + $0x34] sm:$0xf0]  ;;  %v3324_v0 = vor.u32 %v4031_v57, %v3323_v56 }
 0x1a4   : > { %2557 = vmatpush.bf16.msra.mxu1 %v3132_v3  ;;  %v3051_v63 = vld [vmem:[%s4843_s30 + $0x128] sm:$0xf]  ;;  %v3963_v1 = vld [vmem:[%s4843_s30 + $0x134] sm:$0xf0]  ;;  %v2924_v6 = vor.u32 %v3931_v62, %v2923_v61 }
 0x1a5   : > { %2570 = vmatpush.bf16.msra.mxu2 %v3260_v4  ;;  %v3179_v2 = vld [vmem:[%s4843_s30 + $0x228] sm:$0xf]  ;;  %v3995_v3 = vld [vmem:[%s4843_s30 + $0x234] sm:$0xf0]  ;;  %v3052_v9 = vor.u32 %v3963_v1, %v3051_v63 }
 0x1a6   : > { %2583 = vmatpush.bf16.msra.mxu3 %v3388_v8  ;;  %v3307_v4 = vld [vmem:[%s4843_s30 + $0x328] sm:$0xf]  ;;  %v4027_v5 = vld [vmem:[%s4843_s30 + $0x334] sm:$0xf0]  ;;  %v3180_v10 = vor.u32 %v3995_v3, %v3179_v2 }
 0x1a7   : > { %2545 = vmatpush.bf16.msra.mxu0 %v2988_v14  ;;  %v2907_v7 = vld [vmem:[%s4843_s30 + $0x8] sm:$0xf]  ;;  %v3927_v8 = vld [vmem:[%s4843_s30 + $0x14] sm:$0xf0]  ;;  %v3308_v14 = vor.u32 %v4027_v5, %v3307_v4 }
 0x1a8   : > { %2558 = vmatpush.bf16.msra.mxu1 %v3116_v15  ;;  %v3035_v11 = vld [vmem:[%s4843_s30 + $0x108] sm:$0xf]  ;;  %v3959_v12 = vld [vmem:[%s4843_s30 + $0x114] sm:$0xf0]  ;;  %v2908_v21 = vor.u32 %v3927_v8, %v2907_v7 }
 0x1a9   : > { %2571 = vmatpush.bf16.msra.mxu2 %v3244_v16  ;;  %v3163_v13 = vld [vmem:[%s4843_s30 + $0x208] sm:$0xf]  ;;  %v3991_v15 = vld [vmem:[%s4843_s30 + $0x214] sm:$0xf0]  ;;  %v3036_v27 = vor.u32 %v3959_v12, %v3035_v11 }
 0x1aa   : > { %2584 = vmatpush.bf16.msra.mxu3 %v3372_v20  ;;  %v3291_v16 = vld [vmem:[%s4843_s30 + $0x308] sm:$0xf]  ;;  %v4023_v17 = vld [vmem:[%s4843_s30 + $0x314] sm:$0xf0] }
 0x1ab   : > { %2546 = vmatpush.bf16.msra.mxu0 %v2972_v28  ;;  %v3531_v18 = vld [vmem:[%s4843_s30 + $0x4e8] sm:$0xf]  ;;  %v4083_v19 = vld [vmem:[%s4843_s30 + $0x4f4] sm:$0xf0]  ;;  %v3164_v28 = vor.u32 %v3991_v15, %v3163_v13  ;;  %v3292_v33 = vor.u32 %v4023_v17, %v3291_v16 }
 0x1ac   : > { %2559 = vmatpush.bf16.msra.mxu1 %v3100_v29  ;;  %v3659_v20 = vld [vmem:[%s4843_s30 + $0x5e8] sm:$0xf]  ;;  %v4115_v22 = vld [vmem:[%s4843_s30 + $0x5f4] sm:$0xf0]  ;;  %v3532_v34 = vor.u32 %v4083_v19, %v3531_v18 }
 0x1ad   : > { %2572 = vmatpush.bf16.msra.mxu2 %v3228_v30  ;;  %v3787_v23 = vld [vmem:[%s4843_s30 + $0x6e8] sm:$0xf]  ;;  %v4147_v24 = vld [vmem:[%s4843_s30 + $0x6f4] sm:$0xf0]  ;;  %v3660_v35 = vor.u32 %v4115_v22, %v3659_v20 }
 0x1ae   : > { %2585 = vmatpush.bf16.msra.mxu3 %v3356_v37  ;;  %v3915_v29 = vld [vmem:[%s4843_s30 + $0x7e8] sm:$0xf]  ;;  %v4179_v30 = vld [vmem:[%s4843_s30 + $0x7f4] sm:$0xf0]  ;;  %v3788_v37 = vor.u32 %v4147_v24, %v3787_v23 }
 0x1af   : > { %2547 = vmatpush.bf16.msra.mxu0 %v2956_v46  ;;  %v3515_v38 = vld [vmem:[%s4843_s30 + $0x4c8] sm:$0xf]  ;;  %v4079_v41 = vld [vmem:[%s4843_s30 + $0x4d4] sm:$0xf0]  ;;  %v3916_v44 = vor.u32 %v4179_v30, %v3915_v29 }
 0x1b0   : > { %2560 = vmatpush.bf16.msra.mxu1 %v3084_v47  ;;  %v3643_v43 = vld [vmem:[%s4843_s30 + $0x5c8] sm:$0xf]  ;;  %v4111_v45 = vld [vmem:[%s4843_s30 + $0x5d4] sm:$0xf0]  ;;  %v3516_v50 = vor.u32 %v4079_v41, %v3515_v38 }
 0x1b1   : > { %2573 = vmatpush.bf16.msra.mxu2 %v3212_v48  ;;  %v3771_v46 = vld [vmem:[%s4843_s30 + $0x6c8] sm:$0xf]  ;;  %v4143_v47 = vld [vmem:[%s4843_s30 + $0x6d4] sm:$0xf0]  ;;  %v3644_v51 = vor.u32 %v4111_v45, %v3643_v43 }
 0x1b2   : > { %2586 = vmatpush.bf16.msra.mxu3 %v3340_v52  ;;  %v3899_v48 = vld [vmem:[%s4843_s30 + $0x7c8] sm:$0xf]  ;;  %v4175_v49 = vld [vmem:[%s4843_s30 + $0x7d4] sm:$0xf0]  ;;  %v3772_v52 = vor.u32 %v4143_v47, %v3771_v46 }
 0x1b3   : > { %2548 = vmatpush.bf16.msra.mxu0 %v2940_v58  ;;  %v3499_v53 = vld [vmem:[%s4843_s30 + $0x4a8] sm:$0xf]  ;;  %v4075_v54 = vld [vmem:[%s4843_s30 + $0x4b4] sm:$0xf0]  ;;  %v3900_v56 = vor.u32 %v4175_v49, %v3899_v48 }
 0x1b4   : > { %2561 = vmatpush.bf16.msra.mxu1 %v3068_v59  ;;  %v3627_v55 = vld [vmem:[%s4843_s30 + $0x5a8] sm:$0xf]  ;;  %v4107_v57 = vld [vmem:[%s4843_s30 + $0x5b4] sm:$0xf0]  ;;  %v3500_v62 = vor.u32 %v4075_v54, %v3499_v53 }
 0x1b5   : > { %2574 = vmatpush.bf16.msra.mxu2 %v3196_v60  ;;  %v3755_v58 = vld [vmem:[%s4843_s30 + $0x6a8] sm:$0xf]  ;;  %v4139_v59 = vld [vmem:[%s4843_s30 + $0x6b4] sm:$0xf0]  ;;  %v3628_v63 = vor.u32 %v4107_v57, %v3627_v55 }
 0x1b6   : > { %2587 = vmatpush.bf16.msra.mxu3 %v3324_v0  ;;  %v3883_v60 = vld [vmem:[%s4843_s30 + $0x7a8] sm:$0xf]  ;;  %v4171_v61 = vld [vmem:[%s4843_s30 + $0x7b4] sm:$0xf0]  ;;  %v3756_v0 = vor.u32 %v4139_v59, %v3755_v58 }
 0x1b7   : > { %2549 = vmatpush.bf16.msra.mxu0 %v2924_v6  ;;  %v3483_v1 = vld [vmem:[%s4843_s30 + $0x488] sm:$0xf]  ;;  %v4071_v2 = vld [vmem:[%s4843_s30 + $0x494] sm:$0xf0]  ;;  %v3884_v4 = vor.u32 %v4171_v61, %v3883_v60 }
 0x1b8   : > { %2562 = vmatpush.bf16.msra.mxu1 %v3052_v9  ;;  %v3611_v3 = vld [vmem:[%s4843_s30 + $0x588] sm:$0xf]  ;;  %v4103_v5 = vld [vmem:[%s4843_s30 + $0x594] sm:$0xf0] }
 0x1b9   : > { %2575 = vmatpush.bf16.msra.mxu2 %v3180_v10  ;;  %v3739_v6 = vld [vmem:[%s4843_s30 + $0x688] sm:$0xf]  ;;  %v4135_v7 = vld [vmem:[%s4843_s30 + $0x694] sm:$0xf0]  ;;  %v3484_v10 = vor.u32 %v4071_v2, %v3483_v1  ;;  %v3612_v11 = vor.u32 %v4103_v5, %v3611_v3  ;;  %v3953_v5 = vld [vmem:[%s4843_s30 + $0xec] sm:$0xf] }
 0x1ba   : > { %2588 = vmatpush.bf16.msra.mxu3 %v3308_v14  ;;  %v3867_v8 = vld [vmem:[%s4843_s30 + $0x788] sm:$0xf]  ;;  %v4167_v9 = vld [vmem:[%s4843_s30 + $0x794] sm:$0xf0]  ;;  %v3740_v12 = vor.u32 %v4135_v7, %v3739_v6  ;;  %v3021_v6 = vld [vmem:[%s4843_s30 + $0xf8] sm:$0xf0] }
 0x1bb   : > { %2550 = vmatpush.bf16.msra.mxu0 %v2908_v21  ;;  %v3467_v13 = vld [vmem:[%s4843_s30 + $0x468] sm:$0xf]  ;;  %v4067_v14 = vld [vmem:[%s4843_s30 + $0x474] sm:$0xf0]  ;;  %v3868_v16 = vor.u32 %v4167_v9, %v3867_v8  ;;  %v3985_v7 = vld [vmem:[%s4843_s30 + $0x1ec] sm:$0xf] }
 0x1bc   : > { %2563 = vmatpush.bf16.msra.mxu1 %v3036_v27  ;;  %v3595_v15 = vld [vmem:[%s4843_s30 + $0x568] sm:$0xf]  ;;  %v4099_v17 = vld [vmem:[%s4843_s30 + $0x574] sm:$0xf0]  ;;  %v3468_v22 = vor.u32 %v4067_v14, %v3467_v13 }
 0x1bd   : > { %2576 = vmatpush.bf16.msra.mxu2 %v3164_v28  ;;  %v3723_v18 = vld [vmem:[%s4843_s30 + $0x668] sm:$0xf]  ;;  %v4131_v19 = vld [vmem:[%s4843_s30 + $0x674] sm:$0xf0]  ;;  %v3596_v23 = vor.u32 %v4099_v17, %v3595_v15  ;;  %v3405_v17 = vld [vmem:[%s4843_s30 + $0x3f8] sm:$0xf0] }
 0x1be   : > { %2589 = vmatpush.bf16.msra.mxu3 %v3292_v33  ;;  %2551 = vmatmul.bf16.vlgmr.msra.gmra.mxu0 %v4952_v26  ;;  %v3851_v20 = vld [vmem:[%s4843_s30 + $0x768] sm:$0xf]  ;;  %v4163_v21 = vld [vmem:[%s4843_s30 + $0x774] sm:$0xf0]  ;;  %v3724_v24 = vor.u32 %v4131_v19, %v3723_v18  ;;  %v3024_v19 = vor.u32 %v3953_v5, %v3021_v6 }
 0x1bf   : > { %2595 = vmatpush.bf16.msrb.mxu0 %v3532_v34  ;;  %2564 = vmatmul.bf16.vlgmr.msra.gmra.mxu1 %v4958_v32  ;;  %v3451_v27 = vld [vmem:[%s4843_s30 + $0x448] sm:$0xf]  ;;  %v4063_v28 = vld [vmem:[%s4843_s30 + $0x454] sm:$0xf0]  ;;  %v3852_v30 = vor.u32 %v4163_v21, %v3851_v20 }
 0x1c0   : > { %2608 = vmatpush.bf16.msrb.mxu1 %v3660_v35  ;;  %2577 = vmatmul.bf16.vlgmr.msra.gmra.mxu2 %v4950_v25  ;;  %v3579_v29 = vld [vmem:[%s4843_s30 + $0x548] sm:$0xf]  ;;  %v4095_v33 = vld [vmem:[%s4843_s30 + $0x554] sm:$0xf0]  ;;  %v3452_v41 = vor.u32 %v4063_v28, %v3451_v27  ;;  %v3981_v27 = vld [vmem:[%s4843_s30 + $0x1cc] sm:$0xf] }
 0x1c1   : > { %2621 = vmatpush.bf16.msrb.mxu2 %v3788_v37  ;;  %2590 = vmatmul.bf16.vlgmr.msra.gmra.mxu3 %v4956_v31  ;;  %v3707_v34 = vld [vmem:[%s4843_s30 + $0x648] sm:$0xf]  ;;  %v4127_v35 = vld [vmem:[%s4843_s30 + $0x654] sm:$0xf0]  ;;  %v3580_v43 = vor.u32 %v4095_v33, %v3579_v29  ;;  %v3133_v33 = vld [vmem:[%s4843_s30 + $0x1d8] sm:$0xf0] }
 0x1c2   : > { %2634 = vmatpush.bf16.msrb.mxu3 %v3916_v44  ;;  %v3835_v37 = vld [vmem:[%s4843_s30 + $0x748] sm:$0xf]  ;;  %v4159_v38 = vld [vmem:[%s4843_s30 + $0x754] sm:$0xf0]  ;;  %v3708_v44 = vor.u32 %v4127_v35, %v3707_v34  ;;  %v4013_v34 = vld [vmem:[%s4843_s30 + $0x2cc] sm:$0xf] }
 0x1c3   : > { %2596 = vmatpush.bf16.msrb.mxu0 %v3516_v50  ;;  %v3435_v45 = vld [vmem:[%s4843_s30 + $0x428] sm:$0xf]  ;;  %v4059_v46 = vld [vmem:[%s4843_s30 + $0x434] sm:$0xf0]  ;;  %v3836_v48 = vor.u32 %v4159_v38, %v3835_v37  ;;  %v3261_v35 = vld [vmem:[%s4843_s30 + $0x2d8] sm:$0xf0] }
 0x1c4   : > { %2609 = vmatpush.bf16.msrb.mxu1 %v3644_v51  ;;  %v3563_v47 = vld [vmem:[%s4843_s30 + $0x528] sm:$0xf]  ;;  %v4091_v49 = vld [vmem:[%s4843_s30 + $0x534] sm:$0xf0]  ;;  %v3436_v55 = vor.u32 %v4059_v46, %v3435_v45  ;;  %v4045_v38 = vld [vmem:[%s4843_s30 + $0x3cc] sm:$0xf]  ;;  %v3264_v45 = vor.u32 %v4013_v34, %v3261_v35 }
 0x1c5   : > { %2622 = vmatpush.bf16.msrb.mxu2 %v3772_v52  ;;  %v3691_v50 = vld [vmem:[%s4843_s30 + $0x628] sm:$0xf]  ;;  %v4123_v51 = vld [vmem:[%s4843_s30 + $0x634] sm:$0xf0]  ;;  %v3564_v59 = vor.u32 %v4091_v49, %v3563_v47  ;;  %v3945_v46 = vld [vmem:[%s4843_s30 + $0xac] sm:$0xf] }
 0x1c6   : > { %2635 = vmatpush.bf16.msrb.mxu3 %v3900_v56  ;;  %v3819_v52 = vld [vmem:[%s4843_s30 + $0x728] sm:$0xf]  ;;  %v4155_v53 = vld [vmem:[%s4843_s30 + $0x734] sm:$0xf0]  ;;  %v3692_v60 = vor.u32 %v4123_v51, %v3691_v50  ;;  %v2989_v47 = vld [vmem:[%s4843_s30 + $0xb8] sm:$0xf0] }
 0x1c7   : > { %2597 = vmatpush.bf16.msrb.mxu0 %v3500_v62  ;;  %v3419_v56 = vld [vmem:[%s4843_s30 + $0x408] sm:$0xf]  ;;  %v4055_v57 = vld [vmem:[%s4843_s30 + $0x414] sm:$0xf0]  ;;  %v3820_v1 = vor.u32 %v4155_v53, %v3819_v52  ;;  %v3117_v51 = vld [vmem:[%s4843_s30 + $0x1b8] sm:$0xf0] }
 0x1c8   : > { %2610 = vmatpush.bf16.msrb.mxu1 %v3628_v63  ;;  %v3547_v61 = vld [vmem:[%s4843_s30 + $0x508] sm:$0xf]  ;;  %v4087_v62 = vld [vmem:[%s4843_s30 + $0x514] sm:$0xf0]  ;;  %v3420_v9 = vor.u32 %v4055_v57, %v3419_v56  ;;  %v4009_v52 = vld [vmem:[%s4843_s30 + $0x2ac] sm:$0xf]  ;;  %v2992_v56 = vor.u32 %v3945_v46, %v2989_v47 }
 0x1c9   : > { %2623 = vmatpush.bf16.msrb.mxu2 %v3756_v0  ;;  %v3675_v63 = vld [vmem:[%s4843_s30 + $0x608] sm:$0xf]  ;;  %v4119_v2 = vld [vmem:[%s4843_s30 + $0x614] sm:$0xf0]  ;;  %v3548_v14 = vor.u32 %v4087_v62, %v3547_v61  ;;  %v3245_v53 = vld [vmem:[%s4843_s30 + $0x2b8] sm:$0xf0] }
 0x1ca   : > { %2636 = vmatpush.bf16.msrb.mxu3 %v3884_v4  ;;  %v3803_v3 = vld [vmem:[%s4843_s30 + $0x708] sm:$0xf]  ;;  %v4151_v4 = vld [vmem:[%s4843_s30 + $0x714] sm:$0xf0]  ;;  %v3676_v15 = vor.u32 %v4119_v2, %v3675_v63  ;;  %v2973_v61 = vld [vmem:[%s4843_s30 + $0x98] sm:$0xf0] }
 0x1cb   : > { %2598 = vmatpush.bf16.msrb.mxu0 %v3484_v10  ;;  %v3149_v10 = vld [vmem:[%s4843_s30 + $0x1f8] sm:$0xf0]  ;;  %v3804_v18 = vor.u32 %v4151_v4, %v3803_v3  ;;  %v3973_v62 = vld [vmem:[%s4843_s30 + $0x18c] sm:$0xf] }
 0x1cc   : > { %2611 = vmatpush.bf16.msrb.mxu1 %v3612_v11  ;;  %v2344_v54 = vpop.f32.mrf.mxu0  ;;  %v4017_v11 = vld [vmem:[%s4843_s30 + $0x2ec] sm:$0xf]  ;;  %v3152_v21 = vor.u32 %v3985_v7, %v3149_v10  ;;  %v3229_v2 = vld [vmem:[%s4843_s30 + $0x298] sm:$0xf0] }
 0x1cd   : > { %2624 = vmatpush.bf16.msrb.mxu2 %v3740_v12  ;;  %v2357_v58 = vpop.f32.mrf.mxu1  ;;  %v3277_v12 = vld [vmem:[%s4843_s30 + $0x2f8] sm:$0xf0]  ;;  %v4037_v3 = vld [vmem:[%s4843_s30 + $0x38c] sm:$0xf] }
 0x1ce   : > { %2637 = vmatpush.bf16.msrb.mxu3 %v3868_v16  ;;  %v2358_v0 = vadd.f32 %v2357_v58, %v2344_v54  ;;  %v4049_v16 = vld [vmem:[%s4843_s30 + $0x3ec] sm:$0xf]  ;;  %v3357_v4 = vld [vmem:[%s4843_s30 + $0x398] sm:$0xf0] }
 0x1cf   : > { %2599 = vmatpush.bf16.msrb.mxu0 %v3468_v22  ;;  %v3280_v22 = vor.u32 %v4017_v11, %v3277_v12  ;;  %v4041_v54 = vld [vmem:[%s4843_s30 + $0x3ac] sm:$0xf]  ;;  %v2957_v10 = vld [vmem:[%s4843_s30 + $0x78] sm:$0xf0] }
 0x1d0   : > { %2612 = vmatpush.bf16.msrb.mxu1 %v3596_v23  ;;  %v3949_v23 = vld [vmem:[%s4843_s30 + $0xcc] sm:$0xf]  ;;  %v3197_v35 = vld [vmem:[%s4843_s30 + $0x258] sm:$0xf0] }
 0x1d1   : > { %2625 = vmatpush.bf16.msrb.mxu2 %v3724_v24  ;;  %v3005_v24 = vld [vmem:[%s4843_s30 + $0xd8] sm:$0xf0]  ;;  %v3969_v11 = vld [vmem:[%s4843_s30 + $0x16c] sm:$0xf] }
 0x1d2   : > { %2638 = vmatpush.bf16.msrb.mxu3 %v3852_v30  ;;  %v2370_v8 = vpop.f32.mrf.mxu2  ;;  %v3408_v30 = vor.u32 %v4049_v16, %v3405_v17  ;;  %v4001_v16 = vld [vmem:[%s4843_s30 + $0x26c] sm:$0xf]  ;;  %v3213_v17 = vld [vmem:[%s4843_s30 + $0x278] sm:$0xf0] }
 0x1d3   : > { %2600 = vmatpush.bf16.msrb.mxu0 %v3452_v41  ;;  %v2371_v13 = vadd.f32 %v2370_v8, %v2358_v0  ;;  %v2383_v20 = vpop.f32.mrf.mxu3  ;;  %v3389_v41 = vld [vmem:[%s4843_s30 + $0x3d8] sm:$0xf0]  ;;  %v3997_v34 = vld [vmem:[%s4843_s30 + $0x24c] sm:$0xf] }
 0x1d4   : > { %2613 = vmatpush.bf16.msrb.mxu1 %v3580_v43  ;;  %v2346_v29 = vpop.f32.mrf.mxu0  ;;  %v3008_v43 = vor.u32 %v3949_v23, %v3005_v24  ;;  %v3392_v50 = vor.u32 %v4045_v38, %v3389_v41  ;;  %v3101_v0 = vld [vmem:[%s4843_s30 + $0x198] sm:$0xf0]  ;;  %v3216_v23 = vor.u32 %v4001_v16, %v3213_v17  ;;  %v3933_v24 = vld [vmem:[%s4843_s30 + $0x4c] sm:$0xf] }
 0x1d5   : > { %2626 = vmatpush.bf16.msrb.mxu2 %v3708_v44  ;;  %v2384_v28 = vadd.f32 %v2383_v20, %v2371_v13  ;;  %v2359_v37 = vpop.f32.mrf.mxu1  ;;  %v3136_v44 = vor.u32 %v3981_v27, %v3133_v33  ;;  %v3104_v7 = vor.u32 %v3973_v62, %v3101_v0  ;;  %v2941_v27 = vld [vmem:[%s4843_s30 + $0x58] sm:$0xf0]  ;;  %v4029_v41 = vld [vmem:[%s4843_s30 + $0x34c] sm:$0xf] }
 0x1d6   : > { %2639 = vmatpush.bf16.msrb.mxu3 %v3836_v48  ;;  %v3977_v48 = vld [vmem:[%s4843_s30 + $0x1ac] sm:$0xf]  ;;  %v3069_v33 = vld [vmem:[%s4843_s30 + $0x158] sm:$0xf0] }
 0x1d7   : > { %2601 = vmatpush.bf16.msrb.mxu0 %v3436_v55  ;;  %v3373_v55 = vld [vmem:[%s4843_s30 + $0x3b8] sm:$0xf0]  ;;  %v3120_v58 = vor.u32 %v3977_v48, %v3117_v51  ;;  %v3200_v48 = vor.u32 %v3997_v34, %v3197_v35  ;;  %v3961_v51 = vld [vmem:[%s4843_s30 + $0x12c] sm:$0xf] }
 0x1d8   : > { %2614 = vmatpush.bf16.msrb.mxu1 %v3564_v59  ;;  %v3248_v59 = vor.u32 %v4009_v52, %v3245_v53  ;;  %v3376_v63 = vor.u32 %v4041_v54, %v3373_v55  ;;  %v3053_v54 = vld [vmem:[%s4843_s30 + $0x138] sm:$0xf0]  ;;  %v3993_v55 = vld [vmem:[%s4843_s30 + $0x22c] sm:$0xf] }
 0x1d9   : > { %2627 = vmatpush.bf16.msrb.mxu2 %v3692_v60  ;;  %v3941_v60 = vld [vmem:[%s4843_s30 + $0x8c] sm:$0xf]  ;;  %v3056_v62 = vor.u32 %v3961_v51, %v3053_v54  ;;  %v3773_v34 = vld [vmem:[%s4843_s30 + $0x6d8] sm:$0xf0] }
 0x1da   : > { %2640 = vmatpush.bf16.msrb.mxu3 %v3820_v1  ;;  %v2372_v49 = vpop.f32.mrf.mxu2  ;;  %v4005_v1 = vld [vmem:[%s4843_s30 + $0x28c] sm:$0xf]  ;;  %v2976_v5 = vor.u32 %v3941_v60, %v2973_v61  ;;  %v2909_v61 = vld [vmem:[%s4843_s30 + $0x18] sm:$0xf0] }
 0x1db   : > { %2602 = vmatpush.bf16.msrb.mxu0 %v3420_v9  ;;  %v2385_v57 = vpop.f32.mrf.mxu3  ;;  %v3232_v8 = vor.u32 %v4005_v1, %v3229_v2  ;;  %v3937_v9 = vld [vmem:[%s4843_s30 + $0x6c] sm:$0xf]  ;;  %v3037_v1 = vld [vmem:[%s4843_s30 + $0x118] sm:$0xf0] }
 0x1dc   : > { %2615 = vmatpush.bf16.msrb.mxu1 %v3548_v14  ;;  %v3360_v14 = vor.u32 %v4037_v3, %v3357_v4  ;;  %v3929_v49 = vld [vmem:[%s4843_s30 + $0x2c] sm:$0xf]  ;;  %v3757_v51 = vld [vmem:[%s4843_s30 + $0x6b8] sm:$0xf0] }
 0x1dd   : > { %2628 = vmatpush.bf16.msrb.mxu2 %v3676_v15  ;;  %v3085_v15 = vld [vmem:[%s4843_s30 + $0x178] sm:$0xf0]  ;;  %v4025_v57 = vld [vmem:[%s4843_s30 + $0x32c] sm:$0xf] }
 0x1de   : > { %2641 = vmatpush.bf16.msrb.mxu3 %v3804_v18  ;;  %2603 = vmatmul.bf16.vlgmr.msrb.gmra.mxu0 %v5009_v39  ;;  %v2396_v6 = vpop.f32.mrf.mxu0  ;;  %v4033_v18 = vld [vmem:[%s4843_s30 + $0x36c] sm:$0xf] }
 0x1df   : > { %2647 = vmatpush.bf16.msra.mxu0 %v3024_v19  ;;  %2616 = vmatmul.bf16.vlgmr.msrb.gmra.mxu1 %v5013_v42  ;;  %v2397_v12 = vadd.f32 %v2396_v6, %v2384_v28  ;;  %v2409_v13 = vpop.f32.mrf.mxu1  ;;  %v3341_v19 = vld [vmem:[%s4843_s30 + $0x378] sm:$0xf0]  ;;  %v3965_v28 = vld [vmem:[%s4843_s30 + $0x14c] sm:$0xf] }
 0x1e0   : > { %2660 = vmatpush.bf16.msra.mxu1 %v3152_v21  ;;  %2629 = vmatmul.bf16.vlgmr.msrb.gmra.mxu2 %v5005_v36  ;;  %v2960_v21 = vor.u32 %v3937_v9, %v2957_v10  ;;  %v3072_v47 = vor.u32 %v3965_v28, %v3069_v33  ;;  %v3925_v60 = vld [vmem:[%s4843_s30 + $0xc] sm:$0xf]  ;;  %v3533_v10 = vld [vmem:[%s4843_s30 + $0x4f8] sm:$0xf0] }
 0x1e1   : > { %2673 = vmatpush.bf16.msra.mxu2 %v3280_v22  ;;  %2642 = vmatmul.bf16.vlgmr.msrb.gmra.mxu3 %v5011_v40  ;;  %v2410_v20 = vadd.f32 %v2409_v13, %v2397_v12  ;;  %v3088_v22 = vor.u32 %v3969_v11, %v3085_v15  ;;  %v3957_v0 = vld [vmem:[%s4843_s30 + $0x10c] sm:$0xf]  ;;  %v2912_v12 = vor.u32 %v3925_v60, %v2909_v61  ;;  %v3661_v13 = vld [vmem:[%s4843_s30 + $0x5f8] sm:$0xf0] }
 0x1e2   : > { %2686 = vmatpush.bf16.msra.mxu3 %v3408_v30  ;;  %v3344_v30 = vor.u32 %v4033_v18, %v3341_v19  ;;  %v3989_v2 = vld [vmem:[%s4843_s30 + $0x20c] sm:$0xf]  ;;  %v3789_v15 = vld [vmem:[%s4843_s30 + $0x6f8] sm:$0xf0]  ;;  %v3040_v16 = vor.u32 %v3957_v0, %v3037_v1 }
 0x1e3   : > { %2648 = vmatpush.bf16.msra.mxu0 %v3008_v43  ;;  %v2422_v29 = vpop.f32.mrf.mxu2  ;;  %v3325_v43 = vld [vmem:[%s4843_s30 + $0x358] sm:$0xf0]  ;;  %v4021_v6 = vld [vmem:[%s4843_s30 + $0x30c] sm:$0xf] }
 0x1e4   : > { %2661 = vmatpush.bf16.msra.mxu1 %v3136_v44  ;;  %v2423_v37 = vadd.f32 %v2422_v29, %v2410_v20  ;;  %v2944_v44 = vor.u32 %v3933_v24, %v2941_v27  ;;  %v3328_v53 = vor.u32 %v4029_v41, %v3325_v43  ;;  %v4081_v9 = vld [vmem:[%s4843_s30 + $0x4ec] sm:$0xf]  ;;  %v3917_v19 = vld [vmem:[%s4843_s30 + $0x7f8] sm:$0xf0] }
 0x1e5   : > { %2674 = vmatpush.bf16.msra.mxu2 %v3264_v45  ;;  %v4113_v11 = vld [vmem:[%s4843_s30 + $0x5ec] sm:$0xf]  ;;  %v3517_v27 = vld [vmem:[%s4843_s30 + $0x4d8] sm:$0xf0] }
 0x1e6   : > { %2687 = vmatpush.bf16.msra.mxu3 %v3392_v50  ;;  %v2435_v38 = vpop.f32.mrf.mxu3  ;;  %v2398_v46 = vpop.f32.mrf.mxu0  ;;  %v2925_v50 = vld [vmem:[%s4843_s30 + $0x38] sm:$0xf0]  ;;  %v4177_v18 = vld [vmem:[%s4843_s30 + $0x7ec] sm:$0xf] }
 0x1e7   : > { %2649 = vmatpush.bf16.msra.mxu0 %v2992_v56  ;;  %v5323_v45 = vadd.f32 %v2435_v38, %v2423_v37  ;;  %v2411_v52 = vpop.f32.mrf.mxu1  ;;  %v3181_v56 = vld [vmem:[%s4843_s30 + $0x238] sm:$0xf0]  ;;  %v4077_v24 = vld [vmem:[%s4843_s30 + $0x4cc] sm:$0xf]  ;;  %v3920_v29 = vor.u32 %v4177_v18, %v3917_v19 }
 0x1e8   : > { %2662 = vmatpush.bf16.msra.mxu1 %v3120_v58  ;;  %v3309_v58 = vld [vmem:[%s4843_s30 + $0x338] sm:$0xf0]  ;;  %v4109_v28 = vld [vmem:[%s4843_s30 + $0x5cc] sm:$0xf]  ;;  %v3520_v38 = vor.u32 %v4077_v24, %v3517_v27 }
 0x1e9   : > { %2675 = vmatpush.bf16.msra.mxu2 %v3248_v59  ;;  %v2928_v59 = vor.u32 %v3929_v49, %v2925_v50  ;;  %v3312_v4 = vor.u32 %v4025_v57, %v3309_v58  ;;  %v4141_v33 = vld [vmem:[%s4843_s30 + $0x6cc] sm:$0xf]  ;;  %v3901_v37 = vld [vmem:[%s4843_s30 + $0x7d8] sm:$0xf0] }
 0x1ea   : > { %2688 = vmatpush.bf16.msra.mxu3 %v3376_v63  ;;  %v3184_v63 = vor.u32 %v3993_v55, %v3181_v56  ;;  %v4173_v35 = vld [vmem:[%s4843_s30 + $0x7cc] sm:$0xf]  ;;  %v3776_v43 = vor.u32 %v4141_v33, %v3773_v34  ;;  %v3501_v46 = vld [vmem:[%s4843_s30 + $0x4b8] sm:$0xf0] }
 0x1eb   : > { %2650 = vmatpush.bf16.msra.mxu0 %v2976_v5  ;;  %v2424_v3 = vpop.f32.mrf.mxu2  ;;  %v3165_v5 = vld [vmem:[%s4843_s30 + $0x218] sm:$0xf0]  ;;  %v4137_v50 = vld [vmem:[%s4843_s30 + $0x6ac] sm:$0xf] }
 0x1ec   : > { %2663 = vmatpush.bf16.msra.mxu1 %v3104_v7  ;;  %v3293_v7 = vld [vmem:[%s4843_s30 + $0x318] sm:$0xf0]  ;;  %v3168_v17 = vor.u32 %v3989_v2, %v3165_v5  ;;  %v4169_v52 = vld [vmem:[%s4843_s30 + $0x7ac] sm:$0xf]  ;;  %v3760_v55 = vor.u32 %v4137_v50, %v3757_v51 }
 0x1ed   : > { %2676 = vmatpush.bf16.msra.mxu2 %v3232_v8  ;;  %v3296_v20 = vor.u32 %v4021_v6, %v3293_v7  ;;  %v3629_v49 = vld [vmem:[%s4843_s30 + $0x5b8] sm:$0xf0]  ;;  %v4069_v56 = vld [vmem:[%s4843_s30 + $0x48c] sm:$0xf] }
 0x1ee   : > { %2689 = vmatpush.bf16.msra.mxu3 %v3360_v14  ;;  %v2437_v8 = vpop.f32.mrf.mxu3  ;;  %v4145_v14 = vld [vmem:[%s4843_s30 + $0x6ec] sm:$0xf]  ;;  %v3485_v57 = vld [vmem:[%s4843_s30 + $0x498] sm:$0xf0] }
 0x1ef   : > { %2651 = vmatpush.bf16.msra.mxu0 %v2960_v21  ;;  %v3536_v21 = vor.u32 %v4081_v9, %v3533_v10  ;;  %v4101_v58 = vld [vmem:[%s4843_s30 + $0x58c] sm:$0xf]  ;;  %v3741_v60 = vld [vmem:[%s4843_s30 + $0x698] sm:$0xf0] }
 0x1f0   : > { %2664 = vmatpush.bf16.msra.mxu1 %v3088_v22  ;;  %v3664_v22 = vor.u32 %v4113_v11, %v3661_v13  ;;  %v4165_v61 = vld [vmem:[%s4843_s30 + $0x78c] sm:$0xf]  ;;  %v3469_v3 = vld [vmem:[%s4843_s30 + $0x478] sm:$0xf0] }
 0x1f1   : > { %2677 = vmatpush.bf16.msra.mxu2 %v3216_v23  ;;  %v3792_v23 = vor.u32 %v4145_v14, %v3789_v15  ;;  %v4065_v2 = vld [vmem:[%s4843_s30 + $0x46c] sm:$0xf]  ;;  %v3597_v7 = vld [vmem:[%s4843_s30 + $0x578] sm:$0xf0] }
 0x1f2   : > { %2690 = vmatpush.bf16.msra.mxu3 %v3344_v30  ;;  %v3645_v30 = vld [vmem:[%s4843_s30 + $0x5d8] sm:$0xf0]  ;;  %v4129_v8 = vld [vmem:[%s4843_s30 + $0x66c] sm:$0xf]  ;;  %v3472_v13 = vor.u32 %v4065_v2, %v3469_v3 }
 0x1f3   : > { %2652 = vmatpush.bf16.msra.mxu0 %v2944_v44  ;;  %v3648_v41 = vor.u32 %v4109_v28, %v3645_v30  ;;  %v4073_v44 = vld [vmem:[%s4843_s30 + $0x4ac] sm:$0xf]  ;;  %v3725_v9 = vld [vmem:[%s4843_s30 + $0x678] sm:$0xf0] }
 0x1f4   : > { %2665 = vmatpush.bf16.msra.mxu1 %v3072_v47  ;;  %v4105_v47 = vld [vmem:[%s4843_s30 + $0x5ac] sm:$0xf]  ;;  %v3504_v54 = vor.u32 %v4073_v44, %v3501_v46  ;;  %v3728_v15 = vor.u32 %v4129_v8, %v3725_v9  ;;  %v3821_v51 = vld [vmem:[%s4843_s30 + $0x738] sm:$0xf0] }
 0x1f5   : > { %2678 = vmatpush.bf16.msra.mxu2 %v3200_v48  ;;  %v3904_v48 = vor.u32 %v4173_v35, %v3901_v37  ;;  %v4161_v11 = vld [vmem:[%s4843_s30 + $0x76c] sm:$0xf] }
 0x1f6   : > { %2691 = vmatpush.bf16.msra.mxu3 %v3328_v53  ;;  %v3885_v53 = vld [vmem:[%s4843_s30 + $0x7b8] sm:$0xf0]  ;;  %v4093_v18 = vld [vmem:[%s4843_s30 + $0x54c] sm:$0xf] }
 0x1f7   : > { %2653 = vmatpush.bf16.msra.mxu0 %v2928_v59  ;;  %v3613_v59 = vld [vmem:[%s4843_s30 + $0x598] sm:$0xf0]  ;;  %v4157_v28 = vld [vmem:[%s4843_s30 + $0x74c] sm:$0xf] }
 0x1f8   : > { %2666 = vmatpush.bf16.msra.mxu1 %v3056_v62  ;;  %v3869_v62 = vld [vmem:[%s4843_s30 + $0x798] sm:$0xf0]  ;;  %v3616_v0 = vor.u32 %v4101_v58, %v3613_v59  ;;  %v4153_v50 = vld [vmem:[%s4843_s30 + $0x72c] sm:$0xf] }
 0x1f9   : > { %2679 = vmatpush.bf16.msra.mxu2 %v3184_v63  ;;  %v3872_v6 = vor.u32 %v4165_v61, %v3869_v62  ;;  %v3824_v58 = vor.u32 %v4153_v50, %v3821_v51  ;;  %v4117_v59 = vld [vmem:[%s4843_s30 + $0x60c] sm:$0xf]  ;;  %v3805_v62 = vld [vmem:[%s4843_s30 + $0x718] sm:$0xf0]  ;;  %v2771_v50 = vld [vmem:[%s754_s11] sm:$0xf] }
 0x1fa   : > { %2692 = vmatpush.bf16.msra.mxu3 %v3312_v4  ;;  %v4097_v4 = vld [vmem:[%s4843_s30 + $0x56c] sm:$0xf] }
 0x1fb   : > { %2654 = vmatpush.bf16.msra.mxu0 %v2912_v12  ;;  %v2448_v63 = vpop.f32.mrf.mxu0  ;;  %v3853_v12 = vld [vmem:[%s4843_s30 + $0x778] sm:$0xf0]  ;;  %v3600_v14 = vor.u32 %v4097_v4, %v3597_v7  ;;  %v4149_v61 = vld [vmem:[%s4843_s30 + $0x70c] sm:$0xf] }
 0x1fc   : > { %2667 = vmatpush.bf16.msra.mxu1 %v3040_v16  ;;  %v2461_v5 = vpop.f32.mrf.mxu1  ;;  %v4061_v16 = vld [vmem:[%s4843_s30 + $0x44c] sm:$0xf] }
 0x1fd   : > { %2680 = vmatpush.bf16.msra.mxu2 %v3168_v17  ;;  %v2462_v10 = vadd.f32 %v2461_v5, %v2448_v63  ;;  %v3453_v17 = vld [vmem:[%s4843_s30 + $0x458] sm:$0xf0] }
 0x1fe   : > { %2693 = vmatpush.bf16.msra.mxu3 %v3296_v20  ;;  %2655 = vmatmul.bf16.vlgmr.msra.gmra.mxu0 %v4952_v26  ;;  %v3888_v26 = vor.u32 %v4169_v52, %v3885_v53  ;;  %v3856_v20 = vor.u32 %v4161_v11, %v3853_v12  ;;  %v3456_v30 = vor.u32 %v4061_v16, %v3453_v17 }
 0x1ff   : > { %2699 = vmatpush.bf16.msrb.mxu0 %v3536_v21  ;;  %2668 = vmatmul.bf16.vlgmr.msra.gmra.mxu1 %v4958_v32  ;;  %v3488_v32 = vor.u32 %v4069_v56, %v3485_v57  ;;  %v3581_v21 = vld [vmem:[%s4843_s30 + $0x558] sm:$0xf0]  ;;  %v4085_v56 = vld [vmem:[%s4843_s30 + $0x50c] sm:$0xf] }
 0x200   : > { %2712 = vmatpush.bf16.msrb.mxu1 %v3664_v22  ;;  %2681 = vmatmul.bf16.vlgmr.msra.gmra.mxu2 %v4950_v25  ;;  %v3632_v25 = vor.u32 %v4105_v47, %v3629_v49  ;;  %v4125_v22 = vld [vmem:[%s4843_s30 + $0x64c] sm:$0xf]  ;;  %v3584_v35 = vor.u32 %v4093_v18, %v3581_v21  ;;  %v3565_v47 = vld [vmem:[%s4843_s30 + $0x538] sm:$0xf0] }
 0x201   : > { %2725 = vmatpush.bf16.msrb.mxu2 %v3792_v23  ;;  %2694 = vmatmul.bf16.vlgmr.msra.gmra.mxu3 %v4956_v31  ;;  %v4133_v31 = vld [vmem:[%s4843_s30 + $0x68c] sm:$0xf]  ;;  %v3709_v23 = vld [vmem:[%s4843_s30 + $0x658] sm:$0xf0] }
 0x202   : > { %2738 = vmatpush.bf16.msrb.mxu3 %v3920_v29  ;;  %v3744_v1 = vor.u32 %v4133_v31, %v3741_v60  ;;  %v3837_v29 = vld [vmem:[%s4843_s30 + $0x758] sm:$0xf0]  ;;  %v3712_v37 = vor.u32 %v4125_v22, %v3709_v23 }
 0x203   : > { %2700 = vmatpush.bf16.msrb.mxu0 %v3520_v38  ;;  %v2474_v19 = vpop.f32.mrf.mxu2  ;;  %v2450_v34 = vpop.f32.mrf.mxu0  ;;  %v4057_v38 = vld [vmem:[%s4843_s30 + $0x42c] sm:$0xf]  ;;  %v3840_v46 = vor.u32 %v4157_v28, %v3837_v29  ;;  %v3693_v49 = vld [vmem:[%s4843_s30 + $0x638] sm:$0xf0] }
 0x204   : > { %2713 = vmatpush.bf16.msrb.mxu1 %v3648_v41  ;;  %v2475_v24 = vadd.f32 %v2474_v19, %v2462_v10  ;;  %v2487_v27 = vpop.f32.mrf.mxu3  ;;  %v3437_v41 = vld [vmem:[%s4843_s30 + $0x438] sm:$0xf0]  ;;  %v2463_v44 = vpop.f32.mrf.mxu1 }
 0x205   : > { %2726 = vmatpush.bf16.msrb.mxu2 %v3776_v43  ;;  %v4089_v43 = vld [vmem:[%s4843_s30 + $0x52c] sm:$0xf]  ;;  %v3440_v52 = vor.u32 %v4057_v38, %v3437_v41  ;;  %v3677_v31 = vld [vmem:[%s4843_s30 + $0x618] sm:$0xf0] }
 0x206   : > { %2739 = vmatpush.bf16.msrb.mxu3 %v3904_v48  ;;  %v2488_v33 = vadd.f32 %v2487_v27, %v2475_v24  ;;  %v4121_v48 = vld [vmem:[%s4843_s30 + $0x62c] sm:$0xf]  ;;  %v3568_v53 = vor.u32 %v4089_v43, %v3565_v47 }
 0x207   : > { %2701 = vmatpush.bf16.msrb.mxu0 %v3504_v54  ;;  %v3696_v54 = vor.u32 %v4121_v48, %v3693_v49 }
 0x208   : > { %2714 = vmatpush.bf16.msrb.mxu1 %v3632_v25  ;;  %v4053_v25 = vld [vmem:[%s4843_s30 + $0x40c] sm:$0xf] }
 0x209   : > { %2727 = vmatpush.bf16.msrb.mxu2 %v3760_v55  ;;  %v3421_v55 = vld [vmem:[%s4843_s30 + $0x418] sm:$0xf0] }
 0x20a   : > { %2740 = vmatpush.bf16.msrb.mxu3 %v3888_v26  ;;  %v3549_v26 = vld [vmem:[%s4843_s30 + $0x518] sm:$0xf0] }
 0x20b   : > { %2702 = vmatpush.bf16.msrb.mxu0 %v3488_v32  ;;  %v2476_v57 = vpop.f32.mrf.mxu2  ;;  %v3424_v32 = vor.u32 %v4053_v25, %v3421_v55  ;;  %v3552_v63 = vor.u32 %v4085_v56, %v3549_v26  ;;  %v2774_v55 = vperm.slane %v2771_v50, 1 }
 0x20c   : > { %2715 = vmatpush.bf16.msrb.mxu1 %v3616_v0  ;;  %v2489_v60 = vpop.f32.mrf.mxu3  ;;  %v3680_v0 = vor.u32 %v4117_v59, %v3677_v31  ;;  %v2775_v57 = vperm.slane %v2771_v50, 2  ;;  %v2773_v59 = vperm.slane %v2771_v50, 0 }
 0x20d   : > { %2728 = vmatpush.bf16.msrb.mxu2 %v3744_v1  ;;  %v3808_v1 = vor.u32 %v4149_v61, %v3805_v62  ;;  %v2777_v31 = vrot.slane %v2774_v55, 6 }
 0x20e   : > { %2741 = vmatpush.bf16.msrb.mxu3 %v3872_v6 }
 0x20f   : > { %2703 = vmatpush.bf16.msrb.mxu0 %v3472_v13 }
 0x210   : > { %2716 = vmatpush.bf16.msrb.mxu1 %v3600_v14 }
 0x211   : > { %2729 = vmatpush.bf16.msrb.mxu2 %v3728_v15 }
 0x212   : > { %2742 = vmatpush.bf16.msrb.mxu3 %v3856_v20 }
 0x213   : > { %2704 = vmatpush.bf16.msrb.mxu0 %v3456_v30 }
 0x214   : > { %2717 = vmatpush.bf16.msrb.mxu1 %v3584_v35 }
 0x215   : > { %2730 = vmatpush.bf16.msrb.mxu2 %v3712_v37 }
 0x216   : > { %2743 = vmatpush.bf16.msrb.mxu3 %v3840_v46 }
 0x217   : > { %2705 = vmatpush.bf16.msrb.mxu0 %v3440_v52 }
 0x218   : > { %2718 = vmatpush.bf16.msrb.mxu1 %v3568_v53 }
 0x219   : > { %2731 = vmatpush.bf16.msrb.mxu2 %v3696_v54 }
 0x21a   : > { %2744 = vmatpush.bf16.msrb.mxu3 %v3824_v58  ;;  %v2776_v58 = vperm.slane %v2771_v50, 3 }
 0x21b   : > { %2706 = vmatpush.bf16.msrb.mxu0 %v3424_v32  ;;  %v2500_v2 = vpop.f32.mrf.mxu0 }
 0x21c   : > { %2719 = vmatpush.bf16.msrb.mxu1 %v3552_v63  ;;  %v2501_v3 = vadd.f32 %v2500_v2, %v2488_v33  ;;  %v2513_v4 = vpop.f32.mrf.mxu1  ;;  %v2778_v63 = vrot.slane %v2775_v57, 4 }
 0x21d   : > { %2732 = vmatpush.bf16.msrb.mxu2 %v3680_v0  ;;  %v2779_v0 = vrot.slane %v2776_v58, 2 }
 0x21e   : > { %2745 = vmatpush.bf16.msrb.mxu3 %v3808_v1  ;;  %2707 = vmatmul.bf16.vlgmr.msrb.gmra.mxu0 %v5009_v39  ;;  %v2514_v5 = vadd.f32 %v2513_v4, %v2501_v3  ;;  %v2780_v4 = vsel %vm2758_vm0, %v2773_v59, %v2777_v31 }
 0x21f   : > { %2720 = vmatmul.bf16.vlgmr.msrb.gmra.mxu1 %v5013_v42 }
 0x220   : > { %2733 = vmatmul.bf16.vlgmr.msrb.gmra.mxu2 %v5005_v36 }
 0x221   : > { %2746 = vmatmul.bf16.vlgmr.msrb.gmra.mxu3 %v5011_v40 }
 0x223   : > { %v2526_v6 = vpop.f32.mrf.mxu2  ;;  %v2502_v10 = vpop.f32.mrf.mxu0 }
 0x224   : > { %v2527_v7 = vadd.f32 %v2526_v6, %v2514_v5  ;;  %v2539_v8 = vpop.f32.mrf.mxu3  ;;  %v2515_v11 = vpop.f32.mrf.mxu1 }
 0x226   : > { %v2540_v9 = vadd.f32 %v2539_v8, %v2527_v7  ;;  %v2781_v7 = vsel %vm2760_vm1, %v2778_v63, %v2779_v0 }
 0x227   : > { %v2782_v10 = vsel %vm2762_vm2, %v2780_v4, %v2781_v7 }
 0x228   : > { %v2755_v12 = vrot.slane %v2540_v9, 6 }
 0x22a   : > { %v5415_v39 = vsel %vm2758_vm0, %v5323_v45, %v2755_v12 }
 0x22b   : > { %v2528_v42 = vpop.f32.mrf.mxu2 }
 0x22c   : > { %v2541_v36 = vpop.f32.mrf.mxu3 }
 0x23b   : > { %v2552_v13 = vpop.f32.mrf.mxu0 }
 0x23c   : > { %v2565_v40 = vpop.f32.mrf.mxu1 }
 0x23d   : > { %v2566_v14 = vadd.f32 %v2565_v40, %v2552_v13 }
 0x243   : > { %v2578_v15 = vpop.f32.mrf.mxu2  ;;  %v2554_v19 = vpop.f32.mrf.mxu0 }
 0x244   : > { %v2579_v16 = vadd.f32 %v2578_v15, %v2566_v14  ;;  %v2591_v17 = vpop.f32.mrf.mxu3  ;;  %v2567_v20 = vpop.f32.mrf.mxu1 }
 0x246   : > { %v2592_v18 = vadd.f32 %v2591_v17, %v2579_v16 }
 0x24b   : > { %v2580_v21 = vpop.f32.mrf.mxu2 }
 0x24c   : > { %v2593_v22 = vpop.f32.mrf.mxu3 }
 0x25b   : > { %v2604_v23 = vpop.f32.mrf.mxu0 }
 0x25c   : > { %v2617_v24 = vpop.f32.mrf.mxu1  ;;  %v2605_v48 = vadd.f32 %v2604_v23, %v2592_v18 }
 0x25e   : > { %v2618_v51 = vadd.f32 %v2617_v24, %v2605_v48 }
 0x263   : > { %v2630_v27 = vpop.f32.mrf.mxu2  ;;  %v2606_v45 = vpop.f32.mrf.mxu0 }
 0x264   : > { %v2643_v28 = vpop.f32.mrf.mxu3  ;;  %v2619_v29 = vpop.f32.mrf.mxu1  ;;  %v2631_v56 = vadd.f32 %v2630_v27, %v2618_v51 }
 0x266   : > { %v2644_v61 = vadd.f32 %v2643_v28, %v2631_v56 }
 0x268   : > { %v2756_v5 = vrot.slane %v2644_v61, 4 }
 0x26b   : > { %v2632_v30 = vpop.f32.mrf.mxu2 }
 0x26c   : > { %v2645_v33 = vpop.f32.mrf.mxu3 }
 0x27b   : > { %v2656_v34 = vpop.f32.mrf.mxu0 }
 0x27c   : > { %v2669_v35 = vpop.f32.mrf.mxu1 }
 0x27d   : > { %v2670_v47 = vadd.f32 %v2669_v35, %v2656_v34 }
 0x283   : > { %v2682_v37 = vpop.f32.mrf.mxu2  ;;  %v2658_v41 = vpop.f32.mrf.mxu0 }
 0x284   : > { %v2695_v38 = vpop.f32.mrf.mxu3  ;;  %v2671_v43 = vpop.f32.mrf.mxu1  ;;  %v2683_v49 = vadd.f32 %v2682_v37, %v2670_v47 }
 0x286   : > { %v2696_v52 = vadd.f32 %v2695_v38, %v2683_v49 }
 0x28b   : > { %v2684_v44 = vpop.f32.mrf.mxu2 }
 0x28c   : > { %v2697_v46 = vpop.f32.mrf.mxu3 }
 0x29b   : > { %v2708_v53 = vpop.f32.mrf.mxu0 }
 0x29c   : > { %v2721_v54 = vpop.f32.mrf.mxu1  ;;  %v2709_v25 = vadd.f32 %v2708_v53, %v2696_v52 }
 0x29e   : > { %v2722_v26 = vadd.f32 %v2721_v54, %v2709_v25 }
 0x2a3   : > { %v2734_v60 = vpop.f32.mrf.mxu2  ;;  %v2710_v1 = vpop.f32.mrf.mxu0 }
 0x2a4   : > { %v2735_v62 = vadd.f32 %v2734_v60, %v2722_v26  ;;  %v2747_v32 = vpop.f32.mrf.mxu3  ;;  %v2723_v2 = vpop.f32.mrf.mxu1 }
 0x2a6   : > { %v2748_v3 = vadd.f32 %v2747_v32, %v2735_v62 }
 0x2a8   : > { %v2757_v6 = vrot.slane %v2748_v3, 2 }
 0x2aa   : > { %v2761_v8 = vsel %vm2760_vm1, %v2756_v5, %v2757_v6 }
 0x2ab   : > { %v2763_v9 = vsel %vm2762_vm2, %v5415_v39, %v2761_v8  ;;  %v2736_v11 = vpop.f32.mrf.mxu2 }
 0x2ac   : > { %v2749_v12 = vpop.f32.mrf.mxu3  ;;  %v2784_v42 = vadd.f32 %v2782_v10, %v2763_v9 }
 0x2ae   : > { %2785 = vst [vmem:[%s760_s19] sm:$0xff] %v2784_v42 }
 0x2af PF: > { %s13_s16 = sadd.s32 1, %s4259_s16   ;;  %s5449_s12 = smov %s4247_s13 }
 0x2b0   : > { %p10_p10 = scmp.ge.s32.totalorder %s13_s16, 4   ;;  %s5450_s13 = smov %s4316_s20 }
 0x2b1   : > { %s5451_s14 = smov %s4255_s15  ;;  %s5452_s15 = smov %s5454_s17 }
 0x2b2   :  { %12 = sbr.rel (!%p10_p10) target bundleno = 3 (0x3), region = 105 }

// kernel: arbitrary_nn_forward.6
= control target key start
LH: loop header
LB: loop body
LE: loop exit
PB: predicated region body
PF: predicated region fallthrough
CT: control target
= control target key end

     0   :  { %8 = vsyncpa [#allocation3], 0  ;;  %s8441_s0 = inlined_call_operand.vmem [shape: f32[2,32768], index: 0, kind: input, shape index: {}]   ;;  %s8442_s1 = inlined_call_operand.hbm [shape: bf16[32768,1024], index: 1, kind: input, shape index: {}]   ;;  %s8443_s2 = inlined_call_operand.vmem [shape: f32[1,1024], index: 2, kind: input, shape index: {}]   ;;  %s8444_s3 = inlined_call_operand.vmem [shape: f32[2,1024], index: 3, kind: output, shape index: {}]  }
   0x1   :  { %10 = vsyncpa [#allocation3 + $0x1], 0  ;;  %s7143_s12 = smov 0   ;;  %s7145_s13 = smov 0  }
   0x2   :  { %s7147_s14 = smov 0   ;;  %s7149_s15 = smov 0  }
   0x3   :  { %s7151_s16 = smov 0   ;;  %s7153_s17 = smov 0  }
   0x4   :  { %s7155_s18 = smov 0   ;;  %s7157_s19 = smov 0  }
   0x5 LB: > { %s4365_s20 = sadd.s32 4294967295, %s7117_s19   ;;  %s25_s21 = sadd.s32 1, %s7109_s17  ;;  %s7117_s19 = sphi %s7157_s19, %s16_s19   ;;  %s7113_s18 = sphi %s7155_s18, %s8456_s18   ;;  %s7109_s17 = sphi %s7153_s17, %s8455_s17   ;;  %s7105_s16 = sphi %s7151_s16, %s8454_s16   ;;  %s7101_s15 = sphi %s7149_s15, %s8453_s15   ;;  %s7097_s14 = sphi %s7147_s14, %s8452_s14   ;;  %s7093_s13 = sphi %s7145_s13, %s8451_s13   ;;  %s7089_s12 = sphi %s7143_s12, %s8450_s12  }
   0x6   : > { %p26_p0 = scmp.ge.s32.totalorder %s25_s21, 16  ;;  %s28_s22 = sadd.s32 1, %s7113_s18 }
   0x7   : > { %s63_s23 = sadd.s32 1, %s7097_s14  ;;  %p70_p1 = scmp.ne.s32.totalorder %s7097_s14, %s7093_s13 }
   0x8   : > { %s8458_s21 = smov (%p26_p0, %s25_s21), 0  ;;  %s8460_s22 = smov (!%p26_p0, %s28_s22), %s7113_s18 }
   0x9   : > { %s58_s24 = ssub.s32 %s7109_s17, %s8458_s21  ;;  %p71_p2 = scmp.eq.s32.totalorder %s7117_s19, 0 }
   0xa   : > { %p30_p3 = scmp.ge.s32.totalorder %s8460_s22, 2  ;;  %p76_p4 = scmp.ne.s32.totalorder %s7093_s13, %s7089_s12 }
   0xb   : > { %p7194_p5 = por %p71_p2, %p70_p1  ;;  %p77_p6 = scmp.eq.s32.totalorder %s4365_s20, 0 }
   0xc   : > { %s8462_s22 = smov (%p30_p3, %s8460_s22), 0  ;;  %p6952_p8 = scmp.lt.s32.totalorder %s7117_s19, 32 }
   0xd   : > { %8447 = sst [smem:[#allocation5_spill]] %s8462_s22  ;;  %p7200_p7 = por %p77_p6, %p76_p4 }
   0xe   : > { %s59_s27 = ssub.s32 %s7113_s18, %s8462_s22  ;;  %s161_s29 = sand.u32 1, %s7097_s14  }
   0xf   : > { %s60_s28 = sor.u32 %s59_s27, %s58_s24  ;;  %s4369_s30 = sshll.u32 %s161_s29, 12 }
  0x10   : > { %p61_p9 = scmp.eq.s32.totalorder %s60_s28, 0  ;;  %s4371_s4 = sshll.u32 %s7113_s18, 2 }
  0x11   : > { %s6433_s6 = sshll.u32 %s7109_s17, 11  ;;  %s165_s8 = scalar_lea.vmem [#allocation2], %s4369_s30 }
  0x12   : > { %s7210_s5 = scalar_select %p61_p9, %s7097_s14, %s63_s23  }
  0x13   : > { %s171_s7 = sadd.s32 %s6433_s6, %s4371_s4  ;;  %s176_s9 = sshll.u32 %s165_s8, 4  ;;  %s177_s9 = int_to_ptr.vmem [resolvable:$true] %s176_s9 }
  0x14   : > { %s4373_s10 = sshll.u32 %s171_s7, 2  ;;  %p6949_p10 = pnand %p6952_p8, %p7194_p5 }
  0x15   : > { %s173_s20 = scalar_lea.hbm %s8442_s1, %s4373_s10  ;;  %s162_s27 = scalar_lea.sflag [#allocation3], %s161_s29 }
  0x16   : > { %s174_s24 = sshll.u32 %s173_s20, 4  ;;  %s7119_s23 = smov 512   ;;  %s175_s24 = int_to_ptr.hbm [resolvable:$true] %s174_s24 }
  0x17   : > { %s7120_s28 = smov 256   ;;  %s7121_s22 = smov 16  }
  0x18   : > { %6951 = dma.hbm_to_vmem [thread:$0]  (!%p6949_p10), %s175_s24, 65536, %s177_s9, %s162_s27, %s7119_s23, %s7120_s28, %s7121_s22  }
  0x19   : > { %p4374_p11 = scmp.ge.s32.totalorder %s7117_s19, 1  ;;  %p192_p12 = scmp.lt.s32.totalorder %s7117_s19, 33 }
  0x1b   : > { %p193_p13 = pnand %p4374_p11, %p192_p12 }
  0x1c   : > { %s198_s30 = sand.u32 (!%p193_p13), 1, %s7093_s13  }
  0x1d   : > { %196 = sbr.rel (%p193_p13) target bundleno = 726 (0x2d6), region = 32  ;;  %s4375_s4 = sshll.u32 (!%p193_p13), %s198_s30, 12 }
  0x1e   : > { %s199_s6 = scalar_lea.sflag (!%p193_p13), [#allocation3], %s198_s30  ;;  %s7223_s7 = scalar_lea.vmem (!%p193_p13), [#allocation2], %s4375_s4 }
  0x22   : > { %7084 = dma.done.wait (%p7200_p7), %s199_s6, 65536  }
  0x23   : > { %7086 = vsyncadd (%p7200_p7), %s199_s6, 4294901760  ;;  %s4376_s25 = sshll.u32 %s7101_s15, 4  ;;  %s4378_s22 = sshll.u32 %s7105_s16, 2 }
  0x24   : > { %p236_p0 = scmp.lt.s32.totalorder %s4376_s25, 255  ;;  %p244_p1 = scmp.lt.s32.totalorder %s4378_s22, 7 }
  0x25   : > { %p4381_p2 = scmp.ne.s32.totalorder %s7101_s15, 0 }
  0x26   : > { %s8464_s25 = smov (!%p236_p0, %s4376_s25), 255  ;;  %s8466_s22 = smov (!%p244_p1, %s4378_s22), 7 }
  0x27   : > { %s4377_s29 = sshll.u32 %s8464_s25, 1  ;;  %s246_s12 = scalar_lea.vmem %s8443_s2, %s8466_s22 }
  0x28   : > { %s7236_s10 = scalar_lea.vmem %s8441_s0, %s4377_s29  ;;  %s4380_s20 = sshll.u32 %s8466_s22, 1 }
  0x29   : > { %s7246_s27 = scalar_lea.vmem %s8444_s3, %s4380_s20  ;;  %257 = sbr.rel (%p4381_p2) target bundleno = 48 (0x30), region = 40 }
  0x2e   : > { %v7122_v0 = vmov 0.0  }
  0x2f   : > { %258 = vst [vmem:[%s7246_s27] sm:$0xff] %v7122_v0 }
  0x30 PF: > { %v4496_v1 = vld [vmem:[%s7223_s7 + $0xe0] sm:$0xf]  ;;  %v6464_v2 = vld [vmem:[%s7223_s7 + $0xec] sm:$0xf0]  ;;  %vm4232_vm0 = vcmask 1041408   ;;  %vm4234_vm1 = vcmask 1045508  }
  0x31   : > { %v4624_v3 = vld [vmem:[%s7223_s7 + $0x1e0] sm:$0xf]  ;;  %v4497_v4 = vor.u32 %v6464_v2, %v4496_v1  ;;  %v6496_v5 = vld [vmem:[%s7223_s7 + $0x1ec] sm:$0xf0]  ;;  %vm4236_vm2 = vcmask 1043456   ;;  %p6430_p3 = scmp.ne.s32.totalorder %s7101_s15, 15 }
  0x32   : > { %v4752_v6 = vld [vmem:[%s7223_s7 + $0x2e0] sm:$0xf]  ;;  %v6528_v7 = vld [vmem:[%s7223_s7 + $0x2ec] sm:$0xf0]  ;;  %v4625_v8 = vor.u32 %v6496_v5, %v4624_v3 }
  0x33   : > { %v4753_v9 = vor.u32 %v6528_v7, %v4752_v6  ;;  %v4880_v10 = vld [vmem:[%s7223_s7 + $0x3e0] sm:$0xf]  ;;  %v6560_v11 = vld [vmem:[%s7223_s7 + $0x3ec] sm:$0xf0]  ;;  %3393 = vmatpush.bf16.msra.mxu0 %v4497_v4 }
  0x34   : > { %v4480_v12 = vld [vmem:[%s7223_s7 + $0xc0] sm:$0xf]  ;;  %v4881_v13 = vor.u32 %v6560_v11, %v4880_v10  ;;  %v6460_v14 = vld [vmem:[%s7223_s7 + $0xcc] sm:$0xf0]  ;;  %3406 = vmatpush.bf16.msra.mxu1 %v4625_v8 }
  0x35   : > { %v4608_v15 = vld [vmem:[%s7223_s7 + $0x1c0] sm:$0xf]  ;;  %v6492_v16 = vld [vmem:[%s7223_s7 + $0x1cc] sm:$0xf0]  ;;  %3419 = vmatpush.bf16.msra.mxu2 %v4753_v9  ;;  %v4481_v17 = vor.u32 %v6460_v14, %v4480_v12 }
  0x36   : > { %v4609_v18 = vor.u32 %v6492_v16, %v4608_v15  ;;  %v4736_v19 = vld [vmem:[%s7223_s7 + $0x2c0] sm:$0xf]  ;;  %v6524_v20 = vld [vmem:[%s7223_s7 + $0x2cc] sm:$0xf0]  ;;  %3432 = vmatpush.bf16.msra.mxu3 %v4881_v13 }
  0x37   : > { %v4864_v21 = vld [vmem:[%s7223_s7 + $0x3c0] sm:$0xf]  ;;  %v4737_v22 = vor.u32 %v6524_v20, %v4736_v19  ;;  %v6556_v23 = vld [vmem:[%s7223_s7 + $0x3cc] sm:$0xf0]  ;;  %3394 = vmatpush.bf16.msra.mxu0 %v4481_v17 }
  0x38   : > { %v4464_v24 = vld [vmem:[%s7223_s7 + $0xa0] sm:$0xf]  ;;  %v6456_v25 = vld [vmem:[%s7223_s7 + $0xac] sm:$0xf0]  ;;  %v4865_v26 = vor.u32 %v6556_v23, %v4864_v21  ;;  %3407 = vmatpush.bf16.msra.mxu1 %v4609_v18 }
  0x39   : > { %v4592_v27 = vld [vmem:[%s7223_s7 + $0x1a0] sm:$0xf]  ;;  %v6488_v28 = vld [vmem:[%s7223_s7 + $0x1ac] sm:$0xf0]  ;;  %v4465_v30 = vor.u32 %v6456_v25, %v4464_v24  ;;  %3420 = vmatpush.bf16.msra.mxu2 %v4737_v22 }
  0x3a   : > { %v4720_v29 = vld [vmem:[%s7223_s7 + $0x2a0] sm:$0xf]  ;;  %v6520_v31 = vld [vmem:[%s7223_s7 + $0x2ac] sm:$0xf0]  ;;  %v4593_v34 = vor.u32 %v6488_v28, %v4592_v27  ;;  %3433 = vmatpush.bf16.msra.mxu3 %v4865_v26 }
  0x3b   : > { %v4848_v32 = vld [vmem:[%s7223_s7 + $0x3a0] sm:$0xf]  ;;  %v6552_v33 = vld [vmem:[%s7223_s7 + $0x3ac] sm:$0xf0]  ;;  %v4721_v35 = vor.u32 %v6520_v31, %v4720_v29  ;;  %3395 = vmatpush.bf16.msra.mxu0 %v4465_v30 }
  0x3c   : > { %v4448_v36 = vld [vmem:[%s7223_s7 + $0x80] sm:$0xf]  ;;  %v6452_v37 = vld [vmem:[%s7223_s7 + $0x8c] sm:$0xf0]  ;;  %v4849_v39 = vor.u32 %v6552_v33, %v4848_v32  ;;  %3408 = vmatpush.bf16.msra.mxu1 %v4593_v34 }
  0x3d   : > { %v4576_v38 = vld [vmem:[%s7223_s7 + $0x180] sm:$0xf]  ;;  %v6484_v40 = vld [vmem:[%s7223_s7 + $0x18c] sm:$0xf0]  ;;  %v4449_v45 = vor.u32 %v6452_v37, %v4448_v36  ;;  %3421 = vmatpush.bf16.msra.mxu2 %v4721_v35 }
  0x3e   : > { %v4704_v41 = vld [vmem:[%s7223_s7 + $0x280] sm:$0xf]  ;;  %v6516_v42 = vld [vmem:[%s7223_s7 + $0x28c] sm:$0xf0]  ;;  %v4577_v46 = vor.u32 %v6484_v40, %v4576_v38  ;;  %3434 = vmatpush.bf16.msra.mxu3 %v4849_v39 }
  0x3f   : > { %v4832_v43 = vld [vmem:[%s7223_s7 + $0x380] sm:$0xf]  ;;  %v6548_v44 = vld [vmem:[%s7223_s7 + $0x38c] sm:$0xf0]  ;;  %v4705_v47 = vor.u32 %v6516_v42, %v4704_v41  ;;  %3396 = vmatpush.bf16.msra.mxu0 %v4449_v45 }
  0x40   : > { %v4432_v48 = vld [vmem:[%s7223_s7 + $0x60] sm:$0xf]  ;;  %v6448_v49 = vld [vmem:[%s7223_s7 + $0x6c] sm:$0xf0]  ;;  %v4833_v51 = vor.u32 %v6548_v44, %v4832_v43  ;;  %3409 = vmatpush.bf16.msra.mxu1 %v4577_v46 }
  0x41   : > { %v4560_v50 = vld [vmem:[%s7223_s7 + $0x160] sm:$0xf]  ;;  %v6480_v52 = vld [vmem:[%s7223_s7 + $0x16c] sm:$0xf0]  ;;  %v4433_v57 = vor.u32 %v6448_v49, %v4432_v48  ;;  %3422 = vmatpush.bf16.msra.mxu2 %v4705_v47 }
  0x42   : > { %v4688_v53 = vld [vmem:[%s7223_s7 + $0x260] sm:$0xf]  ;;  %v6512_v54 = vld [vmem:[%s7223_s7 + $0x26c] sm:$0xf0]  ;;  %v4561_v58 = vor.u32 %v6480_v52, %v4560_v50  ;;  %3435 = vmatpush.bf16.msra.mxu3 %v4833_v51 }
  0x43   : > { %v4816_v55 = vld [vmem:[%s7223_s7 + $0x360] sm:$0xf]  ;;  %v6544_v56 = vld [vmem:[%s7223_s7 + $0x36c] sm:$0xf0]  ;;  %v4689_v59 = vor.u32 %v6512_v54, %v4688_v53  ;;  %3397 = vmatpush.bf16.msra.mxu0 %v4433_v57 }
  0x44   : > { %v4416_v60 = vld [vmem:[%s7223_s7 + $0x40] sm:$0xf]  ;;  %v6444_v61 = vld [vmem:[%s7223_s7 + $0x4c] sm:$0xf0]  ;;  %v4817_v63 = vor.u32 %v6544_v56, %v4816_v55  ;;  %3410 = vmatpush.bf16.msra.mxu1 %v4561_v58 }
  0x45   : > { %v4544_v62 = vld [vmem:[%s7223_s7 + $0x140] sm:$0xf]  ;;  %v6476_v0 = vld [vmem:[%s7223_s7 + $0x14c] sm:$0xf0]  ;;  %v4417_v5 = vor.u32 %v6444_v61, %v4416_v60  ;;  %3423 = vmatpush.bf16.msra.mxu2 %v4689_v59  ;;  %v260_v60 = vld [vmem:[%s7236_s10] sm:$0xff] }
  0x46   : > { %v4672_v1 = vld [vmem:[%s7223_s7 + $0x240] sm:$0xf]  ;;  %v6508_v2 = vld [vmem:[%s7223_s7 + $0x24c] sm:$0xf0]  ;;  %v4545_v6 = vor.u32 %v6476_v0, %v4544_v62  ;;  %3436 = vmatpush.bf16.msra.mxu3 %v4817_v63  ;;  %268 = vst [vmem:[#allocation1] ss:$4 sm:$0xff] %v260_v60 }
  0x47   : > { %v4800_v3 = vld [vmem:[%s7223_s7 + $0x340] sm:$0xf]  ;;  %v6540_v4 = vld [vmem:[%s7223_s7 + $0x34c] sm:$0xf0]  ;;  %v4673_v7 = vor.u32 %v6508_v2, %v4672_v1  ;;  %3398 = vmatpush.bf16.msra.mxu0 %v4417_v5 }
  0x48   : > { %v4400_v8 = vld [vmem:[%s7223_s7 + $0x20] sm:$0xf]  ;;  %v6440_v9 = vld [vmem:[%s7223_s7 + $0x2c] sm:$0xf0]  ;;  %v4801_v11 = vor.u32 %v6540_v4, %v4800_v3  ;;  %3411 = vmatpush.bf16.msra.mxu1 %v4545_v6 }
  0x49   : > { %v4528_v10 = vld [vmem:[%s7223_s7 + $0x120] sm:$0xf]  ;;  %v6472_v12 = vld [vmem:[%s7223_s7 + $0x12c] sm:$0xf0]  ;;  %v4401_v17 = vor.u32 %v6440_v9, %v4400_v8  ;;  %3424 = vmatpush.bf16.msra.mxu2 %v4673_v7 }
  0x4a   : > { %v4656_v13 = vld [vmem:[%s7223_s7 + $0x220] sm:$0xf]  ;;  %v6504_v14 = vld [vmem:[%s7223_s7 + $0x22c] sm:$0xf0]  ;;  %v4529_v20 = vor.u32 %v6472_v12, %v4528_v10  ;;  %3437 = vmatpush.bf16.msra.mxu3 %v4801_v11 }
  0x4b   : > { %v4784_v15 = vld [vmem:[%s7223_s7 + $0x320] sm:$0xf]  ;;  %v6536_v16 = vld [vmem:[%s7223_s7 + $0x32c] sm:$0xf0]  ;;  %v4657_v21 = vor.u32 %v6504_v14, %v4656_v13  ;;  %3399 = vmatpush.bf16.msra.mxu0 %v4401_v17 }
  0x4c   : > { %v4384_v18 = vld [vmem:[%s7223_s7] sm:$0xf]  ;;  %v6436_v19 = vld [vmem:[%s7223_s7 + $0xc] sm:$0xf0]  ;;  %v4785_v25 = vor.u32 %v6536_v16, %v4784_v15  ;;  %3412 = vmatpush.bf16.msra.mxu1 %v4529_v20 }
  0x4d   : > { %v4512_v22 = vld [vmem:[%s7223_s7 + $0x100] sm:$0xf]  ;;  %v6468_v23 = vld [vmem:[%s7223_s7 + $0x10c] sm:$0xf0]  ;;  %v4385_v32 = vor.u32 %v6436_v19, %v4384_v18  ;;  %3425 = vmatpush.bf16.msra.mxu2 %v4657_v21  ;;  %v262_v21 = vld [vmem:[%s7236_s10 + $0x10] sm:$0xff] }
  0x4e   : > { %v4640_v24 = vld [vmem:[%s7223_s7 + $0x200] sm:$0xf]  ;;  %v6500_v26 = vld [vmem:[%s7223_s7 + $0x20c] sm:$0xf0]  ;;  %v4513_v36 = vor.u32 %v6468_v23, %v4512_v22  ;;  %3438 = vmatpush.bf16.msra.mxu3 %v4785_v25 }
  0x4f   : > { %v4768_v27 = vld [vmem:[%s7223_s7 + $0x300] sm:$0xf]  ;;  %v6532_v28 = vld [vmem:[%s7223_s7 + $0x30c] sm:$0xf0]  ;;  %v4641_v37 = vor.u32 %v6500_v26, %v4640_v24  ;;  %3400 = vmatpush.bf16.msra.mxu0 %v4385_v32 }
  0x50   : > { %v5008_v29 = vld [vmem:[%s7223_s7 + $0x4e0] sm:$0xf]  ;;  %v6592_v30 = vld [vmem:[%s7223_s7 + $0x4ec] sm:$0xf0]  ;;  %v4769_v40 = vor.u32 %v6532_v28, %v4768_v27  ;;  %3413 = vmatpush.bf16.msra.mxu1 %v4513_v36 }
  0x51   : > { %v5136_v31 = vld [vmem:[%s7223_s7 + $0x5e0] sm:$0xf]  ;;  %v6624_v33 = vld [vmem:[%s7223_s7 + $0x5ec] sm:$0xf0]  ;;  %v5009_v41 = vor.u32 %v6592_v30, %v5008_v29  ;;  %3426 = vmatpush.bf16.msra.mxu2 %v4641_v37 }
  0x52   : > { %v5264_v34 = vld [vmem:[%s7223_s7 + $0x6e0] sm:$0xf]  ;;  %v6656_v35 = vld [vmem:[%s7223_s7 + $0x6ec] sm:$0xf0]  ;;  %v5137_v42 = vor.u32 %v6624_v33, %v5136_v31  ;;  %3439 = vmatpush.bf16.msra.mxu3 %v4769_v40 }
  0x53   : > { %v5392_v38 = vld [vmem:[%s7223_s7 + $0x7e0] sm:$0xf]  ;;  %v6688_v39 = vld [vmem:[%s7223_s7 + $0x7ec] sm:$0xf0]  ;;  %v5265_v43 = vor.u32 %v6656_v35, %v5264_v34  ;;  %3445 = vmatpush.bf16.msrb.mxu0 %v5009_v41 }
  0x54   : > { %v4992_v44 = vld [vmem:[%s7223_s7 + $0x4c0] sm:$0xf]  ;;  %v6588_v45 = vld [vmem:[%s7223_s7 + $0x4cc] sm:$0xf0]  ;;  %v5393_v47 = vor.u32 %v6688_v39, %v5392_v38  ;;  %3458 = vmatpush.bf16.msrb.mxu1 %v5137_v42 }
  0x55   : > { %v5120_v46 = vld [vmem:[%s7223_s7 + $0x5c0] sm:$0xf]  ;;  %v6620_v48 = vld [vmem:[%s7223_s7 + $0x5cc] sm:$0xf0]  ;;  %v4993_v53 = vor.u32 %v6588_v45, %v4992_v44  ;;  %3471 = vmatpush.bf16.msrb.mxu2 %v5265_v43 }
  0x56   : > { %v5248_v49 = vld [vmem:[%s7223_s7 + $0x6c0] sm:$0xf]  ;;  %v6652_v50 = vld [vmem:[%s7223_s7 + $0x6cc] sm:$0xf0]  ;;  %v5121_v56 = vor.u32 %v6620_v48, %v5120_v46  ;;  %3484 = vmatpush.bf16.msrb.mxu3 %v5393_v47 }
  0x57   : > { %v5376_v51 = vld [vmem:[%s7223_s7 + $0x7c0] sm:$0xf]  ;;  %v6684_v52 = vld [vmem:[%s7223_s7 + $0x7cc] sm:$0xf0]  ;;  %v5249_v57 = vor.u32 %v6652_v50, %v5248_v49  ;;  %3446 = vmatpush.bf16.msrb.mxu0 %v4993_v53 }
  0x58   : > { %v4976_v54 = vld [vmem:[%s7223_s7 + $0x4a0] sm:$0xf]  ;;  %v6584_v55 = vld [vmem:[%s7223_s7 + $0x4ac] sm:$0xf0]  ;;  %v5377_v61 = vor.u32 %v6684_v52, %v5376_v51  ;;  %3459 = vmatpush.bf16.msrb.mxu1 %v5121_v56 }
  0x59   : > { %v5104_v58 = vld [vmem:[%s7223_s7 + $0x5a0] sm:$0xf]  ;;  %v6616_v59 = vld [vmem:[%s7223_s7 + $0x5ac] sm:$0xf0]  ;;  %v4977_v2 = vor.u32 %v6584_v55, %v4976_v54  ;;  %3472 = vmatpush.bf16.msrb.mxu2 %v5249_v57 }
  0x5a   : > { %v5232_v62 = vld [vmem:[%s7223_s7 + $0x6a0] sm:$0xf]  ;;  %v6648_v63 = vld [vmem:[%s7223_s7 + $0x6ac] sm:$0xf0]  ;;  %v5105_v4 = vor.u32 %v6616_v59, %v5104_v58  ;;  %3485 = vmatpush.bf16.msrb.mxu3 %v5377_v61 }
  0x5b   : > { %v5360_v0 = vld [vmem:[%s7223_s7 + $0x7a0] sm:$0xf]  ;;  %v6680_v1 = vld [vmem:[%s7223_s7 + $0x7ac] sm:$0xf0]  ;;  %v5233_v5 = vor.u32 %v6648_v63, %v5232_v62  ;;  %3447 = vmatpush.bf16.msrb.mxu0 %v4977_v2 }
  0x5c   : > { %v4960_v3 = vld [vmem:[%s7223_s7 + $0x480] sm:$0xf]  ;;  %v6580_v6 = vld [vmem:[%s7223_s7 + $0x48c] sm:$0xf0]  ;;  %v5361_v9 = vor.u32 %v6680_v1, %v5360_v0  ;;  %3460 = vmatpush.bf16.msrb.mxu1 %v5105_v4 }
  0x5d   : > { %v5088_v7 = vld [vmem:[%s7223_s7 + $0x580] sm:$0xf]  ;;  %v6612_v8 = vld [vmem:[%s7223_s7 + $0x58c] sm:$0xf0]  ;;  %v4961_v16 = vor.u32 %v6580_v6, %v4960_v3  ;;  %3473 = vmatpush.bf16.msrb.mxu2 %v5233_v5 }
  0x5e   : > { %v5216_v10 = vld [vmem:[%s7223_s7 + $0x680] sm:$0xf]  ;;  %v6644_v11 = vld [vmem:[%s7223_s7 + $0x68c] sm:$0xf0]  ;;  %v5089_v22 = vor.u32 %v6612_v8, %v5088_v7  ;;  %3486 = vmatpush.bf16.msrb.mxu3 %v5361_v9 }
  0x5f   : > { %v5344_v12 = vld [vmem:[%s7223_s7 + $0x780] sm:$0xf]  ;;  %v6676_v13 = vld [vmem:[%s7223_s7 + $0x78c] sm:$0xf0]  ;;  %v5217_v23 = vor.u32 %v6644_v11, %v5216_v10  ;;  %3448 = vmatpush.bf16.msrb.mxu0 %v4961_v16 }
  0x60   : > { %v4944_v14 = vld [vmem:[%s7223_s7 + $0x460] sm:$0xf]  ;;  %v6576_v15 = vld [vmem:[%s7223_s7 + $0x46c] sm:$0xf0]  ;;  %v5345_v26 = vor.u32 %v6676_v13, %v5344_v12  ;;  %3461 = vmatpush.bf16.msrb.mxu1 %v5089_v22 }
  0x61   : > { %v5072_v17 = vld [vmem:[%s7223_s7 + $0x560] sm:$0xf]  ;;  %v6608_v18 = vld [vmem:[%s7223_s7 + $0x56c] sm:$0xf0]  ;;  %v4945_v35 = vor.u32 %v6576_v15, %v4944_v14  ;;  %3474 = vmatpush.bf16.msrb.mxu2 %v5217_v23 }
  0x62   : > { %v5200_v19 = vld [vmem:[%s7223_s7 + $0x660] sm:$0xf]  ;;  %v6640_v20 = vld [vmem:[%s7223_s7 + $0x66c] sm:$0xf0]  ;;  %v5073_v36 = vor.u32 %v6608_v18, %v5072_v17  ;;  %3487 = vmatpush.bf16.msrb.mxu3 %v5345_v26 }
  0x63   : > { %v273_v24 = vld.sshfl [vmem:[#allocation1 + $0x10] sm:$0xff pattern:$0x73625140]  ;;  %v271_v25 = vld.sshfl [vmem:[#allocation1] sm:$0xff pattern:$0x73625140]  ;;  %v5201_v37 = vor.u32 %v6640_v20, %v5200_v19  ;;  %3449 = vmatpush.bf16.msrb.mxu0 %v4945_v35 }
  0x64   : > { %v7354_v27 = vpack.c.bf16 %v273_v24, %v273_v24  ;;  %v7356_v28 = vpack.c.bf16 %v271_v25, %v271_v25  ;;  %v274_v29 = vld.sshfl [vmem:[#allocation1 + $0x18] sm:$0xff pattern:$0x73625140]  ;;  %v272_v30 = vld.sshfl [vmem:[#allocation1 + $0x8] sm:$0xff pattern:$0x73625140]  ;;  %3462 = vmatpush.bf16.msrb.mxu1 %v5073_v36 }
  0x65   : > { %v5328_v31 = vld [vmem:[%s7223_s7 + $0x760] sm:$0xf]  ;;  %v6672_v32 = vld [vmem:[%s7223_s7 + $0x76c] sm:$0xf0]  ;;  %v7360_v33 = vpack.c.bf16 %v274_v29, %v274_v29  ;;  %279 = vst [vmem:[#allocation1] ss:$4 sm:$0xff] %v262_v21  ;;  %v7362_v34 = vpack.c.bf16 %v272_v30, %v272_v30  ;;  %3475 = vmatpush.bf16.msrb.mxu2 %v5201_v37 }
  0x66   : > { %3427 = vmatmul.bf16.vlgmr.msra.gmra.mxu2 %v7354_v27  ;;  %v4928_v38 = vld [vmem:[%s7223_s7 + $0x440] sm:$0xf]  ;;  %v6572_v39 = vld [vmem:[%s7223_s7 + $0x44c] sm:$0xf0]  ;;  %v5329_v41 = vor.u32 %v6672_v32, %v5328_v31  ;;  %3401 = vmatmul.bf16.vlgmr.msra.gmra.mxu0 %v7356_v28 }
  0x67   : > { %v5056_v40 = vld [vmem:[%s7223_s7 + $0x540] sm:$0xf]  ;;  %v6604_v42 = vld [vmem:[%s7223_s7 + $0x54c] sm:$0xf0]  ;;  %3440 = vmatmul.bf16.vlgmr.msra.gmra.mxu3 %v7360_v33  ;;  %3414 = vmatmul.bf16.vlgmr.msra.gmra.mxu1 %v7362_v34  ;;  %v4929_v47 = vor.u32 %v6572_v39, %v4928_v38 }
  0x68   : > { %v5184_v43 = vld [vmem:[%s7223_s7 + $0x640] sm:$0xf]  ;;  %v6636_v44 = vld [vmem:[%s7223_s7 + $0x64c] sm:$0xf0]  ;;  %v5057_v50 = vor.u32 %v6604_v42, %v5056_v40  ;;  %3488 = vmatpush.bf16.msrb.mxu3 %v5329_v41 }
  0x69   : > { %v5312_v45 = vld [vmem:[%s7223_s7 + $0x740] sm:$0xf]  ;;  %v6668_v46 = vld [vmem:[%s7223_s7 + $0x74c] sm:$0xf0]  ;;  %v5185_v51 = vor.u32 %v6636_v44, %v5184_v43  ;;  %3450 = vmatpush.bf16.msrb.mxu0 %v4929_v47 }
  0x6a   : > { %v4912_v48 = vld [vmem:[%s7223_s7 + $0x420] sm:$0xf]  ;;  %v6568_v49 = vld [vmem:[%s7223_s7 + $0x42c] sm:$0xf0]  ;;  %v5313_v55 = vor.u32 %v6668_v46, %v5312_v45  ;;  %3463 = vmatpush.bf16.msrb.mxu1 %v5057_v50 }
  0x6b   : > { %v5040_v52 = vld [vmem:[%s7223_s7 + $0x520] sm:$0xf]  ;;  %v6600_v53 = vld [vmem:[%s7223_s7 + $0x52c] sm:$0xf0]  ;;  %v4913_v61 = vor.u32 %v6568_v49, %v4912_v48  ;;  %3476 = vmatpush.bf16.msrb.mxu2 %v5185_v51 }
  0x6c   : > { %v5168_v54 = vld [vmem:[%s7223_s7 + $0x620] sm:$0xf]  ;;  %v6632_v56 = vld [vmem:[%s7223_s7 + $0x62c] sm:$0xf0]  ;;  %v5041_v1 = vor.u32 %v6600_v53, %v5040_v52  ;;  %3489 = vmatpush.bf16.msrb.mxu3 %v5313_v55 }
  0x6d   : > { %v5296_v57 = vld [vmem:[%s7223_s7 + $0x720] sm:$0xf]  ;;  %v6664_v59 = vld [vmem:[%s7223_s7 + $0x72c] sm:$0xf0]  ;;  %v5169_v2 = vor.u32 %v6632_v56, %v5168_v54  ;;  %3451 = vmatpush.bf16.msrb.mxu0 %v4913_v61 }
  0x6e   : > { %v261_v58 = vld [vmem:[%s7236_s10 + $0x8] sm:$0xff]  ;;  %v6564_v62 = vld [vmem:[%s7223_s7 + $0x40c] sm:$0xf0]  ;;  %v5297_v6 = vor.u32 %v6664_v59, %v5296_v57  ;;  %3464 = vmatpush.bf16.msrb.mxu1 %v5041_v1 }
  0x6f   : > { %v4896_v60 = vld [vmem:[%s7223_s7 + $0x400] sm:$0xf]  ;;  %270 = vst [vmem:[#allocation1 + $0x20] ss:$4 sm:$0xff] %v261_v58  ;;  %v6596_v0 = vld [vmem:[%s7223_s7 + $0x50c] sm:$0xf0]  ;;  %3477 = vmatpush.bf16.msrb.mxu2 %v5169_v2 }
  0x70   : > { %v5024_v63 = vld [vmem:[%s7223_s7 + $0x500] sm:$0xf]  ;;  %v6628_v4 = vld [vmem:[%s7223_s7 + $0x60c] sm:$0xf0]  ;;  %v4897_v13 = vor.u32 %v6564_v62, %v4896_v60  ;;  %3490 = vmatpush.bf16.msrb.mxu3 %v5297_v6 }
  0x71   : > { %v5152_v3 = vld [vmem:[%s7223_s7 + $0x600] sm:$0xf]  ;;  %v6660_v7 = vld [vmem:[%s7223_s7 + $0x70c] sm:$0xf0]  ;;  %v5025_v17 = vor.u32 %v6596_v0, %v5024_v63 }
  0x72   : > { %v5280_v5 = vld [vmem:[%s7223_s7 + $0x700] sm:$0xf]  ;;  %v6720_v9 = vld [vmem:[%s7223_s7 + $0x8ec] sm:$0xf0]  ;;  %v5153_v18 = vor.u32 %v6628_v4, %v5152_v3  ;;  %3452 = vmatpush.bf16.msrb.mxu0 %v4897_v13 }
  0x73   : > { %v5520_v8 = vld [vmem:[%s7223_s7 + $0x8e0] sm:$0xf]  ;;  %v6752_v11 = vld [vmem:[%s7223_s7 + $0x9ec] sm:$0xf0]  ;;  %v5281_v22 = vor.u32 %v6660_v7, %v5280_v5  ;;  %3465 = vmatpush.bf16.msrb.mxu1 %v5025_v17 }
  0x74   : > { %v5648_v10 = vld [vmem:[%s7223_s7 + $0x9e0] sm:$0xf]  ;;  %v6784_v14 = vld [vmem:[%s7223_s7 + $0xaec] sm:$0xf0]  ;;  %v5521_v23 = vor.u32 %v6720_v9, %v5520_v8  ;;  %3478 = vmatpush.bf16.msrb.mxu2 %v5153_v18 }
  0x75   : > { %v5776_v12 = vld [vmem:[%s7223_s7 + $0xae0] sm:$0xf]  ;;  %v6816_v16 = vld [vmem:[%s7223_s7 + $0xbec] sm:$0xf0]  ;;  %v5649_v30 = vor.u32 %v6752_v11, %v5648_v10  ;;  %3491 = vmatpush.bf16.msrb.mxu3 %v5281_v22 }
  0x76   : > { %v5904_v15 = vld [vmem:[%s7223_s7 + $0xbe0] sm:$0xf]  ;;  %v6716_v20 = vld [vmem:[%s7223_s7 + $0x8cc] sm:$0xf0]  ;;  %v5777_v31 = vor.u32 %v6784_v14, %v5776_v12  ;;  %3497 = vmatpush.bf16.msra.mxu0 %v5521_v23 }
  0x77   : > { %v5504_v19 = vld [vmem:[%s7223_s7 + $0x8c0] sm:$0xf]  ;;  %v263_v21 = vld [vmem:[%s7236_s10 + $0x18] sm:$0xff]  ;;  %v277_v26 = vld.sshfl [vmem:[#allocation1 + $0x30] sm:$0xff pattern:$0x73625140]  ;;  %v5905_v36 = vor.u32 %v6816_v16, %v5904_v15  ;;  %3510 = vmatpush.bf16.msra.mxu1 %v5649_v30 }
  0x78   : > { %v5632_v24 = vld [vmem:[%s7223_s7 + $0x9c0] sm:$0xf]  ;;  %v6748_v25 = vld [vmem:[%s7223_s7 + $0x9cc] sm:$0xf0]  ;;  %v7408_v39 = vpack.c.bf16 %v277_v26, %v277_v26  ;;  %v5505_v44 = vor.u32 %v6716_v20, %v5504_v19  ;;  %3523 = vmatpush.bf16.msra.mxu2 %v5777_v31 }
  0x79   : > { %v275_v29 = vld.sshfl [vmem:[#allocation1 + $0x20] sm:$0xff pattern:$0x73625140]  ;;  %v278_v32 = vld.sshfl [vmem:[#allocation1 + $0x38] sm:$0xff pattern:$0x73625140]  ;;  %v5633_v46 = vor.u32 %v6748_v25, %v5632_v24  ;;  %3536 = vmatpush.bf16.msra.mxu3 %v5905_v36 }
  0x7a   : > { %v276_v35 = vld.sshfl [vmem:[#allocation1 + $0x28] sm:$0xff pattern:$0x73625140]  ;;  %v6780_v38 = vld [vmem:[%s7223_s7 + $0xacc] sm:$0xf0]  ;;  %v7412_v42 = vpack.c.bf16 %v275_v29, %v275_v29  ;;  %v7414_v43 = vpack.c.bf16 %v278_v32, %v278_v32  ;;  %3479 = vmatmul.bf16.vlgmr.msrb.gmra.mxu2 %v7408_v39  ;;  %3498 = vmatpush.bf16.msra.mxu0 %v5505_v44 }
  0x7b   : > { %v5760_v37 = vld [vmem:[%s7223_s7 + $0xac0] sm:$0xf]  ;;  %280 = vst [vmem:[#allocation1 + $0x20] ss:$4 sm:$0xff] %v263_v21  ;;  %v6812_v41 = vld [vmem:[%s7223_s7 + $0xbcc] sm:$0xf0]  ;;  %v7416_v45 = vpack.c.bf16 %v276_v35, %v276_v35  ;;  %3511 = vmatpush.bf16.msra.mxu1 %v5633_v46 }
  0x7c   : > { %v5888_v40 = vld [vmem:[%s7223_s7 + $0xbc0] sm:$0xf]  ;;  %v5761_v47 = vor.u32 %v6780_v38, %v5760_v37  ;;  %v6712_v49 = vld [vmem:[%s7223_s7 + $0x8ac] sm:$0xf0]  ;;  %3453 = vmatmul.bf16.vlgmr.msrb.gmra.mxu0 %v7412_v42  ;;  %3492 = vmatmul.bf16.vlgmr.msrb.gmra.mxu3 %v7414_v43 }
  0x7d   : > { %v5488_v48 = vld [vmem:[%s7223_s7 + $0x8a0] sm:$0xf]  ;;  %v5889_v51 = vor.u32 %v6812_v41, %v5888_v40  ;;  %v6744_v52 = vld [vmem:[%s7223_s7 + $0x9ac] sm:$0xf0]  ;;  %3466 = vmatmul.bf16.vlgmr.msrb.gmra.mxu1 %v7416_v45 }
  0x7e   : > { %v5616_v50 = vld [vmem:[%s7223_s7 + $0x9a0] sm:$0xf]  ;;  %v6776_v54 = vld [vmem:[%s7223_s7 + $0xaac] sm:$0xf0]  ;;  %v5489_v57 = vor.u32 %v6712_v49, %v5488_v48  ;;  %3524 = vmatpush.bf16.msra.mxu2 %v5761_v47 }
  0x7f   : > { %v5744_v53 = vld [vmem:[%s7223_s7 + $0xaa0] sm:$0xf]  ;;  %v6808_v56 = vld [vmem:[%s7223_s7 + $0xbac] sm:$0xf0]  ;;  %v5617_v58 = vor.u32 %v6744_v52, %v5616_v50  ;;  %3537 = vmatpush.bf16.msra.mxu3 %v5889_v51 }
  0x80   : > { %v5872_v55 = vld [vmem:[%s7223_s7 + $0xba0] sm:$0xf]  ;;  %v5745_v59 = vor.u32 %v6776_v54, %v5744_v53  ;;  %v6708_v61 = vld [vmem:[%s7223_s7 + $0x88c] sm:$0xf0]  ;;  %3499 = vmatpush.bf16.msra.mxu0 %v5489_v57 }
  0x81   : > { %v5472_v60 = vld [vmem:[%s7223_s7 + $0x880] sm:$0xf]  ;;  %v5873_v63 = vor.u32 %v6808_v56, %v5872_v55  ;;  %v6740_v0 = vld [vmem:[%s7223_s7 + $0x98c] sm:$0xf0]  ;;  %3512 = vmatpush.bf16.msra.mxu1 %v5617_v58 }
  0x82   : > { %v5600_v62 = vld [vmem:[%s7223_s7 + $0x980] sm:$0xf]  ;;  %v6772_v2 = vld [vmem:[%s7223_s7 + $0xa8c] sm:$0xf0]  ;;  %v5473_v5 = vor.u32 %v6708_v61, %v5472_v60  ;;  %3525 = vmatpush.bf16.msra.mxu2 %v5745_v59 }
  0x83   : > { %v5728_v1 = vld [vmem:[%s7223_s7 + $0xa80] sm:$0xf]  ;;  %v6804_v4 = vld [vmem:[%s7223_s7 + $0xb8c] sm:$0xf0]  ;;  %v5601_v6 = vor.u32 %v6740_v0, %v5600_v62  ;;  %3538 = vmatpush.bf16.msra.mxu3 %v5873_v63 }
  0x84   : > { %v5856_v3 = vld [vmem:[%s7223_s7 + $0xb80] sm:$0xf]  ;;  %v5729_v7 = vor.u32 %v6772_v2, %v5728_v1  ;;  %v6704_v9 = vld [vmem:[%s7223_s7 + $0x86c] sm:$0xf0]  ;;  %3500 = vmatpush.bf16.msra.mxu0 %v5473_v5 }
  0x85   : > { %v5456_v8 = vld [vmem:[%s7223_s7 + $0x860] sm:$0xf]  ;;  %v5857_v11 = vor.u32 %v6804_v4, %v5856_v3  ;;  %v6736_v12 = vld [vmem:[%s7223_s7 + $0x96c] sm:$0xf0]  ;;  %3513 = vmatpush.bf16.msra.mxu1 %v5601_v6 }
  0x86   : > { %v5584_v10 = vld [vmem:[%s7223_s7 + $0x960] sm:$0xf]  ;;  %v6768_v14 = vld [vmem:[%s7223_s7 + $0xa6c] sm:$0xf0]  ;;  %v5457_v17 = vor.u32 %v6704_v9, %v5456_v8  ;;  %3526 = vmatpush.bf16.msra.mxu2 %v5729_v7 }
  0x87   : > { %v5712_v13 = vld [vmem:[%s7223_s7 + $0xa60] sm:$0xf]  ;;  %v6800_v16 = vld [vmem:[%s7223_s7 + $0xb6c] sm:$0xf0]  ;;  %v5585_v18 = vor.u32 %v6736_v12, %v5584_v10  ;;  %3539 = vmatpush.bf16.msra.mxu3 %v5857_v11 }
  0x88   : > { %v5840_v15 = vld [vmem:[%s7223_s7 + $0xb60] sm:$0xf]  ;;  %v5713_v19 = vor.u32 %v6768_v14, %v5712_v13  ;;  %v6700_v21 = vld [vmem:[%s7223_s7 + $0x84c] sm:$0xf0]  ;;  %3501 = vmatpush.bf16.msra.mxu0 %v5457_v17 }
  0x89   : > { %v5440_v20 = vld [vmem:[%s7223_s7 + $0x840] sm:$0xf]  ;;  %v5841_v23 = vor.u32 %v6800_v16, %v5840_v15  ;;  %v6732_v24 = vld [vmem:[%s7223_s7 + $0x94c] sm:$0xf0]  ;;  %3514 = vmatpush.bf16.msra.mxu1 %v5585_v18 }
  0x8a   : > { %v5568_v22 = vld [vmem:[%s7223_s7 + $0x940] sm:$0xf]  ;;  %v6764_v26 = vld [vmem:[%s7223_s7 + $0xa4c] sm:$0xf0]  ;;  %v5441_v31 = vor.u32 %v6700_v21, %v5440_v20  ;;  %3527 = vmatpush.bf16.msra.mxu2 %v5713_v19 }
  0x8b   : > { %v5696_v25 = vld [vmem:[%s7223_s7 + $0xa40] sm:$0xf]  ;;  %v6796_v30 = vld [vmem:[%s7223_s7 + $0xb4c] sm:$0xf0]  ;;  %v5569_v32 = vor.u32 %v6732_v24, %v5568_v22  ;;  %3540 = vmatpush.bf16.msra.mxu3 %v5841_v23 }
  0x8c   : > { %v5824_v29 = vld [vmem:[%s7223_s7 + $0xb40] sm:$0xf]  ;;  %v5697_v35 = vor.u32 %v6764_v26, %v5696_v25  ;;  %v6696_v37 = vld [vmem:[%s7223_s7 + $0x82c] sm:$0xf0]  ;;  %3502 = vmatpush.bf16.msra.mxu0 %v5441_v31 }
  0x8d   : > { %v5424_v36 = vld [vmem:[%s7223_s7 + $0x820] sm:$0xf]  ;;  %v5825_v40 = vor.u32 %v6796_v30, %v5824_v29  ;;  %v6728_v41 = vld [vmem:[%s7223_s7 + $0x92c] sm:$0xf0]  ;;  %3515 = vmatpush.bf16.msra.mxu1 %v5569_v32 }
  0x8e   : > { %v5552_v38 = vld [vmem:[%s7223_s7 + $0x920] sm:$0xf]  ;;  %v6760_v46 = vld [vmem:[%s7223_s7 + $0xa2c] sm:$0xf0]  ;;  %v5425_v50 = vor.u32 %v6696_v37, %v5424_v36  ;;  %3528 = vmatpush.bf16.msra.mxu2 %v5697_v35 }
  0x8f   : > { %v5680_v44 = vld [vmem:[%s7223_s7 + $0xa20] sm:$0xf]  ;;  %v6792_v48 = vld [vmem:[%s7223_s7 + $0xb2c] sm:$0xf0]  ;;  %v5553_v54 = vor.u32 %v6728_v41, %v5552_v38  ;;  %3541 = vmatpush.bf16.msra.mxu3 %v5825_v40 }
  0x90   : > { %v5808_v47 = vld [vmem:[%s7223_s7 + $0xb20] sm:$0xf]  ;;  %v6692_v51 = vld [vmem:[%s7223_s7 + $0x80c] sm:$0xf0]  ;;  %v5681_v55 = vor.u32 %v6760_v46, %v5680_v44  ;;  %3503 = vmatpush.bf16.msra.mxu0 %v5425_v50 }
  0x91   : > { %v5408_v49 = vld [vmem:[%s7223_s7 + $0x800] sm:$0xf]  ;;  %v6724_v53 = vld [vmem:[%s7223_s7 + $0x90c] sm:$0xf0]  ;;  %v5809_v59 = vor.u32 %v6792_v48, %v5808_v47  ;;  %3516 = vmatpush.bf16.msra.mxu1 %v5553_v54 }
  0x92   : > { %v5536_v52 = vld [vmem:[%s7223_s7 + $0x900] sm:$0xf]  ;;  %v6756_v57 = vld [vmem:[%s7223_s7 + $0xa0c] sm:$0xf0]  ;;  %v5409_v2 = vor.u32 %v6692_v51, %v5408_v49  ;;  %3529 = vmatpush.bf16.msra.mxu2 %v5681_v55 }
  0x93   : > { %v5664_v56 = vld [vmem:[%s7223_s7 + $0xa00] sm:$0xf]  ;;  %v6788_v60 = vld [vmem:[%s7223_s7 + $0xb0c] sm:$0xf0]  ;;  %v5537_v6 = vor.u32 %v6724_v53, %v5536_v52  ;;  %3542 = vmatpush.bf16.msra.mxu3 %v5809_v59 }
  0x94   : > { %v5792_v58 = vld [vmem:[%s7223_s7 + $0xb00] sm:$0xf]  ;;  %v6848_v62 = vld [vmem:[%s7223_s7 + $0xcec] sm:$0xf0]  ;;  %v5665_v7 = vor.u32 %v6756_v57, %v5664_v56  ;;  %3504 = vmatpush.bf16.msra.mxu0 %v5409_v2 }
  0x95   : > { %v6032_v61 = vld [vmem:[%s7223_s7 + $0xce0] sm:$0xf]  ;;  %v6880_v0 = vld [vmem:[%s7223_s7 + $0xdec] sm:$0xf0]  ;;  %v5793_v10 = vor.u32 %v6788_v60, %v5792_v58  ;;  %3517 = vmatpush.bf16.msra.mxu1 %v5537_v6 }
  0x96   : > { %v6160_v63 = vld [vmem:[%s7223_s7 + $0xde0] sm:$0xf]  ;;  %v6912_v3 = vld [vmem:[%s7223_s7 + $0xeec] sm:$0xf0]  ;;  %v6033_v11 = vor.u32 %v6848_v62, %v6032_v61  ;;  %3530 = vmatpush.bf16.msra.mxu2 %v5665_v7 }
  0x97   : > { %v6288_v1 = vld [vmem:[%s7223_s7 + $0xee0] sm:$0xf]  ;;  %v6944_v5 = vld [vmem:[%s7223_s7 + $0xfec] sm:$0xf0]  ;;  %v6161_v14 = vor.u32 %v6880_v0, %v6160_v63  ;;  %3543 = vmatpush.bf16.msra.mxu3 %v5793_v10 }
  0x98   : > { %v6416_v4 = vld [vmem:[%s7223_s7 + $0xfe0] sm:$0xf]  ;;  %v281_v8 = vld.sshfl [vmem:[#allocation1] sm:$0xff pattern:$0x73625140]  ;;  %v6289_v15 = vor.u32 %v6912_v3, %v6288_v1  ;;  %3549 = vmatpush.bf16.msrb.mxu0 %v6033_v11 }
  0x99   : > { %v283_v9 = vld.sshfl [vmem:[#allocation1 + $0x10] sm:$0xff pattern:$0x73625140]  ;;  %v282_v12 = vld.sshfl [vmem:[#allocation1 + $0x8] sm:$0xff pattern:$0x73625140]  ;;  %v6417_v19 = vor.u32 %v6944_v5, %v6416_v4  ;;  %v7481_v20 = vpack.c.bf16 %v281_v8, %v281_v8  ;;  %3562 = vmatpush.bf16.msrb.mxu1 %v6161_v14 }
  0x9a   : > { %v284_v13 = vld.sshfl [vmem:[#allocation1 + $0x18] sm:$0xff pattern:$0x73625140]  ;;  %v6016_v16 = vld [vmem:[%s7223_s7 + $0xcc0] sm:$0xf]  ;;  %v7486_v24 = vpack.c.bf16 %v283_v9, %v283_v9  ;;  %v7488_v25 = vpack.c.bf16 %v282_v12, %v282_v12  ;;  %3575 = vmatpush.bf16.msrb.mxu2 %v6289_v15 }
  0x9b   : > { %v6844_v17 = vld [vmem:[%s7223_s7 + $0xccc] sm:$0xf0]  ;;  %v6144_v18 = vld [vmem:[%s7223_s7 + $0xdc0] sm:$0xf]  ;;  %v7492_v30 = vpack.c.bf16 %v284_v13, %v284_v13  ;;  %3588 = vmatpush.bf16.msrb.mxu3 %v6417_v19  ;;  %3505 = vmatmul.bf16.vlgmr.msra.gmra.mxu0 %v7481_v20 }
  0x9c   : > { %v6876_v21 = vld [vmem:[%s7223_s7 + $0xdcc] sm:$0xf0]  ;;  %v6272_v22 = vld [vmem:[%s7223_s7 + $0xec0] sm:$0xf]  ;;  %v6017_v31 = vor.u32 %v6844_v17, %v6016_v16  ;;  %3531 = vmatmul.bf16.vlgmr.msra.gmra.mxu2 %v7486_v24  ;;  %3518 = vmatmul.bf16.vlgmr.msra.gmra.mxu1 %v7488_v25 }
  0x9d   : > { %v6908_v23 = vld [vmem:[%s7223_s7 + $0xecc] sm:$0xf0]  ;;  %v6400_v26 = vld [vmem:[%s7223_s7 + $0xfc0] sm:$0xf]  ;;  %v6145_v32 = vor.u32 %v6876_v21, %v6144_v18  ;;  %3544 = vmatmul.bf16.vlgmr.msra.gmra.mxu3 %v7492_v30 }
  0x9e   : > { %v6940_v29 = vld [vmem:[%s7223_s7 + $0xfcc] sm:$0xf0]  ;;  %v6273_v35 = vor.u32 %v6908_v23, %v6272_v22  ;;  %v6000_v36 = vld [vmem:[%s7223_s7 + $0xca0] sm:$0xf]  ;;  %3550 = vmatpush.bf16.msrb.mxu0 %v6017_v31 }
  0x9f   : > { %v6840_v37 = vld [vmem:[%s7223_s7 + $0xcac] sm:$0xf0]  ;;  %v6128_v38 = vld [vmem:[%s7223_s7 + $0xda0] sm:$0xf]  ;;  %v6401_v40 = vor.u32 %v6940_v29, %v6400_v26  ;;  %3563 = vmatpush.bf16.msrb.mxu1 %v6145_v32 }
  0xa0   : > { %v6872_v41 = vld [vmem:[%s7223_s7 + $0xdac] sm:$0xf0]  ;;  %v6256_v44 = vld [vmem:[%s7223_s7 + $0xea0] sm:$0xf]  ;;  %v6001_v49 = vor.u32 %v6840_v37, %v6000_v36  ;;  %3576 = vmatpush.bf16.msrb.mxu2 %v6273_v35 }
  0xa1   : > { %v6904_v46 = vld [vmem:[%s7223_s7 + $0xeac] sm:$0xf0]  ;;  %v6384_v47 = vld [vmem:[%s7223_s7 + $0xfa0] sm:$0xf]  ;;  %v6129_v50 = vor.u32 %v6872_v41, %v6128_v38  ;;  %3589 = vmatpush.bf16.msrb.mxu3 %v6401_v40 }
  0xa2   : > { %v6936_v48 = vld [vmem:[%s7223_s7 + $0xfac] sm:$0xf0]  ;;  %v6257_v51 = vor.u32 %v6904_v46, %v6256_v44  ;;  %v5984_v52 = vld [vmem:[%s7223_s7 + $0xc80] sm:$0xf]  ;;  %3551 = vmatpush.bf16.msrb.mxu0 %v6001_v49 }
  0xa3   : > { %v6836_v53 = vld [vmem:[%s7223_s7 + $0xc8c] sm:$0xf0]  ;;  %v6112_v54 = vld [vmem:[%s7223_s7 + $0xd80] sm:$0xf]  ;;  %v6385_v55 = vor.u32 %v6936_v48, %v6384_v47  ;;  %3564 = vmatpush.bf16.msrb.mxu1 %v6129_v50 }
  0xa4   : > { %v6868_v56 = vld [vmem:[%s7223_s7 + $0xd8c] sm:$0xf0]  ;;  %v6240_v57 = vld [vmem:[%s7223_s7 + $0xe80] sm:$0xf]  ;;  %v5985_v61 = vor.u32 %v6836_v53, %v5984_v52  ;;  %3577 = vmatpush.bf16.msrb.mxu2 %v6257_v51 }
  0xa5   : > { %v6900_v58 = vld [vmem:[%s7223_s7 + $0xe8c] sm:$0xf0]  ;;  %v6368_v59 = vld [vmem:[%s7223_s7 + $0xf80] sm:$0xf]  ;;  %v6113_v62 = vor.u32 %v6868_v56, %v6112_v54  ;;  %3590 = vmatpush.bf16.msrb.mxu3 %v6385_v55 }
  0xa6   : > { %v6932_v60 = vld [vmem:[%s7223_s7 + $0xf8c] sm:$0xf0]  ;;  %v6241_v63 = vor.u32 %v6900_v58, %v6240_v57  ;;  %v5968_v0 = vld [vmem:[%s7223_s7 + $0xc60] sm:$0xf]  ;;  %3552 = vmatpush.bf16.msrb.mxu0 %v5985_v61  ;;  %v6462_v57 = vld [vmem:[%s7223_s7 + $0xe4] sm:$0xf] }
  0xa7   : > { %v6832_v1 = vld [vmem:[%s7223_s7 + $0xc6c] sm:$0xf0]  ;;  %v6096_v2 = vld [vmem:[%s7223_s7 + $0xd60] sm:$0xf]  ;;  %v6369_v3 = vor.u32 %v6932_v60, %v6368_v59  ;;  %3565 = vmatpush.bf16.msrb.mxu1 %v6113_v62  ;;  %v4498_v58 = vld [vmem:[%s7223_s7 + $0xf0] sm:$0xf0] }
  0xa8   : > { %v6864_v4 = vld [vmem:[%s7223_s7 + $0xd6c] sm:$0xf0]  ;;  %v6224_v5 = vld [vmem:[%s7223_s7 + $0xe60] sm:$0xf]  ;;  %v5969_v9 = vor.u32 %v6832_v1, %v5968_v0  ;;  %3578 = vmatpush.bf16.msrb.mxu2 %v6241_v63  ;;  %v6494_v59 = vld [vmem:[%s7223_s7 + $0x1e4] sm:$0xf] }
  0xa9   : > { %v6896_v6 = vld [vmem:[%s7223_s7 + $0xe6c] sm:$0xf0]  ;;  %v6352_v7 = vld [vmem:[%s7223_s7 + $0xf60] sm:$0xf]  ;;  %v6097_v10 = vor.u32 %v6864_v4, %v6096_v2  ;;  %3591 = vmatpush.bf16.msrb.mxu3 %v6369_v3  ;;  %v4626_v60 = vld [vmem:[%s7223_s7 + $0x1f0] sm:$0xf0] }
  0xaa   : > { %v6928_v8 = vld [vmem:[%s7223_s7 + $0xf6c] sm:$0xf0]  ;;  %v6225_v11 = vor.u32 %v6896_v6, %v6224_v5  ;;  %v5952_v12 = vld [vmem:[%s7223_s7 + $0xc40] sm:$0xf]  ;;  %3553 = vmatpush.bf16.msrb.mxu0 %v5969_v9  ;;  %v6526_v61 = vld [vmem:[%s7223_s7 + $0x2e4] sm:$0xf] }
  0xab   : > { %v6828_v13 = vld [vmem:[%s7223_s7 + $0xc4c] sm:$0xf0]  ;;  %v6080_v14 = vld [vmem:[%s7223_s7 + $0xd40] sm:$0xf]  ;;  %v6353_v15 = vor.u32 %v6928_v8, %v6352_v7  ;;  %3566 = vmatpush.bf16.msrb.mxu1 %v6097_v10  ;;  %v4754_v63 = vld [vmem:[%s7223_s7 + $0x2f0] sm:$0xf0]  ;;  %v4501_v7 = vor.u32 %v6462_v57, %v4498_v58  ;;  %v4629_v10 = vor.u32 %v6494_v59, %v4626_v60 }
  0xac   : > { %v6860_v16 = vld [vmem:[%s7223_s7 + $0xd4c] sm:$0xf0]  ;;  %v6208_v17 = vld [vmem:[%s7223_s7 + $0xe40] sm:$0xf]  ;;  %v5953_v22 = vor.u32 %v6828_v13, %v5952_v12  ;;  %3579 = vmatpush.bf16.msrb.mxu2 %v6225_v11  ;;  %v6558_v0 = vld [vmem:[%s7223_s7 + $0x3e4] sm:$0xf]  ;;  %v4757_v11 = vor.u32 %v6526_v61, %v4754_v63 }
  0xad   : > { %v6892_v18 = vld [vmem:[%s7223_s7 + $0xe4c] sm:$0xf0]  ;;  %v6336_v19 = vld [vmem:[%s7223_s7 + $0xf40] sm:$0xf]  ;;  %v6081_v23 = vor.u32 %v6860_v16, %v6080_v14  ;;  %3592 = vmatpush.bf16.msrb.mxu3 %v6353_v15  ;;  %v4882_v1 = vld [vmem:[%s7223_s7 + $0x3f0] sm:$0xf0] }
  0xae   : > { %v6924_v21 = vld [vmem:[%s7223_s7 + $0xf4c] sm:$0xf0]  ;;  %v6209_v26 = vor.u32 %v6892_v18, %v6208_v17  ;;  %v5936_v29 = vld [vmem:[%s7223_s7 + $0xc20] sm:$0xf]  ;;  %3554 = vmatpush.bf16.msrb.mxu0 %v5953_v22  ;;  %v6458_v12 = vld [vmem:[%s7223_s7 + $0xc4] sm:$0xf]  ;;  %v4885_v15 = vor.u32 %v6558_v0, %v4882_v1 }
  0xaf   : > { %v6824_v31 = vld [vmem:[%s7223_s7 + $0xc2c] sm:$0xf0]  ;;  %v6064_v32 = vld [vmem:[%s7223_s7 + $0xd20] sm:$0xf]  ;;  %v6337_v35 = vor.u32 %v6924_v21, %v6336_v19  ;;  %3567 = vmatpush.bf16.msrb.mxu1 %v6081_v23  ;;  %v4482_v13 = vld [vmem:[%s7223_s7 + $0xd0] sm:$0xf0] }
  0xb0   : > { %v6856_v36 = vld [vmem:[%s7223_s7 + $0xd2c] sm:$0xf0]  ;;  %v6192_v37 = vld [vmem:[%s7223_s7 + $0xe20] sm:$0xf]  ;;  %v5937_v46 = vor.u32 %v6824_v31, %v5936_v29  ;;  %3580 = vmatpush.bf16.msrb.mxu2 %v6209_v26  ;;  %v6490_v14 = vld [vmem:[%s7223_s7 + $0x1c4] sm:$0xf]  ;;  %v4485_v31 = vor.u32 %v6458_v12, %v4482_v13 }
  0xb1   : > { %v6888_v38 = vld [vmem:[%s7223_s7 + $0xe2c] sm:$0xf0]  ;;  %v6320_v40 = vld [vmem:[%s7223_s7 + $0xf20] sm:$0xf]  ;;  %v6065_v50 = vor.u32 %v6856_v36, %v6064_v32  ;;  %3593 = vmatpush.bf16.msrb.mxu3 %v6337_v35  ;;  %v4610_v17 = vld [vmem:[%s7223_s7 + $0x1d0] sm:$0xf0] }
  0xb2   : > { %v6920_v41 = vld [vmem:[%s7223_s7 + $0xf2c] sm:$0xf0]  ;;  %v5920_v44 = vld [vmem:[%s7223_s7 + $0xc00] sm:$0xf]  ;;  %v6193_v51 = vor.u32 %v6888_v38, %v6192_v37  ;;  %3555 = vmatpush.bf16.msrb.mxu0 %v5937_v46  ;;  %v6522_v18 = vld [vmem:[%s7223_s7 + $0x2c4] sm:$0xf]  ;;  %v4613_v32 = vor.u32 %v6490_v14, %v4610_v17 }
  0xb3   : > { %v6820_v47 = vld [vmem:[%s7223_s7 + $0xc0c] sm:$0xf0]  ;;  %v6048_v48 = vld [vmem:[%s7223_s7 + $0xd00] sm:$0xf]  ;;  %v6321_v55 = vor.u32 %v6920_v41, %v6320_v40  ;;  %3568 = vmatpush.bf16.msrb.mxu1 %v6065_v50  ;;  %v4738_v19 = vld [vmem:[%s7223_s7 + $0x2d0] sm:$0xf0] }
  0xb4   : > { %v6852_v49 = vld [vmem:[%s7223_s7 + $0xd0c] sm:$0xf0]  ;;  %v6176_v52 = vld [vmem:[%s7223_s7 + $0xe00] sm:$0xf]  ;;  %v5921_v62 = vor.u32 %v6820_v47, %v5920_v44  ;;  %3581 = vmatpush.bf16.msrb.mxu2 %v6193_v51  ;;  %v6554_v23 = vld [vmem:[%s7223_s7 + $0x3c4] sm:$0xf]  ;;  %v4741_v35 = vor.u32 %v6522_v18, %v4738_v19 }
  0xb5   : > { %v6884_v53 = vld [vmem:[%s7223_s7 + $0xe0c] sm:$0xf0]  ;;  %v6304_v54 = vld [vmem:[%s7223_s7 + $0xf00] sm:$0xf]  ;;  %v6049_v2 = vor.u32 %v6852_v49, %v6048_v48  ;;  %3594 = vmatpush.bf16.msrb.mxu3 %v6321_v55  ;;  %v4866_v26 = vld [vmem:[%s7223_s7 + $0x3d0] sm:$0xf0] }
  0xb6   : > { %v6916_v56 = vld [vmem:[%s7223_s7 + $0xf0c] sm:$0xf0]  ;;  %v6177_v3 = vor.u32 %v6884_v53, %v6176_v52  ;;  %v285_v4 = vld.sshfl [vmem:[#allocation1 + $0x20] sm:$0xff pattern:$0x73625140]  ;;  %3556 = vmatpush.bf16.msrb.mxu0 %v5921_v62  ;;  %v4869_v40 = vor.u32 %v6554_v23, %v4866_v26 }
  0xb7   : > { %v287_v5 = vld.sshfl [vmem:[#allocation1 + $0x30] sm:$0xff pattern:$0x73625140]  ;;  %v6305_v6 = vor.u32 %v6916_v56, %v6304_v54  ;;  %v286_v8 = vld.sshfl [vmem:[#allocation1 + $0x28] sm:$0xff pattern:$0x73625140]  ;;  %v7557_v16 = vpack.c.bf16 %v285_v4, %v285_v4  ;;  %3569 = vmatpush.bf16.msrb.mxu1 %v6049_v2 }
  0xb8   : > { %v288_v9 = vld.sshfl [vmem:[#allocation1 + $0x38] sm:$0xff pattern:$0x73625140]  ;;  %3582 = vmatpush.bf16.msrb.mxu2 %v6177_v3  ;;  %v7562_v21 = vpack.c.bf16 %v287_v5, %v287_v5  ;;  %v7564_v22 = vpack.c.bf16 %v286_v8, %v286_v8  ;;  %v6454_v36 = vld [vmem:[%s7223_s7 + $0xa4] sm:$0xf] }
  0xb9   : > { %3595 = vmatpush.bf16.msrb.mxu3 %v6305_v6  ;;  %v7568_v29 = vpack.c.bf16 %v288_v9, %v288_v9  ;;  %v4466_v37 = vld [vmem:[%s7223_s7 + $0xb0] sm:$0xf0]  ;;  %v6486_v38 = vld [vmem:[%s7223_s7 + $0x1a4] sm:$0xf]  ;;  %3557 = vmatmul.bf16.vlgmr.msrb.gmra.mxu0 %v7557_v16 }
  0xba   : > { %3601 = vmatpush.bf16.msra.mxu0 %v4501_v7  ;;  %v4594_v41 = vld [vmem:[%s7223_s7 + $0x1b0] sm:$0xf0]  ;;  %v6518_v44 = vld [vmem:[%s7223_s7 + $0x2a4] sm:$0xf]  ;;  %3570 = vmatmul.bf16.vlgmr.msrb.gmra.mxu1 %v7564_v22  ;;  %v4469_v49 = vor.u32 %v6454_v36, %v4466_v37 }
  0xbb   : > { %3614 = vmatpush.bf16.msra.mxu1 %v4629_v10  ;;  %v4722_v46 = vld [vmem:[%s7223_s7 + $0x2b0] sm:$0xf0]  ;;  %3583 = vmatmul.bf16.vlgmr.msrb.gmra.mxu2 %v7562_v21  ;;  %v6550_v47 = vld [vmem:[%s7223_s7 + $0x3a4] sm:$0xf]  ;;  %v4597_v50 = vor.u32 %v6486_v38, %v4594_v41 }
  0xbc   : > { %3627 = vmatpush.bf16.msra.mxu2 %v4757_v11  ;;  %v4850_v48 = vld [vmem:[%s7223_s7 + $0x3b0] sm:$0xf0]  ;;  %3596 = vmatmul.bf16.vlgmr.msrb.gmra.mxu3 %v7568_v29  ;;  %v4725_v51 = vor.u32 %v6518_v44, %v4722_v46  ;;  %v6450_v52 = vld [vmem:[%s7223_s7 + $0x84] sm:$0xf] }
  0xbd   : > { %3640 = vmatpush.bf16.msra.mxu3 %v4885_v15  ;;  %v4450_v53 = vld [vmem:[%s7223_s7 + $0x90] sm:$0xf0]  ;;  %v6482_v54 = vld [vmem:[%s7223_s7 + $0x184] sm:$0xf]  ;;  %v4853_v55 = vor.u32 %v6550_v47, %v4850_v48 }
  0xbe   : > { %3602 = vmatpush.bf16.msra.mxu0 %v4485_v31  ;;  %v4578_v56 = vld [vmem:[%s7223_s7 + $0x190] sm:$0xf0]  ;;  %v6514_v57 = vld [vmem:[%s7223_s7 + $0x284] sm:$0xf]  ;;  %v4453_v61 = vor.u32 %v6450_v52, %v4450_v53 }
  0xbf   : > { %3615 = vmatpush.bf16.msra.mxu1 %v4613_v32  ;;  %v4706_v58 = vld [vmem:[%s7223_s7 + $0x290] sm:$0xf0]  ;;  %v6546_v59 = vld [vmem:[%s7223_s7 + $0x384] sm:$0xf]  ;;  %v4581_v62 = vor.u32 %v6482_v54, %v4578_v56 }
  0xc0   : > { %3628 = vmatpush.bf16.msra.mxu2 %v4741_v35  ;;  %v4834_v60 = vld [vmem:[%s7223_s7 + $0x390] sm:$0xf0]  ;;  %v4709_v63 = vor.u32 %v6514_v57, %v4706_v58  ;;  %v6446_v0 = vld [vmem:[%s7223_s7 + $0x64] sm:$0xf] }
  0xc1   : > { %3641 = vmatpush.bf16.msra.mxu3 %v4869_v40  ;;  %v4434_v1 = vld [vmem:[%s7223_s7 + $0x70] sm:$0xf0]  ;;  %v6478_v2 = vld [vmem:[%s7223_s7 + $0x164] sm:$0xf]  ;;  %v4837_v3 = vor.u32 %v6546_v59, %v4834_v60 }
  0xc2   : > { %3603 = vmatpush.bf16.msra.mxu0 %v4469_v49  ;;  %v4562_v4 = vld [vmem:[%s7223_s7 + $0x170] sm:$0xf0]  ;;  %v6510_v5 = vld [vmem:[%s7223_s7 + $0x264] sm:$0xf]  ;;  %v4437_v9 = vor.u32 %v6446_v0, %v4434_v1 }
  0xc3   : > { %3616 = vmatpush.bf16.msra.mxu1 %v4597_v50  ;;  %v4690_v6 = vld [vmem:[%s7223_s7 + $0x270] sm:$0xf0]  ;;  %v6542_v7 = vld [vmem:[%s7223_s7 + $0x364] sm:$0xf]  ;;  %v4565_v10 = vor.u32 %v6478_v2, %v4562_v4 }
  0xc4   : > { %3629 = vmatpush.bf16.msra.mxu2 %v4725_v51  ;;  %v4818_v8 = vld [vmem:[%s7223_s7 + $0x370] sm:$0xf0]  ;;  %v4693_v11 = vor.u32 %v6510_v5, %v4690_v6  ;;  %v6442_v12 = vld [vmem:[%s7223_s7 + $0x44] sm:$0xf] }
  0xc5   : > { %3642 = vmatpush.bf16.msra.mxu3 %v4853_v55  ;;  %v4418_v13 = vld [vmem:[%s7223_s7 + $0x50] sm:$0xf0]  ;;  %v6474_v14 = vld [vmem:[%s7223_s7 + $0x144] sm:$0xf]  ;;  %v4821_v15 = vor.u32 %v6542_v7, %v4818_v8 }
  0xc6   : > { %3604 = vmatpush.bf16.msra.mxu0 %v4453_v61  ;;  %v4546_v17 = vld [vmem:[%s7223_s7 + $0x150] sm:$0xf0]  ;;  %v6506_v18 = vld [vmem:[%s7223_s7 + $0x244] sm:$0xf]  ;;  %v4421_v31 = vor.u32 %v6442_v12, %v4418_v13 }
  0xc7   : > { %3617 = vmatpush.bf16.msra.mxu1 %v4581_v62  ;;  %v4674_v19 = vld [vmem:[%s7223_s7 + $0x250] sm:$0xf0]  ;;  %v6538_v23 = vld [vmem:[%s7223_s7 + $0x344] sm:$0xf]  ;;  %v4549_v32 = vor.u32 %v6474_v14, %v4546_v17 }
  0xc8   : > { %3630 = vmatpush.bf16.msra.mxu2 %v4709_v63  ;;  %v4802_v26 = vld [vmem:[%s7223_s7 + $0x350] sm:$0xf0]  ;;  %v4677_v35 = vor.u32 %v6506_v18, %v4674_v19  ;;  %v6438_v36 = vld [vmem:[%s7223_s7 + $0x24] sm:$0xf] }
  0xc9   : > { %3643 = vmatpush.bf16.msra.mxu3 %v4837_v3  ;;  %v4402_v37 = vld [vmem:[%s7223_s7 + $0x30] sm:$0xf0]  ;;  %v6470_v38 = vld [vmem:[%s7223_s7 + $0x124] sm:$0xf]  ;;  %v4805_v40 = vor.u32 %v6538_v23, %v4802_v26 }
  0xca   : > { %3605 = vmatpush.bf16.msra.mxu0 %v4437_v9  ;;  %v4530_v41 = vld [vmem:[%s7223_s7 + $0x130] sm:$0xf0]  ;;  %v6502_v44 = vld [vmem:[%s7223_s7 + $0x224] sm:$0xf]  ;;  %v4405_v49 = vor.u32 %v6438_v36, %v4402_v37 }
  0xcb   : > { %3618 = vmatpush.bf16.msra.mxu1 %v4565_v10  ;;  %v4658_v46 = vld [vmem:[%s7223_s7 + $0x230] sm:$0xf0]  ;;  %v6534_v47 = vld [vmem:[%s7223_s7 + $0x324] sm:$0xf]  ;;  %v4533_v52 = vor.u32 %v6470_v38, %v4530_v41 }
  0xcc   : > { %3631 = vmatpush.bf16.msra.mxu2 %v4693_v11  ;;  %v4786_v48 = vld [vmem:[%s7223_s7 + $0x330] sm:$0xf0]  ;;  %v6434_v50 = vld [vmem:[%s7223_s7 + $0x4] sm:$0xf]  ;;  %v4661_v53 = vor.u32 %v6502_v44, %v4658_v46 }
  0xcd   : > { %3644 = vmatpush.bf16.msra.mxu3 %v4821_v15  ;;  %v4386_v51 = vld [vmem:[%s7223_s7 + $0x10] sm:$0xf0]  ;;  %v6466_v54 = vld [vmem:[%s7223_s7 + $0x104] sm:$0xf]  ;;  %v4789_v57 = vor.u32 %v6534_v47, %v4786_v48 }
  0xce   : > { %3606 = vmatpush.bf16.msra.mxu0 %v4421_v31  ;;  %v4514_v55 = vld [vmem:[%s7223_s7 + $0x110] sm:$0xf0]  ;;  %v6498_v56 = vld [vmem:[%s7223_s7 + $0x204] sm:$0xf]  ;;  %v4389_v0 = vor.u32 %v6434_v50, %v4386_v51 }
  0xcf   : > { %3619 = vmatpush.bf16.msra.mxu1 %v4549_v32  ;;  %v4642_v58 = vld [vmem:[%s7223_s7 + $0x210] sm:$0xf0]  ;;  %v6530_v59 = vld [vmem:[%s7223_s7 + $0x304] sm:$0xf]  ;;  %v4517_v4 = vor.u32 %v6466_v54, %v4514_v55 }
  0xd0   : > { %3632 = vmatpush.bf16.msra.mxu2 %v4677_v35  ;;  %v4770_v60 = vld [vmem:[%s7223_s7 + $0x310] sm:$0xf0]  ;;  %v6590_v61 = vld [vmem:[%s7223_s7 + $0x4e4] sm:$0xf]  ;;  %v4645_v5 = vor.u32 %v6498_v56, %v4642_v58 }
  0xd1   : > { %3645 = vmatpush.bf16.msra.mxu3 %v4805_v40  ;;  %v5010_v62 = vld [vmem:[%s7223_s7 + $0x4f0] sm:$0xf0]  ;;  %v6622_v63 = vld [vmem:[%s7223_s7 + $0x5e4] sm:$0xf]  ;;  %v4773_v8 = vor.u32 %v6530_v59, %v4770_v60 }
  0xd2   : > { %3607 = vmatpush.bf16.msra.mxu0 %v4405_v49  ;;  %v5138_v1 = vld [vmem:[%s7223_s7 + $0x5f0] sm:$0xf0]  ;;  %v6654_v2 = vld [vmem:[%s7223_s7 + $0x6e4] sm:$0xf]  ;;  %v5013_v9 = vor.u32 %v6590_v61, %v5010_v62 }
  0xd3   : > { %v5266_v3 = vld [vmem:[%s7223_s7 + $0x6f0] sm:$0xf0]  ;;  %3620 = vmatpush.bf16.msra.mxu1 %v4533_v52  ;;  %v6686_v6 = vld [vmem:[%s7223_s7 + $0x7e4] sm:$0xf]  ;;  %v5141_v10 = vor.u32 %v6622_v63, %v5138_v1 }
  0xd4   : > { %3633 = vmatpush.bf16.msra.mxu2 %v4661_v53  ;;  %v5394_v7 = vld [vmem:[%s7223_s7 + $0x7f0] sm:$0xf0]  ;;  %v5269_v11 = vor.u32 %v6654_v2, %v5266_v3  ;;  %v6586_v12 = vld [vmem:[%s7223_s7 + $0x4c4] sm:$0xf] }
  0xd5   : > { %3646 = vmatpush.bf16.msra.mxu3 %v4789_v57  ;;  %v4994_v13 = vld [vmem:[%s7223_s7 + $0x4d0] sm:$0xf0]  ;;  %v6618_v14 = vld [vmem:[%s7223_s7 + $0x5c4] sm:$0xf]  ;;  %v5397_v15 = vor.u32 %v6686_v6, %v5394_v7 }
  0xd6   : > { %3608 = vmatpush.bf16.msra.mxu0 %v4389_v0  ;;  %v5122_v17 = vld [vmem:[%s7223_s7 + $0x5d0] sm:$0xf0]  ;;  %v6650_v18 = vld [vmem:[%s7223_s7 + $0x6c4] sm:$0xf]  ;;  %v4997_v31 = vor.u32 %v6586_v12, %v4994_v13 }
  0xd7   : > { %v5250_v19 = vld [vmem:[%s7223_s7 + $0x6d0] sm:$0xf0]  ;;  %3621 = vmatpush.bf16.msra.mxu1 %v4517_v4  ;;  %v6682_v23 = vld [vmem:[%s7223_s7 + $0x7c4] sm:$0xf]  ;;  %v5125_v32 = vor.u32 %v6618_v14, %v5122_v17 }
  0xd8   : > { %3634 = vmatpush.bf16.msra.mxu2 %v4645_v5  ;;  %v5378_v26 = vld [vmem:[%s7223_s7 + $0x7d0] sm:$0xf0]  ;;  %v5253_v35 = vor.u32 %v6650_v18, %v5250_v19  ;;  %v6582_v36 = vld [vmem:[%s7223_s7 + $0x4a4] sm:$0xf] }
  0xd9   : > { %3647 = vmatpush.bf16.msra.mxu3 %v4773_v8  ;;  %v4978_v37 = vld [vmem:[%s7223_s7 + $0x4b0] sm:$0xf0]  ;;  %v6614_v38 = vld [vmem:[%s7223_s7 + $0x5a4] sm:$0xf]  ;;  %v5381_v40 = vor.u32 %v6682_v23, %v5378_v26  ;;  %3609 = vmatmul.bf16.vlgmr.msra.gmra.mxu0 %v7356_v28 }
  0xda   : > { %3653 = vmatpush.bf16.msrb.mxu0 %v5013_v9  ;;  %v5106_v41 = vld [vmem:[%s7223_s7 + $0x5b0] sm:$0xf0]  ;;  %v6646_v44 = vld [vmem:[%s7223_s7 + $0x6a4] sm:$0xf]  ;;  %v4981_v49 = vor.u32 %v6582_v36, %v4978_v37  ;;  %3622 = vmatmul.bf16.vlgmr.msra.gmra.mxu1 %v7362_v34 }
  0xdb   : > { %3666 = vmatpush.bf16.msrb.mxu1 %v5141_v10  ;;  %v5234_v46 = vld [vmem:[%s7223_s7 + $0x6b0] sm:$0xf0]  ;;  %3635 = vmatmul.bf16.vlgmr.msra.gmra.mxu2 %v7354_v27  ;;  %v6678_v47 = vld [vmem:[%s7223_s7 + $0x7a4] sm:$0xf]  ;;  %v5109_v50 = vor.u32 %v6614_v38, %v5106_v41 }
  0xdc   : > { %3679 = vmatpush.bf16.msrb.mxu2 %v5269_v11  ;;  %v5362_v48 = vld [vmem:[%s7223_s7 + $0x7b0] sm:$0xf0]  ;;  %3648 = vmatmul.bf16.vlgmr.msra.gmra.mxu3 %v7360_v33  ;;  %v5237_v51 = vor.u32 %v6646_v44, %v5234_v46  ;;  %v6578_v52 = vld [vmem:[%s7223_s7 + $0x484] sm:$0xf] }
  0xdd   : > { %3692 = vmatpush.bf16.msrb.mxu3 %v5397_v15  ;;  %v4962_v53 = vld [vmem:[%s7223_s7 + $0x490] sm:$0xf0]  ;;  %v6610_v54 = vld [vmem:[%s7223_s7 + $0x584] sm:$0xf]  ;;  %v5365_v55 = vor.u32 %v6678_v47, %v5362_v48 }
  0xde   : > { %3654 = vmatpush.bf16.msrb.mxu0 %v4997_v31  ;;  %v5090_v56 = vld [vmem:[%s7223_s7 + $0x590] sm:$0xf0]  ;;  %v6642_v57 = vld [vmem:[%s7223_s7 + $0x684] sm:$0xf]  ;;  %v4965_v61 = vor.u32 %v6578_v52, %v4962_v53 }
  0xdf   : > { %3667 = vmatpush.bf16.msrb.mxu1 %v5125_v32  ;;  %v5218_v58 = vld [vmem:[%s7223_s7 + $0x690] sm:$0xf0]  ;;  %v6674_v59 = vld [vmem:[%s7223_s7 + $0x784] sm:$0xf]  ;;  %v5093_v62 = vor.u32 %v6610_v54, %v5090_v56 }
  0xe0   : > { %3680 = vmatpush.bf16.msrb.mxu2 %v5253_v35  ;;  %v5346_v60 = vld [vmem:[%s7223_s7 + $0x790] sm:$0xf0]  ;;  %v5221_v63 = vor.u32 %v6642_v57, %v5218_v58  ;;  %v6574_v0 = vld [vmem:[%s7223_s7 + $0x464] sm:$0xf] }
  0xe1   : > { %3693 = vmatpush.bf16.msrb.mxu3 %v5381_v40  ;;  %v4946_v1 = vld [vmem:[%s7223_s7 + $0x470] sm:$0xf0]  ;;  %v6606_v2 = vld [vmem:[%s7223_s7 + $0x564] sm:$0xf]  ;;  %v5349_v3 = vor.u32 %v6674_v59, %v5346_v60 }
  0xe2   : > { %3655 = vmatpush.bf16.msrb.mxu0 %v4981_v49  ;;  %v5074_v4 = vld [vmem:[%s7223_s7 + $0x570] sm:$0xf0]  ;;  %v6638_v5 = vld [vmem:[%s7223_s7 + $0x664] sm:$0xf]  ;;  %v4949_v9 = vor.u32 %v6574_v0, %v4946_v1 }
  0xe3   : > { %3668 = vmatpush.bf16.msrb.mxu1 %v5109_v50  ;;  %v5202_v6 = vld [vmem:[%s7223_s7 + $0x670] sm:$0xf0]  ;;  %v6670_v7 = vld [vmem:[%s7223_s7 + $0x764] sm:$0xf]  ;;  %v5077_v10 = vor.u32 %v6606_v2, %v5074_v4  ;;  %v3402_v49 = vpop.f32.mrf.mxu0 }
  0xe4   : > { %3681 = vmatpush.bf16.msrb.mxu2 %v5237_v51  ;;  %v5330_v8 = vld [vmem:[%s7223_s7 + $0x770] sm:$0xf0]  ;;  %v5205_v11 = vor.u32 %v6638_v5, %v5202_v6  ;;  %v6570_v12 = vld [vmem:[%s7223_s7 + $0x444] sm:$0xf]  ;;  %v3415_v53 = vpop.f32.mrf.mxu1 }
  0xe5   : > { %3694 = vmatpush.bf16.msrb.mxu3 %v5365_v55  ;;  %v4930_v13 = vld [vmem:[%s7223_s7 + $0x450] sm:$0xf0]  ;;  %v6602_v14 = vld [vmem:[%s7223_s7 + $0x544] sm:$0xf]  ;;  %v5333_v15 = vor.u32 %v6670_v7, %v5330_v8  ;;  %v3416_v59 = vadd.f32 %v3415_v53, %v3402_v49 }
  0xe6   : > { %3656 = vmatpush.bf16.msrb.mxu0 %v4965_v61  ;;  %v5058_v17 = vld [vmem:[%s7223_s7 + $0x550] sm:$0xf0]  ;;  %v6634_v18 = vld [vmem:[%s7223_s7 + $0x644] sm:$0xf]  ;;  %v4933_v31 = vor.u32 %v6570_v12, %v4930_v13 }
  0xe7   : > { %3669 = vmatpush.bf16.msrb.mxu1 %v5093_v62  ;;  %v5186_v19 = vld [vmem:[%s7223_s7 + $0x650] sm:$0xf0]  ;;  %v6666_v23 = vld [vmem:[%s7223_s7 + $0x744] sm:$0xf]  ;;  %v5061_v32 = vor.u32 %v6602_v14, %v5058_v17 }
  0xe8   : > { %3682 = vmatpush.bf16.msrb.mxu2 %v5221_v63  ;;  %v5314_v26 = vld [vmem:[%s7223_s7 + $0x750] sm:$0xf0]  ;;  %v5189_v35 = vor.u32 %v6634_v18, %v5186_v19  ;;  %v6566_v36 = vld [vmem:[%s7223_s7 + $0x424] sm:$0xf] }
  0xe9   : > { %3695 = vmatpush.bf16.msrb.mxu3 %v5349_v3  ;;  %v4914_v37 = vld [vmem:[%s7223_s7 + $0x430] sm:$0xf0]  ;;  %v6598_v38 = vld [vmem:[%s7223_s7 + $0x524] sm:$0xf]  ;;  %v5317_v40 = vor.u32 %v6666_v23, %v5314_v26  ;;  %v3428_v3 = vpop.f32.mrf.mxu2 }
  0xea   : > { %3657 = vmatpush.bf16.msrb.mxu0 %v4949_v9  ;;  %v5042_v41 = vld [vmem:[%s7223_s7 + $0x530] sm:$0xf0]  ;;  %v6630_v44 = vld [vmem:[%s7223_s7 + $0x624] sm:$0xf]  ;;  %v4917_v50 = vor.u32 %v6566_v36, %v4914_v37  ;;  %v3429_v8 = vadd.f32 %v3428_v3, %v3416_v59 }
  0xeb   : > { %3670 = vmatpush.bf16.msrb.mxu1 %v5077_v10  ;;  %v5170_v46 = vld [vmem:[%s7223_s7 + $0x630] sm:$0xf0]  ;;  %v6662_v47 = vld [vmem:[%s7223_s7 + $0x724] sm:$0xf]  ;;  %v5045_v54 = vor.u32 %v6598_v38, %v5042_v41 }
  0xec   : > { %3683 = vmatpush.bf16.msrb.mxu2 %v5205_v11  ;;  %v5298_v48 = vld [vmem:[%s7223_s7 + $0x730] sm:$0xf0]  ;;  %v6562_v51 = vld [vmem:[%s7223_s7 + $0x404] sm:$0xf]  ;;  %v5173_v55 = vor.u32 %v6630_v44, %v5170_v46 }
  0xed   : > { %3696 = vmatpush.bf16.msrb.mxu3 %v5333_v15  ;;  %v4898_v52 = vld [vmem:[%s7223_s7 + $0x410] sm:$0xf0]  ;;  %v6594_v56 = vld [vmem:[%s7223_s7 + $0x504] sm:$0xf]  ;;  %v5301_v60 = vor.u32 %v6662_v47, %v5298_v48  ;;  %v3441_v15 = vpop.f32.mrf.mxu3 }
  0xee   : > { %3658 = vmatpush.bf16.msrb.mxu0 %v4933_v31  ;;  %v5026_v57 = vld [vmem:[%s7223_s7 + $0x510] sm:$0xf0]  ;;  %v6626_v58 = vld [vmem:[%s7223_s7 + $0x604] sm:$0xf]  ;;  %v4901_v4 = vor.u32 %v6562_v51, %v4898_v52  ;;  %v3442_v31 = vadd.f32 %v3441_v15, %v3429_v8 }
  0xef   : > { %3671 = vmatpush.bf16.msrb.mxu1 %v5061_v32  ;;  %v5154_v61 = vld [vmem:[%s7223_s7 + $0x610] sm:$0xf0]  ;;  %v6658_v62 = vld [vmem:[%s7223_s7 + $0x704] sm:$0xf]  ;;  %v5029_v9 = vor.u32 %v6594_v56, %v5026_v57  ;;  %v3404_v32 = vpop.f32.mrf.mxu0 }
  0xf0   : > { %3684 = vmatpush.bf16.msrb.mxu2 %v5189_v35  ;;  %v5282_v63 = vld [vmem:[%s7223_s7 + $0x710] sm:$0xf0]  ;;  %v6718_v0 = vld [vmem:[%s7223_s7 + $0x8e4] sm:$0xf]  ;;  %v5157_v10 = vor.u32 %v6626_v58, %v5154_v61 }
  0xf1   : > { %3697 = vmatpush.bf16.msrb.mxu3 %v5317_v40  ;;  %v5522_v1 = vld [vmem:[%s7223_s7 + $0x8f0] sm:$0xf0]  ;;  %v6750_v2 = vld [vmem:[%s7223_s7 + $0x9e4] sm:$0xf]  ;;  %v5285_v13 = vor.u32 %v6658_v62, %v5282_v63  ;;  %v3417_v40 = vpop.f32.mrf.mxu1  ;;  %v3430_v52 = vpop.f32.mrf.mxu2 }
  0xf2   : > { %3659 = vmatpush.bf16.msrb.mxu0 %v4917_v50  ;;  %v5650_v5 = vld [vmem:[%s7223_s7 + $0x9f0] sm:$0xf0]  ;;  %v6782_v6 = vld [vmem:[%s7223_s7 + $0xae4] sm:$0xf]  ;;  %v5525_v14 = vor.u32 %v6718_v0, %v5522_v1 }
  0xf3   : > { %v5778_v7 = vld [vmem:[%s7223_s7 + $0xaf0] sm:$0xf0]  ;;  %3672 = vmatpush.bf16.msrb.mxu1 %v5045_v54  ;;  %v6814_v11 = vld [vmem:[%s7223_s7 + $0xbe4] sm:$0xf]  ;;  %v5653_v17 = vor.u32 %v6750_v2, %v5650_v5 }
  0xf4   : > { %3685 = vmatpush.bf16.msrb.mxu2 %v5173_v55  ;;  %v5906_v12 = vld [vmem:[%s7223_s7 + $0xbf0] sm:$0xf0]  ;;  %v5781_v18 = vor.u32 %v6782_v6, %v5778_v7  ;;  %v6714_v19 = vld [vmem:[%s7223_s7 + $0x8c4] sm:$0xf] }
  0xf5   : > { %3698 = vmatpush.bf16.msrb.mxu3 %v5301_v60  ;;  %v5506_v23 = vld [vmem:[%s7223_s7 + $0x8d0] sm:$0xf0]  ;;  %v6746_v26 = vld [vmem:[%s7223_s7 + $0x9c4] sm:$0xf]  ;;  %v5909_v35 = vor.u32 %v6814_v11, %v5906_v12  ;;  %v3443_v60 = vpop.f32.mrf.mxu3 }
  0xf6   : > { %3660 = vmatpush.bf16.msrb.mxu0 %v4901_v4  ;;  %v5634_v36 = vld [vmem:[%s7223_s7 + $0x9d0] sm:$0xf0]  ;;  %v6778_v37 = vld [vmem:[%s7223_s7 + $0xac4] sm:$0xf]  ;;  %v5509_v46 = vor.u32 %v6714_v19, %v5506_v23 }
  0xf7   : > { %v5762_v38 = vld [vmem:[%s7223_s7 + $0xad0] sm:$0xf0]  ;;  %3673 = vmatpush.bf16.msrb.mxu1 %v5029_v9  ;;  %v6810_v41 = vld [vmem:[%s7223_s7 + $0xbc4] sm:$0xf]  ;;  %v5637_v47 = vor.u32 %v6746_v26, %v5634_v36 }
  0xf8   : > { %3686 = vmatpush.bf16.msrb.mxu2 %v5157_v10  ;;  %v5890_v44 = vld [vmem:[%s7223_s7 + $0xbd0] sm:$0xf0]  ;;  %v5765_v48 = vor.u32 %v6778_v37, %v5762_v38  ;;  %v6710_v49 = vld [vmem:[%s7223_s7 + $0x8a4] sm:$0xf] }
  0xf9   : > { %3699 = vmatpush.bf16.msrb.mxu3 %v5285_v13  ;;  %v5490_v50 = vld [vmem:[%s7223_s7 + $0x8b0] sm:$0xf0]  ;;  %v6742_v51 = vld [vmem:[%s7223_s7 + $0x9a4] sm:$0xf]  ;;  %v5893_v53 = vor.u32 %v6810_v41, %v5890_v44  ;;  %3661 = vmatmul.bf16.vlgmr.msrb.gmra.mxu0 %v7412_v42  ;;  %v3454_v9 = vpop.f32.mrf.mxu0 }
  0xfa   : > { %3705 = vmatpush.bf16.msra.mxu0 %v5525_v14  ;;  %v5618_v54 = vld [vmem:[%s7223_s7 + $0x9b0] sm:$0xf0]  ;;  %v6774_v55 = vld [vmem:[%s7223_s7 + $0xaa4] sm:$0xf]  ;;  %v5493_v59 = vor.u32 %v6710_v49, %v5490_v50  ;;  %3674 = vmatmul.bf16.vlgmr.msrb.gmra.mxu1 %v7416_v45  ;;  %v3455_v15 = vadd.f32 %v3454_v9, %v3442_v31 }
  0xfb   : > { %3718 = vmatpush.bf16.msra.mxu1 %v5653_v17  ;;  %3687 = vmatmul.bf16.vlgmr.msrb.gmra.mxu2 %v7408_v39  ;;  %v5746_v56 = vld [vmem:[%s7223_s7 + $0xab0] sm:$0xf0]  ;;  %v6806_v57 = vld [vmem:[%s7223_s7 + $0xba4] sm:$0xf]  ;;  %v5621_v61 = vor.u32 %v6742_v51, %v5618_v54  ;;  %v3467_v17 = vpop.f32.mrf.mxu1 }
  0xfc   : > { %3731 = vmatpush.bf16.msra.mxu2 %v5781_v18  ;;  %3700 = vmatmul.bf16.vlgmr.msrb.gmra.mxu3 %v7414_v43  ;;  %v5874_v58 = vld [vmem:[%s7223_s7 + $0xbb0] sm:$0xf0]  ;;  %v5749_v62 = vor.u32 %v6774_v55, %v5746_v56  ;;  %v6706_v63 = vld [vmem:[%s7223_s7 + $0x884] sm:$0xf]  ;;  %v3468_v36 = vadd.f32 %v3467_v17, %v3455_v15 }
  0xfd   : > { %3744 = vmatpush.bf16.msra.mxu3 %v5909_v35  ;;  %v5474_v0 = vld [vmem:[%s7223_s7 + $0x890] sm:$0xf0]  ;;  %v6738_v1 = vld [vmem:[%s7223_s7 + $0x984] sm:$0xf]  ;;  %v5877_v2 = vor.u32 %v6806_v57, %v5874_v58 }
  0xfe   : > { %3706 = vmatpush.bf16.msra.mxu0 %v5509_v46  ;;  %v5602_v3 = vld [vmem:[%s7223_s7 + $0x990] sm:$0xf0]  ;;  %v6770_v4 = vld [vmem:[%s7223_s7 + $0xa84] sm:$0xf]  ;;  %v5477_v8 = vor.u32 %v6706_v63, %v5474_v0  ;;  %v3480_v46 = vpop.f32.mrf.mxu2 }
  0xff   : > { %3719 = vmatpush.bf16.msra.mxu1 %v5637_v47  ;;  %v5730_v5 = vld [vmem:[%s7223_s7 + $0xa90] sm:$0xf0]  ;;  %v6802_v6 = vld [vmem:[%s7223_s7 + $0xb84] sm:$0xf]  ;;  %v5605_v10 = vor.u32 %v6738_v1, %v5602_v3  ;;  %v3481_v51 = vadd.f32 %v3480_v46, %v3468_v36  ;;  %v3493_v52 = vpop.f32.mrf.mxu3 }
 0x100   : > { %3732 = vmatpush.bf16.msra.mxu2 %v5765_v48  ;;  %v5858_v7 = vld [vmem:[%s7223_s7 + $0xb90] sm:$0xf0]  ;;  %v5733_v11 = vor.u32 %v6770_v4, %v5730_v5  ;;  %v6702_v12 = vld [vmem:[%s7223_s7 + $0x864] sm:$0xf] }
 0x101   : > { %3745 = vmatpush.bf16.msra.mxu3 %v5893_v53  ;;  %v5458_v13 = vld [vmem:[%s7223_s7 + $0x870] sm:$0xf0]  ;;  %v6734_v14 = vld [vmem:[%s7223_s7 + $0x964] sm:$0xf]  ;;  %v5861_v18 = vor.u32 %v6802_v6, %v5858_v7  ;;  %v7742_v56 = vadd.f32 %v3493_v52, %v3481_v51  ;;  %v3456_v57 = vpop.f32.mrf.mxu0 }
 0x102   : > { %3707 = vmatpush.bf16.msra.mxu0 %v5493_v59  ;;  %v5586_v19 = vld [vmem:[%s7223_s7 + $0x970] sm:$0xf0]  ;;  %v6766_v23 = vld [vmem:[%s7223_s7 + $0xa64] sm:$0xf]  ;;  %v5461_v37 = vor.u32 %v6702_v12, %v5458_v13 }
 0x103   : > { %3720 = vmatpush.bf16.msra.mxu1 %v5621_v61  ;;  %v5714_v26 = vld [vmem:[%s7223_s7 + $0xa70] sm:$0xf0]  ;;  %v6798_v32 = vld [vmem:[%s7223_s7 + $0xb64] sm:$0xf]  ;;  %v5589_v31 = vor.u32 %v6734_v14, %v5586_v19  ;;  %v3469_v63 = vpop.f32.mrf.mxu1 }
 0x104   : > { %3733 = vmatpush.bf16.msra.mxu2 %v5749_v62  ;;  %v5842_v35 = vld [vmem:[%s7223_s7 + $0xb70] sm:$0xf0]  ;;  %v5717_v38 = vor.u32 %v6766_v23, %v5714_v26  ;;  %v6698_v40 = vld [vmem:[%s7223_s7 + $0x844] sm:$0xf] }
 0x105   : > { %3746 = vmatpush.bf16.msra.mxu3 %v5877_v2  ;;  %v5442_v41 = vld [vmem:[%s7223_s7 + $0x850] sm:$0xf0]  ;;  %v6730_v44 = vld [vmem:[%s7223_s7 + $0x944] sm:$0xf]  ;;  %v5845_v47 = vor.u32 %v6798_v32, %v5842_v35 }
 0x106   : > { %3708 = vmatpush.bf16.msra.mxu0 %v5477_v8  ;;  %v5570_v48 = vld [vmem:[%s7223_s7 + $0x950] sm:$0xf0]  ;;  %v6762_v49 = vld [vmem:[%s7223_s7 + $0xa44] sm:$0xf]  ;;  %v5445_v55 = vor.u32 %v6698_v40, %v5442_v41  ;;  %v3482_v14 = vpop.f32.mrf.mxu2 }
 0x107   : > { %3721 = vmatpush.bf16.msra.mxu1 %v5605_v10  ;;  %v5698_v50 = vld [vmem:[%s7223_s7 + $0xa50] sm:$0xf0]  ;;  %v6794_v53 = vld [vmem:[%s7223_s7 + $0xb44] sm:$0xf]  ;;  %v5573_v58 = vor.u32 %v6730_v44, %v5570_v48  ;;  %v3495_v23 = vpop.f32.mrf.mxu3 }
 0x108   : > { %3734 = vmatpush.bf16.msra.mxu2 %v5733_v11  ;;  %v5826_v54 = vld [vmem:[%s7223_s7 + $0xb50] sm:$0xf0]  ;;  %v5701_v59 = vor.u32 %v6762_v49, %v5698_v50  ;;  %v6694_v60 = vld [vmem:[%s7223_s7 + $0x824] sm:$0xf] }
 0x109   : > { %3747 = vmatpush.bf16.msra.mxu3 %v5861_v18  ;;  %v5426_v61 = vld [vmem:[%s7223_s7 + $0x830] sm:$0xf0]  ;;  %v6726_v62 = vld [vmem:[%s7223_s7 + $0x924] sm:$0xf]  ;;  %v5829_v0 = vor.u32 %v6794_v53, %v5826_v54 }
 0x10a   : > { %3709 = vmatpush.bf16.msra.mxu0 %v5461_v37  ;;  %v5554_v1 = vld [vmem:[%s7223_s7 + $0x930] sm:$0xf0]  ;;  %v6758_v2 = vld [vmem:[%s7223_s7 + $0xa24] sm:$0xf]  ;;  %v5429_v6 = vor.u32 %v6694_v60, %v5426_v61 }
 0x10b   : > { %3722 = vmatpush.bf16.msra.mxu1 %v5589_v31  ;;  %v5682_v3 = vld [vmem:[%s7223_s7 + $0xa30] sm:$0xf0]  ;;  %v6790_v4 = vld [vmem:[%s7223_s7 + $0xb24] sm:$0xf]  ;;  %v5557_v9 = vor.u32 %v6726_v62, %v5554_v1 }
 0x10c   : > { %3735 = vmatpush.bf16.msra.mxu2 %v5717_v38  ;;  %v5810_v5 = vld [vmem:[%s7223_s7 + $0xb30] sm:$0xf0]  ;;  %v6690_v7 = vld [vmem:[%s7223_s7 + $0x804] sm:$0xf]  ;;  %v5685_v10 = vor.u32 %v6758_v2, %v5682_v3 }
 0x10d   : > { %3748 = vmatpush.bf16.msra.mxu3 %v5845_v47  ;;  %v5410_v8 = vld [vmem:[%s7223_s7 + $0x810] sm:$0xf0]  ;;  %v6722_v11 = vld [vmem:[%s7223_s7 + $0x904] sm:$0xf]  ;;  %v5813_v15 = vor.u32 %v6790_v4, %v5810_v5 }
 0x10e   : > { %3710 = vmatpush.bf16.msra.mxu0 %v5445_v55  ;;  %v5538_v12 = vld [vmem:[%s7223_s7 + $0x910] sm:$0xf0]  ;;  %v6754_v13 = vld [vmem:[%s7223_s7 + $0xa04] sm:$0xf]  ;;  %v5413_v36 = vor.u32 %v6690_v7, %v5410_v8 }
 0x10f   : > { %3723 = vmatpush.bf16.msra.mxu1 %v5573_v58  ;;  %v5666_v17 = vld [vmem:[%s7223_s7 + $0xa10] sm:$0xf0]  ;;  %v6786_v18 = vld [vmem:[%s7223_s7 + $0xb04] sm:$0xf]  ;;  %v5541_v40 = vor.u32 %v6722_v11, %v5538_v12 }
 0x110   : > { %3736 = vmatpush.bf16.msra.mxu2 %v5701_v59  ;;  %v5794_v19 = vld [vmem:[%s7223_s7 + $0xb10] sm:$0xf0]  ;;  %v6846_v26 = vld [vmem:[%s7223_s7 + $0xce4] sm:$0xf]  ;;  %v5669_v41 = vor.u32 %v6754_v13, %v5666_v17 }
 0x111   : > { %3749 = vmatpush.bf16.msra.mxu3 %v5829_v0  ;;  %v6034_v32 = vld [vmem:[%s7223_s7 + $0xcf0] sm:$0xf0]  ;;  %v6878_v35 = vld [vmem:[%s7223_s7 + $0xde4] sm:$0xf]  ;;  %v5797_v47 = vor.u32 %v6786_v18, %v5794_v19 }
 0x112   : > { %3711 = vmatpush.bf16.msra.mxu0 %v5429_v6  ;;  %v6162_v37 = vld [vmem:[%s7223_s7 + $0xdf0] sm:$0xf0]  ;;  %v6910_v31 = vld [vmem:[%s7223_s7 + $0xee4] sm:$0xf]  ;;  %v6037_v48 = vor.u32 %v6846_v26, %v6034_v32 }
 0x113   : > { %v6290_v38 = vld [vmem:[%s7223_s7 + $0xef0] sm:$0xf0]  ;;  %3724 = vmatpush.bf16.msra.mxu1 %v5557_v9  ;;  %v6942_v44 = vld [vmem:[%s7223_s7 + $0xfe4] sm:$0xf]  ;;  %v6165_v49 = vor.u32 %v6878_v35, %v6162_v37 }
 0x114   : > { %3737 = vmatpush.bf16.msra.mxu2 %v5685_v10  ;;  %v6418_v46 = vld [vmem:[%s7223_s7 + $0xff0] sm:$0xf0]  ;;  %v6293_v50 = vor.u32 %v6910_v31, %v6290_v38  ;;  %v6842_v51 = vld [vmem:[%s7223_s7 + $0xcc4] sm:$0xf] }
 0x115   : > { %3750 = vmatpush.bf16.msra.mxu3 %v5813_v15  ;;  %v6018_v52 = vld [vmem:[%s7223_s7 + $0xcd0] sm:$0xf0]  ;;  %v6874_v53 = vld [vmem:[%s7223_s7 + $0xdc4] sm:$0xf]  ;;  %v6421_v54 = vor.u32 %v6942_v44, %v6418_v46 }
 0x116   : > { %3712 = vmatpush.bf16.msra.mxu0 %v5413_v36  ;;  %v6146_v55 = vld [vmem:[%s7223_s7 + $0xdd0] sm:$0xf0]  ;;  %v6906_v57 = vld [vmem:[%s7223_s7 + $0xec4] sm:$0xf]  ;;  %v6021_v61 = vor.u32 %v6842_v51, %v6018_v52 }
 0x117   : > { %v6274_v58 = vld [vmem:[%s7223_s7 + $0xed0] sm:$0xf0]  ;;  %3725 = vmatpush.bf16.msra.mxu1 %v5541_v40  ;;  %v6938_v59 = vld [vmem:[%s7223_s7 + $0xfc4] sm:$0xf]  ;;  %v6149_v62 = vor.u32 %v6874_v53, %v6146_v55 }
 0x118   : > { %3738 = vmatpush.bf16.msra.mxu2 %v5669_v41  ;;  %v6402_v60 = vld [vmem:[%s7223_s7 + $0xfd0] sm:$0xf0]  ;;  %v6277_v63 = vor.u32 %v6906_v57, %v6274_v58  ;;  %v6838_v0 = vld [vmem:[%s7223_s7 + $0xca4] sm:$0xf]  ;;  %v3506_v23 = vpop.f32.mrf.mxu0 }
 0x119   : > { %3751 = vmatpush.bf16.msra.mxu3 %v5797_v47  ;;  %v6002_v1 = vld [vmem:[%s7223_s7 + $0xcb0] sm:$0xf0]  ;;  %v6870_v2 = vld [vmem:[%s7223_s7 + $0xda4] sm:$0xf]  ;;  %3713 = vmatmul.bf16.vlgmr.msra.gmra.mxu0 %v7481_v20  ;;  %v6405_v3 = vor.u32 %v6938_v59, %v6402_v60  ;;  %v3507_v35 = vadd.f32 %v3506_v23, %v7742_v56  ;;  %v3519_v37 = vpop.f32.mrf.mxu1 }
 0x11a   : > { %3757 = vmatpush.bf16.msrb.mxu0 %v6037_v48  ;;  %v6130_v4 = vld [vmem:[%s7223_s7 + $0xdb0] sm:$0xf0]  ;;  %v6902_v5 = vld [vmem:[%s7223_s7 + $0xea4] sm:$0xf]  ;;  %3726 = vmatmul.bf16.vlgmr.msra.gmra.mxu1 %v7488_v25  ;;  %v6005_v9 = vor.u32 %v6838_v0, %v6002_v1 }
 0x11b   : > { %3770 = vmatpush.bf16.msrb.mxu1 %v6165_v49  ;;  %v6258_v6 = vld [vmem:[%s7223_s7 + $0xeb0] sm:$0xf0]  ;;  %3739 = vmatmul.bf16.vlgmr.msra.gmra.mxu2 %v7486_v24  ;;  %v6934_v7 = vld [vmem:[%s7223_s7 + $0xfa4] sm:$0xf]  ;;  %v6133_v10 = vor.u32 %v6870_v2, %v6130_v4  ;;  %v3520_v47 = vadd.f32 %v3519_v37, %v3507_v35 }
 0x11c   : > { %3783 = vmatpush.bf16.msrb.mxu2 %v6293_v50  ;;  %v6386_v8 = vld [vmem:[%s7223_s7 + $0xfb0] sm:$0xf0]  ;;  %3752 = vmatmul.bf16.vlgmr.msra.gmra.mxu3 %v7492_v30  ;;  %v6261_v11 = vor.u32 %v6902_v5, %v6258_v6  ;;  %v6834_v12 = vld [vmem:[%s7223_s7 + $0xc84] sm:$0xf] }
 0x11d   : > { %3796 = vmatpush.bf16.msrb.mxu3 %v6421_v54  ;;  %v5986_v13 = vld [vmem:[%s7223_s7 + $0xc90] sm:$0xf0]  ;;  %v6866_v14 = vld [vmem:[%s7223_s7 + $0xd84] sm:$0xf]  ;;  %v6389_v15 = vor.u32 %v6934_v7, %v6386_v8 }
 0x11e   : > { %3758 = vmatpush.bf16.msrb.mxu0 %v6021_v61  ;;  %v6114_v17 = vld [vmem:[%s7223_s7 + $0xd90] sm:$0xf0]  ;;  %v6898_v18 = vld [vmem:[%s7223_s7 + $0xe84] sm:$0xf]  ;;  %v5989_v36 = vor.u32 %v6834_v12, %v5986_v13 }
 0x11f   : > { %3771 = vmatpush.bf16.msrb.mxu1 %v6149_v62  ;;  %v6242_v19 = vld [vmem:[%s7223_s7 + $0xe90] sm:$0xf0]  ;;  %v6930_v26 = vld [vmem:[%s7223_s7 + $0xf84] sm:$0xf]  ;;  %v6117_v31 = vor.u32 %v6866_v14, %v6114_v17  ;;  %v3532_v60 = vpop.f32.mrf.mxu2 }
 0x120   : > { %3784 = vmatpush.bf16.msrb.mxu2 %v6277_v63  ;;  %v6370_v32 = vld [vmem:[%s7223_s7 + $0xf90] sm:$0xf0]  ;;  %v6245_v38 = vor.u32 %v6898_v18, %v6242_v19  ;;  %v6830_v40 = vld [vmem:[%s7223_s7 + $0xc64] sm:$0xf]  ;;  %v3533_v0 = vadd.f32 %v3532_v60, %v3520_v47  ;;  %v3545_v1 = vpop.f32.mrf.mxu3  ;;  %v3508_v4 = vpop.f32.mrf.mxu0 }
 0x121   : > { %3797 = vmatpush.bf16.msrb.mxu3 %v6405_v3  ;;  %v5970_v41 = vld [vmem:[%s7223_s7 + $0xc70] sm:$0xf0]  ;;  %v6862_v44 = vld [vmem:[%s7223_s7 + $0xd64] sm:$0xf]  ;;  %v6373_v46 = vor.u32 %v6930_v26, %v6370_v32  ;;  %v3521_v6 = vpop.f32.mrf.mxu1  ;;  %v6493_v4 = vld [vmem:[%s7223_s7 + $0x1d4] sm:$0xf0] }
 0x122   : > { %3759 = vmatpush.bf16.msrb.mxu0 %v6005_v9  ;;  %v6098_v48 = vld [vmem:[%s7223_s7 + $0xd70] sm:$0xf0]  ;;  %v6894_v49 = vld [vmem:[%s7223_s7 + $0xe64] sm:$0xf]  ;;  %v5973_v52 = vor.u32 %v6830_v40, %v5970_v41  ;;  %v7813_v7 = vadd.f32 %v3545_v1, %v3533_v0  ;;  %v4488_v0 = vld [vmem:[%s7223_s7 + $0xc8] sm:$0xf] }
 0x123   : > { %3772 = vmatpush.bf16.msrb.mxu1 %v6133_v10  ;;  %v6226_v56 = vld [vmem:[%s7223_s7 + $0xe70] sm:$0xf0]  ;;  %v6926_v50 = vld [vmem:[%s7223_s7 + $0xf64] sm:$0xf]  ;;  %v6101_v53 = vor.u32 %v6862_v44, %v6098_v48  ;;  %v4504_v48 = vld [vmem:[%s7223_s7 + $0xe8] sm:$0xf] }
 0x124   : > { %3785 = vmatpush.bf16.msrb.mxu2 %v6261_v11  ;;  %v6354_v51 = vld [vmem:[%s7223_s7 + $0xf70] sm:$0xf0]  ;;  %v6229_v54 = vor.u32 %v6894_v49, %v6226_v56  ;;  %v6826_v55 = vld [vmem:[%s7223_s7 + $0xc44] sm:$0xf]  ;;  %v6465_v49 = vld [vmem:[%s7223_s7 + $0xf4] sm:$0xf0] }
 0x125   : > { %3798 = vmatpush.bf16.msrb.mxu3 %v6389_v15  ;;  %v5954_v57 = vld [vmem:[%s7223_s7 + $0xc50] sm:$0xf0]  ;;  %v6858_v58 = vld [vmem:[%s7223_s7 + $0xd44] sm:$0xf]  ;;  %v6357_v59 = vor.u32 %v6926_v50, %v6354_v51  ;;  %v4632_v56 = vld [vmem:[%s7223_s7 + $0x1e8] sm:$0xf] }
 0x126   : > { %3760 = vmatpush.bf16.msrb.mxu0 %v5989_v36  ;;  %v6082_v61 = vld [vmem:[%s7223_s7 + $0xd50] sm:$0xf0]  ;;  %v6890_v62 = vld [vmem:[%s7223_s7 + $0xe44] sm:$0xf]  ;;  %v5957_v5 = vor.u32 %v6826_v55, %v5954_v57  ;;  %v6461_v1 = vld [vmem:[%s7223_s7 + $0xd4] sm:$0xf0] }
 0x127   : > { %3773 = vmatpush.bf16.msrb.mxu1 %v6117_v31  ;;  %v6210_v63 = vld [vmem:[%s7223_s7 + $0xe50] sm:$0xf0]  ;;  %v6922_v2 = vld [vmem:[%s7223_s7 + $0xf44] sm:$0xf]  ;;  %v6085_v8 = vor.u32 %v6858_v58, %v6082_v61  ;;  %v3534_v47 = vpop.f32.mrf.mxu2  ;;  %v4888_v58 = vld [vmem:[%s7223_s7 + $0x3e8] sm:$0xf]  ;;  %v4505_v61 = vor.u32 %v6465_v49, %v4504_v48 }
 0x128   : > { %3786 = vmatpush.bf16.msrb.mxu2 %v6245_v38  ;;  %v6338_v3 = vld [vmem:[%s7223_s7 + $0xf50] sm:$0xf0]  ;;  %v6213_v9 = vor.u32 %v6890_v62, %v6210_v63  ;;  %v6822_v10 = vld [vmem:[%s7223_s7 + $0xc24] sm:$0xf]  ;;  %v3547_v50 = vpop.f32.mrf.mxu3  ;;  %v6525_v6 = vld [vmem:[%s7223_s7 + $0x2d4] sm:$0xf0] }
 0x129   : > { %3799 = vmatpush.bf16.msrb.mxu3 %v6373_v46  ;;  %v5938_v11 = vld [vmem:[%s7223_s7 + $0xc30] sm:$0xf0]  ;;  %v6854_v12 = vld [vmem:[%s7223_s7 + $0xd24] sm:$0xf]  ;;  %v6341_v13 = vor.u32 %v6922_v2, %v6338_v3  ;;  %v4616_v2 = vld [vmem:[%s7223_s7 + $0x1c8] sm:$0xf] }
 0x12a   : > { %3761 = vmatpush.bf16.msrb.mxu0 %v5973_v52  ;;  %v6066_v14 = vld [vmem:[%s7223_s7 + $0xd30] sm:$0xf0]  ;;  %v6886_v15 = vld [vmem:[%s7223_s7 + $0xe24] sm:$0xf]  ;;  %v5941_v23 = vor.u32 %v6822_v10, %v5938_v11  ;;  %v6497_v52 = vld [vmem:[%s7223_s7 + $0x1f4] sm:$0xf0]  ;;  %v4489_v10 = vor.u32 %v6461_v1, %v4488_v0  ;;  %v4617_v11 = vor.u32 %v6493_v4, %v4616_v2 }
 0x12b   : > { %3774 = vmatpush.bf16.msrb.mxu1 %v6101_v53  ;;  %v6194_v17 = vld [vmem:[%s7223_s7 + $0xe30] sm:$0xf0]  ;;  %v6918_v18 = vld [vmem:[%s7223_s7 + $0xf24] sm:$0xf]  ;;  %v6069_v35 = vor.u32 %v6854_v12, %v6066_v14  ;;  %v4760_v53 = vld [vmem:[%s7223_s7 + $0x2e8] sm:$0xf]  ;;  %v4633_v62 = vor.u32 %v6497_v52, %v4632_v56 }
 0x12c   : > { %3787 = vmatpush.bf16.msrb.mxu2 %v6229_v54  ;;  %v6322_v19 = vld [vmem:[%s7223_s7 + $0xf30] sm:$0xf0]  ;;  %v6818_v26 = vld [vmem:[%s7223_s7 + $0xc04] sm:$0xf]  ;;  %v6197_v36 = vor.u32 %v6886_v15, %v6194_v17  ;;  %v6529_v54 = vld [vmem:[%s7223_s7 + $0x2f4] sm:$0xf0] }
 0x12d   : > { %3800 = vmatpush.bf16.msrb.mxu3 %v6357_v59  ;;  %v5922_v32 = vld [vmem:[%s7223_s7 + $0xc10] sm:$0xf0]  ;;  %v6850_v37 = vld [vmem:[%s7223_s7 + $0xd04] sm:$0xf]  ;;  %v6325_v40 = vor.u32 %v6918_v18, %v6322_v19  ;;  %v6561_v59 = vld [vmem:[%s7223_s7 + $0x3f4] sm:$0xf0]  ;;  %v4761_v63 = vor.u32 %v6529_v54, %v4760_v53 }
 0x12e   : > { %3762 = vmatpush.bf16.msrb.mxu0 %v5957_v5  ;;  %v6050_v31 = vld [vmem:[%s7223_s7 + $0xd10] sm:$0xf0]  ;;  %v6882_v38 = vld [vmem:[%s7223_s7 + $0xe04] sm:$0xf]  ;;  %v5925_v51 = vor.u32 %v6818_v26, %v5922_v32  ;;  %v4889_v3 = vor.u32 %v6561_v59, %v4888_v58  ;;  %v4744_v5 = vld [vmem:[%s7223_s7 + $0x2c8] sm:$0xf] }
 0x12f   : > { %3775 = vmatpush.bf16.msrb.mxu1 %v6085_v8  ;;  %v6178_v41 = vld [vmem:[%s7223_s7 + $0xe10] sm:$0xf0]  ;;  %v6914_v44 = vld [vmem:[%s7223_s7 + $0xf04] sm:$0xf]  ;;  %v6053_v55 = vor.u32 %v6850_v37, %v6050_v31  ;;  %v4872_v8 = vld [vmem:[%s7223_s7 + $0x3c8] sm:$0xf]  ;;  %v4745_v12 = vor.u32 %v6525_v6, %v4744_v5 }
 0x130   : > { %3788 = vmatpush.bf16.msrb.mxu2 %v6213_v9  ;;  %v6306_v46 = vld [vmem:[%s7223_s7 + $0xf10] sm:$0xf0]  ;;  %v6181_v57 = vor.u32 %v6882_v38, %v6178_v41  ;;  %v6557_v9 = vld [vmem:[%s7223_s7 + $0x3d4] sm:$0xf0]  ;;  %v4600_v15 = vld [vmem:[%s7223_s7 + $0x1a8] sm:$0xf] }
 0x131   : > { %3801 = vmatpush.bf16.msrb.mxu3 %v6341_v13  ;;  %v6309_v60 = vor.u32 %v6914_v44, %v6306_v46  ;;  %v4472_v13 = vld [vmem:[%s7223_s7 + $0xa8] sm:$0xf]  ;;  %v6457_v14 = vld [vmem:[%s7223_s7 + $0xb4] sm:$0xf0]  ;;  %v4873_v17 = vor.u32 %v6557_v9, %v4872_v8 }
 0x132   : > { %3763 = vmatpush.bf16.msrb.mxu0 %v5941_v23  ;;  %v6489_v18 = vld [vmem:[%s7223_s7 + $0x1b4] sm:$0xf0]  ;;  %v4728_v19 = vld [vmem:[%s7223_s7 + $0x2a8] sm:$0xf] }
 0x133   : > { %3776 = vmatpush.bf16.msrb.mxu1 %v6069_v35  ;;  %v6521_v23 = vld [vmem:[%s7223_s7 + $0x2b4] sm:$0xf0]  ;;  %v4856_v26 = vld [vmem:[%s7223_s7 + $0x3a8] sm:$0xf]  ;;  %v4473_v35 = vor.u32 %v6457_v14, %v4472_v13 }
 0x134   : > { %3789 = vmatpush.bf16.msrb.mxu2 %v6197_v36  ;;  %v6553_v32 = vld [vmem:[%s7223_s7 + $0x3b4] sm:$0xf0]  ;;  %v4601_v36 = vor.u32 %v6489_v18, %v4600_v15  ;;  %v4729_v37 = vor.u32 %v6521_v23, %v4728_v19  ;;  %v4456_v31 = vld [vmem:[%s7223_s7 + $0x88] sm:$0xf] }
 0x135   : > { %3802 = vmatpush.bf16.msrb.mxu3 %v6325_v40  ;;  %v6453_v38 = vld [vmem:[%s7223_s7 + $0x94] sm:$0xf0]  ;;  %v4584_v40 = vld [vmem:[%s7223_s7 + $0x188] sm:$0xf]  ;;  %v4857_v41 = vor.u32 %v6553_v32, %v4856_v26 }
 0x136   : > { %3764 = vmatpush.bf16.msrb.mxu0 %v5925_v51  ;;  %v6485_v44 = vld [vmem:[%s7223_s7 + $0x194] sm:$0xf0]  ;;  %v4712_v46 = vld [vmem:[%s7223_s7 + $0x288] sm:$0xf]  ;;  %v3558_v48 = vpop.f32.mrf.mxu0  ;;  %v4457_v51 = vor.u32 %v6453_v38, %v4456_v31 }
 0x137   : > { %3777 = vmatpush.bf16.msrb.mxu1 %v6053_v55  ;;  %v6517_v47 = vld [vmem:[%s7223_s7 + $0x294] sm:$0xf0]  ;;  %v4840_v49 = vld [vmem:[%s7223_s7 + $0x388] sm:$0xf]  ;;  %v3559_v50 = vadd.f32 %v3558_v48, %v7813_v7  ;;  %v3571_v52 = vpop.f32.mrf.mxu1  ;;  %v4585_v53 = vor.u32 %v6485_v44, %v4584_v40 }
 0x138   : > { %3790 = vmatpush.bf16.msrb.mxu2 %v6181_v57  ;;  %v6549_v56 = vld [vmem:[%s7223_s7 + $0x394] sm:$0xf0]  ;;  %v4713_v54 = vor.u32 %v6517_v47, %v4712_v46  ;;  %v4440_v55 = vld [vmem:[%s7223_s7 + $0x68] sm:$0xf] }
 0x139   : > { %3803 = vmatpush.bf16.msrb.mxu3 %v6309_v60  ;;  %3765 = vmatmul.bf16.vlgmr.msrb.gmra.mxu0 %v7557_v16  ;;  %v6449_v57 = vld [vmem:[%s7223_s7 + $0x74] sm:$0xf0]  ;;  %v4568_v58 = vld [vmem:[%s7223_s7 + $0x168] sm:$0xf]  ;;  %v4841_v59 = vor.u32 %v6549_v56, %v4840_v49  ;;  %v3572_v60 = vadd.f32 %v3571_v52, %v3559_v50 }
 0x13a   : > { %3809 = vmatpush.bf16.msra.mxu0 %v4505_v61  ;;  %3778 = vmatmul.bf16.vlgmr.msrb.gmra.mxu1 %v7564_v22  ;;  %v6481_v61 = vld [vmem:[%s7223_s7 + $0x174] sm:$0xf0]  ;;  %v4441_v1 = vor.u32 %v6449_v57, %v4440_v55  ;;  %v4424_v4 = vld [vmem:[%s7223_s7 + $0x48] sm:$0xf] }
 0x13b   : > { %3822 = vmatpush.bf16.msra.mxu1 %v4633_v62  ;;  %3791 = vmatmul.bf16.vlgmr.msrb.gmra.mxu2 %v7562_v21  ;;  %v4696_v62 = vld [vmem:[%s7223_s7 + $0x268] sm:$0xf]  ;;  %v6513_v7 = vld [vmem:[%s7223_s7 + $0x274] sm:$0xf0]  ;;  %v4569_v2 = vor.u32 %v6481_v61, %v4568_v58 }
 0x13c   : > { %3835 = vmatpush.bf16.msra.mxu2 %v4761_v63  ;;  %3804 = vmatmul.bf16.vlgmr.msrb.gmra.mxu3 %v7568_v29  ;;  %v4824_v63 = vld [vmem:[%s7223_s7 + $0x368] sm:$0xf]  ;;  %v6545_v0 = vld [vmem:[%s7223_s7 + $0x374] sm:$0xf0] }
 0x13d   : > { %3848 = vmatpush.bf16.msra.mxu3 %v4889_v3  ;;  %v4697_v3 = vor.u32 %v6513_v7, %v4696_v62  ;;  %v6445_v5 = vld [vmem:[%s7223_s7 + $0x54] sm:$0xf0]  ;;  %v4552_v6 = vld [vmem:[%s7223_s7 + $0x148] sm:$0xf]  ;;  %v4825_v8 = vor.u32 %v6545_v0, %v4824_v63 }
 0x13e   : > { %3810 = vmatpush.bf16.msra.mxu0 %v4489_v10  ;;  %v3584_v9 = vpop.f32.mrf.mxu2  ;;  %v6477_v10 = vld [vmem:[%s7223_s7 + $0x154] sm:$0xf0]  ;;  %v4808_v15 = vld [vmem:[%s7223_s7 + $0x348] sm:$0xf]  ;;  %v3560_v18 = vpop.f32.mrf.mxu0  ;;  %v4425_v19 = vor.u32 %v6445_v5, %v4424_v4 }
 0x13f   : > { %3823 = vmatpush.bf16.msra.mxu1 %v4617_v11  ;;  %v4680_v11 = vld [vmem:[%s7223_s7 + $0x248] sm:$0xf]  ;;  %v3585_v13 = vadd.f32 %v3584_v9, %v3572_v60  ;;  %v3597_v14 = vpop.f32.mrf.mxu3  ;;  %v3573_v23 = vpop.f32.mrf.mxu1  ;;  %v4553_v32 = vor.u32 %v6477_v10, %v4552_v6  ;;  %v6473_v40 = vld [vmem:[%s7223_s7 + $0x134] sm:$0xf0] }
 0x140   : > { %3836 = vmatpush.bf16.msra.mxu2 %v4745_v12  ;;  %v6509_v12 = vld [vmem:[%s7223_s7 + $0x254] sm:$0xf0]  ;;  %v4536_v31 = vld [vmem:[%s7223_s7 + $0x128] sm:$0xf] }
 0x141   : > { %3849 = vmatpush.bf16.msra.mxu3 %v4873_v17  ;;  %v6541_v17 = vld [vmem:[%s7223_s7 + $0x354] sm:$0xf0]  ;;  %v7884_v26 = vadd.f32 %v3597_v14, %v3585_v13  ;;  %v4792_v46 = vld [vmem:[%s7223_s7 + $0x328] sm:$0xf]  ;;  %v4537_v50 = vor.u32 %v6473_v40, %v4536_v31 }
 0x142   : > { %3811 = vmatpush.bf16.msra.mxu0 %v4473_v35  ;;  %v4681_v35 = vor.u32 %v6509_v12, %v4680_v11  ;;  %v4809_v38 = vor.u32 %v6541_v17, %v4808_v15  ;;  %v6505_v44 = vld [vmem:[%s7223_s7 + $0x234] sm:$0xf0]  ;;  %v4392_v49 = vld [vmem:[%s7223_s7 + $0x8] sm:$0xf] }
 0x143   : > { %3824 = vmatpush.bf16.msra.mxu1 %v4601_v36  ;;  %v4408_v36 = vld [vmem:[%s7223_s7 + $0x28] sm:$0xf]  ;;  %v6537_v47 = vld [vmem:[%s7223_s7 + $0x334] sm:$0xf0] }
 0x144   : > { %3837 = vmatpush.bf16.msra.mxu2 %v4729_v37  ;;  %v6441_v37 = vld [vmem:[%s7223_s7 + $0x34] sm:$0xf0]  ;;  %v4520_v52 = vld [vmem:[%s7223_s7 + $0x108] sm:$0xf]  ;;  %v4793_v55 = vor.u32 %v6537_v47, %v4792_v46 }
 0x145   : > { %3850 = vmatpush.bf16.msra.mxu3 %v4857_v41  ;;  %v4664_v41 = vld [vmem:[%s7223_s7 + $0x228] sm:$0xf]  ;;  %v4409_v48 = vor.u32 %v6441_v37, %v4408_v36  ;;  %v6437_v56 = vld [vmem:[%s7223_s7 + $0x14] sm:$0xf0] }
 0x146   : > { %3812 = vmatpush.bf16.msra.mxu0 %v4457_v51  ;;  %v4665_v51 = vor.u32 %v6505_v44, %v4664_v41  ;;  %v6501_v57 = vld [vmem:[%s7223_s7 + $0x214] sm:$0xf0]  ;;  %v4776_v58 = vld [vmem:[%s7223_s7 + $0x308] sm:$0xf]  ;;  %v3586_v60 = vpop.f32.mrf.mxu2  ;;  %v4393_v0 = vor.u32 %v6437_v56, %v4392_v49 }
 0x147   : > { %3825 = vmatpush.bf16.msra.mxu1 %v4585_v53  ;;  %v6469_v53 = vld [vmem:[%s7223_s7 + $0x114] sm:$0xf0]  ;;  %v5016_v61 = vld [vmem:[%s7223_s7 + $0x4e8] sm:$0xf]  ;;  %v3599_v63 = vpop.f32.mrf.mxu3 }
 0x148   : > { %3838 = vmatpush.bf16.msra.mxu2 %v4713_v54  ;;  %v4648_v54 = vld [vmem:[%s7223_s7 + $0x208] sm:$0xf]  ;;  %v6593_v62 = vld [vmem:[%s7223_s7 + $0x4f4] sm:$0xf0]  ;;  %v4521_v4 = vor.u32 %v6469_v53, %v4520_v52 }
 0x149   : > { %3851 = vmatpush.bf16.msra.mxu3 %v4841_v59  ;;  %v6533_v59 = vld [vmem:[%s7223_s7 + $0x314] sm:$0xf0]  ;;  %v5144_v7 = vld [vmem:[%s7223_s7 + $0x5e8] sm:$0xf]  ;;  %v4649_v5 = vor.u32 %v6501_v57, %v4648_v54  ;;  %v5017_v10 = vor.u32 %v6593_v62, %v5016_v61 }
 0x14a   : > { %3813 = vmatpush.bf16.msra.mxu0 %v4441_v1  ;;  %v6625_v1 = vld [vmem:[%s7223_s7 + $0x5f4] sm:$0xf0]  ;;  %v5400_v6 = vld [vmem:[%s7223_s7 + $0x7e8] sm:$0xf]  ;;  %v4777_v9 = vor.u32 %v6533_v59, %v4776_v58 }
 0x14b   : > { %3826 = vmatpush.bf16.msra.mxu1 %v4569_v2  ;;  %v5272_v2 = vld [vmem:[%s7223_s7 + $0x6e8] sm:$0xf]  ;;  %v5145_v11 = vor.u32 %v6625_v1, %v5144_v7  ;;  %v6589_v14 = vld [vmem:[%s7223_s7 + $0x4d4] sm:$0xf0] }
 0x14c   : > { %3839 = vmatpush.bf16.msra.mxu2 %v4697_v3  ;;  %v6657_v3 = vld [vmem:[%s7223_s7 + $0x6f4] sm:$0xf0]  ;;  %v5000_v13 = vld [vmem:[%s7223_s7 + $0x4c8] sm:$0xf] }
 0x14d   : > { %3852 = vmatpush.bf16.msra.mxu3 %v4825_v8  ;;  %v6689_v8 = vld [vmem:[%s7223_s7 + $0x7f4] sm:$0xf0]  ;;  %v5273_v12 = vor.u32 %v6657_v3, %v5272_v2  ;;  %v5128_v15 = vld [vmem:[%s7223_s7 + $0x5c8] sm:$0xf]  ;;  %v5001_v36 = vor.u32 %v6589_v14, %v5000_v13 }
 0x14e   : > { %3814 = vmatpush.bf16.msra.mxu0 %v4425_v19  ;;  %v5401_v17 = vor.u32 %v6689_v8, %v5400_v6  ;;  %v6621_v18 = vld [vmem:[%s7223_s7 + $0x5d4] sm:$0xf0]  ;;  %v5256_v19 = vld [vmem:[%s7223_s7 + $0x6c8] sm:$0xf] }
 0x14f   : > { %3827 = vmatpush.bf16.msra.mxu1 %v4553_v32  ;;  %v6653_v23 = vld [vmem:[%s7223_s7 + $0x6d4] sm:$0xf0]  ;;  %v5384_v32 = vld [vmem:[%s7223_s7 + $0x7c8] sm:$0xf]  ;;  %v5129_v37 = vor.u32 %v6621_v18, %v5128_v15 }
 0x150   : > { %3840 = vmatpush.bf16.msra.mxu2 %v4681_v35  ;;  %v6685_v35 = vld [vmem:[%s7223_s7 + $0x7d4] sm:$0xf0]  ;;  %v5257_v31 = vor.u32 %v6653_v23, %v5256_v19  ;;  %v5112_v41 = vld [vmem:[%s7223_s7 + $0x5a8] sm:$0xf] }
 0x151   : > { %3853 = vmatpush.bf16.msra.mxu3 %v4809_v38  ;;  %v4984_v38 = vld [vmem:[%s7223_s7 + $0x4a8] sm:$0xf]  ;;  %v6585_v40 = vld [vmem:[%s7223_s7 + $0x4b4] sm:$0xf0]  ;;  %v5385_v44 = vor.u32 %v6685_v35, %v5384_v32 }
 0x152   : > { %3815 = vmatpush.bf16.msra.mxu0 %v4409_v48  ;;  %v6617_v46 = vld [vmem:[%s7223_s7 + $0x5b4] sm:$0xf0]  ;;  %v5240_v47 = vld [vmem:[%s7223_s7 + $0x6a8] sm:$0xf] }
 0x153   : > { %3828 = vmatpush.bf16.msra.mxu1 %v4537_v50  ;;  %v6649_v48 = vld [vmem:[%s7223_s7 + $0x6b4] sm:$0xf0]  ;;  %v5368_v49 = vld [vmem:[%s7223_s7 + $0x7a8] sm:$0xf]  ;;  %v4985_v50 = vor.u32 %v6585_v40, %v4984_v38 }
 0x154   : > { %3841 = vmatpush.bf16.msra.mxu2 %v4665_v51  ;;  %v6681_v56 = vld [vmem:[%s7223_s7 + $0x7b4] sm:$0xf0]  ;;  %v5113_v51 = vor.u32 %v6617_v46, %v5112_v41  ;;  %v5241_v52 = vor.u32 %v6649_v48, %v5240_v47  ;;  %v4968_v53 = vld [vmem:[%s7223_s7 + $0x488] sm:$0xf] }
 0x155   : > { %3854 = vmatpush.bf16.msra.mxu3 %v4793_v55  ;;  %v6581_v54 = vld [vmem:[%s7223_s7 + $0x494] sm:$0xf0]  ;;  %v5096_v55 = vld [vmem:[%s7223_s7 + $0x588] sm:$0xf]  ;;  %v5369_v57 = vor.u32 %v6681_v56, %v5368_v49 }
 0x156   : > { %3816 = vmatpush.bf16.msra.mxu0 %v4393_v0  ;;  %v6613_v58 = vld [vmem:[%s7223_s7 + $0x594] sm:$0xf0]  ;;  %v5224_v59 = vld [vmem:[%s7223_s7 + $0x688] sm:$0xf]  ;;  %v4969_v7 = vor.u32 %v6581_v54, %v4968_v53  ;;  %v3610_v63 = vpop.f32.mrf.mxu0 }
 0x157   : > { %3829 = vmatpush.bf16.msra.mxu1 %v4521_v4  ;;  %v6645_v60 = vld [vmem:[%s7223_s7 + $0x694] sm:$0xf0]  ;;  %v5352_v61 = vld [vmem:[%s7223_s7 + $0x788] sm:$0xf]  ;;  %v5097_v0 = vor.u32 %v6613_v58, %v5096_v55 }
 0x158   : > { %3842 = vmatpush.bf16.msra.mxu2 %v4649_v5  ;;  %v6677_v62 = vld [vmem:[%s7223_s7 + $0x794] sm:$0xf0]  ;;  %v5225_v1 = vor.u32 %v6645_v60, %v5224_v59  ;;  %v4952_v2 = vld [vmem:[%s7223_s7 + $0x468] sm:$0xf]  ;;  %v3623_v5 = vpop.f32.mrf.mxu1 }
 0x159   : > { %3855 = vmatpush.bf16.msra.mxu3 %v4777_v9  ;;  %3817 = vmatmul.bf16.vlgmr.msra.gmra.mxu0 %v7356_v28  ;;  %v6577_v3 = vld [vmem:[%s7223_s7 + $0x474] sm:$0xf0]  ;;  %v5080_v4 = vld [vmem:[%s7223_s7 + $0x568] sm:$0xf]  ;;  %v5353_v6 = vor.u32 %v6677_v62, %v5352_v61 }
 0x15a   : > { %3861 = vmatpush.bf16.msrb.mxu0 %v5017_v10  ;;  %3830 = vmatmul.bf16.vlgmr.msra.gmra.mxu1 %v7362_v34  ;;  %v6609_v8 = vld [vmem:[%s7223_s7 + $0x574] sm:$0xf0]  ;;  %v5208_v9 = vld [vmem:[%s7223_s7 + $0x668] sm:$0xf]  ;;  %v4953_v14 = vor.u32 %v6577_v3, %v4952_v2 }
 0x15b   : > { %3874 = vmatpush.bf16.msrb.mxu1 %v5145_v11  ;;  %3843 = vmatmul.bf16.vlgmr.msra.gmra.mxu2 %v7354_v27  ;;  %v6641_v10 = vld [vmem:[%s7223_s7 + $0x674] sm:$0xf0]  ;;  %v3624_v11 = vadd.f32 %v3623_v5, %v3610_v63  ;;  %v5081_v15 = vor.u32 %v6609_v8, %v5080_v4  ;;  %v4936_v18 = vld [vmem:[%s7223_s7 + $0x448] sm:$0xf] }
 0x15c   : > { %3887 = vmatpush.bf16.msrb.mxu2 %v5273_v12  ;;  %3856 = vmatmul.bf16.vlgmr.msra.gmra.mxu3 %v7360_v33  ;;  %v5336_v12 = vld [vmem:[%s7223_s7 + $0x768] sm:$0xf]  ;;  %v6673_v13 = vld [vmem:[%s7223_s7 + $0x774] sm:$0xf0] }
 0x15d   : > { %3900 = vmatpush.bf16.msrb.mxu3 %v5401_v17  ;;  %v5209_v17 = vor.u32 %v6641_v10, %v5208_v9  ;;  %v6573_v19 = vld [vmem:[%s7223_s7 + $0x454] sm:$0xf0]  ;;  %v5064_v23 = vld [vmem:[%s7223_s7 + $0x548] sm:$0xf]  ;;  %v5337_v35 = vor.u32 %v6673_v13, %v5336_v12 }
 0x15e   : > { %3862 = vmatpush.bf16.msrb.mxu0 %v5001_v36  ;;  %v3636_v32 = vpop.f32.mrf.mxu2  ;;  %v6605_v36 = vld [vmem:[%s7223_s7 + $0x554] sm:$0xf0]  ;;  %v5320_v41 = vld [vmem:[%s7223_s7 + $0x748] sm:$0xf]  ;;  %v4937_v46 = vor.u32 %v6573_v19, %v4936_v18  ;;  %v3612_v48 = vpop.f32.mrf.mxu0 }
 0x15f   : > { %3875 = vmatpush.bf16.msrb.mxu1 %v5129_v37  ;;  %v5192_v37 = vld [vmem:[%s7223_s7 + $0x648] sm:$0xf]  ;;  %v3637_v38 = vadd.f32 %v3636_v32, %v3624_v11  ;;  %v3649_v40 = vpop.f32.mrf.mxu3  ;;  %v5065_v49 = vor.u32 %v6605_v36, %v5064_v23  ;;  %v6601_v55 = vld [vmem:[%s7223_s7 + $0x534] sm:$0xf0] }
 0x160   : > { %3888 = vmatpush.bf16.msrb.mxu2 %v5257_v31  ;;  %v6637_v31 = vld [vmem:[%s7223_s7 + $0x654] sm:$0xf0]  ;;  %v3625_v53 = vpop.f32.mrf.mxu1  ;;  %v5304_v59 = vld [vmem:[%s7223_s7 + $0x728] sm:$0xf] }
 0x161   : > { %3901 = vmatpush.bf16.msrb.mxu3 %v5385_v44  ;;  %v6669_v44 = vld [vmem:[%s7223_s7 + $0x754] sm:$0xf0]  ;;  %v7954_v47 = vadd.f32 %v3649_v40, %v3637_v38  ;;  %v5193_v56 = vor.u32 %v6637_v31, %v5192_v37  ;;  %v4904_v62 = vld [vmem:[%s7223_s7 + $0x408] sm:$0xf] }
 0x162   : > { %3863 = vmatpush.bf16.msrb.mxu0 %v4985_v50  ;;  %v4920_v50 = vld [vmem:[%s7223_s7 + $0x428] sm:$0xf]  ;;  %v5321_v54 = vor.u32 %v6669_v44, %v5320_v41  ;;  %v6633_v58 = vld [vmem:[%s7223_s7 + $0x634] sm:$0xf0] }
 0x163   : > { %3876 = vmatpush.bf16.msrb.mxu1 %v5113_v51  ;;  %v6569_v51 = vld [vmem:[%s7223_s7 + $0x434] sm:$0xf0]  ;;  %v5160_v3 = vld [vmem:[%s7223_s7 + $0x608] sm:$0xf] }
 0x164   : > { %3889 = vmatpush.bf16.msrb.mxu2 %v5241_v52  ;;  %v5048_v52 = vld [vmem:[%s7223_s7 + $0x528] sm:$0xf]  ;;  %v6665_v60 = vld [vmem:[%s7223_s7 + $0x734] sm:$0xf0]  ;;  %v4921_v61 = vor.u32 %v6569_v51, %v4920_v50 }
 0x165   : > { %3902 = vmatpush.bf16.msrb.mxu3 %v5369_v57  ;;  %v5176_v57 = vld [vmem:[%s7223_s7 + $0x628] sm:$0xf]  ;;  %v5049_v63 = vor.u32 %v6601_v55, %v5048_v52  ;;  %v6597_v2 = vld [vmem:[%s7223_s7 + $0x514] sm:$0xf0]  ;;  %v5305_v5 = vor.u32 %v6665_v60, %v5304_v59 }
 0x166   : > { %3864 = vmatpush.bf16.msrb.mxu0 %v4969_v7  ;;  %v6565_v7 = vld [vmem:[%s7223_s7 + $0x414] sm:$0xf0]  ;;  %v3638_v4 = vpop.f32.mrf.mxu2  ;;  %v5288_v8 = vld [vmem:[%s7223_s7 + $0x708] sm:$0xf] }
 0x167   : > { %3877 = vmatpush.bf16.msrb.mxu1 %v5097_v0  ;;  %v5177_v0 = vor.u32 %v6633_v58, %v5176_v57  ;;  %v6661_v9 = vld [vmem:[%s7223_s7 + $0x714] sm:$0xf0]  ;;  %v3651_v10 = vpop.f32.mrf.mxu3  ;;  %v5528_v11 = vld [vmem:[%s7223_s7 + $0x8e8] sm:$0xf] }
 0x168   : > { %3890 = vmatpush.bf16.msrb.mxu2 %v5225_v1  ;;  %v5032_v1 = vld [vmem:[%s7223_s7 + $0x508] sm:$0xf]  ;;  %v6721_v12 = vld [vmem:[%s7223_s7 + $0x8f4] sm:$0xf0]  ;;  %v5289_v36 = vor.u32 %v6661_v9, %v5288_v8 }
 0x169   : > { %3903 = vmatpush.bf16.msrb.mxu3 %v5353_v6  ;;  %v6629_v6 = vld [vmem:[%s7223_s7 + $0x614] sm:$0xf0]  ;;  %v5656_v13 = vld [vmem:[%s7223_s7 + $0x9e8] sm:$0xf]  ;;  %v5033_v19 = vor.u32 %v6597_v2, %v5032_v1  ;;  %v5529_v37 = vor.u32 %v6721_v12, %v5528_v11 }
 0x16a   : > { %3865 = vmatpush.bf16.msrb.mxu0 %v4953_v14  ;;  %v4905_v14 = vor.u32 %v6565_v7, %v4904_v62  ;;  %v6785_v18 = vld [vmem:[%s7223_s7 + $0xaf4] sm:$0xf0]  ;;  %v5161_v23 = vor.u32 %v6629_v6, %v5160_v3  ;;  %v5912_v32 = vld [vmem:[%s7223_s7 + $0xbe8] sm:$0xf] }
 0x16b   : > { %3878 = vmatpush.bf16.msrb.mxu1 %v5081_v15  ;;  %v6753_v15 = vld [vmem:[%s7223_s7 + $0x9f4] sm:$0xf0]  ;;  %v5512_v40 = vld [vmem:[%s7223_s7 + $0x8c8] sm:$0xf] }
 0x16c   : > { %3891 = vmatpush.bf16.msrb.mxu2 %v5209_v17  ;;  %v5784_v17 = vld [vmem:[%s7223_s7 + $0xae8] sm:$0xf]  ;;  %v5657_v31 = vor.u32 %v6753_v15, %v5656_v13  ;;  %v6717_v41 = vld [vmem:[%s7223_s7 + $0x8d4] sm:$0xf0] }
 0x16d   : > { %3904 = vmatpush.bf16.msrb.mxu3 %v5337_v35  ;;  %v6817_v35 = vld [vmem:[%s7223_s7 + $0xbf4] sm:$0xf0]  ;;  %v5785_v38 = vor.u32 %v6785_v18, %v5784_v17  ;;  %v5640_v44 = vld [vmem:[%s7223_s7 + $0x9c8] sm:$0xf]  ;;  %v5513_v52 = vor.u32 %v6717_v41, %v5512_v40 }
 0x16e   : > { %3866 = vmatpush.bf16.msrb.mxu0 %v4937_v46  ;;  %v5913_v46 = vor.u32 %v6817_v35, %v5912_v32  ;;  %v6749_v48 = vld [vmem:[%s7223_s7 + $0x9d4] sm:$0xf0]  ;;  %v5896_v50 = vld [vmem:[%s7223_s7 + $0xbc8] sm:$0xf] }
 0x16f   : > { %3879 = vmatpush.bf16.msrb.mxu1 %v5065_v49  ;;  %v5768_v49 = vld [vmem:[%s7223_s7 + $0xac8] sm:$0xf]  ;;  %v6813_v51 = vld [vmem:[%s7223_s7 + $0xbd4] sm:$0xf0]  ;;  %v5641_v53 = vor.u32 %v6749_v48, %v5640_v44 }
 0x170   : > { %3892 = vmatpush.bf16.msrb.mxu2 %v5193_v56  ;;  %v6781_v56 = vld [vmem:[%s7223_s7 + $0xad4] sm:$0xf0]  ;;  %v5496_v55 = vld [vmem:[%s7223_s7 + $0x8a8] sm:$0xf]  ;;  %v5897_v59 = vor.u32 %v6813_v51, %v5896_v50 }
 0x171   : > { %3905 = vmatpush.bf16.msrb.mxu3 %v5321_v54  ;;  %v5769_v54 = vor.u32 %v6781_v56, %v5768_v49  ;;  %v6713_v57 = vld [vmem:[%s7223_s7 + $0x8b4] sm:$0xf0]  ;;  %v5624_v58 = vld [vmem:[%s7223_s7 + $0x9a8] sm:$0xf] }
 0x172   : > { %3867 = vmatpush.bf16.msrb.mxu0 %v4921_v61  ;;  %v6745_v60 = vld [vmem:[%s7223_s7 + $0x9b4] sm:$0xf0]  ;;  %v5752_v61 = vld [vmem:[%s7223_s7 + $0xaa8] sm:$0xf] }
 0x173   : > { %3880 = vmatpush.bf16.msrb.mxu1 %v5049_v63  ;;  %v6777_v62 = vld [vmem:[%s7223_s7 + $0xab4] sm:$0xf0]  ;;  %v5880_v7 = vld [vmem:[%s7223_s7 + $0xba8] sm:$0xf]  ;;  %v5625_v1 = vor.u32 %v6745_v60, %v5624_v58 }
 0x174   : > { %3893 = vmatpush.bf16.msrb.mxu2 %v5177_v0  ;;  %v6809_v63 = vld [vmem:[%s7223_s7 + $0xbb4] sm:$0xf0]  ;;  %v5497_v0 = vor.u32 %v6713_v57, %v5496_v55  ;;  %v5753_v2 = vor.u32 %v6777_v62, %v5752_v61  ;;  %v5480_v3 = vld [vmem:[%s7223_s7 + $0x888] sm:$0xf] }
 0x175   : > { %3906 = vmatpush.bf16.msrb.mxu3 %v5305_v5  ;;  %v6709_v4 = vld [vmem:[%s7223_s7 + $0x894] sm:$0xf0]  ;;  %v5608_v5 = vld [vmem:[%s7223_s7 + $0x988] sm:$0xf]  ;;  %v5881_v6 = vor.u32 %v6809_v63, %v5880_v7 }
 0x176   : > { %3868 = vmatpush.bf16.msrb.mxu0 %v4905_v14  ;;  %v6741_v8 = vld [vmem:[%s7223_s7 + $0x994] sm:$0xf0]  ;;  %v5736_v9 = vld [vmem:[%s7223_s7 + $0xa88] sm:$0xf]  ;;  %v5481_v13 = vor.u32 %v6709_v4, %v5480_v3  ;;  %v3662_v14 = vpop.f32.mrf.mxu0 }
 0x177   : > { %3881 = vmatpush.bf16.msrb.mxu1 %v5033_v19  ;;  %v6773_v10 = vld [vmem:[%s7223_s7 + $0xa94] sm:$0xf0]  ;;  %v5864_v11 = vld [vmem:[%s7223_s7 + $0xb88] sm:$0xf]  ;;  %v5609_v15 = vor.u32 %v6741_v8, %v5608_v5  ;;  %v3663_v32 = vadd.f32 %v3662_v14, %v7954_v47  ;;  %v3675_v35 = vpop.f32.mrf.mxu1 }
 0x178   : > { %3894 = vmatpush.bf16.msrb.mxu2 %v5161_v23  ;;  %v6805_v12 = vld [vmem:[%s7223_s7 + $0xb94] sm:$0xf0]  ;;  %v5737_v17 = vor.u32 %v6773_v10, %v5736_v9  ;;  %v5464_v18 = vld [vmem:[%s7223_s7 + $0x868] sm:$0xf] }
 0x179   : > { %3907 = vmatpush.bf16.msrb.mxu3 %v5289_v36  ;;  %3869 = vmatmul.bf16.vlgmr.msrb.gmra.mxu0 %v7412_v42  ;;  %v6705_v19 = vld [vmem:[%s7223_s7 + $0x874] sm:$0xf0]  ;;  %v5592_v23 = vld [vmem:[%s7223_s7 + $0x968] sm:$0xf]  ;;  %v5865_v36 = vor.u32 %v6805_v12, %v5864_v11  ;;  %v3676_v44 = vadd.f32 %v3675_v35, %v3663_v32 }
 0x17a   : > { %3913 = vmatpush.bf16.msra.mxu0 %v5529_v37  ;;  %3882 = vmatmul.bf16.vlgmr.msrb.gmra.mxu1 %v7416_v45  ;;  %v6737_v37 = vld [vmem:[%s7223_s7 + $0x974] sm:$0xf0]  ;;  %v5848_v40 = vld [vmem:[%s7223_s7 + $0xb68] sm:$0xf] }
 0x17b   : > { %3926 = vmatpush.bf16.msra.mxu1 %v5657_v31  ;;  %3895 = vmatmul.bf16.vlgmr.msrb.gmra.mxu2 %v7408_v39  ;;  %v5720_v31 = vld [vmem:[%s7223_s7 + $0xa68] sm:$0xf]  ;;  %v6801_v41 = vld [vmem:[%s7223_s7 + $0xb74] sm:$0xf0]  ;;  %v5593_v47 = vor.u32 %v6737_v37, %v5592_v23 }
 0x17c   : > { %3939 = vmatpush.bf16.msra.mxu2 %v5785_v38  ;;  %3908 = vmatmul.bf16.vlgmr.msrb.gmra.mxu3 %v7414_v43  ;;  %v6769_v38 = vld [vmem:[%s7223_s7 + $0xa74] sm:$0xf0]  ;;  %v5448_v49 = vld [vmem:[%s7223_s7 + $0x848] sm:$0xf] }
 0x17d   : > { %3952 = vmatpush.bf16.msra.mxu3 %v5913_v46  ;;  %v5465_v46 = vor.u32 %v6705_v19, %v5464_v18  ;;  %v5721_v48 = vor.u32 %v6769_v38, %v5720_v31  ;;  %v6701_v56 = vld [vmem:[%s7223_s7 + $0x854] sm:$0xf0]  ;;  %v5576_v50 = vld [vmem:[%s7223_s7 + $0x948] sm:$0xf] }
 0x17e   : > { %3914 = vmatpush.bf16.msra.mxu0 %v5513_v52  ;;  %v3688_v51 = vpop.f32.mrf.mxu2  ;;  %v5849_v52 = vor.u32 %v6801_v41, %v5848_v40  ;;  %v6765_v55 = vld [vmem:[%s7223_s7 + $0xa54] sm:$0xf0]  ;;  %v5449_v61 = vor.u32 %v6701_v56, %v5448_v49  ;;  %v3664_v7 = vpop.f32.mrf.mxu0  ;;  %v5560_v3 = vld [vmem:[%s7223_s7 + $0x928] sm:$0xf] }
 0x17f   : > { %3927 = vmatpush.bf16.msra.mxu1 %v5641_v53  ;;  %v6733_v53 = vld [vmem:[%s7223_s7 + $0x954] sm:$0xf0]  ;;  %v3689_v57 = vadd.f32 %v3688_v51, %v3676_v44  ;;  %v3701_v58 = vpop.f32.mrf.mxu3  ;;  %v3677_v4 = vpop.f32.mrf.mxu1  ;;  %v5688_v8 = vld [vmem:[%s7223_s7 + $0xa28] sm:$0xf] }
 0x180   : > { %3940 = vmatpush.bf16.msra.mxu2 %v5769_v54  ;;  %v5704_v54 = vld [vmem:[%s7223_s7 + $0xa48] sm:$0xf]  ;;  %v6797_v60 = vld [vmem:[%s7223_s7 + $0xb54] sm:$0xf0]  ;;  %v5577_v63 = vor.u32 %v6733_v53, %v5576_v50 }
 0x181   : > { %3953 = vmatpush.bf16.msra.mxu3 %v5897_v59  ;;  %v5832_v59 = vld [vmem:[%s7223_s7 + $0xb48] sm:$0xf]  ;;  %v8025_v62 = vadd.f32 %v3701_v58, %v3689_v57  ;;  %v6761_v9 = vld [vmem:[%s7223_s7 + $0xa34] sm:$0xf0] }
 0x182   : > { %3915 = vmatpush.bf16.msra.mxu0 %v5497_v0  ;;  %v5705_v0 = vor.u32 %v6765_v55, %v5704_v54  ;;  %v5833_v5 = vor.u32 %v6797_v60, %v5832_v59  ;;  %v5816_v10 = vld [vmem:[%s7223_s7 + $0xb28] sm:$0xf]  ;;  %v6793_v11 = vld [vmem:[%s7223_s7 + $0xb34] sm:$0xf0] }
 0x183   : > { %3928 = vmatpush.bf16.msra.mxu1 %v5625_v1  ;;  %v5432_v1 = vld [vmem:[%s7223_s7 + $0x828] sm:$0xf]  ;;  %v6693_v14 = vld [vmem:[%s7223_s7 + $0x814] sm:$0xf0]  ;;  %v5817_v35 = vor.u32 %v6793_v11, %v5816_v10 }
 0x184   : > { %3941 = vmatpush.bf16.msra.mxu2 %v5753_v2  ;;  %v6697_v2 = vld [vmem:[%s7223_s7 + $0x834] sm:$0xf0]  ;;  %v5544_v18 = vld [vmem:[%s7223_s7 + $0x908] sm:$0xf] }
 0x185   : > { %3954 = vmatpush.bf16.msra.mxu3 %v5881_v6  ;;  %v6729_v6 = vld [vmem:[%s7223_s7 + $0x934] sm:$0xf0]  ;;  %v5433_v12 = vor.u32 %v6697_v2, %v5432_v1  ;;  %v5672_v23 = vld [vmem:[%s7223_s7 + $0xa08] sm:$0xf] }
 0x186   : > { %3916 = vmatpush.bf16.msra.mxu0 %v5481_v13  ;;  %v5416_v13 = vld [vmem:[%s7223_s7 + $0x808] sm:$0xf]  ;;  %v6725_v19 = vld [vmem:[%s7223_s7 + $0x914] sm:$0xf0]  ;;  %v3690_v32 = vpop.f32.mrf.mxu2 }
 0x187   : > { %3929 = vmatpush.bf16.msra.mxu1 %v5609_v15  ;;  %v5561_v15 = vor.u32 %v6729_v6, %v5560_v3  ;;  %v5800_v37 = vld [vmem:[%s7223_s7 + $0xb08] sm:$0xf]  ;;  %v6789_v31 = vld [vmem:[%s7223_s7 + $0xb14] sm:$0xf0]  ;;  %v3703_v38 = vpop.f32.mrf.mxu3  ;;  %v5545_v56 = vor.u32 %v6725_v19, %v5544_v18 }
 0x188   : > { %3942 = vmatpush.bf16.msra.mxu2 %v5737_v17  ;;  %v5689_v17 = vor.u32 %v6761_v9, %v5688_v8  ;;  %v6040_v40 = vld [vmem:[%s7223_s7 + $0xce8] sm:$0xf]  ;;  %v6849_v41 = vld [vmem:[%s7223_s7 + $0xcf4] sm:$0xf0]  ;;  %v5801_v53 = vor.u32 %v6789_v31, %v5800_v37 }
 0x189   : > { %3955 = vmatpush.bf16.msra.mxu3 %v5865_v36  ;;  %v6757_v36 = vld [vmem:[%s7223_s7 + $0xa14] sm:$0xf0]  ;;  %v6168_v44 = vld [vmem:[%s7223_s7 + $0xde8] sm:$0xf]  ;;  %v6041_v54 = vor.u32 %v6849_v41, %v6040_v40 }
 0x18a   : > { %3917 = vmatpush.bf16.msra.mxu0 %v5465_v46  ;;  %v5417_v46 = vor.u32 %v6693_v14, %v5416_v13  ;;  %v6913_v49 = vld [vmem:[%s7223_s7 + $0xef4] sm:$0xf0]  ;;  %v5673_v50 = vor.u32 %v6757_v36, %v5672_v23  ;;  %v6424_v51 = vld [vmem:[%s7223_s7 + $0xfe8] sm:$0xf] }
 0x18b   : > { %3930 = vmatpush.bf16.msra.mxu1 %v5593_v47  ;;  %v6881_v47 = vld [vmem:[%s7223_s7 + $0xdf4] sm:$0xf0]  ;;  %v6024_v58 = vld [vmem:[%s7223_s7 + $0xcc8] sm:$0xf] }
 0x18c   : > { %3943 = vmatpush.bf16.msra.mxu2 %v5721_v48  ;;  %v6296_v48 = vld [vmem:[%s7223_s7 + $0xee8] sm:$0xf]  ;;  %v6169_v55 = vor.u32 %v6881_v47, %v6168_v44  ;;  %v6845_v59 = vld [vmem:[%s7223_s7 + $0xcd4] sm:$0xf0] }
 0x18d   : > { %3956 = vmatpush.bf16.msra.mxu3 %v5849_v52  ;;  %v6945_v52 = vld [vmem:[%s7223_s7 + $0xff4] sm:$0xf0]  ;;  %v6297_v57 = vor.u32 %v6913_v49, %v6296_v48  ;;  %v6152_v60 = vld [vmem:[%s7223_s7 + $0xdc8] sm:$0xf]  ;;  %v6025_v3 = vor.u32 %v6845_v59, %v6024_v58 }
 0x18e   : > { %3918 = vmatpush.bf16.msra.mxu0 %v5449_v61  ;;  %v6425_v61 = vor.u32 %v6945_v52, %v6424_v51  ;;  %v6877_v7 = vld [vmem:[%s7223_s7 + $0xdd4] sm:$0xf0]  ;;  %v6408_v1 = vld [vmem:[%s7223_s7 + $0xfc8] sm:$0xf] }
 0x18f   : > { %3931 = vmatpush.bf16.msra.mxu1 %v5577_v63  ;;  %v6280_v63 = vld [vmem:[%s7223_s7 + $0xec8] sm:$0xf]  ;;  %v6941_v2 = vld [vmem:[%s7223_s7 + $0xfd4] sm:$0xf0]  ;;  %v6153_v4 = vor.u32 %v6877_v7, %v6152_v60 }
 0x190   : > { %3944 = vmatpush.bf16.msra.mxu2 %v5705_v0  ;;  %v6909_v0 = vld [vmem:[%s7223_s7 + $0xed4] sm:$0xf0]  ;;  %v6008_v6 = vld [vmem:[%s7223_s7 + $0xca8] sm:$0xf]  ;;  %v6409_v10 = vor.u32 %v6941_v2, %v6408_v1 }
 0x191   : > { %3957 = vmatpush.bf16.msra.mxu3 %v5833_v5  ;;  %v6281_v5 = vor.u32 %v6909_v0, %v6280_v63  ;;  %v6841_v8 = vld [vmem:[%s7223_s7 + $0xcb4] sm:$0xf0]  ;;  %v6136_v9 = vld [vmem:[%s7223_s7 + $0xda8] sm:$0xf] }
 0x192   : > { %3919 = vmatpush.bf16.msra.mxu0 %v5433_v12  ;;  %v6873_v11 = vld [vmem:[%s7223_s7 + $0xdb4] sm:$0xf0]  ;;  %v6264_v12 = vld [vmem:[%s7223_s7 + $0xea8] sm:$0xf] }
 0x193   : > { %3932 = vmatpush.bf16.msra.mxu1 %v5561_v15  ;;  %v6905_v13 = vld [vmem:[%s7223_s7 + $0xeb4] sm:$0xf0]  ;;  %v6392_v14 = vld [vmem:[%s7223_s7 + $0xfa8] sm:$0xf]  ;;  %v6137_v18 = vor.u32 %v6873_v11, %v6136_v9 }
 0x194   : > { %3945 = vmatpush.bf16.msra.mxu2 %v5689_v17  ;;  %v6937_v15 = vld [vmem:[%s7223_s7 + $0xfb4] sm:$0xf0]  ;;  %v6009_v17 = vor.u32 %v6841_v8, %v6008_v6  ;;  %v6265_v19 = vor.u32 %v6905_v13, %v6264_v12  ;;  %v5992_v23 = vld [vmem:[%s7223_s7 + $0xc88] sm:$0xf] }
 0x195   : > { %3958 = vmatpush.bf16.msra.mxu3 %v5817_v35  ;;  %v6837_v32 = vld [vmem:[%s7223_s7 + $0xc94] sm:$0xf0]  ;;  %v6120_v35 = vld [vmem:[%s7223_s7 + $0xd88] sm:$0xf]  ;;  %v6393_v36 = vor.u32 %v6937_v15, %v6392_v14 }
 0x196   : > { %3920 = vmatpush.bf16.msra.mxu0 %v5417_v46  ;;  %v6869_v37 = vld [vmem:[%s7223_s7 + $0xd94] sm:$0xf0]  ;;  %v6248_v31 = vld [vmem:[%s7223_s7 + $0xe88] sm:$0xf]  ;;  %v3714_v40 = vpop.f32.mrf.mxu0  ;;  %v5993_v47 = vor.u32 %v6837_v32, %v5992_v23 }
 0x197   : > { %3933 = vmatpush.bf16.msra.mxu1 %v5545_v56  ;;  %v6901_v38 = vld [vmem:[%s7223_s7 + $0xe94] sm:$0xf0]  ;;  %v6376_v41 = vld [vmem:[%s7223_s7 + $0xf88] sm:$0xf]  ;;  %v3715_v46 = vadd.f32 %v3714_v40, %v8025_v62  ;;  %v3727_v48 = vpop.f32.mrf.mxu1  ;;  %v6121_v49 = vor.u32 %v6869_v37, %v6120_v35 }
 0x198   : > { %3946 = vmatpush.bf16.msra.mxu2 %v5673_v50  ;;  %v6933_v44 = vld [vmem:[%s7223_s7 + $0xf94] sm:$0xf0]  ;;  %v6249_v56 = vor.u32 %v6901_v38, %v6248_v31  ;;  %v5976_v50 = vld [vmem:[%s7223_s7 + $0xc68] sm:$0xf] }
 0x199   : > { %3959 = vmatpush.bf16.msra.mxu3 %v5801_v53  ;;  %3921 = vmatmul.bf16.vlgmr.msra.gmra.mxu0 %v7481_v20  ;;  %v6833_v51 = vld [vmem:[%s7223_s7 + $0xc74] sm:$0xf0]  ;;  %v6104_v52 = vld [vmem:[%s7223_s7 + $0xd68] sm:$0xf]  ;;  %v6377_v53 = vor.u32 %v6933_v44, %v6376_v41 }
 0x19a   : > { %3965 = vmatpush.bf16.msrb.mxu0 %v6041_v54  ;;  %3934 = vmatmul.bf16.vlgmr.msra.gmra.mxu1 %v7488_v25  ;;  %v3728_v54 = vadd.f32 %v3727_v48, %v3715_v46  ;;  %v6897_v62 = vld [vmem:[%s7223_s7 + $0xe74] sm:$0xf0]  ;;  %v6360_v58 = vld [vmem:[%s7223_s7 + $0xf68] sm:$0xf]  ;;  %v5977_v60 = vor.u32 %v6833_v51, %v5976_v50 }
 0x19b   : > { %3978 = vmatpush.bf16.msrb.mxu1 %v6169_v55  ;;  %3947 = vmatmul.bf16.vlgmr.msra.gmra.mxu2 %v7486_v24  ;;  %v6865_v55 = vld [vmem:[%s7223_s7 + $0xd74] sm:$0xf0]  ;;  %v5960_v63 = vld [vmem:[%s7223_s7 + $0xc48] sm:$0xf] }
 0x19c   : > { %3991 = vmatpush.bf16.msrb.mxu2 %v6297_v57  ;;  %3960 = vmatmul.bf16.vlgmr.msra.gmra.mxu3 %v7492_v30  ;;  %v6232_v57 = vld [vmem:[%s7223_s7 + $0xe68] sm:$0xf]  ;;  %v6929_v59 = vld [vmem:[%s7223_s7 + $0xf74] sm:$0xf0] }
 0x19d   : > { %4004 = vmatpush.bf16.msrb.mxu3 %v6425_v61  ;;  %v6105_v61 = vor.u32 %v6865_v55, %v6104_v52  ;;  %v6233_v7 = vor.u32 %v6897_v62, %v6232_v57  ;;  %v6829_v0 = vld [vmem:[%s7223_s7 + $0xc54] sm:$0xf0]  ;;  %v6088_v1 = vld [vmem:[%s7223_s7 + $0xd48] sm:$0xf]  ;;  %v6361_v2 = vor.u32 %v6929_v59, %v6360_v58  ;;  %v6463_v57 = vld [vmem:[%s7223_s7 + $0xec] sm:$0xf] }
 0x19e   : > { %3966 = vmatpush.bf16.msrb.mxu0 %v6025_v3  ;;  %v3740_v3 = vpop.f32.mrf.mxu2  ;;  %v6893_v6 = vld [vmem:[%s7223_s7 + $0xe54] sm:$0xf0]  ;;  %v3716_v12 = vpop.f32.mrf.mxu0  ;;  %v5961_v13 = vor.u32 %v6829_v0, %v5960_v63  ;;  %v6072_v32 = vld [vmem:[%s7223_s7 + $0xd28] sm:$0xf]  ;;  %v4506_v62 = vld [vmem:[%s7223_s7 + $0xf8] sm:$0xf0] }
 0x19f   : > { %3979 = vmatpush.bf16.msrb.mxu1 %v6153_v4  ;;  %v6861_v4 = vld [vmem:[%s7223_s7 + $0xd54] sm:$0xf0]  ;;  %v3741_v8 = vadd.f32 %v3740_v3, %v3728_v54  ;;  %v3753_v9 = vpop.f32.mrf.mxu3  ;;  %v3729_v14 = vpop.f32.mrf.mxu1  ;;  %v6200_v37 = vld [vmem:[%s7223_s7 + $0xe28] sm:$0xf]  ;;  %v6495_v58 = vld [vmem:[%s7223_s7 + $0x1ec] sm:$0xf] }
 0x1a0   : > { %3992 = vmatpush.bf16.msrb.mxu2 %v6281_v5  ;;  %v6216_v5 = vld [vmem:[%s7223_s7 + $0xe48] sm:$0xf]  ;;  %v6925_v11 = vld [vmem:[%s7223_s7 + $0xf54] sm:$0xf0]  ;;  %v4762_v63 = vld [vmem:[%s7223_s7 + $0x2f8] sm:$0xf0] }
 0x1a1   : > { %4005 = vmatpush.bf16.msrb.mxu3 %v6409_v10  ;;  %v6344_v10 = vld [vmem:[%s7223_s7 + $0xf48] sm:$0xf]  ;;  %v8096_v15 = vadd.f32 %v3753_v9, %v3741_v8  ;;  %v6825_v23 = vld [vmem:[%s7223_s7 + $0xc34] sm:$0xf0]  ;;  %v4890_v3 = vld [vmem:[%s7223_s7 + $0x3f8] sm:$0xf0] }
 0x1a2   : > { %3967 = vmatpush.bf16.msrb.mxu0 %v6009_v17  ;;  %v6089_v17 = vor.u32 %v6861_v4, %v6088_v1  ;;  %v6345_v35 = vor.u32 %v6925_v11, %v6344_v10  ;;  %v6889_v31 = vld [vmem:[%s7223_s7 + $0xe34] sm:$0xf0]  ;;  %v6328_v38 = vld [vmem:[%s7223_s7 + $0xf28] sm:$0xf]  ;;  %v6459_v9 = vld [vmem:[%s7223_s7 + $0xcc] sm:$0xf] }
 0x1a3   : > { %3980 = vmatpush.bf16.msrb.mxu1 %v6137_v18  ;;  %v6217_v18 = vor.u32 %v6893_v6, %v6216_v5  ;;  %v6921_v40 = vld [vmem:[%s7223_s7 + $0xf34] sm:$0xf0]  ;;  %v5928_v44 = vld [vmem:[%s7223_s7 + $0xc08] sm:$0xf]  ;;  %v6201_v48 = vor.u32 %v6889_v31, %v6200_v37  ;;  %v4509_v5 = vor.u32 %v6463_v57, %v4506_v62  ;;  %v4490_v10 = vld [vmem:[%s7223_s7 + $0xd8] sm:$0xf0] }
 0x1a4   : > { %3993 = vmatpush.bf16.msrb.mxu2 %v6265_v19  ;;  %v5944_v19 = vld [vmem:[%s7223_s7 + $0xc28] sm:$0xf]  ;;  %v6821_v46 = vld [vmem:[%s7223_s7 + $0xc14] sm:$0xf0]  ;;  %v6329_v51 = vor.u32 %v6921_v40, %v6328_v38  ;;  %v6491_v11 = vld [vmem:[%s7223_s7 + $0x1cc] sm:$0xf] }
 0x1a5   : > { %4006 = vmatpush.bf16.msrb.mxu3 %v6393_v36  ;;  %v6857_v36 = vld [vmem:[%s7223_s7 + $0xd34] sm:$0xf0]  ;;  %v5945_v41 = vor.u32 %v6825_v23, %v5944_v19  ;;  %v6184_v50 = vld [vmem:[%s7223_s7 + $0xe08] sm:$0xf]  ;;  %v6523_v14 = vld [vmem:[%s7223_s7 + $0x2cc] sm:$0xf]  ;;  %v4493_v23 = vor.u32 %v6459_v9, %v4490_v10 }
 0x1a6   : > { %3968 = vmatpush.bf16.msrb.mxu0 %v5993_v47  ;;  %v6073_v47 = vor.u32 %v6857_v36, %v6072_v32  ;;  %v6885_v52 = vld [vmem:[%s7223_s7 + $0xe14] sm:$0xf0]  ;;  %v3742_v55 = vpop.f32.mrf.mxu2  ;;  %v4874_v19 = vld [vmem:[%s7223_s7 + $0x3d8] sm:$0xf0]  ;;  %v6455_v36 = vld [vmem:[%s7223_s7 + $0xac] sm:$0xf] }
 0x1a7   : > { %3981 = vmatpush.bf16.msrb.mxu1 %v6121_v49  ;;  %v6056_v49 = vld [vmem:[%s7223_s7 + $0xd08] sm:$0xf]  ;;  %v6917_v54 = vld [vmem:[%s7223_s7 + $0xf14] sm:$0xf0]  ;;  %v3755_v59 = vpop.f32.mrf.mxu3  ;;  %v6185_v1 = vor.u32 %v6885_v52, %v6184_v50  ;;  %v4474_v37 = vld [vmem:[%s7223_s7 + $0xb8] sm:$0xf0] }
 0x1a8   : > { %3994 = vmatpush.bf16.msrb.mxu2 %v6249_v56  ;;  %v6853_v56 = vld [vmem:[%s7223_s7 + $0xd14] sm:$0xf0]  ;;  %v6487_v31 = vld [vmem:[%s7223_s7 + $0x1ac] sm:$0xf]  ;;  %v4602_v40 = vld [vmem:[%s7223_s7 + $0x1b8] sm:$0xf0] }
 0x1a9   : > { %4007 = vmatpush.bf16.msrb.mxu3 %v6377_v53  ;;  %v6312_v53 = vld [vmem:[%s7223_s7 + $0xf08] sm:$0xf]  ;;  %v6057_v0 = vor.u32 %v6853_v56, %v6056_v49  ;;  %v4605_v49 = vor.u32 %v6487_v31, %v4602_v40  ;;  %v6451_v50 = vld [vmem:[%s7223_s7 + $0x8c] sm:$0xf]  ;;  %v4714_v57 = vld [vmem:[%s7223_s7 + $0x298] sm:$0xf0] }
 0x1aa   : > { %3969 = vmatpush.bf16.msrb.mxu0 %v5977_v60  ;;  %v5929_v60 = vor.u32 %v6821_v46, %v5928_v44  ;;  %v6313_v4 = vor.u32 %v6917_v54, %v6312_v53  ;;  %v4730_v44 = vld [vmem:[%s7223_s7 + $0x2b8] sm:$0xf0]  ;;  %v6551_v46 = vld [vmem:[%s7223_s7 + $0x3ac] sm:$0xf] }
 0x1ab   : > { %3982 = vmatpush.bf16.msrb.mxu1 %v6105_v61  ;;  %v4634_v61 = vld [vmem:[%s7223_s7 + $0x1f8] sm:$0xf0]  ;;  %v6483_v52 = vld [vmem:[%s7223_s7 + $0x18c] sm:$0xf] }
 0x1ac   : > { %3995 = vmatpush.bf16.msrb.mxu2 %v6233_v7  ;;  %v6527_v7 = vld [vmem:[%s7223_s7 + $0x2ec] sm:$0xf]  ;;  %v4637_v6 = vor.u32 %v6495_v58, %v4634_v61  ;;  %v4586_v54 = vld [vmem:[%s7223_s7 + $0x198] sm:$0xf0] }
 0x1ad   : > { %4008 = vmatpush.bf16.msrb.mxu3 %v6361_v2  ;;  %v6559_v2 = vld [vmem:[%s7223_s7 + $0x3ec] sm:$0xf]  ;;  %v4765_v8 = vor.u32 %v6527_v7, %v4762_v63  ;;  %v4842_v59 = vld [vmem:[%s7223_s7 + $0x398] sm:$0xf0]  ;;  %v4589_v63 = vor.u32 %v6483_v52, %v4586_v54 }
 0x1ae   : > { %3970 = vmatpush.bf16.msrb.mxu0 %v5961_v13  ;;  %v4893_v12 = vor.u32 %v6559_v2, %v4890_v3  ;;  %v4618_v13 = vld [vmem:[%s7223_s7 + $0x1d8] sm:$0xf0]  ;;  %v6515_v55 = vld [vmem:[%s7223_s7 + $0x28c] sm:$0xf] }
 0x1af   : > { %3983 = vmatpush.bf16.msrb.mxu1 %v6089_v17  ;;  %v4746_v17 = vld [vmem:[%s7223_s7 + $0x2d8] sm:$0xf0]  ;;  %v4621_v32 = vor.u32 %v6491_v11, %v4618_v13  ;;  %v6547_v58 = vld [vmem:[%s7223_s7 + $0x38c] sm:$0xf] }
 0x1b0   : > { %3996 = vmatpush.bf16.msrb.mxu2 %v6217_v18  ;;  %v6555_v18 = vld [vmem:[%s7223_s7 + $0x3cc] sm:$0xf]  ;;  %v4442_v2 = vld [vmem:[%s7223_s7 + $0x78] sm:$0xf0] }
 0x1b1   : > { %4009 = vmatpush.bf16.msrb.mxu3 %v6345_v35  ;;  %v4749_v35 = vor.u32 %v6523_v14, %v4746_v17  ;;  %v4877_v38 = vor.u32 %v6555_v18, %v4874_v19  ;;  %v6479_v3 = vld [vmem:[%s7223_s7 + $0x16c] sm:$0xf]  ;;  %v4826_v10 = vld [vmem:[%s7223_s7 + $0x378] sm:$0xf0] }
 0x1b2   : > { %3971 = vmatpush.bf16.msrb.mxu0 %v5945_v41  ;;  %v6519_v41 = vld [vmem:[%s7223_s7 + $0x2ac] sm:$0xf]  ;;  %v4426_v17 = vld [vmem:[%s7223_s7 + $0x58] sm:$0xf0] }
 0x1b3   : > { %3984 = vmatpush.bf16.msrb.mxu1 %v6073_v47  ;;  %v4858_v47 = vld [vmem:[%s7223_s7 + $0x3b8] sm:$0xf0]  ;;  %v4733_v56 = vor.u32 %v6519_v41, %v4730_v44  ;;  %v6543_v9 = vld [vmem:[%s7223_s7 + $0x36c] sm:$0xf] }
 0x1b4   : > { %3997 = vmatpush.bf16.msrb.mxu2 %v6201_v48  ;;  %v4477_v48 = vor.u32 %v6455_v36, %v4474_v37  ;;  %v4861_v53 = vor.u32 %v6551_v46, %v4858_v47  ;;  %v6443_v14 = vld [vmem:[%s7223_s7 + $0x4c] sm:$0xf]  ;;  %v4829_v19 = vor.u32 %v6543_v9, %v4826_v10  ;;  %v4682_v36 = vld [vmem:[%s7223_s7 + $0x258] sm:$0xf0] }
 0x1b5   : > { %4010 = vmatpush.bf16.msrb.mxu3 %v6329_v51  ;;  %v4458_v51 = vld [vmem:[%s7223_s7 + $0x98] sm:$0xf0]  ;;  %v6475_v18 = vld [vmem:[%s7223_s7 + $0x14c] sm:$0xf]  ;;  %v4429_v44 = vor.u32 %v6443_v14, %v4426_v17 }
 0x1b6   : > { %3972 = vmatpush.bf16.msrb.mxu0 %v5929_v60  ;;  %v3766_v62 = vpop.f32.mrf.mxu0  ;;  %v4461_v61 = vor.u32 %v6451_v50, %v4458_v51  ;;  %v4810_v40 = vld [vmem:[%s7223_s7 + $0x358] sm:$0xf0]  ;;  %v6471_v51 = vld [vmem:[%s7223_s7 + $0x12c] sm:$0xf] }
 0x1b7   : > { %3985 = vmatpush.bf16.msrb.mxu1 %v6057_v0  ;;  %v3767_v60 = vadd.f32 %v3766_v62, %v8096_v15  ;;  %v3779_v7 = vpop.f32.mrf.mxu1  ;;  %v4717_v0 = vor.u32 %v6515_v55, %v4714_v57  ;;  %v4698_v15 = vld [vmem:[%s7223_s7 + $0x278] sm:$0xf0]  ;;  %v6503_v54 = vld [vmem:[%s7223_s7 + $0x22c] sm:$0xf] }
 0x1b8   : > { %3998 = vmatpush.bf16.msrb.mxu2 %v6185_v1  ;;  %v6447_v1 = vld [vmem:[%s7223_s7 + $0x6c] sm:$0xf]  ;;  %v4410_v50 = vld [vmem:[%s7223_s7 + $0x38] sm:$0xf0] }
 0x1b9   : > { %4011 = vmatpush.bf16.msrb.mxu3 %v6313_v4  ;;  %3973 = vmatmul.bf16.vlgmr.msrb.gmra.mxu0 %v7557_v16  ;;  %v4845_v4 = vor.u32 %v6547_v58, %v4842_v59  ;;  %v4445_v11 = vor.u32 %v6447_v1, %v4442_v2  ;;  %v4666_v55 = vld [vmem:[%s7223_s7 + $0x238] sm:$0xf0]  ;;  %v6535_v62 = vld [vmem:[%s7223_s7 + $0x32c] sm:$0xf] }
 0x1ba   : > { %4017 = vmatpush.bf16.msra.mxu0 %v4509_v5  ;;  %3986 = vmatmul.bf16.vlgmr.msrb.gmra.mxu1 %v7564_v22  ;;  %v3780_v5 = vadd.f32 %v3779_v7, %v3767_v60  ;;  %v4794_v58 = vld [vmem:[%s7223_s7 + $0x338] sm:$0xf0]  ;;  %v6435_v60 = vld [vmem:[%s7223_s7 + $0xc] sm:$0xf] }
 0x1bb   : > { %4030 = vmatpush.bf16.msra.mxu1 %v4637_v6  ;;  %3999 = vmatmul.bf16.vlgmr.msrb.gmra.mxu2 %v7562_v21  ;;  %v4570_v6 = vld [vmem:[%s7223_s7 + $0x178] sm:$0xf0]  ;;  %v6467_v1 = vld [vmem:[%s7223_s7 + $0x10c] sm:$0xf] }
 0x1bc   : > { %4043 = vmatpush.bf16.msra.mxu2 %v4765_v8  ;;  %4012 = vmatmul.bf16.vlgmr.msrb.gmra.mxu3 %v7568_v29  ;;  %v6511_v8 = vld [vmem:[%s7223_s7 + $0x26c] sm:$0xf]  ;;  %v4522_v2 = vld [vmem:[%s7223_s7 + $0x118] sm:$0xf0] }
 0x1bd   : > { %4056 = vmatpush.bf16.msra.mxu3 %v4893_v12  ;;  %v4573_v12 = vor.u32 %v6479_v3, %v4570_v6  ;;  %v4701_v13 = vor.u32 %v6511_v8, %v4698_v15  ;;  %v6499_v3 = vld [vmem:[%s7223_s7 + $0x20c] sm:$0xf]  ;;  %v4778_v8 = vld [vmem:[%s7223_s7 + $0x318] sm:$0xf0] }
 0x1be   : > { %4018 = vmatpush.bf16.msra.mxu0 %v4493_v23  ;;  %v3792_v23 = vpop.f32.mrf.mxu2  ;;  %v3768_v41 = vpop.f32.mrf.mxu0  ;;  %v6531_v6 = vld [vmem:[%s7223_s7 + $0x30c] sm:$0xf]  ;;  %v5018_v9 = vld [vmem:[%s7223_s7 + $0x4f8] sm:$0xf0] }
 0x1bf   : > { %4031 = vmatpush.bf16.msra.mxu1 %v4621_v32  ;;  %v4554_v32 = vld [vmem:[%s7223_s7 + $0x158] sm:$0xf0]  ;;  %v3793_v37 = vadd.f32 %v3792_v23, %v3780_v5  ;;  %v3805_v31 = vpop.f32.mrf.mxu3  ;;  %v3781_v46 = vpop.f32.mrf.mxu1  ;;  %v6591_v15 = vld [vmem:[%s7223_s7 + $0x4ec] sm:$0xf] }
 0x1c0   : > { %4044 = vmatpush.bf16.msra.mxu2 %v4749_v35  ;;  %v6507_v35 = vld [vmem:[%s7223_s7 + $0x24c] sm:$0xf]  ;;  %v4650_v5 = vld [vmem:[%s7223_s7 + $0x218] sm:$0xf0] }
 0x1c1   : > { %4057 = vmatpush.bf16.msra.mxu3 %v4877_v38  ;;  %v6539_v38 = vld [vmem:[%s7223_s7 + $0x34c] sm:$0xf]  ;;  %v3806_v47 = vadd.f32 %v3805_v31, %v3793_v37  ;;  %v5274_v17 = vld [vmem:[%s7223_s7 + $0x6f8] sm:$0xf0] }
 0x1c2   : > { %4019 = vmatpush.bf16.msra.mxu0 %v4477_v48  ;;  %v4557_v48 = vor.u32 %v6475_v18, %v4554_v32  ;;  %v4813_v52 = vor.u32 %v6539_v38, %v4810_v40  ;;  %v6623_v10 = vld [vmem:[%s7223_s7 + $0x5ec] sm:$0xf]  ;;  %v4525_v18 = vor.u32 %v6467_v1, %v4522_v2  ;;  %v5402_v32 = vld [vmem:[%s7223_s7 + $0x7f8] sm:$0xf0] }
 0x1c3   : > { %4032 = vmatpush.bf16.msra.mxu1 %v4605_v49  ;;  %v4685_v49 = vor.u32 %v6507_v35, %v4682_v36  ;;  %v4229_v57 = vrot.slane %v3806_v47, 6  ;;  %v6655_v14 = vld [vmem:[%s7223_s7 + $0x6ec] sm:$0xf]  ;;  %v4781_v35 = vor.u32 %v6531_v6, %v4778_v8  ;;  %v5021_v36 = vor.u32 %v6591_v15, %v5018_v9  ;;  %v5002_v40 = vld [vmem:[%s7223_s7 + $0x4d8] sm:$0xf0] }
 0x1c4   : > { %4045 = vmatpush.bf16.msra.mxu2 %v4733_v56  ;;  %v6439_v56 = vld [vmem:[%s7223_s7 + $0x2c] sm:$0xf]  ;;  %v5277_v31 = vor.u32 %v6655_v14, %v5274_v17  ;;  %v5130_v46 = vld [vmem:[%s7223_s7 + $0x5d8] sm:$0xf0] }
 0x1c5   : > { %4058 = vmatpush.bf16.msra.mxu3 %v4861_v53  ;;  %v4538_v53 = vld [vmem:[%s7223_s7 + $0x138] sm:$0xf0]  ;;  %v4413_v59 = vor.u32 %v6439_v56, %v4410_v50  ;;  %v8179_v7 = vsel %vm4232_vm0, %v7884_v26, %v4229_v57  ;;  %v6687_v23 = vld [vmem:[%s7223_s7 + $0x7ec] sm:$0xf] }
 0x1c6   : > { %4020 = vmatpush.bf16.msra.mxu0 %v4461_v61  ;;  %v4394_v61 = vld [vmem:[%s7223_s7 + $0x18] sm:$0xf0]  ;;  %v3794_v26 = vpop.f32.mrf.mxu2  ;;  %v6587_v38 = vld [vmem:[%s7223_s7 + $0x4cc] sm:$0xf] }
 0x1c7   : > { %4033 = vmatpush.bf16.msra.mxu1 %v4589_v63  ;;  %v4541_v63 = vor.u32 %v6471_v51, %v4538_v53  ;;  %v6619_v41 = vld [vmem:[%s7223_s7 + $0x5cc] sm:$0xf]  ;;  %v5386_v56 = vld [vmem:[%s7223_s7 + $0x7d8] sm:$0xf0]  ;;  %v5005_v50 = vor.u32 %v6587_v38, %v5002_v40 }
 0x1c8   : > { %4046 = vmatpush.bf16.msra.mxu2 %v4717_v0  ;;  %v4669_v0 = vor.u32 %v6503_v54, %v4666_v55  ;;  %v6651_v47 = vld [vmem:[%s7223_s7 + $0x6cc] sm:$0xf]  ;;  %v5133_v51 = vor.u32 %v6619_v41, %v5130_v46  ;;  %v4986_v54 = vld [vmem:[%s7223_s7 + $0x4b8] sm:$0xf0] }
 0x1c9   : > { %4059 = vmatpush.bf16.msra.mxu3 %v4845_v4  ;;  %v4797_v4 = vor.u32 %v6535_v62, %v4794_v58  ;;  %v6583_v53 = vld [vmem:[%s7223_s7 + $0x4ac] sm:$0xf]  ;;  %v5114_v62 = vld [vmem:[%s7223_s7 + $0x5b8] sm:$0xf0] }
 0x1ca   : > { %4021 = vmatpush.bf16.msra.mxu0 %v4445_v11  ;;  %v3807_v11 = vpop.f32.mrf.mxu3  ;;  %v6615_v55 = vld [vmem:[%s7223_s7 + $0x5ac] sm:$0xf]  ;;  %v4970_v2 = vld [vmem:[%s7223_s7 + $0x498] sm:$0xf0] }
 0x1cb   : > { %4034 = vmatpush.bf16.msra.mxu1 %v4573_v12  ;;  %v4397_v12 = vor.u32 %v6435_v60, %v4394_v61  ;;  %v6647_v58 = vld [vmem:[%s7223_s7 + $0x6ac] sm:$0xf]  ;;  %v5370_v61 = vld [vmem:[%s7223_s7 + $0x7b8] sm:$0xf0] }
 0x1cc   : > { %4047 = vmatpush.bf16.msra.mxu2 %v4701_v13  ;;  %v5146_v13 = vld [vmem:[%s7223_s7 + $0x5f8] sm:$0xf0]  ;;  %v6679_v60 = vld [vmem:[%s7223_s7 + $0x7ac] sm:$0xf] }
 0x1cd   : > { %4060 = vmatpush.bf16.msra.mxu3 %v4829_v19  ;;  %v4653_v19 = vor.u32 %v6499_v3, %v4650_v5  ;;  %v5149_v37 = vor.u32 %v6623_v10, %v5146_v13  ;;  %v6611_v3 = vld [vmem:[%s7223_s7 + $0x58c] sm:$0xf]  ;;  %v5226_v5 = vld [vmem:[%s7223_s7 + $0x698] sm:$0xf0] }
 0x1ce   : > { %4022 = vmatpush.bf16.msra.mxu0 %v4429_v44  ;;  %v5405_v44 = vor.u32 %v6687_v23, %v5402_v32  ;;  %v6675_v6 = vld [vmem:[%s7223_s7 + $0x78c] sm:$0xf]  ;;  %v5354_v8 = vld [vmem:[%s7223_s7 + $0x798] sm:$0xf0] }
 0x1cf   : > { %4035 = vmatpush.bf16.msra.mxu1 %v4557_v48  ;;  %v5258_v48 = vld [vmem:[%s7223_s7 + $0x6d8] sm:$0xf0]  ;;  %v6575_v10 = vld [vmem:[%s7223_s7 + $0x46c] sm:$0xf]  ;;  %v5357_v14 = vor.u32 %v6675_v6, %v5354_v8 }
 0x1d0   : > { %4048 = vmatpush.bf16.msra.mxu2 %v4685_v49  ;;  %v6683_v49 = vld [vmem:[%s7223_s7 + $0x7cc] sm:$0xf]  ;;  %v4954_v11 = vld [vmem:[%s7223_s7 + $0x478] sm:$0xf0] }
 0x1d1   : > { %4061 = vmatpush.bf16.msra.mxu3 %v4813_v52  ;;  %v5261_v52 = vor.u32 %v6651_v47, %v5258_v48  ;;  %v5389_v57 = vor.u32 %v6683_v49, %v5386_v56  ;;  %v5082_v17 = vld [vmem:[%s7223_s7 + $0x578] sm:$0xf0]  ;;  %v6671_v32 = vld [vmem:[%s7223_s7 + $0x76c] sm:$0xf] }
 0x1d2   : > { %4023 = vmatpush.bf16.msra.mxu0 %v4413_v59  ;;  %v5242_v59 = vld [vmem:[%s7223_s7 + $0x6b8] sm:$0xf0]  ;;  %v6571_v38 = vld [vmem:[%s7223_s7 + $0x44c] sm:$0xf] }
 0x1d3   : > { %4036 = vmatpush.bf16.msra.mxu1 %v4541_v63  ;;  %v4989_v63 = vor.u32 %v6583_v53, %v4986_v54  ;;  %v5245_v1 = vor.u32 %v6647_v58, %v5242_v59  ;;  %v4938_v40 = vld [vmem:[%s7223_s7 + $0x458] sm:$0xf0]  ;;  %v6603_v41 = vld [vmem:[%s7223_s7 + $0x54c] sm:$0xf] }
 0x1d4   : > { %4049 = vmatpush.bf16.msra.mxu2 %v4669_v0  ;;  %v5117_v0 = vor.u32 %v6615_v55, %v5114_v62  ;;  %v5066_v47 = vld [vmem:[%s7223_s7 + $0x558] sm:$0xf0]  ;;  %v6635_v48 = vld [vmem:[%s7223_s7 + $0x64c] sm:$0xf]  ;;  %v4941_v53 = vor.u32 %v6571_v38, %v4938_v40 }
 0x1d5   : > { %4062 = vmatpush.bf16.msra.mxu3 %v4797_v4  ;;  %v5098_v4 = vld [vmem:[%s7223_s7 + $0x598] sm:$0xf0]  ;;  %v6567_v58 = vld [vmem:[%s7223_s7 + $0x42c] sm:$0xf] }
 0x1d6   : > { %4024 = vmatpush.bf16.msra.mxu0 %v4397_v12  ;;  %v3818_v26 = vpop.f32.mrf.mxu0  ;;  %v5101_v15 = vor.u32 %v6611_v3, %v5098_v4  ;;  %v6607_v12 = vld [vmem:[%s7223_s7 + $0x56c] sm:$0xf]  ;;  %v5194_v49 = vld [vmem:[%s7223_s7 + $0x658] sm:$0xf0] }
 0x1d7   : > { %4037 = vmatpush.bf16.msra.mxu1 %v4525_v18  ;;  %v3831_v13 = vpop.f32.mrf.mxu1  ;;  %v6639_v18 = vld [vmem:[%s7223_s7 + $0x66c] sm:$0xf]  ;;  %v5197_v62 = vor.u32 %v6635_v48, %v5194_v49  ;;  %v4922_v59 = vld [vmem:[%s7223_s7 + $0x438] sm:$0xf0] }
 0x1d8   : > { %4050 = vmatpush.bf16.msra.mxu2 %v4653_v19  ;;  %v5210_v19 = vld [vmem:[%s7223_s7 + $0x678] sm:$0xf0]  ;;  %v3832_v23 = vadd.f32 %v3831_v13, %v3818_v26  ;;  %v6563_v4 = vld [vmem:[%s7223_s7 + $0x40c] sm:$0xf] }
 0x1d9   : > { %4063 = vmatpush.bf16.msra.mxu3 %v4781_v35  ;;  %4025 = vmatmul.bf16.vlgmr.msra.gmra.mxu0 %v7356_v28  ;;  %v5373_v28 = vor.u32 %v6679_v60, %v5370_v61  ;;  %v5338_v35 = vld [vmem:[%s7223_s7 + $0x778] sm:$0xf0]  ;;  %v6599_v60 = vld [vmem:[%s7223_s7 + $0x52c] sm:$0xf] }
 0x1da   : > { %4069 = vmatpush.bf16.msrb.mxu0 %v5021_v36  ;;  %4038 = vmatmul.bf16.vlgmr.msra.gmra.mxu1 %v7362_v34  ;;  %v4957_v36 = vor.u32 %v6575_v10, %v4954_v11  ;;  %v5341_v46 = vor.u32 %v6671_v32, %v5338_v35  ;;  %v5306_v3 = vld [vmem:[%s7223_s7 + $0x738] sm:$0xf0]  ;;  %v6595_v8 = vld [vmem:[%s7223_s7 + $0x50c] sm:$0xf] }
 0x1db   : > { %4082 = vmatpush.bf16.msrb.mxu1 %v5149_v37  ;;  %4051 = vmatmul.bf16.vlgmr.msra.gmra.mxu2 %v7354_v27  ;;  %v6579_v27 = vld [vmem:[%s7223_s7 + $0x48c] sm:$0xf]  ;;  %v5085_v37 = vor.u32 %v6607_v12, %v5082_v17  ;;  %v5162_v10 = vld [vmem:[%s7223_s7 + $0x618] sm:$0xf0] }
 0x1dc   : > { %4095 = vmatpush.bf16.msrb.mxu2 %v5277_v31  ;;  %4064 = vmatmul.bf16.vlgmr.msra.gmra.mxu3 %v7360_v33  ;;  %v6643_v33 = vld [vmem:[%s7223_s7 + $0x68c] sm:$0xf]  ;;  %v4973_v34 = vor.u32 %v6579_v27, %v4970_v2  ;;  %v5213_v31 = vor.u32 %v6639_v18, %v5210_v19  ;;  %v5178_v27 = vld [vmem:[%s7223_s7 + $0x638] sm:$0xf0] }
 0x1dd   : > { %4108 = vmatpush.bf16.msrb.mxu3 %v5405_v44  ;;  %v5229_v9 = vor.u32 %v6643_v33, %v5226_v5  ;;  %v6663_v2 = vld [vmem:[%s7223_s7 + $0x72c] sm:$0xf]  ;;  %v4906_v33 = vld [vmem:[%s7223_s7 + $0x418] sm:$0xf0] }
 0x1de   : > { %4070 = vmatpush.bf16.msrb.mxu0 %v5005_v50  ;;  %v3844_v44 = vpop.f32.mrf.mxu2  ;;  %v3820_v55 = vpop.f32.mrf.mxu0  ;;  %v6627_v26 = vld [vmem:[%s7223_s7 + $0x60c] sm:$0xf]  ;;  %v5290_v12 = vld [vmem:[%s7223_s7 + $0x718] sm:$0xf0]  ;;  %v4909_v19 = vor.u32 %v6563_v4, %v4906_v33 }
 0x1df   : > { %4083 = vmatpush.bf16.msrb.mxu1 %v5133_v51  ;;  %v3845_v56 = vadd.f32 %v3844_v44, %v3832_v23  ;;  %v3857_v50 = vpop.f32.mrf.mxu3  ;;  %v6667_v51 = vld [vmem:[%s7223_s7 + $0x74c] sm:$0xf]  ;;  %v3833_v61 = vpop.f32.mrf.mxu1  ;;  %v5530_v17 = vld [vmem:[%s7223_s7 + $0x8f8] sm:$0xf0] }
 0x1e0   : > { %4096 = vmatpush.bf16.msrb.mxu2 %v5261_v52  ;;  %v5322_v52 = vld [vmem:[%s7223_s7 + $0x758] sm:$0xf0]  ;;  %v6659_v11 = vld [vmem:[%s7223_s7 + $0x70c] sm:$0xf] }
 0x1e1   : > { %4109 = vmatpush.bf16.msrb.mxu3 %v5389_v57  ;;  %v8239_v54 = vadd.f32 %v3857_v50, %v3845_v56  ;;  %v5069_v57 = vor.u32 %v6603_v41, %v5066_v47  ;;  %v6751_v18 = vld [vmem:[%s7223_s7 + $0x9ec] sm:$0xf]  ;;  %v5658_v23 = vld [vmem:[%s7223_s7 + $0x9f8] sm:$0xf0]  ;;  %v5293_v40 = vor.u32 %v6659_v11, %v5290_v12 }
 0x1e2   : > { %4071 = vmatpush.bf16.msrb.mxu0 %v4989_v63  ;;  %v5325_v63 = vor.u32 %v6667_v51, %v5322_v52  ;;  %v6783_v32 = vld [vmem:[%s7223_s7 + $0xaec] sm:$0xf]  ;;  %v5786_v35 = vld [vmem:[%s7223_s7 + $0xaf8] sm:$0xf0]  ;;  %v5661_v44 = vor.u32 %v6751_v18, %v5658_v23 }
 0x1e3   : > { %4084 = vmatpush.bf16.msrb.mxu1 %v5117_v0  ;;  %v5050_v0 = vld [vmem:[%s7223_s7 + $0x538] sm:$0xf0]  ;;  %v6715_v47 = vld [vmem:[%s7223_s7 + $0x8cc] sm:$0xf] }
 0x1e4   : > { %4097 = vmatpush.bf16.msrb.mxu2 %v5245_v1  ;;  %v6631_v1 = vld [vmem:[%s7223_s7 + $0x62c] sm:$0xf]  ;;  %v5053_v5 = vor.u32 %v6599_v60, %v5050_v0  ;;  %v5914_v38 = vld [vmem:[%s7223_s7 + $0xbf8] sm:$0xf0] }
 0x1e5   : > { %4110 = vmatpush.bf16.msrb.mxu3 %v5373_v28  ;;  %v4925_v28 = vor.u32 %v6567_v58, %v4922_v59  ;;  %v5181_v6 = vor.u32 %v6631_v1, %v5178_v27  ;;  %v5514_v48 = vld [vmem:[%s7223_s7 + $0x8d8] sm:$0xf0]  ;;  %v6747_v49 = vld [vmem:[%s7223_s7 + $0x9cc] sm:$0xf] }
 0x1e6   : > { %4072 = vmatpush.bf16.msrb.mxu0 %v4973_v34  ;;  %v5034_v34 = vld [vmem:[%s7223_s7 + $0x518] sm:$0xf0]  ;;  %v6779_v51 = vld [vmem:[%s7223_s7 + $0xacc] sm:$0xf] }
 0x1e7   : > { %4085 = vmatpush.bf16.msrb.mxu1 %v5101_v15  ;;  %v3846_v15 = vpop.f32.mrf.mxu2  ;;  %v3859_v13 = vpop.f32.mrf.mxu3  ;;  %v5642_v50 = vld [vmem:[%s7223_s7 + $0x9d8] sm:$0xf0]  ;;  %v6711_v59 = vld [vmem:[%s7223_s7 + $0x8ac] sm:$0xf] }
 0x1e8   : > { %4098 = vmatpush.bf16.msrb.mxu2 %v5229_v9  ;;  %v5309_v9 = vor.u32 %v6663_v2, %v5306_v3  ;;  %v5770_v52 = vld [vmem:[%s7223_s7 + $0xad8] sm:$0xf0]  ;;  %v6743_v61 = vld [vmem:[%s7223_s7 + $0x9ac] sm:$0xf] }
 0x1e9   : > { %4111 = vmatpush.bf16.msrb.mxu3 %v5357_v14  ;;  %v6719_v14 = vld [vmem:[%s7223_s7 + $0x8ec] sm:$0xf]  ;;  %v5898_v55 = vld [vmem:[%s7223_s7 + $0xbd8] sm:$0xf0]  ;;  %v5773_v58 = vor.u32 %v6779_v51, %v5770_v52 }
 0x1ea   : > { %4073 = vmatpush.bf16.msrb.mxu0 %v4957_v36  ;;  %v5037_v36 = vor.u32 %v6595_v8, %v5034_v34  ;;  %v5533_v41 = vor.u32 %v6719_v14, %v5530_v17  ;;  %v5498_v60 = vld [vmem:[%s7223_s7 + $0x8b8] sm:$0xf0]  ;;  %v6775_v1 = vld [vmem:[%s7223_s7 + $0xaac] sm:$0xf] }
 0x1eb   : > { %4086 = vmatpush.bf16.msrb.mxu1 %v5085_v37  ;;  %v5165_v37 = vor.u32 %v6627_v26, %v5162_v10  ;;  %v5626_v0 = vld [vmem:[%s7223_s7 + $0x9b8] sm:$0xf0]  ;;  %v6807_v2 = vld [vmem:[%s7223_s7 + $0xbac] sm:$0xf] }
 0x1ec   : > { %4099 = vmatpush.bf16.msrb.mxu2 %v5213_v31  ;;  %v6815_v31 = vld [vmem:[%s7223_s7 + $0xbec] sm:$0xf]  ;;  %v5754_v27 = vld [vmem:[%s7223_s7 + $0xab8] sm:$0xf0] }
 0x1ed   : > { %4112 = vmatpush.bf16.msrb.mxu3 %v5341_v46  ;;  %v5789_v46 = vor.u32 %v6783_v32, %v5786_v35  ;;  %v5917_v56 = vor.u32 %v6815_v31, %v5914_v38  ;;  %v5882_v3 = vld [vmem:[%s7223_s7 + $0xbb8] sm:$0xf0]  ;;  %v5757_v4 = vor.u32 %v6775_v1, %v5754_v27  ;;  %v6707_v33 = vld [vmem:[%s7223_s7 + $0x88c] sm:$0xf] }
 0x1ee   : > { %4074 = vmatpush.bf16.msrb.mxu0 %v4941_v53  ;;  %v6811_v53 = vld [vmem:[%s7223_s7 + $0xbcc] sm:$0xf]  ;;  %v5738_v34 = vld [vmem:[%s7223_s7 + $0xa98] sm:$0xf0] }
 0x1ef   : > { %4087 = vmatpush.bf16.msrb.mxu1 %v5069_v57  ;;  %v5517_v57 = vor.u32 %v6715_v47, %v5514_v48  ;;  %v6771_v8 = vld [vmem:[%s7223_s7 + $0xa8c] sm:$0xf]  ;;  %v5866_v15 = vld [vmem:[%s7223_s7 + $0xb98] sm:$0xf0] }
 0x1f0   : > { %4100 = vmatpush.bf16.msrb.mxu2 %v5197_v62  ;;  %v5645_v62 = vor.u32 %v6747_v49, %v5642_v50  ;;  %v6803_v26 = vld [vmem:[%s7223_s7 + $0xb8c] sm:$0xf]  ;;  %v5741_v11 = vor.u32 %v6771_v8, %v5738_v34  ;;  %v5466_v13 = vld [vmem:[%s7223_s7 + $0x878] sm:$0xf0] }
 0x1f1   : > { %4113 = vmatpush.bf16.msrb.mxu3 %v5325_v63  ;;  %v5901_v63 = vor.u32 %v6811_v53, %v5898_v55  ;;  %v6703_v12 = vld [vmem:[%s7223_s7 + $0x86c] sm:$0xf]  ;;  %v5594_v23 = vld [vmem:[%s7223_s7 + $0x978] sm:$0xf0] }
 0x1f2   : > { %4075 = vmatpush.bf16.msrb.mxu0 %v4925_v28  ;;  %v5501_v28 = vor.u32 %v6711_v59, %v5498_v60  ;;  %v6735_v14 = vld [vmem:[%s7223_s7 + $0x96c] sm:$0xf]  ;;  %v5722_v35 = vld [vmem:[%s7223_s7 + $0xa78] sm:$0xf0]  ;;  %v5469_v38 = vor.u32 %v6703_v12, %v5466_v13 }
 0x1f3   : > { %4088 = vmatpush.bf16.msrb.mxu1 %v5053_v5  ;;  %v5482_v5 = vld [vmem:[%s7223_s7 + $0x898] sm:$0xf0]  ;;  %v6767_v32 = vld [vmem:[%s7223_s7 + $0xa6c] sm:$0xf] }
 0x1f4   : > { %4101 = vmatpush.bf16.msrb.mxu2 %v5181_v6  ;;  %v5610_v6 = vld [vmem:[%s7223_s7 + $0x998] sm:$0xf0]  ;;  %v6795_v53 = vld [vmem:[%s7223_s7 + $0xb4c] sm:$0xf] }
 0x1f5   : > { %4114 = vmatpush.bf16.msrb.mxu3 %v5309_v9  ;;  %v5578_v49 = vld [vmem:[%s7223_s7 + $0x958] sm:$0xf0]  ;;  %v6723_v8 = vld [vmem:[%s7223_s7 + $0x90c] sm:$0xf] }
 0x1f6   : > { %4076 = vmatpush.bf16.msrb.mxu0 %v4909_v19  ;;  %v3870_v9 = vpop.f32.mrf.mxu0  ;;  %v5869_v19 = vor.u32 %v6803_v26, %v5866_v15  ;;  %v5706_v50 = vld [vmem:[%s7223_s7 + $0xa58] sm:$0xf0]  ;;  %v6755_v26 = vld [vmem:[%s7223_s7 + $0xa0c] sm:$0xf] }
 0x1f7   : > { %4089 = vmatpush.bf16.msrb.mxu1 %v5037_v36  ;;  %v3871_v17 = vadd.f32 %v3870_v9, %v8239_v54  ;;  %v3883_v18 = vpop.f32.mrf.mxu1  ;;  %v6799_v36 = vld [vmem:[%s7223_s7 + $0xb6c] sm:$0xf]  ;;  %v5597_v54 = vor.u32 %v6735_v14, %v5594_v23  ;;  %v5834_v55 = vld [vmem:[%s7223_s7 + $0xb58] sm:$0xf0] }
 0x1f8   : > { %4102 = vmatpush.bf16.msrb.mxu2 %v5165_v37  ;;  %v5850_v37 = vld [vmem:[%s7223_s7 + $0xb78] sm:$0xf0]  ;;  %v5837_v27 = vor.u32 %v6795_v53, %v5834_v55  ;;  %v6847_v13 = vld [vmem:[%s7223_s7 + $0xcec] sm:$0xf] }
 0x1f9   : > { %4115 = vmatpush.bf16.msrb.mxu3 %v5293_v40  ;;  %4077 = vmatmul.bf16.vlgmr.msrb.gmra.mxu0 %v7412_v42  ;;  %v6739_v42 = vld [vmem:[%s7223_s7 + $0x98c] sm:$0xf]  ;;  %v3884_v31 = vadd.f32 %v3883_v18, %v3871_v17  ;;  %v5725_v40 = vor.u32 %v6767_v32, %v5722_v35  ;;  %v5853_v48 = vor.u32 %v6799_v36, %v5850_v37  ;;  %v5546_v34 = vld [vmem:[%s7223_s7 + $0x918] sm:$0xf0] }
 0x1fa   : > { %4121 = vmatpush.bf16.msra.mxu0 %v5533_v41  ;;  %4090 = vmatmul.bf16.vlgmr.msrb.gmra.mxu1 %v7416_v45  ;;  %v5485_v45 = vor.u32 %v6707_v33, %v5482_v5  ;;  %v5613_v10 = vor.u32 %v6739_v42, %v5610_v6  ;;  %v6699_v41 = vld [vmem:[%s7223_s7 + $0x84c] sm:$0xf]  ;;  %v5418_v42 = vld [vmem:[%s7223_s7 + $0x818] sm:$0xf0]  ;;  %v5549_v35 = vor.u32 %v6723_v8, %v5546_v34 }
 0x1fb   : > { %4134 = vmatpush.bf16.msra.mxu1 %v5661_v44  ;;  %4103 = vmatmul.bf16.vlgmr.msrb.gmra.mxu2 %v7408_v39  ;;  %v5629_v39 = vor.u32 %v6743_v61, %v5626_v0  ;;  %v5450_v44 = vld [vmem:[%s7223_s7 + $0x858] sm:$0xf0]  ;;  %v6695_v61 = vld [vmem:[%s7223_s7 + $0x82c] sm:$0xf] }
 0x1fc   : > { %4147 = vmatpush.bf16.msra.mxu2 %v5789_v46  ;;  %4116 = vmatmul.bf16.vlgmr.msrb.gmra.mxu3 %v7414_v43  ;;  %v5885_v43 = vor.u32 %v6807_v2, %v5882_v3  ;;  %v6731_v46 = vld [vmem:[%s7223_s7 + $0x94c] sm:$0xf]  ;;  %v5562_v2 = vld [vmem:[%s7223_s7 + $0x938] sm:$0xf0] }
 0x1fd   : > { %4160 = vmatpush.bf16.msra.mxu3 %v5917_v56  ;;  %v6763_v56 = vld [vmem:[%s7223_s7 + $0xa4c] sm:$0xf]  ;;  %v5581_v59 = vor.u32 %v6731_v46, %v5578_v49  ;;  %v5674_v9 = vld [vmem:[%s7223_s7 + $0xa18] sm:$0xf0] }
 0x1fe   : > { %4122 = vmatpush.bf16.msra.mxu0 %v5517_v57  ;;  %v3896_v47 = vpop.f32.mrf.mxu2  ;;  %v5453_v57 = vor.u32 %v6699_v41, %v5450_v44  ;;  %v5709_v60 = vor.u32 %v6763_v56, %v5706_v50  ;;  %v6727_v0 = vld [vmem:[%s7223_s7 + $0x92c] sm:$0xf]  ;;  %v6042_v14 = vld [vmem:[%s7223_s7 + $0xcf8] sm:$0xf0]  ;;  %v5677_v36 = vor.u32 %v6755_v26, %v5674_v9 }
 0x1ff   : > { %4135 = vmatpush.bf16.msra.mxu1 %v5645_v62  ;;  %v3897_v51 = vadd.f32 %v3896_v47, %v3884_v31  ;;  %v3909_v52 = vpop.f32.mrf.mxu3  ;;  %v3885_v1 = vpop.f32.mrf.mxu1  ;;  %v6759_v3 = vld [vmem:[%s7223_s7 + $0xa2c] sm:$0xf]  ;;  %v6298_v32 = vld [vmem:[%s7223_s7 + $0xef8] sm:$0xf0] }
 0x200   : > { %4148 = vmatpush.bf16.msra.mxu2 %v5773_v58  ;;  %v3872_v58 = vpop.f32.mrf.mxu0  ;;  %v6691_v5 = vld [vmem:[%s7223_s7 + $0x80c] sm:$0xf]  ;;  %v6426_v31 = vld [vmem:[%s7223_s7 + $0xff8] sm:$0xf0] }
 0x201   : > { %4161 = vmatpush.bf16.msra.mxu3 %v5901_v63  ;;  %v8310_v62 = vadd.f32 %v3909_v52, %v3897_v51  ;;  %v5434_v63 = vld [vmem:[%s7223_s7 + $0x838] sm:$0xf0]  ;;  %v6879_v17 = vld [vmem:[%s7223_s7 + $0xdec] sm:$0xf]  ;;  %v5421_v18 = vor.u32 %v6691_v5, %v5418_v42 }
 0x202   : > { %4123 = vmatpush.bf16.msra.mxu0 %v5501_v28  ;;  %v5690_v28 = vld [vmem:[%s7223_s7 + $0xa38] sm:$0xf0]  ;;  %v5437_v33 = vor.u32 %v6695_v61, %v5434_v63  ;;  %v6911_v23 = vld [vmem:[%s7223_s7 + $0xeec] sm:$0xf] }
 0x203   : > { %4136 = vmatpush.bf16.msra.mxu1 %v5629_v39  ;;  %v6791_v39 = vld [vmem:[%s7223_s7 + $0xb2c] sm:$0xf]  ;;  %v5693_v6 = vor.u32 %v6759_v3, %v5690_v28  ;;  %v6301_v41 = vor.u32 %v6911_v23, %v6298_v32  ;;  %v6026_v46 = vld [vmem:[%s7223_s7 + $0xcd8] sm:$0xf0] }
 0x204   : > { %4149 = vmatpush.bf16.msra.mxu2 %v5757_v4  ;;  %v5818_v4 = vld [vmem:[%s7223_s7 + $0xb38] sm:$0xf0]  ;;  %v6943_v37 = vld [vmem:[%s7223_s7 + $0xfec] sm:$0xf] }
 0x205   : > { %4162 = vmatpush.bf16.msra.mxu3 %v5885_v43  ;;  %v5565_v43 = vor.u32 %v6727_v0, %v5562_v2  ;;  %v6843_v44 = vld [vmem:[%s7223_s7 + $0xccc] sm:$0xf]  ;;  %v6154_v49 = vld [vmem:[%s7223_s7 + $0xdd8] sm:$0xf0] }
 0x206   : > { %4124 = vmatpush.bf16.msra.mxu0 %v5485_v45  ;;  %v3898_v15 = vpop.f32.mrf.mxu2  ;;  %v5821_v45 = vor.u32 %v6791_v39, %v5818_v4  ;;  %v6875_v47 = vld [vmem:[%s7223_s7 + $0xdcc] sm:$0xf]  ;;  %v6282_v50 = vld [vmem:[%s7223_s7 + $0xed8] sm:$0xf0]  ;;  %v6029_v53 = vor.u32 %v6843_v44, %v6026_v46 }
 0x207   : > { %4137 = vmatpush.bf16.msra.mxu1 %v5613_v10  ;;  %v6787_v10 = vld [vmem:[%s7223_s7 + $0xb0c] sm:$0xf]  ;;  %v3911_v12 = vpop.f32.mrf.mxu3  ;;  %v6410_v52 = vld [vmem:[%s7223_s7 + $0xfd8] sm:$0xf0]  ;;  %v6157_v55 = vor.u32 %v6875_v47, %v6154_v49 }
 0x208   : > { %4150 = vmatpush.bf16.msra.mxu2 %v5741_v11  ;;  %v5802_v11 = vld [vmem:[%s7223_s7 + $0xb18] sm:$0xf0]  ;;  %v6907_v56 = vld [vmem:[%s7223_s7 + $0xecc] sm:$0xf] }
 0x209   : > { %4163 = vmatpush.bf16.msra.mxu3 %v5869_v19  ;;  %v6170_v19 = vld [vmem:[%s7223_s7 + $0xdf8] sm:$0xf0]  ;;  %v6939_v51 = vld [vmem:[%s7223_s7 + $0xfcc] sm:$0xf] }
 0x20a   : > { %4125 = vmatpush.bf16.msra.mxu0 %v5469_v38  ;;  %v5805_v38 = vor.u32 %v6787_v10, %v5802_v11  ;;  %v6839_v58 = vld [vmem:[%s7223_s7 + $0xcac] sm:$0xf]  ;;  %v6413_v61 = vor.u32 %v6939_v51, %v6410_v52  ;;  %v6138_v63 = vld [vmem:[%s7223_s7 + $0xdb8] sm:$0xf0] }
 0x20b   : > { %4138 = vmatpush.bf16.msra.mxu1 %v5597_v54  ;;  %v6045_v54 = vor.u32 %v6847_v13, %v6042_v14  ;;  %v6903_v0 = vld [vmem:[%s7223_s7 + $0xeac] sm:$0xf]  ;;  %v6266_v1 = vld [vmem:[%s7223_s7 + $0xeb8] sm:$0xf0] }
 0x20c   : > { %4151 = vmatpush.bf16.msra.mxu2 %v5725_v40  ;;  %v6173_v40 = vor.u32 %v6879_v17, %v6170_v19  ;;  %v6394_v2 = vld [vmem:[%s7223_s7 + $0xfb8] sm:$0xf0]  ;;  %v6269_v28 = vor.u32 %v6903_v0, %v6266_v1  ;;  %v6835_v39 = vld [vmem:[%s7223_s7 + $0xc8c] sm:$0xf] }
 0x20d   : > { %4164 = vmatpush.bf16.msra.mxu3 %v5853_v48  ;;  %v6429_v48 = vor.u32 %v6943_v37, %v6426_v31  ;;  %v5994_v4 = vld [vmem:[%s7223_s7 + $0xc98] sm:$0xf0]  ;;  %v6899_v5 = vld [vmem:[%s7223_s7 + $0xe8c] sm:$0xf] }
 0x20e   : > { %4126 = vmatpush.bf16.msra.mxu0 %v5453_v57  ;;  %v6285_v57 = vor.u32 %v6907_v56, %v6282_v50  ;;  %v6250_v42 = vld [vmem:[%s7223_s7 + $0xe98] sm:$0xf0]  ;;  %v5997_v34 = vor.u32 %v6835_v39, %v5994_v4  ;;  %v6831_v9 = vld [vmem:[%s7223_s7 + $0xc6c] sm:$0xf] }
 0x20f   : > { %4139 = vmatpush.bf16.msra.mxu1 %v5581_v59  ;;  %v6010_v59 = vld [vmem:[%s7223_s7 + $0xcb8] sm:$0xf0]  ;;  %v6863_v11 = vld [vmem:[%s7223_s7 + $0xd6c] sm:$0xf] }
 0x210   : > { %4152 = vmatpush.bf16.msra.mxu2 %v5709_v60  ;;  %v6871_v60 = vld [vmem:[%s7223_s7 + $0xdac] sm:$0xf]  ;;  %v5978_v10 = vld [vmem:[%s7223_s7 + $0xc78] sm:$0xf0] }
 0x211   : > { %4165 = vmatpush.bf16.msra.mxu3 %v5837_v27  ;;  %v6935_v27 = vld [vmem:[%s7223_s7 + $0xfac] sm:$0xf]  ;;  %v6141_v3 = vor.u32 %v6871_v60, %v6138_v63  ;;  %v6106_v14 = vld [vmem:[%s7223_s7 + $0xd78] sm:$0xf0]  ;;  %v5981_v23 = vor.u32 %v6831_v9, %v5978_v10 }
 0x212   : > { %4127 = vmatpush.bf16.msra.mxu0 %v5437_v33  ;;  %v6122_v33 = vld [vmem:[%s7223_s7 + $0xd98] sm:$0xf0]  ;;  %v6895_v17 = vld [vmem:[%s7223_s7 + $0xe6c] sm:$0xf]  ;;  %v6109_v32 = vor.u32 %v6863_v11, %v6106_v14 }
 0x213   : > { %4140 = vmatpush.bf16.msra.mxu1 %v5565_v43  ;;  %v6931_v43 = vld [vmem:[%s7223_s7 + $0xf8c] sm:$0xf]  ;;  %v6362_v19 = vld [vmem:[%s7223_s7 + $0xf78] sm:$0xf0] }
 0x214   : > { %4153 = vmatpush.bf16.msra.mxu2 %v5693_v6  ;;  %v6378_v6 = vld [vmem:[%s7223_s7 + $0xf98] sm:$0xf0]  ;;  %v6859_v31 = vld [vmem:[%s7223_s7 + $0xd4c] sm:$0xf] }
 0x215   : > { %4166 = vmatpush.bf16.msra.mxu3 %v5821_v45  ;;  %v6253_v45 = vor.u32 %v6899_v5, %v6250_v42  ;;  %v6381_v12 = vor.u32 %v6931_v43, %v6378_v6  ;;  %v5962_v37 = vld [vmem:[%s7223_s7 + $0xc58] sm:$0xf0]  ;;  %v6887_v63 = vld [vmem:[%s7223_s7 + $0xe2c] sm:$0xf] }
 0x216   : > { %4128 = vmatpush.bf16.msra.mxu0 %v5421_v18  ;;  %v6927_v18 = vld [vmem:[%s7223_s7 + $0xf6c] sm:$0xf]  ;;  %v6218_v44 = vld [vmem:[%s7223_s7 + $0xe58] sm:$0xf0] }
 0x217   : > { %4141 = vmatpush.bf16.msra.mxu1 %v5549_v35  ;;  %v3935_v26 = vpop.f32.mrf.mxu1  ;;  %v6346_v49 = vld [vmem:[%s7223_s7 + $0xf58] sm:$0xf0]  ;;  %v6919_v1 = vld [vmem:[%s7223_s7 + $0xf2c] sm:$0xf] }
 0x218   : > { %4154 = vmatpush.bf16.msra.mxu2 %v5677_v36  ;;  %v6827_v36 = vld [vmem:[%s7223_s7 + $0xc4c] sm:$0xf]  ;;  %v6202_v0 = vld [vmem:[%s7223_s7 + $0xe38] sm:$0xf0] }
 0x219   : > { %4167 = vmatpush.bf16.msra.mxu3 %v5805_v38  ;;  %4129 = vmatmul.bf16.vlgmr.msra.gmra.mxu0 %v7481_v20  ;;  %v6013_v20 = vor.u32 %v6839_v58, %v6010_v59  ;;  %v6365_v38 = vor.u32 %v6927_v18, %v6362_v19  ;;  %v5965_v50 = vor.u32 %v6827_v36, %v5962_v37  ;;  %v5946_v58 = vld [vmem:[%s7223_s7 + $0xc38] sm:$0xf0]  ;;  %v6855_v59 = vld [vmem:[%s7223_s7 + $0xd2c] sm:$0xf] }
 0x21a   : > { %4173 = vmatpush.bf16.msrb.mxu0 %v6045_v54  ;;  %4142 = vmatmul.bf16.vlgmr.msra.gmra.mxu1 %v7488_v25  ;;  %v6397_v25 = vor.u32 %v6935_v27, %v6394_v2  ;;  %v6330_v27 = vld [vmem:[%s7223_s7 + $0xf38] sm:$0xf0]  ;;  %v6851_v4 = vld [vmem:[%s7223_s7 + $0xd0c] sm:$0xf] }
 0x21b   : > { %4186 = vmatpush.bf16.msrb.mxu1 %v6173_v40  ;;  %4155 = vmatmul.bf16.vlgmr.msra.gmra.mxu2 %v7486_v24  ;;  %v6867_v24 = vld [vmem:[%s7223_s7 + $0xd8c] sm:$0xf]  ;;  %v6090_v40 = vld [vmem:[%s7223_s7 + $0xd58] sm:$0xf0] }
 0x21c   : > { %4199 = vmatpush.bf16.msrb.mxu2 %v6301_v41  ;;  %4168 = vmatmul.bf16.vlgmr.msra.gmra.mxu3 %v7492_v30  ;;  %v3922_v30 = vpop.f32.mrf.mxu0  ;;  %v6125_v15 = vor.u32 %v6867_v24, %v6122_v33  ;;  %v6891_v41 = vld [vmem:[%s7223_s7 + $0xe4c] sm:$0xf]  ;;  %v5930_v39 = vld [vmem:[%s7223_s7 + $0xc18] sm:$0xf0]  ;;  %v6333_v24 = vor.u32 %v6919_v1, %v6330_v27 }
 0x21d   : > { %4212 = vmatpush.bf16.msrb.mxu3 %v6429_v48  ;;  %v3923_v8 = vadd.f32 %v3922_v30, %v8310_v62  ;;  %v6234_v62 = vld [vmem:[%s7223_s7 + $0xe78] sm:$0xf0]  ;;  %v6923_v48 = vld [vmem:[%s7223_s7 + $0xf4c] sm:$0xf] }
 0x21e   : > { %4174 = vmatpush.bf16.msrb.mxu0 %v6029_v53  ;;  %v6237_v35 = vor.u32 %v6895_v17, %v6234_v62  ;;  %v3948_v54 = vpop.f32.mrf.mxu2  ;;  %v6093_v53 = vor.u32 %v6859_v31, %v6090_v40  ;;  %v6349_v60 = vor.u32 %v6923_v48, %v6346_v49  ;;  %v6883_v33 = vld [vmem:[%s7223_s7 + $0xe0c] sm:$0xf]  ;;  %v6186_v5 = vld [vmem:[%s7223_s7 + $0xe18] sm:$0xf0] }
 0x21f   : > { %4187 = vmatpush.bf16.msrb.mxu1 %v6157_v55  ;;  %v3936_v13 = vadd.f32 %v3935_v26, %v3923_v8  ;;  %v3961_v47 = vpop.f32.mrf.mxu3  ;;  %v3937_v51 = vpop.f32.mrf.mxu1  ;;  %v6221_v55 = vor.u32 %v6891_v41, %v6218_v44  ;;  %v6915_v30 = vld [vmem:[%s7223_s7 + $0xf0c] sm:$0xf]  ;;  %v6314_v43 = vld [vmem:[%s7223_s7 + $0xf18] sm:$0xf0]  ;;  %v6189_v26 = vor.u32 %v6883_v33, %v6186_v5 }
 0x220   : > { %4200 = vmatpush.bf16.msrb.mxu2 %v6285_v57  ;;  %v6823_v57 = vld [vmem:[%s7223_s7 + $0xc2c] sm:$0xf] }
 0x221   : > { %4213 = vmatpush.bf16.msrb.mxu3 %v6413_v61  ;;  %v3949_v46 = vadd.f32 %v3948_v54, %v3936_v13  ;;  %v6074_v61 = vld [vmem:[%s7223_s7 + $0xd38] sm:$0xf0]  ;;  %v5949_v2 = vor.u32 %v6823_v57, %v5946_v58 }
 0x222   : > { %4175 = vmatpush.bf16.msrb.mxu0 %v6013_v20  ;;  %v6077_v20 = vor.u32 %v6855_v59, %v6074_v61 }
 0x223   : > { %4188 = vmatpush.bf16.msrb.mxu1 %v6141_v3  ;;  %v3962_v52 = vadd.f32 %v3961_v47, %v3949_v46  ;;  %v6205_v3 = vor.u32 %v6887_v63, %v6202_v0 }
 0x224   : > { %4201 = vmatpush.bf16.msrb.mxu2 %v6269_v28  ;;  %v3924_v56 = vpop.f32.mrf.mxu0  ;;  %v6819_v28 = vld [vmem:[%s7223_s7 + $0xc0c] sm:$0xf] }
 0x225   : > { %4214 = vmatpush.bf16.msrb.mxu3 %v6397_v25  ;;  %v6058_v25 = vld [vmem:[%s7223_s7 + $0xd18] sm:$0xf0]  ;;  %v5933_v8 = vor.u32 %v6819_v28, %v5930_v39 }
 0x226   : > { %4176 = vmatpush.bf16.msrb.mxu0 %v5997_v34  ;;  %v3950_v42 = vpop.f32.mrf.mxu2  ;;  %v6061_v34 = vor.u32 %v6851_v4, %v6058_v25 }
 0x227   : > { %4189 = vmatpush.bf16.msrb.mxu1 %v6125_v15  ;;  %v3963_v6 = vpop.f32.mrf.mxu3  ;;  %v6317_v15 = vor.u32 %v6915_v30, %v6314_v43 }
 0x228   : > { %4202 = vmatpush.bf16.msrb.mxu2 %v6253_v45 }
 0x229   : > { %4215 = vmatpush.bf16.msrb.mxu3 %v6381_v12 }
 0x22a   : > { %4177 = vmatpush.bf16.msrb.mxu0 %v5981_v23 }
 0x22b   : > { %4190 = vmatpush.bf16.msrb.mxu1 %v6109_v32 }
 0x22c   : > { %4203 = vmatpush.bf16.msrb.mxu2 %v6237_v35 }
 0x22d   : > { %4216 = vmatpush.bf16.msrb.mxu3 %v6365_v38 }
 0x22e   : > { %4178 = vmatpush.bf16.msrb.mxu0 %v5965_v50 }
 0x22f   : > { %4191 = vmatpush.bf16.msrb.mxu1 %v6093_v53 }
 0x230   : > { %4204 = vmatpush.bf16.msrb.mxu2 %v6221_v55 }
 0x231   : > { %4217 = vmatpush.bf16.msrb.mxu3 %v6349_v60 }
 0x232   : > { %4179 = vmatpush.bf16.msrb.mxu0 %v5949_v2 }
 0x233   : > { %4192 = vmatpush.bf16.msrb.mxu1 %v6077_v20 }
 0x234   : > { %4205 = vmatpush.bf16.msrb.mxu2 %v6205_v3 }
 0x235   : > { %4218 = vmatpush.bf16.msrb.mxu3 %v6333_v24 }
 0x236   : > { %4180 = vmatpush.bf16.msrb.mxu0 %v5933_v8  ;;  %v3974_v45 = vpop.f32.mrf.mxu0  ;;  %v259_v8 = vld [vmem:[%s7246_s27] sm:$0xff] }
 0x237   : > { %4193 = vmatpush.bf16.msrb.mxu1 %v6061_v34  ;;  %v3975_v9 = vadd.f32 %v3974_v45, %v3962_v52  ;;  %v3987_v10 = vpop.f32.mrf.mxu1 }
 0x238   : > { %4206 = vmatpush.bf16.msrb.mxu2 %v6189_v26 }
 0x239   : > { %4219 = vmatpush.bf16.msrb.mxu3 %v6317_v15  ;;  %4181 = vmatmul.bf16.vlgmr.msrb.gmra.mxu0 %v7557_v16  ;;  %v3988_v11 = vadd.f32 %v3987_v10, %v3975_v9 }
 0x23a   : > { %4194 = vmatmul.bf16.vlgmr.msrb.gmra.mxu1 %v7564_v22 }
 0x23b   : > { %4207 = vmatmul.bf16.vlgmr.msrb.gmra.mxu2 %v7562_v21 }
 0x23c   : > { %4220 = vmatmul.bf16.vlgmr.msrb.gmra.mxu3 %v7568_v29 }
 0x23e   : > { %v4000_v12 = vpop.f32.mrf.mxu2  ;;  %v3976_v17 = vpop.f32.mrf.mxu0 }
 0x23f   : > { %v4001_v13 = vadd.f32 %v4000_v12, %v3988_v11  ;;  %v4013_v14 = vpop.f32.mrf.mxu3  ;;  %v3989_v62 = vpop.f32.mrf.mxu1 }
 0x241   : > { %v4014_v18 = vadd.f32 %v4013_v14, %v4001_v13 }
 0x243   : > { %v4230_v43 = vrot.slane %v4014_v18, 4 }
 0x246   : > { %v4002_v19 = vpop.f32.mrf.mxu2 }
 0x247   : > { %v4015_v23 = vpop.f32.mrf.mxu3 }
 0x256   : > { %v4026_v32 = vpop.f32.mrf.mxu0 }
 0x257   : > { %v4039_v16 = vpop.f32.mrf.mxu1 }
 0x258   : > { %v4040_v35 = vadd.f32 %v4039_v16, %v4026_v32 }
 0x25e   : > { %v4052_v22 = vpop.f32.mrf.mxu2  ;;  %v4028_v29 = vpop.f32.mrf.mxu0 }
 0x25f   : > { %v4053_v36 = vadd.f32 %v4052_v22, %v4040_v35  ;;  %v4065_v21 = vpop.f32.mrf.mxu3  ;;  %v4041_v31 = vpop.f32.mrf.mxu1 }
 0x261   : > { %v4066_v37 = vadd.f32 %v4065_v21, %v4053_v36 }
 0x266   : > { %v4054_v38 = vpop.f32.mrf.mxu2 }
 0x267   : > { %v4067_v54 = vpop.f32.mrf.mxu3 }
 0x276   : > { %v4078_v40 = vpop.f32.mrf.mxu0 }
 0x277   : > { %v4091_v41 = vpop.f32.mrf.mxu1  ;;  %v4079_v52 = vadd.f32 %v4078_v40, %v4066_v37 }
 0x279   : > { %v4092_v58 = vadd.f32 %v4091_v41, %v4079_v52 }
 0x27e   : > { %v4104_v44 = vpop.f32.mrf.mxu2  ;;  %v4080_v47 = vpop.f32.mrf.mxu0 }
 0x27f   : > { %v4117_v46 = vpop.f32.mrf.mxu3  ;;  %v4093_v48 = vpop.f32.mrf.mxu1  ;;  %v4105_v60 = vadd.f32 %v4104_v44, %v4092_v58 }
 0x281   : > { %v4118_v0 = vadd.f32 %v4117_v46, %v4105_v60 }
 0x286   : > { %v4106_v49 = vpop.f32.mrf.mxu2 }
 0x287   : > { %v4119_v56 = vpop.f32.mrf.mxu3 }
 0x296   : > { %v4130_v50 = vpop.f32.mrf.mxu0 }
 0x297   : > { %v4143_v51 = vpop.f32.mrf.mxu1  ;;  %v4131_v1 = vadd.f32 %v4130_v50, %v4118_v0 }
 0x299   : > { %v4144_v27 = vadd.f32 %v4143_v51, %v4131_v1 }
 0x29e   : > { %v4156_v53 = vpop.f32.mrf.mxu2  ;;  %v4132_v57 = vpop.f32.mrf.mxu0 }
 0x29f   : > { %v4169_v55 = vpop.f32.mrf.mxu3  ;;  %v4145_v59 = vpop.f32.mrf.mxu1  ;;  %v4157_v2 = vadd.f32 %v4156_v53, %v4144_v27 }
 0x2a1   : > { %v4170_v20 = vadd.f32 %v4169_v55, %v4157_v2 }
 0x2a6   : > { %v4158_v61 = vpop.f32.mrf.mxu2 }
 0x2a7   : > { %v4171_v63 = vpop.f32.mrf.mxu3 }
 0x2b6   : > { %v4182_v3 = vpop.f32.mrf.mxu0 }
 0x2b7   : > { %v4195_v28 = vpop.f32.mrf.mxu1  ;;  %v4183_v39 = vadd.f32 %v4182_v3, %v4170_v20 }
 0x2b9   : > { %v4196_v4 = vadd.f32 %v4195_v28, %v4183_v39 }
 0x2be   : > { %v4208_v24 = vpop.f32.mrf.mxu2  ;;  %v4184_v5 = vpop.f32.mrf.mxu0 }
 0x2bf   : > { %v4209_v25 = vadd.f32 %v4208_v24, %v4196_v4  ;;  %v4221_v33 = vpop.f32.mrf.mxu3  ;;  %v4197_v42 = vpop.f32.mrf.mxu1 }
 0x2c1   : > { %v4222_v30 = vadd.f32 %v4221_v33, %v4209_v25 }
 0x2c3   : > { %v4231_v6 = vrot.slane %v4222_v30, 2 }
 0x2c5   : > { %v4235_v34 = vsel %vm4234_vm1, %v4230_v43, %v4231_v6  ;;  %4244 = sbr.rel (%p6430_p3) target bundleno = 726 (0x2d6), region = 44 }
 0x2c6   : > { %v4237_v26 = vsel %vm4236_vm2, %v8179_v7, %v4235_v34  ;;  %v4210_v15 = vpop.f32.mrf.mxu2 }
 0x2c7   : > { %v4239_v45 = vadd.f32 %v4237_v26, %v259_v8  ;;  %v4223_v9 = vpop.f32.mrf.mxu3 }
 0x2c9   : > { %4240 = vst [vmem:[%s7246_s27] sm:$0xff] %v4239_v45 }
 0x2ca   : > { %v4246_v10 = vld [vmem:[%s246_s12] sm:$0xf] }
 0x2cb   : > { %v4248_v11 = vperm.slane %v4246_v10, 0  ;;  %v4249_v12 = vperm.slane %v4246_v10, 1  ;;  %v4250_v13 = vperm.slane %v4246_v10, 2  ;;  %v4251_v14 = vperm.slane %v4246_v10, 3 }
 0x2cd   : > { %v4252_v7 = vrot.slane %v4249_v12, 6  ;;  %v4253_v17 = vrot.slane %v4250_v13, 4  ;;  %v4254_v62 = vrot.slane %v4251_v14, 2 }
 0x2cf   : > { %v4255_v19 = vsel %vm4232_vm0, %v4248_v11, %v4252_v7  ;;  %v4256_v23 = vsel %vm4234_vm1, %v4253_v17, %v4254_v62 }
 0x2d0   : > { %v4245_v18 = vld [vmem:[%s7246_s27] sm:$0xff]  ;;  %v4257_v32 = vsel %vm4236_vm2, %v4255_v19, %v4256_v23 }
 0x2d1   : > { %v4259_v16 = vadd.f32 %v4257_v32, %v4245_v18 }
 0x2d3   : > { %v4260_v35 = vmax.f32 %v4259_v16, 0.0 }
 0x2d5   : > { %4261 = vst [vmem:[%s7246_s27] sm:$0xff] %v4260_v35 }
 0x2d6 PF: > { %s16_s19 = sadd.s32 1, %s7117_s19   ;;  %s8449_s30 = sld [smem:[#allocation5_spill]] }
 0x2d7   : > { %p13_p4 = scmp.ge.s32.totalorder %s16_s19, 34   ;;  %s8450_s12 = smov %s7093_s13 }
 0x2d8   : > { %s8451_s13 = smov %s7097_s14  ;;  %s8452_s14 = smov %s7210_s5 }
 0x2d9   : > { %s8453_s15 = smov %s7109_s17  ;;  %s8454_s16 = smov %s7113_s18 }
 0x2da   : > { %s8455_s17 = smov %s8458_s21  ;;  %15 = sbr.rel (!%p13_p4) target bundleno = 5 (0x5), region = 87 }
 0x2dc   : > { %s8456_s18 = smov %s8449_s30 }
 0x2df   :  { %4284 = vsyncpa [#allocation3], 1 }
 0x2e0   :  { %4286 = vsyncpa [#allocation3 + $0x1], 1 }

</bundles_post_ra>
